<compile_context>
chip_gen: v7x
topology: tpu7x:2x2x1
jax: 0.10.0
libtpu: 0.0.40
codegen_flags: <defaults>
</compile_context>

<pallas_src>
import jax
import jax.numpy as jnp
from jax.experimental import pallas as pl
from jax.experimental.pallas import tpu as pltpu


def _round_up(x, m):
    return (x + m - 1) // m * m


def _cdiv(a, b):
    return -(-a // b)


def _pad2d(a, rows, cols):
    if a.shape == (rows, cols):
        return a
    return jnp.zeros((rows, cols), a.dtype).at[: a.shape[0], : a.shape[1]].set(a)


def _autoencoder_kernel(x_ref, *refs):
    # refs = (w0, b0, w1, b1, ..., w7, b7, out_ref)
    out_ref = refs[-1]
    params = refs[:-1]
    ws = params[0::2]
    bs = params[1::2]

    def dense(h, w_ref, b_ref):
        # bf16 x bf16 MXU matmul with f32 accumulation; bias add stays in f32.
        z = jnp.dot(h, w_ref[...], preferred_element_type=jnp.float32)
        return z + b_ref[...]

    h = x_ref[...]  # already bf16 (cast done once in the wrapper)

    # ----- encoder: (Linear + ReLU) x3, then Linear (no activation) -----
    for li in range(3):
        h = jnp.maximum(dense(h, ws[li], bs[li]), 0.0).astype(jnp.bfloat16)
    h = dense(h, ws[3], bs[3]).astype(jnp.bfloat16)

    # ----- decoder: (Linear + ReLU) x3, then Linear + Sigmoid -----
    for li in range(4, 7):
        h = jnp.maximum(dense(h, ws[li], bs[li]), 0.0).astype(jnp.bfloat16)
    z = dense(h, ws[7], bs[7])  # f32
    out_ref[...] = jax.nn.sigmoid(z).astype(out_ref.dtype)


def deep_autoencoder_forward(x, params, *, batch_tile=256):
    """Fused forward pass.

    x:      (B, input_size) float32.
    params: list of 8 (W, b) pairs; W pre-transposed to (in_features, out_features),
            b shaped (1, out_features).  Master copies in f32; cast/pad here.
    """
    assert batch_tile % 16 == 0 and batch_tile >= 16, \
        "batch_tile must be a multiple of 16 (bf16 sublane packing)"
    B, D = x.shape

    D_pad = _round_up(D, 128)

    # ---- batch tiling: multiple of 16; if more than one tile, keep the grid
    # length even so both v7x TensorCores get work (re-split, no extra compute).
    B16 = _round_up(B, 16)
    bt = min(batch_tile, B16)
    n = _cdiv(B16, bt)
    if n > 1 and n % 2 == 1:
        bt = _round_up(_cdiv(B16, n + 1), 16)
        n = _cdiv(B16, bt)
    B_pad = n * bt

    # ---- pad + downcast the input once here (halves input DMA; the first dot
    # would downcast to bf16 anyway, so precision is unchanged).
    x_p = _pad2d(x, B_pad, D_pad).astype(jnp.bfloat16)

    # ---- parameters: bf16 weights / f32 biases, every feature dim zero-padded
    # to a multiple of 128 so all intermediates are lane-dense.  Padded lanes
    # carry exact zeros through the network (zero rows/cols + zero bias).
    flat_params = []
    for w, b in params:
        in_p = _round_up(w.shape[0], 128)
        out_p = _round_up(w.shape[1], 128)
        flat_params.append(_pad2d(w.astype(jnp.bfloat16), in_p, out_p))
        flat_params.append(_pad2d(b.astype(jnp.float32), 1, out_p))

    param_bytes = sum(int(p.size) * p.dtype.itemsize for p in flat_params)
    flops = 2 * B_pad * sum(int(w.shape[0]) * int(w.shape[1])
                            for w in flat_params[0::2])
    bytes_accessed = (int(x_p.size) * x_p.dtype.itemsize
                      + B_pad * D_pad * 4                     # f32 output
                      + param_bytes)
    cost = pl.CostEstimate(flops=flops, transcendentals=B * D,
                           bytes_accessed=bytes_accessed)

    x_spec = pl.BlockSpec((bt, D_pad), lambda i: (i, 0))
    out_spec = pl.BlockSpec((bt, D_pad), lambda i: (i, 0))

    def vmem_need(buffered):
        tile_bytes = 2 * bt * D_pad * 2 + 2 * bt * D_pad * 4   # x (bf16) + out (f32), double-buffered
        interm_bytes = 4 * bt * 1024 * 4                       # headroom for fused temporaries
        return param_bytes * (1 if buffered else 2) + tile_bytes + interm_bytes

    def run(buffered_params):
        if buffered_params:
            # Parameters are grid-invariant (index_map == (0,0) for every step):
            # single-buffer them to reclaim the double-buffer VMEM.
            pmode = pl.Buffered(1)
            param_specs = [pl.BlockSpec(p.shape, lambda i: (0, 0), pipeline_mode=pmode)
                           for p in flat_params]
        else:
            param_specs = [pl.BlockSpec(p.shape, lambda i: (0, 0))
                           for p in flat_params]

        ck = dict(dimension_semantics=("parallel",))
        need = vmem_need(buffered_params)
        if need > 28 * (1 << 20):
            # TODO(synk): for very large input_size on v7x (D_pad >~ 8k) the
            # first/last-layer weights should be K/N-tiled over an "arbitrary"
            # grid axis with a VMEM accumulator instead of raising the limit.
            ck["vmem_limit_bytes"] = min(int(need * 1.25), 96 * (1 << 20))

        return pl.pallas_call(
            _autoencoder_kernel,
            out_shape=jax.ShapeDtypeStruct((B_pad, D_pad), jnp.float32),
            grid_spec=pltpu.PrefetchScalarGridSpec(
                num_scalar_prefetch=0,
                grid=(B_pad // bt,),
                in_specs=[x_spec] + param_specs,
                out_specs=out_spec,
            ),
            compiler_params=pltpu.CompilerParams(**ck),
            cost_estimate=cost,
        )(x_p, *flat_params)

    try:
        out = run(buffered_params=True)
    except Exception:
        # Narrow fallback: this jax version rejected pl.Buffered(1); results are
        # identical with default double-buffering, only VMEM usage differs.
        out = run(buffered_params=False)

    if (B_pad, D_pad) != (B, D):
        out = out[:B, :D]
    return out


def init_params(key, input_size):
    """Deterministic init matching torch.nn.Linear default (uniform +-1/sqrt(fan_in)).

    Weights returned pre-transposed: (in_features, out_features); biases (1, out).
    Master copies are f32; the wrapper casts/pads them for the MXU.
    """
    sizes = [input_size, 1024, 64, 32, 16, 32, 64, 1024, input_size]
    params = []
    for li in range(len(sizes) - 1):
        fan_in, fan_out = sizes[li], sizes[li + 1]
        key, kw, kb = jax.random.split(key, 3)
        bound = 1.0 / (fan_in ** 0.5)
        w = jax.random.uniform(kw, (fan_in, fan_out), jnp.float32, -bound, bound)
        b = jax.random.uniform(kb, (1, fan_out), jnp.float32, -bound, bound)
        params.append((w, b))
    return params


def reference_forward(x, params, *, matmul_dtype=jnp.float32):
    """Pure-JAX reference.

    matmul_dtype=bf16 mirrors the kernel's exact recipe (bf16 operands and bf16
    stored intermediates, f32 accumulate / bias / activation math).  With f32 the
    casts are no-ops and this is the plain-f32 semantic reference.
    """
    def dense(h, w, b):
        z = jnp.dot(h.astype(matmul_dtype), w.astype(matmul_dtype),
                    preferred_element_type=jnp.float32)
        return z + b.astype(jnp.float32)

    h = x.astype(matmul_dtype)
    for li in range(3):
        h = jnp.maximum(dense(h, *params[li]), 0.0).astype(matmul_dtype)
    h = dense(h, *params[3]).astype(matmul_dtype)
    for li in range(4, 7):
        h = jnp.maximum(dense(h, *params[li]), 0.0).astype(matmul_dtype)
    return jax.nn.sigmoid(dense(h, *params[7]))


if __name__ == "__main__":
    key = jax.random.PRNGKey(0)
    input_size = 256          # small demo feature dim (multiple of 128; padded otherwise)
    batch = 64                # small demo batch -> single grid step

    k_params, k_x = jax.random.split(key)
    params = init_params(k_params, input_size)
    x = jax.random.uniform(k_x, (batch, input_size), jnp.float32)

    out = deep_autoencoder_forward(x, params, batch_tile=256)
    out = jax.block_until_ready(out)
    assert out.shape == (batch, input_size)

    # Check against a reference using the same bf16-operand / f32-accumulate recipe.
    ref_matched = reference_forward(x, params, matmul_dtype=jnp.bfloat16)
    assert jnp.allclose(out, ref_matched, atol=3e-3, rtol=3e-3), \
        "mismatch vs bf16-matched reference"

    # Loose sanity check against the full-f32 reference (bf16 rounding budget).
    ref_f32 = reference_forward(x, params, matmul_dtype=jnp.float32)
    assert jnp.allclose(out, ref_f32, atol=7e-2, rtol=7e-2), \
        "mismatch vs f32 reference"

    print("KERNEL_OK")
</pallas_src>

<mosaic_0001>
module attributes {stable_mosaic.version = 11 : i64} {
  func.func @_autoencoder_kernel(%arg0: i32, %arg1: memref<64x256xbf16, #tpu.memory_space<vmem>>, %arg2: memref<256x1024xbf16, #tpu.memory_space<vmem>>, %arg3: memref<1x1024xf32, #tpu.memory_space<vmem>>, %arg4: memref<1024x128xbf16, #tpu.memory_space<vmem>>, %arg5: memref<1x128xf32, #tpu.memory_space<vmem>>, %arg6: memref<128x128xbf16, #tpu.memory_space<vmem>>, %arg7: memref<1x128xf32, #tpu.memory_space<vmem>>, %arg8: memref<128x128xbf16, #tpu.memory_space<vmem>>, %arg9: memref<1x128xf32, #tpu.memory_space<vmem>>, %arg10: memref<128x128xbf16, #tpu.memory_space<vmem>>, %arg11: memref<1x128xf32, #tpu.memory_space<vmem>>, %arg12: memref<128x128xbf16, #tpu.memory_space<vmem>>, %arg13: memref<1x128xf32, #tpu.memory_space<vmem>>, %arg14: memref<128x1024xbf16, #tpu.memory_space<vmem>>, %arg15: memref<1x1024xf32, #tpu.memory_space<vmem>>, %arg16: memref<1024x256xbf16, #tpu.memory_space<vmem>>, %arg17: memref<1x256xf32, #tpu.memory_space<vmem>>, %arg18: memref<64x256xf32, #tpu.memory_space<vmem>>) attributes {dimension_semantics = [#tpu.dimension_semantics<parallel>], iteration_bounds = array<i64: 1>, scalar_prefetch = 0 : i64, scratch_operands = 0 : i64, tpu.core_type = #tpu.core_type<tc>, window_params = [{transform_indices = @transform_0, window_bounds = array<i64: 64, 256>}, {pipeline_mode = #tpu.pipeline_mode<synchronous>, transform_indices = @transform_1, window_bounds = array<i64: 256, 1024>}, {pipeline_mode = #tpu.pipeline_mode<synchronous>, transform_indices = @transform_2, window_bounds = array<i64: 1, 1024>}, {pipeline_mode = #tpu.pipeline_mode<synchronous>, transform_indices = @transform_3, window_bounds = array<i64: 1024, 128>}, {pipeline_mode = #tpu.pipeline_mode<synchronous>, transform_indices = @transform_4, window_bounds = array<i64: 1, 128>}, {pipeline_mode = #tpu.pipeline_mode<synchronous>, transform_indices = @transform_5, window_bounds = array<i64: 128, 128>}, {pipeline_mode = #tpu.pipeline_mode<synchronous>, transform_indices = @transform_6, window_bounds = array<i64: 1, 128>}, {pipeline_mode = #tpu.pipeline_mode<synchronous>, transform_indices = @transform_7, window_bounds = array<i64: 128, 128>}, {pipeline_mode = #tpu.pipeline_mode<synchronous>, transform_indices = @transform_8, window_bounds = array<i64: 1, 128>}, {pipeline_mode = #tpu.pipeline_mode<synchronous>, transform_indices = @transform_9, window_bounds = array<i64: 128, 128>}, {pipeline_mode = #tpu.pipeline_mode<synchronous>, transform_indices = @transform_10, window_bounds = array<i64: 1, 128>}, {pipeline_mode = #tpu.pipeline_mode<synchronous>, transform_indices = @transform_11, window_bounds = array<i64: 128, 128>}, {pipeline_mode = #tpu.pipeline_mode<synchronous>, transform_indices = @transform_12, window_bounds = array<i64: 1, 128>}, {pipeline_mode = #tpu.pipeline_mode<synchronous>, transform_indices = @transform_13, window_bounds = array<i64: 128, 1024>}, {pipeline_mode = #tpu.pipeline_mode<synchronous>, transform_indices = @transform_14, window_bounds = array<i64: 1, 1024>}, {pipeline_mode = #tpu.pipeline_mode<synchronous>, transform_indices = @transform_15, window_bounds = array<i64: 1024, 256>}, {pipeline_mode = #tpu.pipeline_mode<synchronous>, transform_indices = @transform_16, window_bounds = array<i64: 1, 256>}, {transform_indices = @transform_17, window_bounds = array<i64: 64, 256>}]} {
    %c0 = arith.constant 0 : index
    %c0_0 = arith.constant 0 : index
    %0 = vector.load %arg1[%c0, %c0_0] : memref<64x256xbf16, #tpu.memory_space<vmem>>, vector<64x256xbf16>
    %c0_1 = arith.constant 0 : index
    %c0_2 = arith.constant 0 : index
    %1 = vector.load %arg2[%c0_1, %c0_2] : memref<256x1024xbf16, #tpu.memory_space<vmem>>, vector<256x1024xbf16>
    %cst = arith.constant dense<0.000000e+00> : vector<64x1024xf32>
    %2 = tpu.matmul %0, %1, %cst {dimension_numbers = #tpu.dot_dimension_numbers<[1], [0], [0], [1], [0, 0, 1, 1], [], []>} : vector<64x256xbf16>, vector<256x1024xbf16>, vector<64x1024xf32> -> vector<64x1024xf32>
    %c0_3 = arith.constant 0 : index
    %c0_4 = arith.constant 0 : index
    %3 = vector.load %arg3[%c0_3, %c0_4] : memref<1x1024xf32, #tpu.memory_space<vmem>>, vector<1x1024xf32>
    %4 = vector.broadcast %3 : vector<1x1024xf32> to vector<64x1024xf32>
    %5 = arith.addf %2, %4 : vector<64x1024xf32>
    %cst_5 = arith.constant 0.000000e+00 : f32
    %6 = vector.broadcast %cst_5 : f32 to vector<64x1024xf32>
    %7 = arith.maximumf %5, %6 : vector<64x1024xf32>
    %8 = arith.truncf %7 : vector<64x1024xf32> to vector<64x1024xbf16>
    %c0_6 = arith.constant 0 : index
    %c0_7 = arith.constant 0 : index
    %9 = vector.load %arg4[%c0_6, %c0_7] : memref<1024x128xbf16, #tpu.memory_space<vmem>>, vector<1024x128xbf16>
    %cst_8 = arith.constant dense<0.000000e+00> : vector<64x128xf32>
    %10 = tpu.matmul %8, %9, %cst_8 {dimension_numbers = #tpu.dot_dimension_numbers<[1], [0], [0], [1], [0, 0, 1, 1], [], []>} : vector<64x1024xbf16>, vector<1024x128xbf16>, vector<64x128xf32> -> vector<64x128xf32>
    %c0_9 = arith.constant 0 : index
    %c0_10 = arith.constant 0 : index
    %11 = vector.load %arg5[%c0_9, %c0_10] : memref<1x128xf32, #tpu.memory_space<vmem>>, vector<1x128xf32>
    %12 = vector.broadcast %11 : vector<1x128xf32> to vector<64x128xf32>
    %13 = arith.addf %10, %12 : vector<64x128xf32>
    %cst_11 = arith.constant 0.000000e+00 : f32
    %14 = vector.broadcast %cst_11 : f32 to vector<64x128xf32>
    %15 = arith.maximumf %13, %14 : vector<64x128xf32>
    %16 = arith.truncf %15 : vector<64x128xf32> to vector<64x128xbf16>
    %c0_12 = arith.constant 0 : index
    %c0_13 = arith.constant 0 : index
    %17 = vector.load %arg6[%c0_12, %c0_13] : memref<128x128xbf16, #tpu.memory_space<vmem>>, vector<128x128xbf16>
    %cst_14 = arith.constant dense<0.000000e+00> : vector<64x128xf32>
    %18 = tpu.matmul %16, %17, %cst_14 {dimension_numbers = #tpu.dot_dimension_numbers<[1], [0], [0], [1], [0, 0, 1, 1], [], []>} : vector<64x128xbf16>, vector<128x128xbf16>, vector<64x128xf32> -> vector<64x128xf32>
    %c0_15 = arith.constant 0 : index
    %c0_16 = arith.constant 0 : index
    %19 = vector.load %arg7[%c0_15, %c0_16] : memref<1x128xf32, #tpu.memory_space<vmem>>, vector<1x128xf32>
    %20 = vector.broadcast %19 : vector<1x128xf32> to vector<64x128xf32>
    %21 = arith.addf %18, %20 : vector<64x128xf32>
    %cst_17 = arith.constant 0.000000e+00 : f32
    %22 = vector.broadcast %cst_17 : f32 to vector<64x128xf32>
    %23 = arith.maximumf %21, %22 : vector<64x128xf32>
    %24 = arith.truncf %23 : vector<64x128xf32> to vector<64x128xbf16>
    %c0_18 = arith.constant 0 : index
    %c0_19 = arith.constant 0 : index
    %25 = vector.load %arg8[%c0_18, %c0_19] : memref<128x128xbf16, #tpu.memory_space<vmem>>, vector<128x128xbf16>
    %cst_20 = arith.constant dense<0.000000e+00> : vector<64x128xf32>
    %26 = tpu.matmul %24, %25, %cst_20 {dimension_numbers = #tpu.dot_dimension_numbers<[1], [0], [0], [1], [0, 0, 1, 1], [], []>} : vector<64x128xbf16>, vector<128x128xbf16>, vector<64x128xf32> -> vector<64x128xf32>
    %c0_21 = arith.constant 0 : index
    %c0_22 = arith.constant 0 : index
    %27 = vector.load %arg9[%c0_21, %c0_22] : memref<1x128xf32, #tpu.memory_space<vmem>>, vector<1x128xf32>
    %28 = vector.broadcast %27 : vector<1x128xf32> to vector<64x128xf32>
    %29 = arith.addf %26, %28 : vector<64x128xf32>
    %30 = arith.truncf %29 : vector<64x128xf32> to vector<64x128xbf16>
    %c0_23 = arith.constant 0 : index
    %c0_24 = arith.constant 0 : index
    %31 = vector.load %arg10[%c0_23, %c0_24] : memref<128x128xbf16, #tpu.memory_space<vmem>>, vector<128x128xbf16>
    %cst_25 = arith.constant dense<0.000000e+00> : vector<64x128xf32>
    %32 = tpu.matmul %30, %31, %cst_25 {dimension_numbers = #tpu.dot_dimension_numbers<[1], [0], [0], [1], [0, 0, 1, 1], [], []>} : vector<64x128xbf16>, vector<128x128xbf16>, vector<64x128xf32> -> vector<64x128xf32>
    %c0_26 = arith.constant 0 : index
    %c0_27 = arith.constant 0 : index
    %33 = vector.load %arg11[%c0_26, %c0_27] : memref<1x128xf32, #tpu.memory_space<vmem>>, vector<1x128xf32>
    %34 = vector.broadcast %33 : vector<1x128xf32> to vector<64x128xf32>
    %35 = arith.addf %32, %34 : vector<64x128xf32>
    %cst_28 = arith.constant 0.000000e+00 : f32
    %36 = vector.broadcast %cst_28 : f32 to vector<64x128xf32>
    %37 = arith.maximumf %35, %36 : vector<64x128xf32>
    %38 = arith.truncf %37 : vector<64x128xf32> to vector<64x128xbf16>
    %c0_29 = arith.constant 0 : index
    %c0_30 = arith.constant 0 : index
    %39 = vector.load %arg12[%c0_29, %c0_30] : memref<128x128xbf16, #tpu.memory_space<vmem>>, vector<128x128xbf16>
    %cst_31 = arith.constant dense<0.000000e+00> : vector<64x128xf32>
    %40 = tpu.matmul %38, %39, %cst_31 {dimension_numbers = #tpu.dot_dimension_numbers<[1], [0], [0], [1], [0, 0, 1, 1], [], []>} : vector<64x128xbf16>, vector<128x128xbf16>, vector<64x128xf32> -> vector<64x128xf32>
    %c0_32 = arith.constant 0 : index
    %c0_33 = arith.constant 0 : index
    %41 = vector.load %arg13[%c0_32, %c0_33] : memref<1x128xf32, #tpu.memory_space<vmem>>, vector<1x128xf32>
    %42 = vector.broadcast %41 : vector<1x128xf32> to vector<64x128xf32>
    %43 = arith.addf %40, %42 : vector<64x128xf32>
    %cst_34 = arith.constant 0.000000e+00 : f32
    %44 = vector.broadcast %cst_34 : f32 to vector<64x128xf32>
    %45 = arith.maximumf %43, %44 : vector<64x128xf32>
    %46 = arith.truncf %45 : vector<64x128xf32> to vector<64x128xbf16>
    %c0_35 = arith.constant 0 : index
    %c0_36 = arith.constant 0 : index
    %47 = vector.load %arg14[%c0_35, %c0_36] : memref<128x1024xbf16, #tpu.memory_space<vmem>>, vector<128x1024xbf16>
    %cst_37 = arith.constant dense<0.000000e+00> : vector<64x1024xf32>
    %48 = tpu.matmul %46, %47, %cst_37 {dimension_numbers = #tpu.dot_dimension_numbers<[1], [0], [0], [1], [0, 0, 1, 1], [], []>} : vector<64x128xbf16>, vector<128x1024xbf16>, vector<64x1024xf32> -> vector<64x1024xf32>
    %c0_38 = arith.constant 0 : index
    %c0_39 = arith.constant 0 : index
    %49 = vector.load %arg15[%c0_38, %c0_39] : memref<1x1024xf32, #tpu.memory_space<vmem>>, vector<1x1024xf32>
    %50 = vector.broadcast %49 : vector<1x1024xf32> to vector<64x1024xf32>
    %51 = arith.addf %48, %50 : vector<64x1024xf32>
    %cst_40 = arith.constant 0.000000e+00 : f32
    %52 = vector.broadcast %cst_40 : f32 to vector<64x1024xf32>
    %53 = arith.maximumf %51, %52 : vector<64x1024xf32>
    %54 = arith.truncf %53 : vector<64x1024xf32> to vector<64x1024xbf16>
    %c0_41 = arith.constant 0 : index
    %c0_42 = arith.constant 0 : index
    %55 = vector.load %arg16[%c0_41, %c0_42] : memref<1024x256xbf16, #tpu.memory_space<vmem>>, vector<1024x256xbf16>
    %cst_43 = arith.constant dense<0.000000e+00> : vector<64x256xf32>
    %56 = tpu.matmul %54, %55, %cst_43 {dimension_numbers = #tpu.dot_dimension_numbers<[1], [0], [0], [1], [0, 0, 1, 1], [], []>} : vector<64x1024xbf16>, vector<1024x256xbf16>, vector<64x256xf32> -> vector<64x256xf32>
    %c0_44 = arith.constant 0 : index
    %c0_45 = arith.constant 0 : index
    %57 = vector.load %arg17[%c0_44, %c0_45] : memref<1x256xf32, #tpu.memory_space<vmem>>, vector<1x256xf32>
    %58 = vector.broadcast %57 : vector<1x256xf32> to vector<64x256xf32>
    %59 = arith.addf %56, %58 : vector<64x256xf32>
    %60 = arith.negf %59 : vector<64x256xf32>
    %61 = math.exp %60 : vector<64x256xf32>
    %cst_46 = arith.constant 1.000000e+00 : f32
    %62 = vector.broadcast %cst_46 : f32 to vector<64x256xf32>
    %63 = arith.addf %62, %61 : vector<64x256xf32>
    %64 = arith.divf %62, %63 : vector<64x256xf32>
    %c0_47 = arith.constant 0 : index
    %c0_48 = arith.constant 0 : index
    %65 = vector.load %arg18[%c0_47, %c0_48] : memref<64x256xf32, #tpu.memory_space<vmem>>, vector<64x256xf32>
    tpu.vector_store %arg18[%c0_47, %c0_48], %64 {strides = array<i32>} : memref<64x256xf32, #tpu.memory_space<vmem>>, vector<64x256xf32>,
    return
  }
  func.func @transform_0(%arg0: i32) -> (i32, i32) {
    %c0_i32 = arith.constant 0 : i32
    %c0_i32_0 = arith.constant 0 : i32
    return %arg0, %c0_i32 : i32, i32
  }
  func.func @transform_1(%arg0: i32) -> (i32, i32) {
    %c0_i32 = arith.constant 0 : i32
    %c0_i32_0 = arith.constant 0 : i32
    %c0_i32_1 = arith.constant 0 : i32
    return %c0_i32, %c0_i32_0 : i32, i32
  }
  func.func @transform_2(%arg0: i32) -> (i32, i32) {
    %c0_i32 = arith.constant 0 : i32
    %c0_i32_0 = arith.constant 0 : i32
    %c0_i32_1 = arith.constant 0 : i32
    return %c0_i32, %c0_i32_0 : i32, i32
  }
  func.func @transform_3(%arg0: i32) -> (i32, i32) {
    %c0_i32 = arith.constant 0 : i32
    %c0_i32_0 = arith.constant 0 : i32
    %c0_i32_1 = arith.constant 0 : i32
    return %c0_i32, %c0_i32_0 : i32, i32
  }
  func.func @transform_4(%arg0: i32) -> (i32, i32) {
    %c0_i32 = arith.constant 0 : i32
    %c0_i32_0 = arith.constant 0 : i32
    %c0_i32_1 = arith.constant 0 : i32
    return %c0_i32, %c0_i32_0 : i32, i32
  }
  func.func @transform_5(%arg0: i32) -> (i32, i32) {
    %c0_i32 = arith.constant 0 : i32
    %c0_i32_0 = arith.constant 0 : i32
    %c0_i32_1 = arith.constant 0 : i32
    return %c0_i32, %c0_i32_0 : i32, i32
  }
  func.func @transform_6(%arg0: i32) -> (i32, i32) {
    %c0_i32 = arith.constant 0 : i32
    %c0_i32_0 = arith.constant 0 : i32
    %c0_i32_1 = arith.constant 0 : i32
    return %c0_i32, %c0_i32_0 : i32, i32
  }
  func.func @transform_7(%arg0: i32) -> (i32, i32) {
    %c0_i32 = arith.constant 0 : i32
    %c0_i32_0 = arith.constant 0 : i32
    %c0_i32_1 = arith.constant 0 : i32
    return %c0_i32, %c0_i32_0 : i32, i32
  }
  func.func @transform_8(%arg0: i32) -> (i32, i32) {
    %c0_i32 = arith.constant 0 : i32
    %c0_i32_0 = arith.constant 0 : i32
    %c0_i32_1 = arith.constant 0 : i32
    return %c0_i32, %c0_i32_0 : i32, i32
  }
  func.func @transform_9(%arg0: i32) -> (i32, i32) {
    %c0_i32 = arith.constant 0 : i32
    %c0_i32_0 = arith.constant 0 : i32
    %c0_i32_1 = arith.constant 0 : i32
    return %c0_i32, %c0_i32_0 : i32, i32
  }
  func.func @transform_10(%arg0: i32) -> (i32, i32) {
    %c0_i32 = arith.constant 0 : i32
    %c0_i32_0 = arith.constant 0 : i32
    %c0_i32_1 = arith.constant 0 : i32
    return %c0_i32, %c0_i32_0 : i32, i32
  }
  func.func @transform_11(%arg0: i32) -> (i32, i32) {
    %c0_i32 = arith.constant 0 : i32
    %c0_i32_0 = arith.constant 0 : i32
    %c0_i32_1 = arith.constant 0 : i32
    return %c0_i32, %c0_i32_0 : i32, i32
  }
  func.func @transform_12(%arg0: i32) -> (i32, i32) {
    %c0_i32 = arith.constant 0 : i32
    %c0_i32_0 = arith.constant 0 : i32
    %c0_i32_1 = arith.constant 0 : i32
    return %c0_i32, %c0_i32_0 : i32, i32
  }
  func.func @transform_13(%arg0: i32) -> (i32, i32) {
    %c0_i32 = arith.constant 0 : i32
    %c0_i32_0 = arith.constant 0 : i32
    %c0_i32_1 = arith.constant 0 : i32
    return %c0_i32, %c0_i32_0 : i32, i32
  }
  func.func @transform_14(%arg0: i32) -> (i32, i32) {
    %c0_i32 = arith.constant 0 : i32
    %c0_i32_0 = arith.constant 0 : i32
    %c0_i32_1 = arith.constant 0 : i32
    return %c0_i32, %c0_i32_0 : i32, i32
  }
  func.func @transform_15(%arg0: i32) -> (i32, i32) {
    %c0_i32 = arith.constant 0 : i32
    %c0_i32_0 = arith.constant 0 : i32
    %c0_i32_1 = arith.constant 0 : i32
    return %c0_i32, %c0_i32_0 : i32, i32
  }
  func.func @transform_16(%arg0: i32) -> (i32, i32) {
    %c0_i32 = arith.constant 0 : i32
    %c0_i32_0 = arith.constant 0 : i32
    %c0_i32_1 = arith.constant 0 : i32
    return %c0_i32, %c0_i32_0 : i32, i32
  }
  func.func @transform_17(%arg0: i32) -> (i32, i32) {
    %c0_i32 = arith.constant 0 : i32
    %c0_i32_0 = arith.constant 0 : i32
    return %arg0, %c0_i32 : i32, i32
  }
}

module attributes {stable_mosaic.version = 11 : i64} {
  func.func @_autoencoder_kernel(%arg0: i32, %arg1: memref<64x256xbf16, #tpu.memory_space<vmem>>, %arg2: memref<256x1024xbf16, #tpu.memory_space<vmem>>, %arg3: memref<1x1024xf32, #tpu.memory_space<vmem>>, %arg4: memref<1024x128xbf16, #tpu.memory_space<vmem>>, %arg5: memref<1x128xf32, #tpu.memory_space<vmem>>, %arg6: memref<128x128xbf16, #tpu.memory_space<vmem>>, %arg7: memref<1x128xf32, #tpu.memory_space<vmem>>, %arg8: memref<128x128xbf16, #tpu.memory_space<vmem>>, %arg9: memref<1x128xf32, #tpu.memory_space<vmem>>, %arg10: memref<128x128xbf16, #tpu.memory_space<vmem>>, %arg11: memref<1x128xf32, #tpu.memory_space<vmem>>, %arg12: memref<128x128xbf16, #tpu.memory_space<vmem>>, %arg13: memref<1x128xf32, #tpu.memory_space<vmem>>, %arg14: memref<128x1024xbf16, #tpu.memory_space<vmem>>, %arg15: memref<1x1024xf32, #tpu.memory_space<vmem>>, %arg16: memref<1024x256xbf16, #tpu.memory_space<vmem>>, %arg17: memref<1x256xf32, #tpu.memory_space<vmem>>, %arg18: memref<64x256xf32, #tpu.memory_space<vmem>>) attributes {dimension_semantics = [#tpu.dimension_semantics<parallel>], iteration_bounds = array<i64: 1>, scalar_prefetch = 0 : i64, scratch_operands = 0 : i64, tpu.core_type = #tpu.core_type<tc>, window_params = [{transform_indices = @transform_0, window_bounds = array<i64: 64, 256>}, {pipeline_mode = #tpu.pipeline_mode<synchronous>, transform_indices = @transform_1, window_bounds = array<i64: 256, 1024>}, {pipeline_mode = #tpu.pipeline_mode<synchronous>, transform_indices = @transform_2, window_bounds = array<i64: 1, 1024>}, {pipeline_mode = #tpu.pipeline_mode<synchronous>, transform_indices = @transform_3, window_bounds = array<i64: 1024, 128>}, {pipeline_mode = #tpu.pipeline_mode<synchronous>, transform_indices = @transform_4, window_bounds = array<i64: 1, 128>}, {pipeline_mode = #tpu.pipeline_mode<synchronous>, transform_indices = @transform_5, window_bounds = array<i64: 128, 128>}, {pipeline_mode = #tpu.pipeline_mode<synchronous>, transform_indices = @transform_6, window_bounds = array<i64: 1, 128>}, {pipeline_mode = #tpu.pipeline_mode<synchronous>, transform_indices = @transform_7, window_bounds = array<i64: 128, 128>}, {pipeline_mode = #tpu.pipeline_mode<synchronous>, transform_indices = @transform_8, window_bounds = array<i64: 1, 128>}, {pipeline_mode = #tpu.pipeline_mode<synchronous>, transform_indices = @transform_9, window_bounds = array<i64: 128, 128>}, {pipeline_mode = #tpu.pipeline_mode<synchronous>, transform_indices = @transform_10, window_bounds = array<i64: 1, 128>}, {pipeline_mode = #tpu.pipeline_mode<synchronous>, transform_indices = @transform_11, window_bounds = array<i64: 128, 128>}, {pipeline_mode = #tpu.pipeline_mode<synchronous>, transform_indices = @transform_12, window_bounds = array<i64: 1, 128>}, {pipeline_mode = #tpu.pipeline_mode<synchronous>, transform_indices = @transform_13, window_bounds = array<i64: 128, 1024>}, {pipeline_mode = #tpu.pipeline_mode<synchronous>, transform_indices = @transform_14, window_bounds = array<i64: 1, 1024>}, {pipeline_mode = #tpu.pipeline_mode<synchronous>, transform_indices = @transform_15, window_bounds = array<i64: 1024, 256>}, {pipeline_mode = #tpu.pipeline_mode<synchronous>, transform_indices = @transform_16, window_bounds = array<i64: 1, 256>}, {transform_indices = @transform_17, window_bounds = array<i64: 64, 256>}]} {
    %c0 = arith.constant 0 : index
    %c0_0 = arith.constant 0 : index
    %0 = vector.load %arg1[%c0, %c0_0] : memref<64x256xbf16, #tpu.memory_space<vmem>>, vector<64x256xbf16>
    %c0_1 = arith.constant 0 : index
    %c0_2 = arith.constant 0 : index
    %1 = vector.load %arg2[%c0_1, %c0_2] : memref<256x1024xbf16, #tpu.memory_space<vmem>>, vector<256x1024xbf16>
    %cst = arith.constant dense<0.000000e+00> : vector<64x1024xf32>
    %2 = tpu.matmul %0, %1, %cst {dimension_numbers = #tpu.dot_dimension_numbers<[1], [0], [0], [1], [0, 0, 1, 1], [], []>} : vector<64x256xbf16>, vector<256x1024xbf16>, vector<64x1024xf32> -> vector<64x1024xf32>
    %c0_3 = arith.constant 0 : index
    %c0_4 = arith.constant 0 : index
    %3 = vector.load %arg3[%c0_3, %c0_4] : memref<1x1024xf32, #tpu.memory_space<vmem>>, vector<1x1024xf32>
    %4 = vector.broadcast %3 : vector<1x1024xf32> to vector<64x1024xf32>
    %5 = arith.addf %2, %4 : vector<64x1024xf32>
    %cst_5 = arith.constant 0.000000e+00 : f32
    %6 = vector.broadcast %cst_5 : f32 to vector<64x1024xf32>
    %7 = arith.maximumf %5, %6 : vector<64x1024xf32>
    %8 = arith.truncf %7 : vector<64x1024xf32> to vector<64x1024xbf16>
    %c0_6 = arith.constant 0 : index
    %c0_7 = arith.constant 0 : index
    %9 = vector.load %arg4[%c0_6, %c0_7] : memref<1024x128xbf16, #tpu.memory_space<vmem>>, vector<1024x128xbf16>
    %cst_8 = arith.constant dense<0.000000e+00> : vector<64x128xf32>
    %10 = tpu.matmul %8, %9, %cst_8 {dimension_numbers = #tpu.dot_dimension_numbers<[1], [0], [0], [1], [0, 0, 1, 1], [], []>} : vector<64x1024xbf16>, vector<1024x128xbf16>, vector<64x128xf32> -> vector<64x128xf32>
    %c0_9 = arith.constant 0 : index
    %c0_10 = arith.constant 0 : index
    %11 = vector.load %arg5[%c0_9, %c0_10] : memref<1x128xf32, #tpu.memory_space<vmem>>, vector<1x128xf32>
    %12 = vector.broadcast %11 : vector<1x128xf32> to vector<64x128xf32>
    %13 = arith.addf %10, %12 : vector<64x128xf32>
    %cst_11 = arith.constant 0.000000e+00 : f32
    %14 = vector.broadcast %cst_11 : f32 to vector<64x128xf32>
    %15 = arith.maximumf %13, %14 : vector<64x128xf32>
    %16 = arith.truncf %15 : vector<64x128xf32> to vector<64x128xbf16>
    %c0_12 = arith.constant 0 : index
    %c0_13 = arith.constant 0 : index
    %17 = vector.load %arg6[%c0_12, %c0_13] : memref<128x128xbf16, #tpu.memory_space<vmem>>, vector<128x128xbf16>
    %cst_14 = arith.constant dense<0.000000e+00> : vector<64x128xf32>
    %18 = tpu.matmul %16, %17, %cst_14 {dimension_numbers = #tpu.dot_dimension_numbers<[1], [0], [0], [1], [0, 0, 1, 1], [], []>} : vector<64x128xbf16>, vector<128x128xbf16>, vector<64x128xf32> -> vector<64x128xf32>
    %c0_15 = arith.constant 0 : index
    %c0_16 = arith.constant 0 : index
    %19 = vector.load %arg7[%c0_15, %c0_16] : memref<1x128xf32, #tpu.memory_space<vmem>>, vector<1x128xf32>
    %20 = vector.broadcast %19 : vector<1x128xf32> to vector<64x128xf32>
    %21 = arith.addf %18, %20 : vector<64x128xf32>
    %cst_17 = arith.constant 0.000000e+00 : f32
    %22 = vector.broadcast %cst_17 : f32 to vector<64x128xf32>
    %23 = arith.maximumf %21, %22 : vector<64x128xf32>
    %24 = arith.truncf %23 : vector<64x128xf32> to vector<64x128xbf16>
    %c0_18 = arith.constant 0 : index
    %c0_19 = arith.constant 0 : index
    %25 = vector.load %arg8[%c0_18, %c0_19] : memref<128x128xbf16, #tpu.memory_space<vmem>>, vector<128x128xbf16>
    %cst_20 = arith.constant dense<0.000000e+00> : vector<64x128xf32>
    %26 = tpu.matmul %24, %25, %cst_20 {dimension_numbers = #tpu.dot_dimension_numbers<[1], [0], [0], [1], [0, 0, 1, 1], [], []>} : vector<64x128xbf16>, vector<128x128xbf16>, vector<64x128xf32> -> vector<64x128xf32>
    %c0_21 = arith.constant 0 : index
    %c0_22 = arith.constant 0 : index
    %27 = vector.load %arg9[%c0_21, %c0_22] : memref<1x128xf32, #tpu.memory_space<vmem>>, vector<1x128xf32>
    %28 = vector.broadcast %27 : vector<1x128xf32> to vector<64x128xf32>
    %29 = arith.addf %26, %28 : vector<64x128xf32>
    %30 = arith.truncf %29 : vector<64x128xf32> to vector<64x128xbf16>
    %c0_23 = arith.constant 0 : index
    %c0_24 = arith.constant 0 : index
    %31 = vector.load %arg10[%c0_23, %c0_24] : memref<128x128xbf16, #tpu.memory_space<vmem>>, vector<128x128xbf16>
    %cst_25 = arith.constant dense<0.000000e+00> : vector<64x128xf32>
    %32 = tpu.matmul %30, %31, %cst_25 {dimension_numbers = #tpu.dot_dimension_numbers<[1], [0], [0], [1], [0, 0, 1, 1], [], []>} : vector<64x128xbf16>, vector<128x128xbf16>, vector<64x128xf32> -> vector<64x128xf32>
    %c0_26 = arith.constant 0 : index
    %c0_27 = arith.constant 0 : index
    %33 = vector.load %arg11[%c0_26, %c0_27] : memref<1x128xf32, #tpu.memory_space<vmem>>, vector<1x128xf32>
    %34 = vector.broadcast %33 : vector<1x128xf32> to vector<64x128xf32>
    %35 = arith.addf %32, %34 : vector<64x128xf32>
    %cst_28 = arith.constant 0.000000e+00 : f32
    %36 = vector.broadcast %cst_28 : f32 to vector<64x128xf32>
    %37 = arith.maximumf %35, %36 : vector<64x128xf32>
    %38 = arith.truncf %37 : vector<64x128xf32> to vector<64x128xbf16>
    %c0_29 = arith.constant 0 : index
    %c0_30 = arith.constant 0 : index
    %39 = vector.load %arg12[%c0_29, %c0_30] : memref<128x128xbf16, #tpu.memory_space<vmem>>, vector<128x128xbf16>
    %cst_31 = arith.constant dense<0.000000e+00> : vector<64x128xf32>
    %40 = tpu.matmul %38, %39, %cst_31 {dimension_numbers = #tpu.dot_dimension_numbers<[1], [0], [0], [1], [0, 0, 1, 1], [], []>} : vector<64x128xbf16>, vector<128x128xbf16>, vector<64x128xf32> -> vector<64x128xf32>
    %c0_32 = arith.constant 0 : index
    %c0_33 = arith.constant 0 : index
    %41 = vector.load %arg13[%c0_32, %c0_33] : memref<1x128xf32, #tpu.memory_space<vmem>>, vector<1x128xf32>
    %42 = vector.broadcast %41 : vector<1x128xf32> to vector<64x128xf32>
    %43 = arith.addf %40, %42 : vector<64x128xf32>
    %cst_34 = arith.constant 0.000000e+00 : f32
    %44 = vector.broadcast %cst_34 : f32 to vector<64x128xf32>
    %45 = arith.maximumf %43, %44 : vector<64x128xf32>
    %46 = arith.truncf %45 : vector<64x128xf32> to vector<64x128xbf16>
    %c0_35 = arith.constant 0 : index
    %c0_36 = arith.constant 0 : index
    %47 = vector.load %arg14[%c0_35, %c0_36] : memref<128x1024xbf16, #tpu.memory_space<vmem>>, vector<128x1024xbf16>
    %cst_37 = arith.constant dense<0.000000e+00> : vector<64x1024xf32>
    %48 = tpu.matmul %46, %47, %cst_37 {dimension_numbers = #tpu.dot_dimension_numbers<[1], [0], [0], [1], [0, 0, 1, 1], [], []>} : vector<64x128xbf16>, vector<128x1024xbf16>, vector<64x1024xf32> -> vector<64x1024xf32>
    %c0_38 = arith.constant 0 : index
    %c0_39 = arith.constant 0 : index
    %49 = vector.load %arg15[%c0_38, %c0_39] : memref<1x1024xf32, #tpu.memory_space<vmem>>, vector<1x1024xf32>
    %50 = vector.broadcast %49 : vector<1x1024xf32> to vector<64x1024xf32>
    %51 = arith.addf %48, %50 : vector<64x1024xf32>
    %cst_40 = arith.constant 0.000000e+00 : f32
    %52 = vector.broadcast %cst_40 : f32 to vector<64x1024xf32>
    %53 = arith.maximumf %51, %52 : vector<64x1024xf32>
    %54 = arith.truncf %53 : vector<64x1024xf32> to vector<64x1024xbf16>
    %c0_41 = arith.constant 0 : index
    %c0_42 = arith.constant 0 : index
    %55 = vector.load %arg16[%c0_41, %c0_42] : memref<1024x256xbf16, #tpu.memory_space<vmem>>, vector<1024x256xbf16>
    %cst_43 = arith.constant dense<0.000000e+00> : vector<64x256xf32>
    %56 = tpu.matmul %54, %55, %cst_43 {dimension_numbers = #tpu.dot_dimension_numbers<[1], [0], [0], [1], [0, 0, 1, 1], [], []>} : vector<64x1024xbf16>, vector<1024x256xbf16>, vector<64x256xf32> -> vector<64x256xf32>
    %c0_44 = arith.constant 0 : index
    %c0_45 = arith.constant 0 : index
    %57 = vector.load %arg17[%c0_44, %c0_45] : memref<1x256xf32, #tpu.memory_space<vmem>>, vector<1x256xf32>
    %58 = vector.broadcast %57 : vector<1x256xf32> to vector<64x256xf32>
    %59 = arith.addf %56, %58 : vector<64x256xf32>
    %60 = arith.negf %59 : vector<64x256xf32>
    %61 = math.exp %60 : vector<64x256xf32>
    %cst_46 = arith.constant 1.000000e+00 : f32
    %62 = vector.broadcast %cst_46 : f32 to vector<64x256xf32>
    %63 = arith.addf %62, %61 : vector<64x256xf32>
    %64 = arith.divf %62, %63 : vector<64x256xf32>
    %c0_47 = arith.constant 0 : index
    %c0_48 = arith.constant 0 : index
    %65 = vector.load %arg18[%c0_47, %c0_48] : memref<64x256xf32, #tpu.memory_space<vmem>>, vector<64x256xf32>
    tpu.vector_store %arg18[%c0_47, %c0_48], %64 {strides = array<i32>} : memref<64x256xf32, #tpu.memory_space<vmem>>, vector<64x256xf32>,
    return
  }
  func.func @transform_0(%arg0: i32) -> (i32, i32) {
    %c0_i32 = arith.constant 0 : i32
    %c0_i32_0 = arith.constant 0 : i32
    return %arg0, %c0_i32 : i32, i32
  }
  func.func @transform_1(%arg0: i32) -> (i32, i32) {
    %c0_i32 = arith.constant 0 : i32
    %c0_i32_0 = arith.constant 0 : i32
    %c0_i32_1 = arith.constant 0 : i32
    return %c0_i32, %c0_i32_0 : i32, i32
  }
  func.func @transform_2(%arg0: i32) -> (i32, i32) {
    %c0_i32 = arith.constant 0 : i32
    %c0_i32_0 = arith.constant 0 : i32
    %c0_i32_1 = arith.constant 0 : i32
    return %c0_i32, %c0_i32_0 : i32, i32
  }
  func.func @transform_3(%arg0: i32) -> (i32, i32) {
    %c0_i32 = arith.constant 0 : i32
    %c0_i32_0 = arith.constant 0 : i32
    %c0_i32_1 = arith.constant 0 : i32
    return %c0_i32, %c0_i32_0 : i32, i32
  }
  func.func @transform_4(%arg0: i32) -> (i32, i32) {
    %c0_i32 = arith.constant 0 : i32
    %c0_i32_0 = arith.constant 0 : i32
    %c0_i32_1 = arith.constant 0 : i32
    return %c0_i32, %c0_i32_0 : i32, i32
  }
  func.func @transform_5(%arg0: i32) -> (i32, i32) {
    %c0_i32 = arith.constant 0 : i32
    %c0_i32_0 = arith.constant 0 : i32
    %c0_i32_1 = arith.constant 0 : i32
    return %c0_i32, %c0_i32_0 : i32, i32
  }
  func.func @transform_6(%arg0: i32) -> (i32, i32) {
    %c0_i32 = arith.constant 0 : i32
    %c0_i32_0 = arith.constant 0 : i32
    %c0_i32_1 = arith.constant 0 : i32
    return %c0_i32, %c0_i32_0 : i32, i32
  }
  func.func @transform_7(%arg0: i32) -> (i32, i32) {
    %c0_i32 = arith.constant 0 : i32
    %c0_i32_0 = arith.constant 0 : i32
    %c0_i32_1 = arith.constant 0 : i32
    return %c0_i32, %c0_i32_0 : i32, i32
  }
  func.func @transform_8(%arg0: i32) -> (i32, i32) {
    %c0_i32 = arith.constant 0 : i32
    %c0_i32_0 = arith.constant 0 : i32
    %c0_i32_1 = arith.constant 0 : i32
    return %c0_i32, %c0_i32_0 : i32, i32
  }
  func.func @transform_9(%arg0: i32) -> (i32, i32) {
    %c0_i32 = arith.constant 0 : i32
    %c0_i32_0 = arith.constant 0 : i32
    %c0_i32_1 = arith.constant 0 : i32
    return %c0_i32, %c0_i32_0 : i32, i32
  }
  func.func @transform_10(%arg0: i32) -> (i32, i32) {
    %c0_i32 = arith.constant 0 : i32
    %c0_i32_0 = arith.constant 0 : i32
    %c0_i32_1 = arith.constant 0 : i32
    return %c0_i32, %c0_i32_0 : i32, i32
  }
  func.func @transform_11(%arg0: i32) -> (i32, i32) {
    %c0_i32 = arith.constant 0 : i32
    %c0_i32_0 = arith.constant 0 : i32
    %c0_i32_1 = arith.constant 0 : i32
    return %c0_i32, %c0_i32_0 : i32, i32
  }
  func.func @transform_12(%arg0: i32) -> (i32, i32) {
    %c0_i32 = arith.constant 0 : i32
    %c0_i32_0 = arith.constant 0 : i32
    %c0_i32_1 = arith.constant 0 : i32
    return %c0_i32, %c0_i32_0 : i32, i32
  }
  func.func @transform_13(%arg0: i32) -> (i32, i32) {
    %c0_i32 = arith.constant 0 : i32
    %c0_i32_0 = arith.constant 0 : i32
    %c0_i32_1 = arith.constant 0 : i32
    return %c0_i32, %c0_i32_0 : i32, i32
  }
  func.func @transform_14(%arg0: i32) -> (i32, i32) {
    %c0_i32 = arith.constant 0 : i32
    %c0_i32_0 = arith.constant 0 : i32
    %c0_i32_1 = arith.constant 0 : i32
    return %c0_i32, %c0_i32_0 : i32, i32
  }
  func.func @transform_15(%arg0: i32) -> (i32, i32) {
    %c0_i32 = arith.constant 0 : i32
    %c0_i32_0 = arith.constant 0 : i32
    %c0_i32_1 = arith.constant 0 : i32
    return %c0_i32, %c0_i32_0 : i32, i32
  }
  func.func @transform_16(%arg0: i32) -> (i32, i32) {
    %c0_i32 = arith.constant 0 : i32
    %c0_i32_0 = arith.constant 0 : i32
    %c0_i32_1 = arith.constant 0 : i32
    return %c0_i32, %c0_i32_0 : i32, i32
  }
  func.func @transform_17(%arg0: i32) -> (i32, i32) {
    %c0_i32 = arith.constant 0 : i32
    %c0_i32_0 = arith.constant 0 : i32
    return %arg0, %c0_i32 : i32, i32
  }
}

</mosaic_0001>

<bundles_post_ra>
// kernel: tpu_custom_call.1
= control target key start
LH: loop header
LB: loop body
LE: loop exit
PB: predicated region body
PF: predicated region fallthrough
CT: control target
= control target key end

     0   :  { %s6966_s0 = inlined_call_operand.hbm [shape: bf16[64,256], index: 0, kind: input, shape index: {}]   ;;  %s6967_s1 = inlined_call_operand.hbm [shape: bf16[256,1024], index: 1, kind: input, shape index: {}]   ;;  %s6968_s2 = inlined_call_operand.hbm [shape: f32[1,1024], index: 2, kind: input, shape index: {}]   ;;  %s6969_s3 = inlined_call_operand.hbm [shape: bf16[1024,128], index: 3, kind: input, shape index: {}]   ;;  %s6970_s4 = inlined_call_operand.vmem [shape: f32[1,128], index: 4, kind: input, shape index: {}]   ;;  %s6971_s5 = inlined_call_operand.hbm [shape: bf16[128,128], index: 5, kind: input, shape index: {}]   ;;  %s6972_s6 = inlined_call_operand.vmem [shape: f32[1,128], index: 6, kind: input, shape index: {}]   ;;  %s6973_s7 = inlined_call_operand.hbm [shape: bf16[128,128], index: 7, kind: input, shape index: {}]   ;;  %s6974_s8 = inlined_call_operand.vmem [shape: f32[1,128], index: 8, kind: input, shape index: {}]   ;;  %s6975_s9 = inlined_call_operand.hbm [shape: bf16[128,128], index: 9, kind: input, shape index: {}]   ;;  %s6976_s10 = inlined_call_operand.vmem [shape: f32[1,128], index: 10, kind: input, shape index: {}]   ;;  %s6977_s11 = inlined_call_operand.hbm [shape: bf16[128,128], index: 11, kind: input, shape index: {}]   ;;  %s6978_s12 = inlined_call_operand.vmem [shape: f32[1,128], index: 12, kind: input, shape index: {}]   ;;  %s6979_s13 = inlined_call_operand.hbm [shape: bf16[128,1024], index: 13, kind: input, shape index: {}]   ;;  %s6980_s14 = inlined_call_operand.vmem [shape: f32[1,1024], index: 14, kind: input, shape index: {}]   ;;  %s6981_s15 = inlined_call_operand.hbm [shape: bf16[1024,256], index: 15, kind: input, shape index: {}]   ;;  %s6982_s16 = inlined_call_operand.vmem [shape: f32[1,256], index: 16, kind: input, shape index: {}]   ;;  %s6983_s17 = inlined_call_operand.hbm [shape: f32[64,256], index: 17, kind: output, shape index: {}]  }
   0x1   :  { %6989 = sst [smem:[#allocation27_spill]] %s6966_s0 }
   0x2   :  { %6990 = sst [smem:[#allocation28_spill]] %s6967_s1 }
   0x3   :  { %6991 = sst [smem:[#allocation29_spill]] %s6983_s17 }
   0x4   :  { %22 = vsyncpa [#allocation3], 0 }
   0x5   :  { %23 = vsyncpa [#allocation6], 0 }
   0x6   :  { %24 = vsyncpa [#allocation9], 0 }
   0x7   :  { %25 = vsyncpa [#allocation12], 0 }
   0x8   :  { %26 = vsyncpa [#allocation15], 0 }
   0x9   :  { %27 = vsyncpa [#allocation18], 0 }
   0xa   :  { %28 = vsyncpa [#allocation4], 0  ;;  %s6294_s24 = smov [#allocation5]   ;;  %s6992_s28 = sld [smem:[#allocation28_spill]] }
   0xb   :  { %s46_s25 = sshll.u32 %s6294_s24, 4  ;;  %s47_s25 = int_to_ptr.vmem [resolvable:$true] %s46_s25 }
  0x10   :  { %s6038_s29 = scalar_lea.hbm %s6992_s28, 16384 }
  0x11   :  { %p6039_p0 = scmp.ne.s32.totalorder %s6992_s28, %s6038_s29  ;;  %p6042_p1 = scmp.lt.u32.totalorder %s6038_s29, %s6992_s28 }
  0x13   :  { %p6044_p2 = pnand %p6042_p1, %p6039_p0 }
  0x15   :  { %6047 = shalt.err (!%p6044_p2)
}
  0x16   :  { %s6048_s1 = scalar_lea.vmem %s47_s25, 16384  ;;  %p6053_p4 = scmp.lt.s32.totalorder %s47_s25, %s47_s25 }
  0x17   :  { %p6049_p3 = scmp.ne.s32.totalorder %s47_s25, %s6048_s1  ;;  %p6054_p5 = scmp.lt.s32.totalorder %s6048_s1, %s6048_s1 }
  0x19   :  { %p6055_p6 = por %p6054_p5, %p6053_p4 }
  0x1b   :  { %p6056_p7 = pnand %p6055_p6, %p6049_p3 }
  0x1d   :  { %6059 = shalt.err (!%p6056_p7)
}
  0x1e   :  { %s6987_s20 = smov 512   ;;  %s6988_s21 = smov 32  }
  0x1f   :  { %52 = dma.hbm_to_vmem [thread:$0]  %s6992_s28, 16384, %s47_s25, [#allocation6], %s6987_s20, %s6987_s20, %s6988_s21  }
  0x20   :  { %s6297_s24 = smov [#allocation8]   ;;  %s6060_s0 = scalar_lea.hbm %s6969_s3, 8192 }
  0x21   :  { %s68_s26 = sshll.u32 %s6297_s24, 4  ;;  %p6061_p8 = scmp.ne.s32.totalorder %s6969_s3, %s6060_s0  ;;  %s69_s26 = int_to_ptr.vmem [resolvable:$true] %s68_s26 }
  0x22   :  { %p6064_p9 = scmp.lt.u32.totalorder %s6060_s0, %s6969_s3 }
  0x24   :  { %p6066_p10 = pnand %p6064_p9, %p6061_p8 }
  0x26   :  { %6069 = shalt.err (!%p6066_p10)
}
  0x27   :  { %s6070_s17 = scalar_lea.vmem %s69_s26, 8192  ;;  %p6075_p12 = scmp.lt.s32.totalorder %s69_s26, %s69_s26 }
  0x28   :  { %p6071_p11 = scmp.ne.s32.totalorder %s69_s26, %s6070_s17  ;;  %p6076_p13 = scmp.lt.s32.totalorder %s6070_s17, %s6070_s17 }
  0x2a   :  { %p6077_p0 = por %p6076_p13, %p6075_p12 }
  0x2c   :  { %p6078_p1 = pnand %p6077_p0, %p6071_p11 }
  0x2e   :  { %6081 = shalt.err (!%p6078_p1)
}
  0x2f   :  { %s6298_s25 = smov 64   ;;  %s6299_s28 = smov 4  }
  0x30   :  { %74 = dma.hbm_to_vmem [thread:$0]  %s6969_s3, 8192, %s69_s26, [#allocation9], %s6298_s25, %s6298_s25, %s6299_s28  }
  0x31   :  { %s6300_s24 = smov [#allocation11]   ;;  %s6301_s29 = smov [#allocation14]  }
  0x32   :  { %s96_s27 = sshll.u32 %s6300_s24, 4  ;;  %s124_s0 = sshll.u32 %s6301_s29, 4  ;;  %s97_s27 = int_to_ptr.vmem [resolvable:$true] %s96_s27  ;;  %s6434_s0 = int_to_ptr.vmem [resolvable:$true] %s124_s0 }
  0x33   :  { %s6082_s18 = scalar_lea.hbm %s6973_s7, 1024 }
  0x34   :  { %p6083_p2 = scmp.ne.s32.totalorder %s6973_s7, %s6082_s18  ;;  %p6086_p3 = scmp.lt.u32.totalorder %s6082_s18, %s6973_s7 }
  0x36   :  { %p6088_p4 = pnand %p6086_p3, %p6083_p2 }
  0x38   :  { %6091 = shalt.err (!%p6088_p4)
}
  0x39   :  { %s6092_s3 = scalar_lea.vmem %s97_s27, 1024  ;;  %p6097_p6 = scmp.lt.s32.totalorder %s97_s27, %s97_s27 }
  0x3a   :  { %p6093_p5 = scmp.ne.s32.totalorder %s97_s27, %s6092_s3  ;;  %p6098_p7 = scmp.lt.s32.totalorder %s6092_s3, %s6092_s3 }
  0x3c   :  { %p6099_p8 = por %p6098_p7, %p6097_p6 }
  0x3e   :  { %p6100_p9 = pnand %p6099_p8, %p6093_p5 }
  0x40   :  { %6103 = shalt.err (!%p6100_p9)
}
  0x41   :  { %102 = dma.hbm_to_vmem [thread:$0]  %s6973_s7, 1024, %s97_s27, [#allocation12], %s6298_s25, %s6298_s25, %s6299_s28  }
  0x42   :  { %s6104_s20 = scalar_lea.hbm %s6977_s11, 1024 }
  0x43   :  { %p6105_p10 = scmp.ne.s32.totalorder %s6977_s11, %s6104_s20  ;;  %p6108_p11 = scmp.lt.u32.totalorder %s6104_s20, %s6977_s11 }
  0x45   :  { %p6110_p12 = pnand %p6108_p11, %p6105_p10 }
  0x47   :  { %6113 = shalt.err (!%p6110_p12)
}
  0x48   :  { %s6114_s18 = scalar_lea.vmem %s6434_s0, 1024  ;;  %p6119_p0 = scmp.lt.s32.totalorder %s6434_s0, %s6434_s0 }
  0x49   :  { %p6115_p13 = scmp.ne.s32.totalorder %s6434_s0, %s6114_s18  ;;  %p6120_p1 = scmp.lt.s32.totalorder %s6114_s18, %s6114_s18 }
  0x4b   :  { %p6121_p2 = por %p6120_p1, %p6119_p0 }
  0x4d   :  { %p6122_p3 = pnand %p6121_p2, %p6115_p13 }
  0x4f   :  { %6125 = shalt.err (!%p6122_p3)
}
  0x50   :  { %130 = dma.hbm_to_vmem [thread:$0]  %s6977_s11, 1024, %s6434_s0, [#allocation15], %s6298_s25, %s6298_s25, %s6299_s28  }
  0x51   :  { %s6302_s19 = smov [#allocation2]   ;;  %s6993_s22 = sld [smem:[#allocation27_spill]] }
  0x52   :  { %s34_s1 = sshll.u32 %s6302_s19, 4  ;;  %s35_s1 = int_to_ptr.vmem [resolvable:$true] %s34_s1 }
  0x57   :  { %s6126_s23 = scalar_lea.hbm %s6993_s22, 1024 }
  0x58   :  { %p6127_p4 = scmp.ne.s32.totalorder %s6993_s22, %s6126_s23  ;;  %p6130_p5 = scmp.lt.u32.totalorder %s6126_s23, %s6993_s22 }
  0x5a   :  { %p6132_p6 = pnand %p6130_p5, %p6127_p4 }
  0x5c   :  { %6135 = shalt.err (!%p6132_p6)
}
  0x5d   :  { %s6136_s17 = scalar_lea.vmem %s35_s1, 1024  ;;  %p6141_p8 = scmp.lt.s32.totalorder %s35_s1, %s35_s1 }
  0x5e   :  { %p6137_p7 = scmp.ne.s32.totalorder %s35_s1, %s6136_s17  ;;  %p6142_p9 = scmp.lt.s32.totalorder %s6136_s17, %s6136_s17 }
  0x60   :  { %p6143_p10 = por %p6142_p9, %p6141_p8 }
  0x62   :  { %p6144_p11 = pnand %p6143_p10, %p6137_p7 }
  0x64   :  { %6147 = shalt.err (!%p6144_p11)
}
  0x65   :  { %s6303_s11 = smov 128   ;;  %s6304_s0 = smov 8  }
  0x66   :  { %40 = dma.hbm_to_vmem [thread:$0]  %s6993_s22, 1024, %s35_s1, [#allocation3], %s6303_s11, %s6303_s11, %s6304_s0  }
  0x67   :  { %s6305_s7 = smov [#allocation7]   ;;  %s6306_s19 = smov [#allocation10]  }
  0x68   :  { %s59_s27 = sshll.u32 %s6305_s7, 4  ;;  %s82_s3 = sshll.u32 %s6306_s19, 4  ;;  %s60_s27 = int_to_ptr.vmem [resolvable:$true] %s59_s27  ;;  %s83_s3 = int_to_ptr.vmem [resolvable:$true] %s82_s3 }
  0x69   :  { %s6148_s24 = scalar_lea.hbm %s6968_s2, 128 }
  0x6a   :  { %p6149_p12 = scmp.ne.s32.totalorder %s6968_s2, %s6148_s24  ;;  %p6152_p13 = scmp.lt.u32.totalorder %s6148_s24, %s6968_s2 }
  0x6c   :  { %p6154_p0 = pnand %p6152_p13, %p6149_p12 }
  0x6e   :  { %6157 = shalt.err (!%p6154_p0)
}
  0x6f   :  { %s6158_s1 = scalar_lea.vmem %s60_s27, 128  ;;  %p6163_p2 = scmp.lt.s32.totalorder %s60_s27, %s60_s27 }
  0x70   :  { %p6159_p1 = scmp.ne.s32.totalorder %s60_s27, %s6158_s1  ;;  %p6164_p3 = scmp.lt.s32.totalorder %s6158_s1, %s6158_s1 }
  0x72   :  { %p6165_p4 = por %p6164_p3, %p6163_p2 }
  0x74   :  { %p6166_p5 = pnand %p6165_p4, %p6159_p1 }
  0x76   :  { %6169 = shalt.err (!%p6166_p5)
}
  0x77   :  { %62 = dma.hbm_to_vmem [thread:$0]  %s6968_s2, 128, %s60_s27, [#allocation6]  }
  0x78   :  { %s6170_s19 = scalar_lea.hbm %s6971_s5, 1024 }
  0x79   :  { %p6171_p6 = scmp.ne.s32.totalorder %s6971_s5, %s6170_s19  ;;  %p6174_p7 = scmp.lt.u32.totalorder %s6170_s19, %s6971_s5 }
  0x7b   :  { %p6176_p8 = pnand %p6174_p7, %p6171_p6 }
  0x7d   :  { %6179 = shalt.err (!%p6176_p8)
}
  0x7e   :  { %s6180_s21 = scalar_lea.vmem %s83_s3, 1024  ;;  %p6185_p10 = scmp.lt.s32.totalorder %s83_s3, %s83_s3 }
  0x7f   :  { %p6181_p9 = scmp.ne.s32.totalorder %s83_s3, %s6180_s21  ;;  %p6186_p11 = scmp.lt.s32.totalorder %s6180_s21, %s6180_s21 }
  0x81   :  { %p6187_p12 = por %p6186_p11, %p6185_p10 }
  0x83   :  { %p6188_p13 = pnand %p6187_p12, %p6181_p9 }
  0x85   :  { %6191 = shalt.err (!%p6188_p13)
}
  0x86   :  { %88 = dma.hbm_to_vmem [thread:$0]  %s6971_s5, 1024, %s83_s3, [#allocation9], %s6298_s25, %s6298_s25, %s6299_s28  }
  0x87   :  { %s6307_s29 = smov [#allocation13]   ;;  %s6308_s1 = smov [#allocation16]  }
  0x88   :  { %s110_s17 = sshll.u32 %s6307_s29, 4  ;;  %s138_s22 = sshll.u32 %s6308_s1, 4  ;;  %s111_s17 = int_to_ptr.vmem [resolvable:$true] %s110_s17  ;;  %s139_s22 = int_to_ptr.vmem [resolvable:$true] %s138_s22 }
  0x89   :  { %s6192_s7 = scalar_lea.hbm %s6975_s9, 1024 }
  0x8a   :  { %p6193_p0 = scmp.ne.s32.totalorder %s6975_s9, %s6192_s7  ;;  %p6196_p1 = scmp.lt.u32.totalorder %s6192_s7, %s6975_s9 }
  0x8c   :  { %p6198_p2 = pnand %p6196_p1, %p6193_p0 }
  0x8e   :  { %6201 = shalt.err (!%p6198_p2)
}
  0x8f   :  { %s6202_s5 = scalar_lea.vmem %s111_s17, 1024  ;;  %p6207_p4 = scmp.lt.s32.totalorder %s111_s17, %s111_s17 }
  0x90   :  { %p6203_p3 = scmp.ne.s32.totalorder %s111_s17, %s6202_s5  ;;  %p6208_p5 = scmp.lt.s32.totalorder %s6202_s5, %s6202_s5 }
  0x92   :  { %p6209_p6 = por %p6208_p5, %p6207_p4 }
  0x94   :  { %p6210_p7 = pnand %p6209_p6, %p6203_p3 }
  0x96   :  { %6213 = shalt.err (!%p6210_p7)
}
  0x97   :  { %116 = dma.hbm_to_vmem [thread:$0]  %s6975_s9, 1024, %s111_s17, [#allocation12], %s6298_s25, %s6298_s25, %s6299_s28  }
  0x98   :  { %s6214_s27 = scalar_lea.hbm %s6979_s13, 8192 }
  0x99   :  { %p6215_p8 = scmp.ne.s32.totalorder %s6979_s13, %s6214_s27  ;;  %p6218_p9 = scmp.lt.u32.totalorder %s6214_s27, %s6979_s13 }
  0x9b   :  { %p6220_p10 = pnand %p6218_p9, %p6215_p8 }
  0x9d   :  { %6223 = shalt.err (!%p6220_p10)
}
  0x9e   :  { %s6224_s7 = scalar_lea.vmem %s139_s22, 8192  ;;  %p6229_p12 = scmp.lt.s32.totalorder %s139_s22, %s139_s22 }
  0x9f   :  { %p6225_p11 = scmp.ne.s32.totalorder %s139_s22, %s6224_s7  ;;  %p6230_p13 = scmp.lt.s32.totalorder %s6224_s7, %s6224_s7 }
  0xa1   :  { %p6231_p0 = por %p6230_p13, %p6229_p12 }
  0xa3   :  { %p6232_p1 = pnand %p6231_p0, %p6225_p11 }
  0xa5   :  { %6235 = shalt.err (!%p6232_p1)
}
  0xa6   :  { %s6994_s9 = smov 32   ;;  %s6995_s25 = smov 512  }
  0xa7   :  { %144 = dma.hbm_to_vmem [thread:$0]  %s6979_s13, 8192, %s139_s22, [#allocation15], %s6995_s25, %s6995_s25, %s6994_s9  }
  0xa8   :  { %s6309_s19 = smov [#allocation17]   ;;  %s6236_s5 = scalar_lea.hbm %s6981_s15, 16384 }
  0xa9   :  { %s152_s26 = sshll.u32 %s6309_s19, 4  ;;  %p6237_p2 = scmp.ne.s32.totalorder %s6981_s15, %s6236_s5  ;;  %s153_s26 = int_to_ptr.vmem [resolvable:$true] %s152_s26 }
  0xaa   :  { %p6240_p3 = scmp.lt.u32.totalorder %s6236_s5, %s6981_s15 }
  0xac   :  { %p6242_p4 = pnand %p6240_p3, %p6237_p2 }
  0xae   :  { %6245 = shalt.err (!%p6242_p4)
}
  0xaf   :  { %s6246_s27 = scalar_lea.vmem %s153_s26, 16384  ;;  %p6251_p6 = scmp.lt.s32.totalorder %s153_s26, %s153_s26 }
  0xb0   :  { %p6247_p5 = scmp.ne.s32.totalorder %s153_s26, %s6246_s27  ;;  %p6252_p7 = scmp.lt.s32.totalorder %s6246_s27, %s6246_s27 }
  0xb2   :  { %p6253_p8 = por %p6252_p7, %p6251_p6 }
  0xb4   :  { %p6254_p9 = pnand %p6253_p8, %p6247_p5 }
  0xb6   :  { %6257 = shalt.err (!%p6254_p9)
}
  0xb7   :  { %158 = dma.hbm_to_vmem [thread:$0]  %s6981_s15, 16384, %s153_s26, [#allocation18], %s6303_s11, %s6303_s11, %s6304_s0  }
  0xb8   :  { %6280 = dma.done.wait [#allocation3], 1024  }
  0xb9   :  { %6281 = vsyncadd [#allocation3], 4294966272 }
  0xba   :  { %6282 = dma.done.wait [#allocation6], 16512  }
  0xbb   :  { %6283 = vsyncadd [#allocation6], 4294950784 }
  0xbc   :  { %6284 = dma.done.wait [#allocation9], 9216  }
  0xbd   :  { %6285 = vsyncadd [#allocation9], 4294958080 }
  0xbe   :  { %6286 = dma.done.wait [#allocation12], 2048  }
  0xbf   :  { %6287 = vsyncadd [#allocation12], 4294965248 }
  0xc0   :  { %6288 = dma.done.wait [#allocation15], 9216  }
  0xc1   :  { %6289 = vsyncadd [#allocation15], 4294958080 }
  0xc2   :  { %6290 = dma.done.wait [#allocation18], 16384  }
  0xc3   :  { %6291 = vsyncadd [#allocation18], 4294950912  ;;  %v200_v0 = vld [vmem:[#allocation5] sm:$0xff]  ;;  %v201_v63 = vld [vmem:[#allocation5 + $0x8] sm:$0xff] }
  0xc4   :  { %v204_v1 = vld [vmem:[#allocation5 + $0x20] sm:$0xff] }
  0xc5   :  { %v208_v2 = vld [vmem:[#allocation5 + $0x40] sm:$0xff]  ;;  %v4842_v3 = vcombine.high %v200_v0, %v204_v1  ;;  %v4841_v4 = vcombine.low %v200_v0, %v204_v1  ;;  %v205_v0 = vld [vmem:[#allocation5 + $0x28] sm:$0xff] }
  0xc6   :  { %v212_v5 = vld [vmem:[#allocation5 + $0x60] sm:$0xff] }
  0xc7   :  { %v4850_v6 = vcombine.high %v208_v2, %v212_v5  ;;  %v216_v7 = vld [vmem:[#allocation5 + $0x80] sm:$0xff]  ;;  %1050 = vmatprep.subr.bf16.mxu1 %v4842_v3  ;;  %v4849_v9 = vcombine.low %v208_v2, %v212_v5  ;;  %v209_v3 = vld [vmem:[#allocation5 + $0x48] sm:$0xff] }
  0xc8   :  { %v220_v8 = vld [vmem:[#allocation5 + $0xa0] sm:$0xff]  ;;  %1051 = vmatpush1.bf16.msra.mxu1 %v4841_v4  ;;  %v213_v4 = vld [vmem:[#allocation5 + $0x68] sm:$0xff] }
  0xc9   :  { %1052 = vmatprep.subr.bf16.mxu1 %v4850_v6  ;;  %v4858_v10 = vcombine.high %v216_v7, %v220_v8  ;;  %v224_v11 = vld [vmem:[#allocation5 + $0xc0] sm:$0xff]  ;;  %v4857_v13 = vcombine.low %v216_v7, %v220_v8  ;;  %v4844_v6 = vcombine.high %v201_v63, %v205_v0  ;;  %v4843_v7 = vcombine.low %v201_v63, %v205_v0  ;;  %v217_v8 = vld [vmem:[#allocation5 + $0x88] sm:$0xff] }
  0xca   :  { %v228_v12 = vld [vmem:[#allocation5 + $0xe0] sm:$0xff]  ;;  %v317_v63 = vld [vmem:[#allocation5 + $0x3a8] sm:$0xff] }
  0xcb   :  { %v4866_v14 = vcombine.high %v224_v11, %v228_v12  ;;  %v232_v15 = vld [vmem:[#allocation5 + $0x100] sm:$0xff]  ;;  %v4865_v18 = vcombine.low %v224_v11, %v228_v12  ;;  %v4852_v11 = vcombine.high %v209_v3, %v213_v4  ;;  %v4851_v12 = vcombine.low %v209_v3, %v213_v4  ;;  %v325_v3 = vld [vmem:[#allocation5 + $0x3e8] sm:$0xff] }
  0xcc   :  { %1053 = vmatpush1.bf16.msra.mxu1 %v4849_v9  ;;  %v236_v16 = vld [vmem:[#allocation5 + $0x120] sm:$0xff]  ;;  %v221_v9 = vld [vmem:[#allocation5 + $0xa8] sm:$0xff] }
  0xcd   :  { %1054 = vmatprep.subr.bf16.mxu1 %v4858_v10  ;;  %v6558_v17 = vld [vmem:[#allocation2 + $0x4] ss:$8 sps:$4 sm:$0xff]   ;;  %v4874_v19 = vcombine.high %v232_v15, %v236_v16  ;;  %v4873_v22 = vcombine.low %v232_v15, %v236_v16  ;;  %v6561_v5 = vld [vmem:[#allocation2] ss:$8 sps:$4 sm:$0xff]   ;;  %v6563_v10 = vld [vmem:[#allocation2 + $0x14] ss:$8 sps:$4 sm:$0xff]   ;;  %v4860_v15 = vcombine.high %v217_v8, %v221_v9 }
  0xce   :  { %1082 = vmatprep.mubr.bf16.mxu1 %v6558_v17  ;;  %v240_v20 = vld [vmem:[#allocation5 + $0x140] sm:$0xff]  ;;  %v6567_v16 = vld [vmem:[#allocation2 + $0x10] ss:$8 sps:$4 sm:$0xff]  }
  0xcf   :  { %v244_v21 = vld [vmem:[#allocation5 + $0x160] sm:$0xff] }
  0xd0   :  { %1055 = vmatpush1.bf16.msra.mxu1 %v4857_v13  ;;  %v4882_v23 = vcombine.high %v240_v20, %v244_v21  ;;  %v248_v24 = vld [vmem:[#allocation5 + $0x180] sm:$0xff]  ;;  %v4881_v26 = vcombine.low %v240_v20, %v244_v21  ;;  %v225_v13 = vld [vmem:[#allocation5 + $0xc8] sm:$0xff] }
  0xd1   :  { %1056 = vmatprep.subr.bf16.mxu1 %v4866_v14  ;;  %v252_v25 = vld [vmem:[#allocation5 + $0x1a0] sm:$0xff]  ;;  %v229_v14 = vld [vmem:[#allocation5 + $0xe8] sm:$0xff] }
  0xd2   :  { %v4890_v27 = vcombine.high %v248_v24, %v252_v25  ;;  %v256_v28 = vld [vmem:[#allocation5 + $0x1c0] sm:$0xff]  ;;  %v4889_v30 = vcombine.low %v248_v24, %v252_v25  ;;  %v237_v20 = vld [vmem:[#allocation5 + $0x128] sm:$0xff] }
  0xd3   :  { %v260_v29 = vld [vmem:[#allocation5 + $0x1e0] sm:$0xff]  ;;  %v241_v24 = vld [vmem:[#allocation5 + $0x148] sm:$0xff] }
  0xd4   :  { %1057 = vmatpush1.bf16.msra.mxu1 %v4865_v18  ;;  %v4898_v31 = vcombine.high %v256_v28, %v260_v29  ;;  %v264_v32 = vld [vmem:[#allocation5 + $0x200] sm:$0xff]  ;;  %v4897_v34 = vcombine.low %v256_v28, %v260_v29  ;;  %v4859_v18 = vcombine.low %v217_v8, %v221_v9  ;;  %v245_v25 = vld [vmem:[#allocation5 + $0x168] sm:$0xff]  ;;  %v206_v8 = vld [vmem:[#allocation5 + $0x30] sm:$0xff] }
  0xd5   :  { %1058 = vmatprep.subr.bf16.mxu1 %v4874_v19  ;;  %v268_v33 = vld [vmem:[#allocation5 + $0x220] sm:$0xff]  ;;  %v233_v19 = vld [vmem:[#allocation5 + $0x108] sm:$0xff] }
  0xd6   :  { %v4906_v35 = vcombine.high %v264_v32, %v268_v33  ;;  %v272_v36 = vld [vmem:[#allocation5 + $0x240] sm:$0xff]  ;;  %v4905_v38 = vcombine.low %v264_v32, %v268_v33  ;;  %v4875_v28 = vcombine.low %v233_v19, %v237_v20  ;;  %v249_v29 = vld [vmem:[#allocation5 + $0x188] sm:$0xff]  ;;  %v4884_v32 = vcombine.high %v241_v24, %v245_v25 }
  0xd7   :  { %v276_v37 = vld [vmem:[#allocation5 + $0x260] sm:$0xff]  ;;  %v4883_v33 = vcombine.low %v241_v24, %v245_v25  ;;  %v5680_v24 = vld [vmem:[#allocation8 + $0x48] sm:$0xff]  }
  0xd8   :  { %1059 = vmatpush1.bf16.msra.mxu1 %v4873_v22  ;;  %v280_v39 = vld [vmem:[#allocation5 + $0x280] sm:$0xff]  ;;  %v4914_v41 = vcombine.high %v272_v36, %v276_v37  ;;  %v4913_v42 = vcombine.low %v272_v36, %v276_v37  ;;  %v4868_v22 = vcombine.high %v225_v13, %v229_v14  ;;  %v6579_v37 = vld [vmem:[#allocation2 + $0x30] ss:$8 sps:$4 sm:$0xff]  }
  0xd9   :  { %1060 = vmatprep.subr.bf16.mxu1 %v4882_v23  ;;  %v284_v40 = vld [vmem:[#allocation5 + $0x2a0] sm:$0xff]  ;;  %v4867_v23 = vcombine.low %v225_v13, %v229_v14  ;;  %v214_v13 = vld [vmem:[#allocation5 + $0x70] sm:$0xff] }
  0xda   :  { %v288_v43 = vld [vmem:[#allocation5 + $0x2c0] sm:$0xff]  ;;  %v4922_v45 = vcombine.high %v280_v39, %v284_v40  ;;  %v4921_v46 = vcombine.low %v280_v39, %v284_v40  ;;  %v265_v39 = vld [vmem:[#allocation5 + $0x208] sm:$0xff]  ;;  %v5681_v25 = vld [vmem:[#allocation8 + $0x8] sm:$0xff]  }
  0xdb   :  { %v292_v44 = vld [vmem:[#allocation5 + $0x2e0] sm:$0xff]  ;;  %v269_v40 = vld [vmem:[#allocation5 + $0x228] sm:$0xff] }
  0xdc   :  { %1061 = vmatpush1.bf16.msra.mxu1 %v4881_v26  ;;  %v296_v47 = vld [vmem:[#allocation5 + $0x300] sm:$0xff]  ;;  %v4930_v49 = vcombine.high %v288_v43, %v292_v44  ;;  %v4929_v50 = vcombine.low %v288_v43, %v292_v44  ;;  %v4876_v26 = vcombine.high %v233_v19, %v237_v20  ;;  %v273_v43 = vld [vmem:[#allocation5 + $0x248] sm:$0xff]  ;;  %v218_v19 = vld [vmem:[#allocation5 + $0x90] sm:$0xff] }
  0xdd   :  { %1062 = vmatprep.subr.bf16.mxu1 %v4890_v27  ;;  %v300_v48 = vld [vmem:[#allocation5 + $0x320] sm:$0xff]  ;;  %v277_v44 = vld [vmem:[#allocation5 + $0x268] sm:$0xff]  ;;  %v222_v20 = vld [vmem:[#allocation5 + $0xb0] sm:$0xff] }
  0xde   :  { %v304_v51 = vld [vmem:[#allocation5 + $0x340] sm:$0xff]  ;;  %v4938_v53 = vcombine.high %v296_v47, %v300_v48  ;;  %v4937_v54 = vcombine.low %v296_v47, %v300_v48  ;;  %v281_v47 = vld [vmem:[#allocation5 + $0x288] sm:$0xff] }
  0xdf   :  { %v308_v52 = vld [vmem:[#allocation5 + $0x360] sm:$0xff]  ;;  %v285_v48 = vld [vmem:[#allocation5 + $0x2a8] sm:$0xff] }
  0xe0   :  { %1063 = vmatpush1.bf16.msra.mxu1 %v4889_v30  ;;  %v312_v55 = vld [vmem:[#allocation5 + $0x380] sm:$0xff]  ;;  %v4946_v57 = vcombine.high %v304_v51, %v308_v52  ;;  %v4945_v58 = vcombine.low %v304_v51, %v308_v52  ;;  %v253_v30 = vld [vmem:[#allocation5 + $0x1a8] sm:$0xff] }
  0xe1   :  { %1064 = vmatprep.subr.bf16.mxu1 %v4898_v31  ;;  %v316_v56 = vld [vmem:[#allocation5 + $0x3a0] sm:$0xff]  ;;  %v6575_v31 = vld [vmem:[#allocation2 + $0x34] ss:$8 sps:$4 sm:$0xff]   ;;  %v4892_v36 = vcombine.high %v249_v29, %v253_v30  ;;  %v289_v51 = vld [vmem:[#allocation5 + $0x2c8] sm:$0xff] }
  0xe2   :  { %v320_v59 = vld [vmem:[#allocation5 + $0x3c0] sm:$0xff]  ;;  %v4954_v61 = vcombine.high %v312_v55, %v316_v56  ;;  %v4953_v62 = vcombine.low %v312_v55, %v316_v56  ;;  %v293_v52 = vld [vmem:[#allocation5 + $0x2e8] sm:$0xff] }
  0xe3   :  { %v324_v60 = vld [vmem:[#allocation5 + $0x3e0] sm:$0xff]  ;;  %v297_v55 = vld [vmem:[#allocation5 + $0x308] sm:$0xff] }
  0xe4   :  { %1065 = vmatpush1.bf16.msra.mxu1 %v4897_v34  ;;  %v4962_v1 = vcombine.high %v320_v59, %v324_v60  ;;  %v4961_v2 = vcombine.low %v320_v59, %v324_v60  ;;  %v6569_v21 = vld [vmem:[#allocation2 + $0x24] ss:$8 sps:$4 sm:$0xff]   ;;  %v6573_v27 = vld [vmem:[#allocation2 + $0x20] ss:$8 sps:$4 sm:$0xff]  }
  0xe5   :  { %1066 = vmatprep.subr.bf16.mxu1 %v4906_v35  ;;  %v257_v34 = vld [vmem:[#allocation5 + $0x1c8] sm:$0xff] }
  0xe6   :  { %v261_v35 = vld [vmem:[#allocation5 + $0x1e8] sm:$0xff] }
  0xe7   :  { %v301_v56 = vld [vmem:[#allocation5 + $0x328] sm:$0xff] }
  0xe8   :  { %1067 = vmatpush1.bf16.msra.mxu1 %v4905_v38  ;;  %v4891_v38 = vcombine.low %v249_v29, %v253_v30  ;;  %v309_v59 = vld [vmem:[#allocation5 + $0x368] sm:$0xff]  ;;  %v4940_v60 = vcombine.high %v297_v55, %v301_v56  ;;  %v226_v29 = vld [vmem:[#allocation5 + $0xd0] sm:$0xff] }
  0xe9   :  { %1068 = vmatprep.subr.bf16.mxu1 %v4914_v41  ;;  %v4900_v41 = vcombine.high %v257_v34, %v261_v35  ;;  %v230_v30 = vld [vmem:[#allocation5 + $0xf0] sm:$0xff] }
  0xec   :  { %1069 = vmatpush1.bf16.msra.mxu1 %v4913_v42  ;;  %v4899_v42 = vcombine.low %v257_v34, %v261_v35  ;;  %v4861_v34 = vcombine.low %v218_v19, %v222_v20  ;;  %v234_v35 = vld [vmem:[#allocation5 + $0x110] sm:$0xff] }
  0xed   :  { %1070 = vmatprep.subr.bf16.mxu1 %v4922_v45  ;;  %v4908_v45 = vcombine.high %v265_v39, %v269_v40 }
  0xf0   :  { %1071 = vmatpush1.bf16.msra.mxu1 %v4921_v46  ;;  %v4907_v46 = vcombine.low %v265_v39, %v269_v40  ;;  %v5684_v39 = vld [vmem:[#allocation8 + $0x58] sm:$0xff]  }
  0xf1   :  { %1072 = vmatprep.subr.bf16.mxu1 %v4930_v49  ;;  %v4916_v49 = vcombine.high %v273_v43, %v277_v44  ;;  %v5685_v40 = vld [vmem:[#allocation8 + $0x18] sm:$0xff]  }
  0xf4   :  { %1073 = vmatpush1.bf16.msra.mxu1 %v4929_v50  ;;  %v4915_v50 = vcombine.low %v273_v43, %v277_v44  ;;  %v242_v43 = vld [vmem:[#allocation5 + $0x150] sm:$0xff] }
  0xf5   :  { %1074 = vmatprep.subr.bf16.mxu1 %v4938_v53  ;;  %v4924_v53 = vcombine.high %v281_v47, %v285_v48  ;;  %v246_v44 = vld [vmem:[#allocation5 + $0x170] sm:$0xff] }
  0xf8   :  { %1075 = vmatpush1.bf16.msra.mxu1 %v4937_v54  ;;  %v4923_v54 = vcombine.low %v281_v47, %v285_v48  ;;  %v250_v48 = vld [vmem:[#allocation5 + $0x190] sm:$0xff] }
  0xf9   :  { %1076 = vmatprep.subr.bf16.mxu1 %v4946_v57  ;;  %v4931_v57 = vcombine.low %v289_v51, %v293_v52 }
  0xfc   :  { %1077 = vmatpush1.bf16.msra.mxu1 %v4945_v58  ;;  %v305_v58 = vld [vmem:[#allocation5 + $0x348] sm:$0xff] }
  0xfd   :  { %1078 = vmatprep.subr.bf16.mxu1 %v4954_v61  ;;  %v4939_v61 = vcombine.low %v297_v55, %v301_v56  ;;  %v4948_v0 = vcombine.high %v305_v58, %v309_v59  ;;  %v5689_v55 = vld [vmem:[#allocation8 + $0x28] sm:$0xff]  }
 0x100   :  { %1079 = vmatpush1.bf16.msra.mxu1 %v4953_v62  ;;  %v313_v62 = vld [vmem:[#allocation5 + $0x388] sm:$0xff] }
 0x101   :  { %1080 = vmatprep.subr.bf16.mxu1 %v4962_v1  ;;  %v4947_v1 = vcombine.low %v305_v58, %v309_v59  ;;  %v4956_v4 = vcombine.high %v313_v62, %v317_v63  ;;  %v266_v58 = vld [vmem:[#allocation5 + $0x210] sm:$0xff] }
 0x102   :  { %v270_v59 = vld [vmem:[#allocation5 + $0x230] sm:$0xff] }
 0x104   :  { %1081 = vmatpush1.bf16.msra.mxu1 %v4961_v2  ;;  %v321_v2 = vld [vmem:[#allocation5 + $0x3c8] sm:$0xff] }
 0x105   :  { %1123 = vmatprep.subr.bf16.mxu1 %v4844_v6  ;;  %v4955_v6 = vcombine.low %v313_v62, %v317_v63  ;;  %v4964_v9 = vcombine.high %v321_v2, %v325_v3  ;;  %v5692_v62 = vld [vmem:[#allocation8 + $0x78] sm:$0xff]  }
 0x107   :  { %1083 = vmatmul.mubr.bf16.vlgmr.msra.gmra.mrb[0].mxu1 %v6561_v5 }
 0x108   :  { %1124 = vmatpush1.bf16.msra.mxu1 %v4843_v7  ;;  %1092 = vmatprep.mubr.bf16.mxu1 %v6563_v10  ;;  %v202_v7 = vld [vmem:[#allocation5 + $0x10] sm:$0xff] }
 0x109   :  { %1125 = vmatprep.subr.bf16.mxu1 %v4852_v11  ;;  %v4963_v11 = vcombine.low %v321_v2, %v325_v3  ;;  %v4846_v14 = vcombine.high %v202_v7, %v206_v8  ;;  %v6590_v2 = vld [vmem:[#allocation2 + $0x4] ss:$8 sps:$4 sm:$0xff]  }
 0x10a   :  { %v5693_v3 = vld [vmem:[#allocation8 + $0x38] sm:$0xff]  }
 0x10c   :  { %1126 = vmatpush1.bf16.msra.mxu1 %v4851_v12  ;;  %v210_v12 = vld [vmem:[#allocation5 + $0x50] sm:$0xff] }
 0x10d   :  { %1127 = vmatprep.subr.bf16.mxu1 %v4860_v15  ;;  %v5678_v15 = vld [vmem:[#allocation8 + $0x40] sm:$0xff]  }
 0x10e   :  { %5278 = vmatprep.subr.bf16.mxu0 %v5678_v15 }
 0x10f   :  { %1093 = vmatmul.mubr.bf16.gmra.mrb[4].mxu1 %v6567_v16 }
 0x110   :  { %1128 = vmatpush1.bf16.msra.mxu1 %v4859_v18  ;;  %1102 = vmatprep.mubr.bf16.mxu1 %v6569_v21  ;;  %v4845_v18 = vcombine.low %v202_v7, %v206_v8  ;;  %v282_v8 = vld [vmem:[#allocation5 + $0x290] sm:$0xff] }
 0x111   :  { %1129 = vmatprep.subr.bf16.mxu1 %v4868_v22  ;;  %v5679_v22 = vld [vmem:[#allocation8] sm:$0xff]  }
 0x112   :  { %5279 = vmatpush3.bf16.msra.mxu0 %v5679_v22 }
 0x113   :  { %5280 = vmatprep.subr.bf16.mxu0 %v5680_v24  ;;  %v306_v24 = vld [vmem:[#allocation5 + $0x350] sm:$0xff] }
 0x114   :  { %1130 = vmatpush1.bf16.msra.mxu1 %v4867_v23  ;;  %v4854_v23 = vcombine.high %v210_v12, %v214_v13 }
 0x115   :  { %1131 = vmatprep.subr.bf16.mxu1 %v4876_v26  ;;  %v5682_v26 = vld [vmem:[#allocation8 + $0x50] sm:$0xff]  }
 0x116   :  { %5281 = vmatpush3.bf16.msra.mxu0 %v5681_v25  ;;  %v310_v25 = vld [vmem:[#allocation5 + $0x370] sm:$0xff] }
 0x117   :  { %1103 = vmatmul.mubr.bf16.gmra.mrb[8].mxu1 %v6573_v27  ;;  %5282 = vmatprep.subr.bf16.mxu0 %v5682_v26 }
 0x118   :  { %1132 = vmatpush1.bf16.msra.mxu1 %v4875_v28  ;;  %1112 = vmatprep.mubr.bf16.mxu1 %v6575_v31  ;;  %v4853_v28 = vcombine.low %v210_v12, %v214_v13  ;;  %v290_v13 = vld [vmem:[#allocation5 + $0x2d0] sm:$0xff] }
 0x119   :  { %1133 = vmatprep.subr.bf16.mxu1 %v4884_v32  ;;  %v5683_v32 = vld [vmem:[#allocation8 + $0x10] sm:$0xff]  }
 0x11a   :  { %5283 = vmatpush3.bf16.msra.mxu0 %v5683_v32  ;;  %v4949_v32 = vcombine.low %v306_v24, %v310_v25 }
 0x11b   :  { %5284 = vmatprep.subr.bf16.mxu0 %v5684_v39  ;;  %v203_v39 = vld [vmem:[#allocation5 + $0x18] sm:$0xff] }
 0x11c   :  { %1134 = vmatpush1.bf16.msra.mxu1 %v4883_v33  ;;  %v4862_v33 = vcombine.high %v218_v19, %v222_v20  ;;  %v298_v19 = vld [vmem:[#allocation5 + $0x310] sm:$0xff] }
 0x11d   :  { %1135 = vmatprep.subr.bf16.mxu1 %v4892_v36  ;;  %v238_v36 = vld [vmem:[#allocation5 + $0x130] sm:$0xff] }
 0x11e   :  { %5285 = vmatpush3.bf16.msra.mxu0 %v5685_v40  ;;  %v4877_v47 = vcombine.low %v234_v35, %v238_v36  ;;  %v302_v20 = vld [vmem:[#allocation5 + $0x330] sm:$0xff]  ;;  %v207_v40 = vld [vmem:[#allocation5 + $0x38] sm:$0xff] }
 0x11f   :  { %1113 = vmatmul.mubr.bf16.gmra.mrb[12].mxu1 %v6579_v37  ;;  %v4941_v26 = vcombine.low %v298_v19, %v302_v20 }
 0x120   :  { %1136 = vmatpush1.bf16.msra.mxu1 %v4891_v38  ;;  %1155 = vmatprep.mubr.bf16.mxu1 %v6558_v17  ;;  %v4932_v17 = vcombine.high %v289_v51, %v293_v52  ;;  %v4870_v38 = vcombine.high %v226_v29, %v230_v30  ;;  %v5688_v51 = vld [vmem:[#allocation8 + $0x68] sm:$0xff]   ;;  %v4885_v52 = vcombine.low %v242_v43, %v246_v44 }
 0x121   :  { %1137 = vmatprep.subr.bf16.mxu1 %v4900_v41  ;;  %v5686_v41 = vld [vmem:[#allocation8 + $0x60] sm:$0xff]  }
 0x122   :  { %5286 = vmatprep.subr.bf16.mxu0 %v5686_v41 }
 0x124   :  { %1138 = vmatpush1.bf16.msra.mxu1 %v4899_v42  ;;  %v4869_v42 = vcombine.low %v226_v29, %v230_v30  ;;  %v314_v29 = vld [vmem:[#allocation5 + $0x390] sm:$0xff] }
 0x125   :  { %1139 = vmatprep.subr.bf16.mxu1 %v4908_v45  ;;  %v5687_v45 = vld [vmem:[#allocation8 + $0x20] sm:$0xff]   ;;  %v318_v30 = vld [vmem:[#allocation5 + $0x3b0] sm:$0xff] }
 0x126   :  { %5287 = vmatpush3.bf16.msra.mxu0 %v5687_v45  ;;  %v4847_v45 = vcombine.low %v203_v39, %v207_v40 }
 0x127   :  { %5288 = vmatprep.subr.bf16.mxu0 %v5688_v51  ;;  %v227_v51 = vld [vmem:[#allocation5 + $0xd8] sm:$0xff] }
 0x128   :  { %1140 = vmatpush1.bf16.msra.mxu1 %v4907_v46  ;;  %v4878_v46 = vcombine.high %v234_v35, %v238_v36  ;;  %v326_v35 = vld [vmem:[#allocation5 + $0x3f0] sm:$0xff]  ;;  %v4957_v36 = vcombine.low %v314_v29, %v318_v30 }
 0x129   :  { %1141 = vmatprep.subr.bf16.mxu1 %v4916_v49  ;;  %v254_v49 = vld [vmem:[#allocation5 + $0x1b0] sm:$0xff] }
 0x12a   :  { %v4894_v56 = vcombine.high %v250_v48, %v254_v49  ;;  %5289 = vmatpush3.bf16.msra.mxu0 %v5689_v55  ;;  %v235_v55 = vld [vmem:[#allocation5 + $0x118] sm:$0xff] }
 0x12c   :  { %1142 = vmatpush1.bf16.msra.mxu1 %v4915_v50  ;;  %v4886_v50 = vcombine.high %v242_v43, %v246_v44  ;;  %v211_v43 = vld [vmem:[#allocation5 + $0x58] sm:$0xff] }
 0x12d   :  { %1143 = vmatprep.subr.bf16.mxu1 %v4924_v53  ;;  %v258_v53 = vld [vmem:[#allocation5 + $0x1d0] sm:$0xff]  ;;  %v215_v44 = vld [vmem:[#allocation5 + $0x78] sm:$0xff] }
 0x130   :  { %1144 = vmatpush1.bf16.msra.mxu1 %v4923_v54  ;;  %v262_v54 = vld [vmem:[#allocation5 + $0x1f0] sm:$0xff] }
 0x131   :  { %1145 = vmatprep.subr.bf16.mxu1 %v4932_v17  ;;  %v5690_v17 = vld [vmem:[#allocation8 + $0x70] sm:$0xff]   ;;  %v4901_v63 = vcombine.low %v258_v53, %v262_v54 }
 0x132   :  { %5290 = vmatprep.subr.bf16.mxu0 %v5690_v17 }
 0x134   :  { %1146 = vmatpush1.bf16.msra.mxu1 %v4931_v57  ;;  %v4893_v57 = vcombine.low %v250_v48, %v254_v49  ;;  %v223_v48 = vld [vmem:[#allocation5 + $0xb8] sm:$0xff]  ;;  %v4855_v49 = vcombine.low %v211_v43, %v215_v44 }
 0x135   :  { %1147 = vmatprep.subr.bf16.mxu1 %v4940_v60  ;;  %v5691_v60 = vld [vmem:[#allocation8 + $0x30] sm:$0xff]  }
 0x136   :  { %5291 = vmatpush3.bf16.msra.mxu0 %v5691_v60  ;;  %v251_v60 = vld [vmem:[#allocation5 + $0x198] sm:$0xff] }
 0x137   :  { %5292 = vmatprep.subr.bf16.mxu0 %v5692_v62 }
 0x138   :  { %1148 = vmatpush1.bf16.msra.mxu1 %v4939_v61  ;;  %v4902_v61 = vcombine.high %v258_v53, %v262_v54 }
 0x139   :  { %1149 = vmatprep.subr.bf16.mxu1 %v4948_v0  ;;  %v274_v0 = vld [vmem:[#allocation5 + $0x250] sm:$0xff] }
 0x13a   :  { %5293 = vmatpush3.bf16.msra.mxu0 %v5693_v3  ;;  %v267_v3 = vld [vmem:[#allocation5 + $0x218] sm:$0xff] }
 0x13c   :  { %1150 = vmatpush1.bf16.msra.mxu1 %v4947_v1  ;;  %v278_v1 = vld [vmem:[#allocation5 + $0x270] sm:$0xff] }
 0x13d   :  { %1151 = vmatprep.subr.bf16.mxu1 %v4956_v4  ;;  %v4910_v4 = vcombine.high %v266_v58, %v270_v59  ;;  %v4918_v7 = vcombine.high %v274_v0, %v278_v1 }
 0x140   :  { %1152 = vmatpush1.bf16.msra.mxu1 %v4955_v6  ;;  %v4909_v6 = vcombine.low %v266_v58, %v270_v59 }
 0x141   :  { %1153 = vmatprep.subr.bf16.mxu1 %v4964_v9  ;;  %v286_v9 = vld [vmem:[#allocation5 + $0x2b0] sm:$0xff] }
 0x142   :  { %v4926_v12 = vcombine.high %v282_v8, %v286_v9  ;;  %v4925_v15 = vcombine.low %v282_v8, %v286_v9 }
 0x144   :  { %1154 = vmatpush1.bf16.msra.mxu1 %v4963_v11  ;;  %v4917_v11 = vcombine.low %v274_v0, %v278_v1 }
 0x145   :  { %1196 = vmatprep.subr.bf16.mxu1 %v4846_v14  ;;  %v294_v14 = vld [vmem:[#allocation5 + $0x2f0] sm:$0xff] }
 0x146   :  { %v4933_v22 = vcombine.low %v290_v13, %v294_v14 }
 0x147   :  { %1156 = vmatmul.mubr.bf16.vlgmr.msra.gmra.mrb[16].mxu1 %v6561_v5 }
 0x148   :  { %1197 = vmatpush1.bf16.msra.mxu1 %v4845_v18  ;;  %1165 = vmatprep.mubr.bf16.mxu1 %v6563_v10  ;;  %v4934_v18 = vcombine.high %v290_v13, %v294_v14 }
 0x149   :  { %1198 = vmatprep.subr.bf16.mxu1 %v4854_v23  ;;  %v4942_v23 = vcombine.high %v298_v19, %v302_v20  ;;  %v299_v19 = vld [vmem:[#allocation5 + $0x318] sm:$0xff] }
 0x14a   :  { %v303_v20 = vld [vmem:[#allocation5 + $0x338] sm:$0xff] }
 0x14c   :  { %1199 = vmatpush1.bf16.msra.mxu1 %v4853_v28  ;;  %v4950_v28 = vcombine.high %v306_v24, %v310_v25  ;;  %v307_v24 = vld [vmem:[#allocation5 + $0x358] sm:$0xff] }
 0x14d   :  { %1200 = vmatprep.subr.bf16.mxu1 %v4862_v33  ;;  %v4958_v33 = vcombine.high %v314_v29, %v318_v30  ;;  %v311_v25 = vld [vmem:[#allocation5 + $0x378] sm:$0xff] }
 0x14e   :  { %v315_v29 = vld [vmem:[#allocation5 + $0x398] sm:$0xff] }
 0x14f   :  { %1166 = vmatmul.mubr.bf16.gmra.mrb[20].mxu1 %v6567_v16  ;;  %v319_v30 = vld [vmem:[#allocation5 + $0x3b8] sm:$0xff] }
 0x150   :  { %1201 = vmatpush1.bf16.msra.mxu1 %v4861_v34  ;;  %1175 = vmatprep.mubr.bf16.mxu1 %v6569_v21  ;;  %v322_v34 = vld [vmem:[#allocation5 + $0x3d0] sm:$0xff] }
 0x151   :  { %1202 = vmatprep.subr.bf16.mxu1 %v4870_v38  ;;  %v4966_v38 = vcombine.high %v322_v34, %v326_v35  ;;  %v4965_v41 = vcombine.low %v322_v34, %v326_v35  ;;  %v323_v34 = vld [vmem:[#allocation5 + $0x3d8] sm:$0xff] }
 0x152   :  { %v327_v35 = vld [vmem:[#allocation5 + $0x3f8] sm:$0xff] }
 0x154   :  { %1203 = vmatpush1.bf16.msra.mxu1 %v4869_v42  ;;  %v4848_v42 = vcombine.high %v203_v39, %v207_v40  ;;  %v5710_v39 = vld [vmem:[#allocation8 + $0x140] sm:$0xff]   ;;  %v4967_v40 = vcombine.low %v323_v34, %v327_v35 }
 0x155   :  { %1204 = vmatprep.subr.bf16.mxu1 %v4878_v46  ;;  %v4856_v46 = vcombine.high %v211_v43, %v215_v44  ;;  %5358 = vmatprep.subr.bf16.mxu0 %v5710_v39  ;;  %v5696_v43 = vld [vmem:[#allocation8 + $0xc8] sm:$0xff]   ;;  %v6031_v44 = vld [vmem:[#allocation2] ss:$8 sps:$4 sm:$0xff]  }
 0x157   :  { %1176 = vmatmul.mubr.bf16.gmra.mrb[24].mxu1 %v6573_v27 }
 0x158   :  { %1205 = vmatpush1.bf16.msra.mxu1 %v4877_v47  ;;  %1185 = vmatprep.mubr.bf16.mxu1 %v6575_v31  ;;  %v219_v47 = vld [vmem:[#allocation5 + $0x98] sm:$0xff] }
 0x159   :  { %1206 = vmatprep.subr.bf16.mxu1 %v4886_v50  ;;  %v4864_v50 = vcombine.high %v219_v47, %v223_v48  ;;  %v4863_v53 = vcombine.low %v219_v47, %v223_v48  ;;  %v5698_v47 = vld [vmem:[#allocation8 + $0xd0] sm:$0xff]   ;;  %v330_v48 = vlaneseq }
 0x15c   :  { %1207 = vmatpush1.bf16.msra.mxu1 %v4885_v52  ;;  %v231_v52 = vld [vmem:[#allocation5 + $0xf8] sm:$0xff] }
 0x15d   :  { %1208 = vmatprep.subr.bf16.mxu1 %v4894_v56  ;;  %v4872_v54 = vcombine.high %v227_v51, %v231_v52  ;;  %v239_v56 = vld [vmem:[#allocation5 + $0x138] sm:$0xff]  ;;  %v4871_v17 = vcombine.low %v227_v51, %v231_v52  ;;  %v6601_v52 = vshrl.u32 %v330_v48, 7 }
 0x15e   :  { %v4879_v58 = vcombine.low %v235_v55, %v239_v56  ;;  %v6033_v51 = vld [vmem:[#allocation2 + $0x10] ss:$8 sps:$4 sm:$0xff]  }
 0x15f   :  { %1186 = vmatmul.mubr.bf16.gmra.mrb[28].mxu1 %v6579_v37 }
 0x160   :  { %1209 = vmatpush1.bf16.msra.mxu1 %v4893_v57  ;;  %1228 = vmatprep.mubr.bf16.mxu1 %v6590_v2  ;;  %v243_v57 = vld [vmem:[#allocation5 + $0x158] sm:$0xff] }
 0x161   :  { %1210 = vmatprep.subr.bf16.mxu1 %v4902_v61  ;;  %v255_v61 = vld [vmem:[#allocation5 + $0x1b8] sm:$0xff] }
 0x162   :  { %v4895_v0 = vcombine.low %v251_v60, %v255_v61 }
 0x164   :  { %1211 = vmatpush1.bf16.msra.mxu1 %v4901_v63  ;;  %v259_v63 = vld [vmem:[#allocation5 + $0x1d8] sm:$0xff] }
 0x165   :  { %1212 = vmatprep.subr.bf16.mxu1 %v4910_v4  ;;  %v271_v4 = vld [vmem:[#allocation5 + $0x238] sm:$0xff] }
 0x166   :  { %v4911_v8 = vcombine.low %v267_v3, %v271_v4 }
 0x168   :  { %1213 = vmatpush1.bf16.msra.mxu1 %v4909_v6 }
 0x169   :  { %1214 = vmatprep.subr.bf16.mxu1 %v4918_v7  ;;  %v275_v7 = vld [vmem:[#allocation5 + $0x258] sm:$0xff] }
 0x16c   :  { %1215 = vmatpush1.bf16.msra.mxu1 %v4917_v11  ;;  %v283_v11 = vld [vmem:[#allocation5 + $0x298] sm:$0xff] }
 0x16d   :  { %1216 = vmatprep.subr.bf16.mxu1 %v4926_v12  ;;  %v287_v12 = vld [vmem:[#allocation5 + $0x2b8] sm:$0xff] }
 0x16e   :  { %v4928_v14 = vcombine.high %v283_v11, %v287_v12 }
 0x170   :  { %1217 = vmatpush1.bf16.msra.mxu1 %v4925_v15  ;;  %v291_v15 = vld [vmem:[#allocation5 + $0x2d8] sm:$0xff] }
 0x171   :  { %1218 = vmatprep.subr.bf16.mxu1 %v4934_v18  ;;  %v4927_v18 = vcombine.low %v283_v11, %v287_v12  ;;  %v6037_v11 = vld [vmem:[#allocation2 + $0x30] ss:$8 sps:$4 sm:$0xff]  }
 0x174   :  { %1219 = vmatpush1.bf16.msra.mxu1 %v4933_v22 }
 0x175   :  { %1220 = vmatprep.subr.bf16.mxu1 %v4942_v23  ;;  %v4944_v23 = vcombine.high %v299_v19, %v303_v20 }
 0x178   :  { %1221 = vmatpush1.bf16.msra.mxu1 %v4941_v26  ;;  %v4943_v26 = vcombine.low %v299_v19, %v303_v20 }
 0x179   :  { %1222 = vmatprep.subr.bf16.mxu1 %v4950_v28  ;;  %v4952_v28 = vcombine.high %v307_v24, %v311_v25 }
 0x17c   :  { %1223 = vmatpush1.bf16.msra.mxu1 %v4949_v32  ;;  %v4951_v32 = vcombine.low %v307_v24, %v311_v25 }
 0x17d   :  { %1224 = vmatprep.subr.bf16.mxu1 %v4958_v33  ;;  %v4960_v33 = vcombine.high %v315_v29, %v319_v30 }
 0x180   :  { %1225 = vmatpush1.bf16.msra.mxu1 %v4957_v36  ;;  %v4959_v36 = vcombine.low %v315_v29, %v319_v30 }
 0x181   :  { %1226 = vmatprep.subr.bf16.mxu1 %v4966_v38  ;;  %v4968_v38 = vcombine.high %v323_v34, %v327_v35  ;;  %v5714_v34 = vld [vmem:[#allocation8 + $0x150] sm:$0xff]  }
 0x184   :  { %1227 = vmatpush1.bf16.msra.mxu1 %v4965_v41  ;;  %v5694_v41 = vld [vmem:[#allocation8 + $0xc0] sm:$0xff]  }
 0x185   :  { %1269 = vmatprep.subr.bf16.mxu1 %v4848_v42  ;;  %v5695_v42 = vld [vmem:[#allocation8 + $0x80] sm:$0xff]  }
 0x187   :  { %1229 = vmatmul.mubr.bf16.vlgmr.msra.gmra.mrb[32].mxu1 %v6561_v5  ;;  %v4880_v5 = vcombine.high %v235_v55, %v239_v56  ;;  %v5702_v55 = vld [vmem:[#allocation8 + $0xe0] sm:$0xff]   ;;  %v6604_v56 = vsub.s32 0, %v6601_v52 }
 0x188   :  { %1270 = vmatpush1.bf16.msra.mxu1 %v4847_v45  ;;  %1238 = vmatprep.mubr.bf16.mxu1 %v6563_v10  ;;  %v247_v10 = vld [vmem:[#allocation5 + $0x178] sm:$0xff] }
 0x189   :  { %1271 = vmatprep.subr.bf16.mxu1 %v4856_v46  ;;  %v4888_v59 = vcombine.high %v243_v57, %v247_v10  ;;  %v4887_v62 = vcombine.low %v243_v57, %v247_v10  ;;  %v6032_v45 = vld [vmem:[#allocation2 + $0x14] ss:$8 sps:$4 sm:$0xff]   ;;  %v5703_v57 = vld [vmem:[#allocation8 + $0xa0] sm:$0xff]  }
 0x18a   :  { %v5697_v46 = vld [vmem:[#allocation8 + $0x88] sm:$0xff]  }
 0x18b   :  { %v5704_v10 = vld [vmem:[#allocation8 + $0xe8] sm:$0xff]  }
 0x18c   :  { %1272 = vmatpush1.bf16.msra.mxu1 %v4855_v49  ;;  %v5699_v49 = vld [vmem:[#allocation8 + $0x90] sm:$0xff]  }
 0x18d   :  { %1273 = vmatprep.subr.bf16.mxu1 %v4864_v50  ;;  %v5700_v50 = vld [vmem:[#allocation8 + $0xd8] sm:$0xff]  }
 0x18f   :  { %1239 = vmatmul.mubr.bf16.gmra.mrb[36].mxu1 %v6567_v16  ;;  %v4896_v16 = vcombine.high %v251_v60, %v255_v61  ;;  %v6036_v61 = vld [vmem:[#allocation2 + $0x34] ss:$8 sps:$4 sm:$0xff]  }
 0x190   :  { %1274 = vmatpush1.bf16.msra.mxu1 %v4863_v53  ;;  %1248 = vmatprep.mubr.bf16.mxu1 %v6569_v21  ;;  %v263_v21 = vld [vmem:[#allocation5 + $0x1f8] sm:$0xff]  ;;  %v6034_v53 = vld [vmem:[#allocation2 + $0x24] ss:$8 sps:$4 sm:$0xff]  }
 0x191   :  { %1275 = vmatprep.subr.bf16.mxu1 %v4872_v54  ;;  %v4904_v1 = vcombine.high %v259_v63, %v263_v21  ;;  %v4903_v6 = vcombine.low %v259_v63, %v263_v21  ;;  %v5701_v54 = vld [vmem:[#allocation8 + $0x98] sm:$0xff]  }
 0x194   :  { %1276 = vmatpush1.bf16.msra.mxu1 %v4871_v17  ;;  %v6606_v17 = vld [vmem:[#allocation7] sm:$0xff] }
 0x195   :  { %1277 = vmatprep.subr.bf16.mxu1 %v4880_v5  ;;  %v6609_v5 = vsub.s32 1, %v6601_v52 }
 0x197   :  { %1249 = vmatmul.mubr.bf16.gmra.mrb[40].mxu1 %v6573_v27  ;;  %v4912_v27 = vcombine.high %v267_v3, %v271_v4  ;;  %v6617_v60 = vrot.slane %v6606_v17, %v6609_v5  ;;  %v5707_v4 = vld [vmem:[#allocation8 + $0xb0] sm:$0xff]  }
 0x198   :  { %1278 = vmatpush1.bf16.msra.mxu1 %v4879_v58  ;;  %1258 = vmatprep.mubr.bf16.mxu1 %v6575_v31  ;;  %v279_v31 = vld [vmem:[#allocation5 + $0x278] sm:$0xff]  ;;  %v6035_v58 = vld [vmem:[#allocation2 + $0x20] ss:$8 sps:$4 sm:$0xff]  }
 0x199   :  { %1279 = vmatprep.subr.bf16.mxu1 %v4888_v59  ;;  %v4920_v9 = vcombine.high %v275_v7, %v279_v31  ;;  %v4919_v13 = vcombine.low %v275_v7, %v279_v31  ;;  %v6613_v59 = vrot.slane %v6606_v17, %v6604_v56  ;;  %v5708_v31 = vld [vmem:[#allocation8 + $0xf8] sm:$0xff]  }
 0x19c   :  { %1280 = vmatpush1.bf16.msra.mxu1 %v4887_v62  ;;  %v5705_v62 = vld [vmem:[#allocation8 + $0xa8] sm:$0xff]  }
 0x19d   :  { %1281 = vmatprep.subr.bf16.mxu1 %v4896_v16  ;;  %v5706_v16 = vld [vmem:[#allocation8 + $0xf0] sm:$0xff]  }
 0x19f   :  { %1259 = vmatmul.mubr.bf16.gmra.mrb[44].mxu1 %v6579_v37  ;;  %v295_v37 = vld [vmem:[#allocation5 + $0x2f8] sm:$0xff] }
 0x1a0   :  { %1282 = vmatpush1.bf16.msra.mxu1 %v4895_v0  ;;  %1301 = vmatprep.mubr.bf16.mxu1 %v6590_v2  ;;  %v4936_v2 = vcombine.high %v291_v15, %v295_v37  ;;  %v4935_v22 = vcombine.low %v291_v15, %v295_v37 }
 0x1a1   :  { %1283 = vmatprep.subr.bf16.mxu1 %v4904_v1 }
 0x1a4   :  { %1284 = vmatpush1.bf16.msra.mxu1 %v4903_v6 }
 0x1a5   :  { %1285 = vmatprep.subr.bf16.mxu1 %v4912_v27 }
 0x1a8   :  { %1286 = vmatpush1.bf16.msra.mxu1 %v4911_v8 }
 0x1a9   :  { %1287 = vmatprep.subr.bf16.mxu1 %v4920_v9 }
 0x1ac   :  { %1288 = vmatpush1.bf16.msra.mxu1 %v4919_v13 }
 0x1ad   :  { %1289 = vmatprep.subr.bf16.mxu1 %v4928_v14  ;;  %v5709_v14 = vld [vmem:[#allocation8 + $0xb8] sm:$0xff]  }
 0x1b0   :  { %1290 = vmatpush1.bf16.msra.mxu1 %v4927_v18 }
 0x1b1   :  { %1291 = vmatprep.subr.bf16.mxu1 %v4936_v2  ;;  %v5711_v2 = vld [vmem:[#allocation8 + $0x100] sm:$0xff]  }
 0x1b4   :  { %1292 = vmatpush1.bf16.msra.mxu1 %v4935_v22  ;;  %v5712_v22 = vld [vmem:[#allocation8 + $0x148] sm:$0xff]  }
 0x1b5   :  { %1293 = vmatprep.subr.bf16.mxu1 %v4944_v23 }
 0x1b8   :  { %1294 = vmatpush1.bf16.msra.mxu1 %v4943_v26 }
 0x1b9   :  { %1295 = vmatprep.subr.bf16.mxu1 %v4952_v28 }
 0x1bc   :  { %1296 = vmatpush1.bf16.msra.mxu1 %v4951_v32  ;;  %v5713_v32 = vld [vmem:[#allocation8 + $0x108] sm:$0xff]  }
 0x1bd   :  { %1297 = vmatprep.subr.bf16.mxu1 %v4960_v33 }
 0x1c0   :  { %1298 = vmatpush1.bf16.msra.mxu1 %v4959_v36 }
 0x1c1   :  { %1299 = vmatprep.subr.bf16.mxu1 %v4968_v38 }
 0x1c4   :  { %1300 = vmatpush1.bf16.msra.mxu1 %v4967_v40  ;;  %v5715_v40 = vld [vmem:[#allocation8 + $0x110] sm:$0xff]  }
 0x1c5   :  { %5318 = vmatprep.subr.bf16.mxu1 %v5694_v41 }
 0x1c7   :  { %1302 = vmatmul.mubr.bf16.vlgmr.msra.gmra.mrb[48].mxu1 %v6031_v44 }
 0x1c8   :  { %1311 = vmatprep.mubr.bf16.mxu1 %v6032_v45  ;;  %5319 = vmatpush3.bf16.msra.mxu1 %v5695_v42 }
 0x1c9   :  { %5320 = vmatprep.subr.bf16.mxu1 %v5696_v43  ;;  %v5716_v43 = vld [vmem:[#allocation8 + $0x158] sm:$0xff]  }
 0x1cc   :  { %5321 = vmatpush3.bf16.msra.mxu1 %v5697_v46 }
 0x1cd   :  { %5322 = vmatprep.subr.bf16.mxu1 %v5698_v47 }
 0x1cf   :  { %1312 = vmatmul.mubr.bf16.gmra.mrb[52].mxu1 %v6033_v51  ;;  %v5717_v51 = vld [vmem:[#allocation8 + $0x118] sm:$0xff]  }
 0x1d0   :  { %1321 = vmatprep.mubr.bf16.mxu1 %v6034_v53  ;;  %5323 = vmatpush3.bf16.msra.mxu1 %v5699_v49 }
 0x1d1   :  { %5324 = vmatprep.subr.bf16.mxu1 %v5700_v50 }
 0x1d4   :  { %5325 = vmatpush3.bf16.msra.mxu1 %v5701_v54  ;;  %v5718_v54 = vld [vmem:[#allocation8 + $0x160] sm:$0xff]  }
 0x1d5   :  { %5326 = vmatprep.subr.bf16.mxu1 %v5702_v55 }
 0x1d7   :  { %1322 = vmatmul.mubr.bf16.gmra.mrb[56].mxu1 %v6035_v58 }
 0x1d8   :  { %1331 = vmatprep.mubr.bf16.mxu1 %v6036_v61  ;;  %5327 = vmatpush3.bf16.msra.mxu1 %v5703_v57  ;;  %v5719_v61 = vld [vmem:[#allocation8 + $0x120] sm:$0xff]  }
 0x1d9   :  { %5328 = vmatprep.subr.bf16.mxu1 %v5704_v10 }
 0x1da   :  { %v1084_v63 = vpop.f32.mrb[0].mxu1 }
 0x1db   :  { %v1085_v21 = vadd.f32 %v1084_v63, %v6613_v59  ;;  %v1086_v0 = vpop.f32.mrb[1].mxu1  ;;  %v5720_v63 = vld [vmem:[#allocation8 + $0x168] sm:$0xff]  }
 0x1dc   :  { %v1087_v1 = vadd.f32 %v1086_v0, %v6617_v60  ;;  %v1088_v3 = vpop.f32.mrb[2].mxu1  ;;  %5329 = vmatpush3.bf16.msra.mxu1 %v5705_v62 }
 0x1dd   :  { %v1342_v6 = vmax.f32 %v1085_v21, 0.0  ;;  %v1089_v27 = vadd.f32 %v1088_v3, %v6613_v59  ;;  %v1090_v7 = vpop.f32.mrb[3].mxu1  ;;  %5330 = vmatprep.subr.bf16.mxu1 %v5706_v16 }
 0x1de   :  { %v1091_v8 = vadd.f32 %v1090_v7, %v6617_v60  ;;  %v1343_v12 = vmax.f32 %v1087_v1, 0.0  ;;  %v5721_v7 = vld [vmem:[#allocation8 + $0x128] sm:$0xff]  }
 0x1df   :  { %v1350_v9 = vmax.f32 %v1089_v27, 0.0  ;;  %1332 = vmatmul.mubr.bf16.gmra.mrb[60].mxu1 %v6037_v11 }
 0x1e0   :  { %v1351_v13 = vmax.f32 %v1091_v8, 0.0  ;;  %5331 = vmatpush3.bf16.msra.mxu1 %v5707_v4  ;;  %v5722_v8 = vld [vmem:[#allocation8 + $0x170] sm:$0xff]  }
 0x1e1   :  { %v1406_v15 = vpack.c.bf16 %v1350_v9, %v1342_v6  ;;  %5332 = vmatprep.subr.bf16.mxu1 %v5708_v31 }
 0x1e2   :  { %v1407_v37 = vpack.c.bf16 %v1351_v13, %v1343_v12  ;;  %v1094_v18 = vpop.f32.mrb[4].mxu1  ;;  %v5723_v13 = vld [vmem:[#allocation8 + $0x130] sm:$0xff]  }
 0x1e3   :  { %v1095_v19 = vadd.f32 %v1094_v18, %v6613_v59  ;;  %v1096_v20 = vpop.f32.mrb[5].mxu1 }
 0x1e4   :  { %1989 = vmatprep.mubr.bf16.mxu0 %v1407_v37  ;;  %v1097_v23 = vadd.f32 %v1096_v20, %v6617_v60  ;;  %v1098_v24 = vpop.f32.mrb[6].mxu1  ;;  %5333 = vmatpush3.bf16.msra.mxu1 %v5709_v14  ;;  %v5724_v14 = vld [vmem:[#allocation8 + $0x178] sm:$0xff]   ;;  %v344_v37 = vsub.s32 3, %v6601_v52 }
 0x1e5   :  { %1990 = vmatmul.mubr.bf16.vlgmr.msra.gmra.mrb[0].mxu0 %v1406_v15  ;;  %v1358_v25 = vmax.f32 %v1095_v19, 0.0  ;;  %v1099_v26 = vadd.f32 %v1098_v24, %v6613_v59  ;;  %v1100_v28 = vpop.f32.mrb[7].mxu1  ;;  %v5725_v15 = vld [vmem:[#allocation8 + $0x138] sm:$0xff]  }
 0x1e6   :  { %v1359_v29 = vmax.f32 %v1097_v23, 0.0  ;;  %v1101_v30 = vadd.f32 %v1100_v28, %v6617_v60  ;;  %5359 = vmatpush3.bf16.msra.mxu0 %v5711_v2  ;;  %v6645_v2 = vrot.slane %v6606_v17, %v344_v37 }
 0x1e7   :  { %v1366_v33 = vmax.f32 %v1099_v26, 0.0  ;;  %5360 = vmatprep.subr.bf16.mxu0 %v5712_v22 }
 0x1e8   :  { %v1367_v35 = vmax.f32 %v1101_v30, 0.0 }
 0x1e9   :  { %v1414_v36 = vpack.c.bf16 %v1366_v33, %v1358_v25 }
 0x1ea   :  { %v1415_v38 = vpack.c.bf16 %v1367_v35, %v1359_v29  ;;  %v1104_v39 = vpop.f32.mrb[8].mxu1  ;;  %5361 = vmatpush3.bf16.msra.mxu0 %v5713_v32 }
 0x1eb   :  { %v1105_v41 = vadd.f32 %v1104_v39, %v6613_v59  ;;  %v1106_v42 = vpop.f32.mrb[9].mxu1  ;;  %5362 = vmatprep.subr.bf16.mxu0 %v5714_v34 }
 0x1ec   :  { %v1107_v44 = vadd.f32 %v1106_v42, %v6617_v60  ;;  %v1108_v45 = vpop.f32.mrb[10].mxu1  ;;  %1997 = vmatprep.mubr.bf16.mxu0 %v1415_v38  ;;  %v5727_v38 = vld [vmem:[#allocation8 + $0x180] sm:$0xff]  }
 0x1ed   :  { %v1374_v46 = vmax.f32 %v1105_v41, 0.0  ;;  %v1109_v47 = vadd.f32 %v1108_v45, %v6613_v59  ;;  %v1110_v48 = vpop.f32.mrb[11].mxu1  ;;  %1998 = vmatmul.mubr.bf16.gmra.mrb[4].mxu0 %v1414_v36  ;;  %v5728_v41 = vld [vmem:[#allocation8 + $0x1c8] sm:$0xff]  }
 0x1ee   :  { %v1375_v49 = vmax.f32 %v1107_v44, 0.0  ;;  %v1111_v50 = vadd.f32 %v1110_v48, %v6617_v60  ;;  %5363 = vmatpush3.bf16.msra.mxu0 %v5715_v40 }
 0x1ef   :  { %v1382_v53 = vmax.f32 %v1109_v47, 0.0  ;;  %5364 = vmatprep.subr.bf16.mxu0 %v5716_v43 }
 0x1f0   :  { %v1383_v55 = vmax.f32 %v1111_v50, 0.0 }
 0x1f1   :  { %v1422_v57 = vpack.c.bf16 %v1382_v53, %v1374_v46 }
 0x1f2   :  { %v1423_v10 = vpack.c.bf16 %v1383_v55, %v1375_v49  ;;  %v1114_v58 = vpop.f32.mrb[12].mxu1  ;;  %5365 = vmatpush3.bf16.msra.mxu0 %v5717_v51  ;;  %v5729_v49 = vld [vmem:[#allocation8 + $0x188] sm:$0xff]   ;;  %v5730_v51 = vld [vmem:[#allocation8 + $0x1d0] sm:$0xff]  }
 0x1f3   :  { %v1115_v62 = vadd.f32 %v1114_v58, %v6613_v59  ;;  %v1116_v16 = vpop.f32.mrb[13].mxu1  ;;  %5366 = vmatprep.subr.bf16.mxu0 %v5718_v54 }
 0x1f4   :  { %v1117_v21 = vadd.f32 %v1116_v16, %v6617_v60  ;;  %v1118_v0 = vpop.f32.mrb[14].mxu1  ;;  %2005 = vmatprep.mubr.bf16.mxu0 %v1423_v10  ;;  %v5731_v10 = vld [vmem:[#allocation8 + $0x190] sm:$0xff]  }
 0x1f5   :  { %v1390_v1 = vmax.f32 %v1115_v62, 0.0  ;;  %v1119_v3 = vadd.f32 %v1118_v0, %v6613_v59  ;;  %v1120_v4 = vpop.f32.mrb[15].mxu1  ;;  %2006 = vmatmul.mubr.bf16.gmra.mrb[8].mxu0 %v1422_v57  ;;  %v5726_v59 = vld [vmem:[#allocation8 + $0x1c0] sm:$0xff]   ;;  %v5732_v62 = vld [vmem:[#allocation8 + $0x1d8] sm:$0xff]  }
 0x1f6   :  { %v1391_v6 = vmax.f32 %v1117_v21, 0.0  ;;  %v1121_v27 = vadd.f32 %v1120_v4, %v6617_v60  ;;  %5367 = vmatpush3.bf16.msra.mxu0 %v5719_v61  ;;  %5398 = vmatprep.subr.bf16.mxu1 %v5726_v59  ;;  %v340_v60 = vsub.s32 2, %v6601_v52  ;;  %v5736_v59 = vld [vmem:[#allocation8 + $0x1e8] sm:$0xff]  }
 0x1f7   :  { %v1398_v31 = vmax.f32 %v1119_v3, 0.0  ;;  %5368 = vmatprep.subr.bf16.mxu0 %v5720_v63 }
 0x1f8   :  { %v1399_v9 = vmax.f32 %v1121_v27, 0.0  ;;  %v6640_v18 = vrot.slane %v6606_v17, %v340_v60 }
 0x1f9   :  { %v1430_v11 = vpack.c.bf16 %v1398_v31, %v1390_v1 }
 0x1fa   :  { %v1431_v12 = vpack.c.bf16 %v1399_v9, %v1391_v6  ;;  %5369 = vmatpush3.bf16.msra.mxu0 %v5721_v7  ;;  %v5733_v6 = vld [vmem:[#allocation8 + $0x198] sm:$0xff]   ;;  %v5734_v7 = vld [vmem:[#allocation8 + $0x1e0] sm:$0xff]  }
 0x1fb   :  { %5370 = vmatprep.subr.bf16.mxu0 %v5722_v8 }
 0x1fc   :  { %2013 = vmatprep.mubr.bf16.mxu0 %v1431_v12  ;;  %v5735_v12 = vld [vmem:[#allocation8 + $0x1a0] sm:$0xff]  }
 0x1fd   :  { %2014 = vmatmul.mubr.bf16.gmra.mrb[12].mxu0 %v1430_v11 }
 0x1fe   :  { %5371 = vmatpush3.bf16.msra.mxu0 %v5723_v13 }
 0x1ff   :  { %5372 = vmatprep.subr.bf16.mxu0 %v5724_v14 }
 0x202   :  { %5373 = vmatpush3.bf16.msra.mxu0 %v5725_v15 }
 0x21a   :  { %v1157_v19 = vpop.f32.mrb[16].mxu1 }
 0x21b   :  { %v1158_v20 = vadd.f32 %v1157_v19, %v6640_v18  ;;  %v1159_v22 = vpop.f32.mrb[17].mxu1 }
 0x21c   :  { %v1160_v23 = vadd.f32 %v1159_v22, %v6645_v2  ;;  %v1161_v24 = vpop.f32.mrb[18].mxu1 }
 0x21d   :  { %v1344_v25 = vmax.f32 %v1158_v20, 0.0  ;;  %v1162_v26 = vadd.f32 %v1161_v24, %v6640_v18  ;;  %v1163_v28 = vpop.f32.mrb[19].mxu1 }
 0x21e   :  { %v1164_v29 = vadd.f32 %v1163_v28, %v6645_v2  ;;  %v1345_v32 = vmax.f32 %v1160_v23, 0.0 }
 0x21f   :  { %v1352_v30 = vmax.f32 %v1162_v26, 0.0  ;;  %v5737_v26 = vld [vmem:[#allocation8 + $0x1a8] sm:$0xff]  }
 0x220   :  { %v1353_v33 = vmax.f32 %v1164_v29, 0.0  ;;  %v5738_v29 = vld [vmem:[#allocation8 + $0x1f0] sm:$0xff]  }
 0x221   :  { %v1408_v34 = vpack.c.bf16 %v1352_v30, %v1344_v25 }
 0x222   :  { %v1409_v35 = vpack.c.bf16 %v1353_v33, %v1345_v32  ;;  %v1167_v36 = vpop.f32.mrb[20].mxu1 }
 0x223   :  { %v1168_v39 = vadd.f32 %v1167_v36, %v6640_v18  ;;  %v1169_v40 = vpop.f32.mrb[21].mxu1  ;;  %v352_v36 = vsub.s32 5, %v6601_v52 }
 0x224   :  { %v1170_v42 = vadd.f32 %v1169_v40, %v6645_v2  ;;  %v1171_v43 = vpop.f32.mrb[22].mxu1  ;;  %2054 = vmatprep.mubr.bf16.mxu1 %v1409_v35  ;;  %v5740_v35 = vld [vmem:[#allocation8 + $0x1f8] sm:$0xff]  }
 0x225   :  { %v1360_v44 = vmax.f32 %v1168_v39, 0.0  ;;  %v1172_v45 = vadd.f32 %v1171_v43, %v6640_v18  ;;  %v1173_v46 = vpop.f32.mrb[23].mxu1  ;;  %2055 = vmatmul.mubr.bf16.vlgmr.msra.gmra.mrb[64].mxu1 %v1408_v34  ;;  %v5739_v34 = vld [vmem:[#allocation8 + $0x1b0] sm:$0xff]   ;;  %v353_v39 = vrot.slane %v6606_v17, %v352_v36 }
 0x226   :  { %v1361_v47 = vmax.f32 %v1170_v42, 0.0  ;;  %v1174_v48 = vadd.f32 %v1173_v46, %v6645_v2  ;;  %5399 = vmatpush3.bf16.msra.mxu1 %v5727_v38 }
 0x227   :  { %v1368_v50 = vmax.f32 %v1172_v45, 0.0  ;;  %5400 = vmatprep.subr.bf16.mxu1 %v5728_v41 }
 0x228   :  { %v1369_v53 = vmax.f32 %v1174_v48, 0.0 }
 0x229   :  { %v1416_v54 = vpack.c.bf16 %v1368_v50, %v1360_v44 }
 0x22a   :  { %v1417_v55 = vpack.c.bf16 %v1369_v53, %v1361_v47  ;;  %v1177_v57 = vpop.f32.mrb[24].mxu1  ;;  %5401 = vmatpush3.bf16.msra.mxu1 %v5729_v49 }
 0x22b   :  { %v1178_v58 = vadd.f32 %v1177_v57, %v6640_v18  ;;  %v1179_v61 = vpop.f32.mrb[25].mxu1  ;;  %5402 = vmatprep.subr.bf16.mxu1 %v5730_v51 }
 0x22c   :  { %v1180_v16 = vadd.f32 %v1179_v61, %v6645_v2  ;;  %v1181_v63 = vpop.f32.mrb[26].mxu1  ;;  %2062 = vmatprep.mubr.bf16.mxu1 %v1417_v55 }
 0x22d   :  { %v1376_v21 = vmax.f32 %v1178_v58, 0.0  ;;  %v1182_v0 = vadd.f32 %v1181_v63, %v6640_v18  ;;  %v1183_v1 = vpop.f32.mrb[27].mxu1  ;;  %2063 = vmatmul.mubr.bf16.gmra.mrb[68].mxu1 %v1416_v54 }
 0x22e   :  { %v1377_v3 = vmax.f32 %v1180_v16, 0.0  ;;  %v1184_v4 = vadd.f32 %v1183_v1, %v6645_v2  ;;  %5403 = vmatpush3.bf16.msra.mxu1 %v5731_v10 }
 0x22f   :  { %v1384_v27 = vmax.f32 %v1182_v0, 0.0  ;;  %5404 = vmatprep.subr.bf16.mxu1 %v5732_v62 }
 0x230   :  { %v1385_v31 = vmax.f32 %v1184_v4, 0.0 }
 0x231   :  { %v1424_v8 = vpack.c.bf16 %v1384_v27, %v1376_v21 }
 0x232   :  { %v1425_v9 = vpack.c.bf16 %v1385_v31, %v1377_v3  ;;  %v1187_v11 = vpop.f32.mrb[28].mxu1  ;;  %5405 = vmatpush3.bf16.msra.mxu1 %v5733_v6 }
 0x233   :  { %v1188_v13 = vadd.f32 %v1187_v11, %v6640_v18  ;;  %v1189_v14 = vpop.f32.mrb[29].mxu1  ;;  %5406 = vmatprep.subr.bf16.mxu1 %v5734_v7 }
 0x234   :  { %v1190_v15 = vadd.f32 %v1189_v14, %v6645_v2  ;;  %v1191_v19 = vpop.f32.mrb[30].mxu1  ;;  %2070 = vmatprep.mubr.bf16.mxu1 %v1425_v9 }
 0x235   :  { %v1392_v20 = vmax.f32 %v1188_v13, 0.0  ;;  %v1192_v22 = vadd.f32 %v1191_v19, %v6640_v18  ;;  %v1193_v23 = vpop.f32.mrb[31].mxu1  ;;  %2071 = vmatmul.mubr.bf16.gmra.mrb[72].mxu1 %v1424_v8  ;;  %v5741_v18 = vld [vmem:[#allocation8 + $0x1b8] sm:$0xff]  }
 0x236   :  { %v1393_v24 = vmax.f32 %v1190_v15, 0.0  ;;  %v1194_v25 = vadd.f32 %v1193_v23, %v6645_v2  ;;  %5407 = vmatpush3.bf16.msra.mxu1 %v5735_v12  ;;  %v348_v2 = vsub.s32 4, %v6601_v52 }
 0x237   :  { %v1400_v28 = vmax.f32 %v1192_v22, 0.0  ;;  %5408 = vmatprep.subr.bf16.mxu1 %v5736_v59 }
 0x238   :  { %v1401_v30 = vmax.f32 %v1194_v25, 0.0  ;;  %v349_v38 = vrot.slane %v6606_v17, %v348_v2 }
 0x239   :  { %v1432_v32 = vpack.c.bf16 %v1400_v28, %v1392_v20 }
 0x23a   :  { %v1433_v33 = vpack.c.bf16 %v1401_v30, %v1393_v24  ;;  %5409 = vmatpush3.bf16.msra.mxu1 %v5737_v26 }
 0x23b   :  { %5410 = vmatprep.subr.bf16.mxu1 %v5738_v29 }
 0x23c   :  { %2078 = vmatprep.mubr.bf16.mxu1 %v1433_v33 }
 0x23d   :  { %2079 = vmatmul.mubr.bf16.gmra.mrb[76].mxu1 %v1432_v32 }
 0x23e   :  { %5411 = vmatpush3.bf16.msra.mxu1 %v5739_v34 }
 0x23f   :  { %5412 = vmatprep.subr.bf16.mxu1 %v5740_v35 }
 0x242   :  { %5413 = vmatpush3.bf16.msra.mxu1 %v5741_v18 }
 0x25a   :  { %v1230_v40 = vpop.f32.mrb[32].mxu1 }
 0x25b   :  { %v1231_v41 = vadd.f32 %v1230_v40, %v349_v38  ;;  %v1232_v42 = vpop.f32.mrb[33].mxu1 }
 0x25c   :  { %v1233_v43 = vadd.f32 %v1232_v42, %v353_v39  ;;  %v1234_v44 = vpop.f32.mrb[34].mxu1  ;;  %v356_v42 = vsub.s32 6, %v6601_v52 }
 0x25d   :  { %v1346_v45 = vmax.f32 %v1231_v41, 0.0  ;;  %v1235_v46 = vadd.f32 %v1234_v44, %v349_v38  ;;  %v1236_v47 = vpop.f32.mrb[35].mxu1 }
 0x25e   :  { %v1237_v48 = vadd.f32 %v1236_v47, %v353_v39  ;;  %v1347_v50 = vmax.f32 %v1233_v43, 0.0  ;;  %v360_v43 = vsub.s32 7, %v6601_v52  ;;  %v357_v44 = vrot.slane %v6606_v17, %v356_v42 }
 0x25f   :  { %v1354_v49 = vmax.f32 %v1235_v46, 0.0 }
 0x260   :  { %v1355_v51 = vmax.f32 %v1237_v48, 0.0 }
 0x261   :  { %v1410_v53 = vpack.c.bf16 %v1354_v49, %v1346_v45 }
 0x262   :  { %v1411_v54 = vpack.c.bf16 %v1355_v51, %v1347_v50  ;;  %v1240_v55 = vpop.f32.mrb[36].mxu1 }
 0x263   :  { %v1241_v57 = vadd.f32 %v1240_v55, %v349_v38  ;;  %v1242_v10 = vpop.f32.mrb[37].mxu1 }
 0x264   :  { %v1243_v58 = vadd.f32 %v1242_v10, %v353_v39  ;;  %v1244_v61 = vpop.f32.mrb[38].mxu1  ;;  %2119 = vmatprep.mubr.bf16.mxu0 %v1411_v54 }
 0x265   :  { %v1362_v62 = vmax.f32 %v1241_v57, 0.0  ;;  %v1245_v16 = vadd.f32 %v1244_v61, %v349_v38  ;;  %v1246_v63 = vpop.f32.mrb[39].mxu1  ;;  %2120 = vmatmul.mubr.bf16.vlgmr.msra.gmra.mrb[16].mxu0 %v1410_v53 }
 0x266   :  { %v1363_v21 = vmax.f32 %v1243_v58, 0.0  ;;  %v1247_v0 = vadd.f32 %v1246_v63, %v353_v39 }
 0x267   :  { %v1370_v1 = vmax.f32 %v1245_v16, 0.0 }
 0x268   :  { %v1371_v3 = vmax.f32 %v1247_v0, 0.0 }
 0x269   :  { %v1418_v4 = vpack.c.bf16 %v1370_v1, %v1362_v62 }
 0x26a   :  { %v1419_v6 = vpack.c.bf16 %v1371_v3, %v1363_v21  ;;  %v1250_v27 = vpop.f32.mrb[40].mxu1 }
 0x26b   :  { %v1251_v7 = vadd.f32 %v1250_v27, %v349_v38  ;;  %v1252_v31 = vpop.f32.mrb[41].mxu1 }
 0x26c   :  { %v1253_v8 = vadd.f32 %v1252_v31, %v353_v39  ;;  %v1254_v9 = vpop.f32.mrb[42].mxu1  ;;  %2127 = vmatprep.mubr.bf16.mxu0 %v1419_v6 }
 0x26d   :  { %v1378_v11 = vmax.f32 %v1251_v7, 0.0  ;;  %v1255_v12 = vadd.f32 %v1254_v9, %v349_v38  ;;  %v1256_v13 = vpop.f32.mrb[43].mxu1  ;;  %2128 = vmatmul.mubr.bf16.gmra.mrb[20].mxu0 %v1418_v4 }
 0x26e   :  { %v1379_v14 = vmax.f32 %v1253_v8, 0.0  ;;  %v1257_v59 = vadd.f32 %v1256_v13, %v353_v39 }
 0x26f   :  { %v1386_v15 = vmax.f32 %v1255_v12, 0.0 }
 0x270   :  { %v1387_v19 = vmax.f32 %v1257_v59, 0.0 }
 0x271   :  { %v1426_v20 = vpack.c.bf16 %v1386_v15, %v1378_v11 }
 0x272   :  { %v1427_v22 = vpack.c.bf16 %v1387_v19, %v1379_v14  ;;  %v1260_v23 = vpop.f32.mrb[44].mxu1 }
 0x273   :  { %v1261_v24 = vadd.f32 %v1260_v23, %v349_v38  ;;  %v1262_v25 = vpop.f32.mrb[45].mxu1 }
 0x274   :  { %v1263_v26 = vadd.f32 %v1262_v25, %v353_v39  ;;  %v1264_v28 = vpop.f32.mrb[46].mxu1  ;;  %2135 = vmatprep.mubr.bf16.mxu0 %v1427_v22 }
 0x275   :  { %v1394_v29 = vmax.f32 %v1261_v24, 0.0  ;;  %v1265_v30 = vadd.f32 %v1264_v28, %v349_v38  ;;  %v1266_v32 = vpop.f32.mrb[47].mxu1  ;;  %2136 = vmatmul.mubr.bf16.gmra.mrb[24].mxu0 %v1426_v20  ;;  %v361_v38 = vrot.slane %v6606_v17, %v360_v43 }
 0x276   :  { %v1395_v33 = vmax.f32 %v1263_v26, 0.0  ;;  %v1267_v34 = vadd.f32 %v1266_v32, %v353_v39 }
 0x277   :  { %v1402_v35 = vmax.f32 %v1265_v30, 0.0 }
 0x278   :  { %v1403_v18 = vmax.f32 %v1267_v34, 0.0 }
 0x279   :  { %v1434_v40 = vpack.c.bf16 %v1402_v35, %v1394_v29 }
 0x27a   :  { %v1435_v41 = vpack.c.bf16 %v1403_v18, %v1395_v33 }
 0x27c   :  { %2143 = vmatprep.mubr.bf16.mxu0 %v1435_v41 }
 0x27d   :  { %2144 = vmatmul.mubr.bf16.gmra.mrb[28].mxu0 %v1434_v40 }
 0x29a   :  { %v1303_v45 = vpop.f32.mrb[48].mxu1 }
 0x29b   :  { %v1304_v39 = vadd.f32 %v1303_v45, %v357_v44  ;;  %v1305_v46 = vpop.f32.mrb[49].mxu1 }
 0x29c   :  { %v1306_v47 = vadd.f32 %v1305_v46, %v361_v38  ;;  %v1307_v48 = vpop.f32.mrb[50].mxu1 }
 0x29d   :  { %v1308_v49 = vadd.f32 %v1307_v48, %v357_v44  ;;  %v1309_v50 = vpop.f32.mrb[51].mxu1  ;;  %v1348_v53 = vmax.f32 %v1304_v39, 0.0 }
 0x29e   :  { %v1310_v51 = vadd.f32 %v1309_v50, %v361_v38  ;;  %v1349_v55 = vmax.f32 %v1306_v47, 0.0 }
 0x29f   :  { %v1356_v54 = vmax.f32 %v1308_v49, 0.0 }
 0x2a0   :  { %v1357_v57 = vmax.f32 %v1310_v51, 0.0 }
 0x2a1   :  { %v1412_v10 = vpack.c.bf16 %v1356_v54, %v1348_v53 }
 0x2a2   :  { %v1413_v58 = vpack.c.bf16 %v1357_v57, %v1349_v55  ;;  %v1313_v61 = vpop.f32.mrb[52].mxu1 }
 0x2a3   :  { %v1314_v62 = vadd.f32 %v1313_v61, %v357_v44  ;;  %v1315_v16 = vpop.f32.mrb[53].mxu1 }
 0x2a4   :  { %v1316_v63 = vadd.f32 %v1315_v16, %v361_v38  ;;  %v1317_v21 = vpop.f32.mrb[54].mxu1  ;;  %2184 = vmatprep.mubr.bf16.mxu1 %v1413_v58 }
 0x2a5   :  { %v1318_v17 = vadd.f32 %v1317_v21, %v357_v44  ;;  %v1319_v0 = vpop.f32.mrb[55].mxu1  ;;  %2185 = vmatmul.mubr.bf16.vlgmr.msra.gmra.mrb[80].mxu1 %v1412_v10  ;;  %v1364_v3 = vmax.f32 %v1314_v62, 0.0 }
 0x2a6   :  { %v1320_v1 = vadd.f32 %v1319_v0, %v361_v38  ;;  %v1365_v6 = vmax.f32 %v1316_v63, 0.0 }
 0x2a7   :  { %v1372_v4 = vmax.f32 %v1318_v17, 0.0 }
 0x2a8   :  { %v1373_v27 = vmax.f32 %v1320_v1, 0.0 }
 0x2a9   :  { %v1420_v7 = vpack.c.bf16 %v1372_v4, %v1364_v3 }
 0x2aa   :  { %v1421_v31 = vpack.c.bf16 %v1373_v27, %v1365_v6  ;;  %v1323_v8 = vpop.f32.mrb[56].mxu1  ;;  %v5742_v27 = vld [vmem:[#allocation10] sm:$0xff]  }
 0x2ab   :  { %v1324_v9 = vadd.f32 %v1323_v8, %v357_v44  ;;  %v1325_v11 = vpop.f32.mrb[57].mxu1  ;;  %5486 = vmatprep.subr.bf16.mxu0 %v5742_v27  ;;  %v5745_v8 = vld [vmem:[#allocation10 + $0x18] sm:$0xff]  }
 0x2ac   :  { %v1326_v12 = vadd.f32 %v1325_v11, %v361_v38  ;;  %v1327_v13 = vpop.f32.mrb[58].mxu1  ;;  %2192 = vmatprep.mubr.bf16.mxu1 %v1421_v31  ;;  %5487 = vmatpush3.bf16.msra.mxu0 %v5742_v27  ;;  %v5744_v31 = vld [vmem:[#allocation10 + $0x10] sm:$0xff]   ;;  %v5754_v27 = vld [vmem:[#allocation11 + $0x20] sm:$0xff]  }
 0x2ad   :  { %v1380_v14 = vmax.f32 %v1324_v9, 0.0  ;;  %v1328_v59 = vadd.f32 %v1327_v13, %v357_v44  ;;  %v1329_v15 = vpop.f32.mrb[59].mxu1  ;;  %2193 = vmatmul.mubr.bf16.gmra.mrb[84].mxu1 %v1420_v7  ;;  %v5743_v7 = vld [vmem:[#allocation10 + $0x8] sm:$0xff]   ;;  %v4969_v9 = vld [vmem:[%s6970_s4] ss:$0 sm:$0xff] }
 0x2ae   :  { %v1381_v19 = vmax.f32 %v1326_v12, 0.0  ;;  %v1330_v20 = vadd.f32 %v1329_v15, %v361_v38  ;;  %5488 = vmatprep.subr.bf16.mxu0 %v5743_v7  ;;  %v5746_v15 = vld [vmem:[#allocation10 + $0x20] sm:$0xff]  }
 0x2af   :  { %v1388_v22 = vmax.f32 %v1328_v59, 0.0 }
 0x2b0   :  { %v1389_v23 = vmax.f32 %v1330_v20, 0.0  ;;  %5489 = vmatpush3.bf16.msra.mxu0 %v5743_v7 }
 0x2b1   :  { %v1428_v24 = vpack.c.bf16 %v1388_v22, %v1380_v14  ;;  %5490 = vmatprep.subr.bf16.mxu0 %v5744_v31 }
 0x2b2   :  { %v1429_v25 = vpack.c.bf16 %v1389_v23, %v1381_v19  ;;  %v1333_v26 = vpop.f32.mrb[60].mxu1 }
 0x2b3   :  { %v1334_v28 = vadd.f32 %v1333_v26, %v357_v44  ;;  %v1335_v29 = vpop.f32.mrb[61].mxu1 }
 0x2b4   :  { %v1336_v30 = vadd.f32 %v1335_v29, %v361_v38  ;;  %v1337_v32 = vpop.f32.mrb[62].mxu1  ;;  %2200 = vmatprep.mubr.bf16.mxu1 %v1429_v25  ;;  %5491 = vmatpush3.bf16.msra.mxu0 %v5744_v31  ;;  %v5747_v25 = vld [vmem:[#allocation10 + $0x28] sm:$0xff]  }
 0x2b5   :  { %v1396_v33 = vmax.f32 %v1334_v28, 0.0  ;;  %v1338_v34 = vadd.f32 %v1337_v32, %v357_v44  ;;  %v1339_v35 = vpop.f32.mrb[63].mxu1  ;;  %2201 = vmatmul.mubr.bf16.gmra.mrb[88].mxu1 %v1428_v24  ;;  %5492 = vmatprep.subr.bf16.mxu0 %v5745_v8 }
 0x2b6   :  { %v1397_v18 = vmax.f32 %v1336_v30, 0.0  ;;  %v1340_v40 = vadd.f32 %v1339_v35, %v361_v38 }
 0x2b7   :  { %v1404_v41 = vmax.f32 %v1338_v34, 0.0 }
 0x2b8   :  { %v1405_v45 = vmax.f32 %v1340_v40, 0.0  ;;  %v5294_v39 = vpop.f32.mrb[0].mxu0  ;;  %5493 = vmatpush3.bf16.msra.mxu0 %v5745_v8 }
 0x2b9   :  { %v1436_v46 = vpack.c.bf16 %v1404_v41, %v1396_v33  ;;  %v5295_v47 = vpop.f32.mrb[1].mxu0  ;;  %5494 = vmatprep.subr.bf16.mxu0 %v5746_v15  ;;  %v5748_v33 = vld [vmem:[#allocation10 + $0x30] sm:$0xff]  }
 0x2ba   :  { %v1437_v48 = vpack.c.bf16 %v1405_v45, %v1397_v18  ;;  %v5296_v49 = vadd.f32 %v5295_v47, %v5294_v39  ;;  %v5297_v50 = vpop.f32.mrb[2].mxu0  ;;  %v5749_v45 = vld [vmem:[#allocation10 + $0x38] sm:$0xff]  }
 0x2bb   :  { %v5298_v51 = vpop.f32.mrb[3].mxu0 }
 0x2bc   :  { %v5299_v53 = vadd.f32 %v5298_v51, %v5297_v50  ;;  %2208 = vmatprep.mubr.bf16.mxu1 %v1437_v48  ;;  %v1992_v13 = vadd.f32 %v5296_v49, %v4969_v9  ;;  %5495 = vmatpush3.bf16.msra.mxu0 %v5746_v15 }
 0x2bd   :  { %2209 = vmatmul.mubr.bf16.gmra.mrb[92].mxu1 %v1436_v46  ;;  %5496 = vmatprep.subr.bf16.mxu0 %v5747_v25 }
 0x2be   :  { %v1995_v20 = vadd.f32 %v5299_v53, %v4969_v9 }
 0x2c0   :  { %v5300_v54 = vpop.f32.mrb[4].mxu0  ;;  %5497 = vmatpush3.bf16.msra.mxu0 %v5747_v25 }
 0x2c1   :  { %v5301_v55 = vpop.f32.mrb[5].mxu0  ;;  %5498 = vmatprep.subr.bf16.mxu0 %v5748_v33 }
 0x2c2   :  { %v5302_v57 = vadd.f32 %v5301_v55, %v5300_v54  ;;  %v5303_v44 = vpop.f32.mrb[6].mxu0 }
 0x2c3   :  { %v5304_v10 = vpop.f32.mrb[7].mxu0 }
 0x2c4   :  { %v5305_v58 = vadd.f32 %v5304_v10, %v5303_v44  ;;  %v2000_v29 = vadd.f32 %v5302_v57, %v4969_v9  ;;  %5499 = vmatpush3.bf16.msra.mxu0 %v5748_v33 }
 0x2c5   :  { %5500 = vmatprep.subr.bf16.mxu0 %v5749_v45 }
 0x2c6   :  { %v2003_v35 = vadd.f32 %v5305_v58, %v4969_v9 }
 0x2c8   :  { %v5306_v61 = vpop.f32.mrb[8].mxu0  ;;  %5501 = vmatpush3.bf16.msra.mxu0 %v5749_v45 }
 0x2c9   :  { %v5307_v38 = vpop.f32.mrb[9].mxu0 }
 0x2ca   :  { %v5308_v62 = vadd.f32 %v5307_v38, %v5306_v61  ;;  %v5309_v16 = vpop.f32.mrb[10].mxu0 }
 0x2cb   :  { %v5310_v63 = vpop.f32.mrb[11].mxu0 }
 0x2cc   :  { %v5311_v21 = vadd.f32 %v5310_v63, %v5309_v16  ;;  %v2008_v47 = vadd.f32 %v5308_v62, %v4969_v9  ;;  %v5752_v62 = vld [vmem:[#allocation11 + $0x10] sm:$0xff]  }
 0x2ce   :  { %v2011_v51 = vadd.f32 %v5311_v21, %v4969_v9  ;;  %v5753_v21 = vld [vmem:[#allocation11 + $0x18] sm:$0xff]  }
 0x2d0   :  { %v5312_v17 = vpop.f32.mrb[12].mxu0 }
 0x2d1   :  { %v5313_v0 = vpop.f32.mrb[13].mxu0 }
 0x2d2   :  { %v5314_v1 = vadd.f32 %v5313_v0, %v5312_v17  ;;  %v5315_v3 = vpop.f32.mrb[14].mxu0 }
 0x2d3   :  { %v5316_v4 = vpop.f32.mrb[15].mxu0 }
 0x2d4   :  { %v5317_v6 = vadd.f32 %v5316_v4, %v5315_v3  ;;  %v2016_v10 = vadd.f32 %v5314_v1, %v4969_v9  ;;  %v5750_v3 = vld [vmem:[#allocation11] sm:$0xff]   ;;  %v5751_v4 = vld [vmem:[#allocation11 + $0x8] sm:$0xff]  }
 0x2d5   :  { %5510 = vmatprep.subr.bf16.mxu1 %v5750_v3  ;;  %v5755_v1 = vld [vmem:[#allocation11 + $0x28] sm:$0xff]  }
 0x2d6   :  { %v2019_v16 = vadd.f32 %v5317_v6, %v4969_v9  ;;  %5511 = vmatpush3.bf16.msra.mxu1 %v5750_v3 }
 0x2d7   :  { %5512 = vmatprep.subr.bf16.mxu1 %v5751_v4 }
 0x2da   :  { %5513 = vmatpush3.bf16.msra.mxu1 %v5751_v4 }
 0x2db   :  { %5514 = vmatprep.subr.bf16.mxu1 %v5752_v62 }
 0x2de   :  { %5515 = vmatpush3.bf16.msra.mxu1 %v5752_v62 }
 0x2df   :  { %5516 = vmatprep.subr.bf16.mxu1 %v5753_v21 }
 0x2e2   :  { %5517 = vmatpush3.bf16.msra.mxu1 %v5753_v21 }
 0x2e3   :  { %5518 = vmatprep.subr.bf16.mxu1 %v5754_v27 }
 0x2e6   :  { %5519 = vmatpush3.bf16.msra.mxu1 %v5754_v27 }
 0x2e7   :  { %5520 = vmatprep.subr.bf16.mxu1 %v5755_v1 }
 0x2ea   :  { %5521 = vmatpush3.bf16.msra.mxu1 %v5755_v1 }
 0x2f8   :  { %v5334_v11 = vpop.f32.mrb[64].mxu1 }
 0x2f9   :  { %v5335_v12 = vpop.f32.mrb[65].mxu1 }
 0x2fa   :  { %v5336_v14 = vadd.f32 %v5335_v12, %v5334_v11  ;;  %v5337_v59 = vpop.f32.mrb[66].mxu1 }
 0x2fb   :  { %v5338_v19 = vpop.f32.mrb[67].mxu1 }
 0x2fc   :  { %v6682_v22 = vadd.f32 %v5336_v14, %v1992_v13  ;;  %v5339_v23 = vadd.f32 %v5338_v19, %v5337_v59 }
 0x2fe   :  { %v6684_v24 = vadd.f32 %v5339_v23, %v1995_v20 }
 0x300   :  { %v5340_v26 = vpop.f32.mrb[68].mxu1 }
 0x301   :  { %v5341_v28 = vpop.f32.mrb[69].mxu1 }
 0x302   :  { %v5342_v30 = vadd.f32 %v5341_v28, %v5340_v26  ;;  %v5343_v32 = vpop.f32.mrb[70].mxu1 }
 0x303   :  { %v5344_v34 = vpop.f32.mrb[71].mxu1 }
 0x304   :  { %v2065_v18 = vadd.f32 %v5342_v30, %v2000_v29  ;;  %v5345_v40 = vadd.f32 %v5344_v34, %v5343_v32 }
 0x306   :  { %v2068_v41 = vadd.f32 %v5345_v40, %v2003_v35 }
 0x308   :  { %v5346_v39 = vpop.f32.mrb[72].mxu1 }
 0x309   :  { %v5347_v46 = vpop.f32.mrb[73].mxu1 }
 0x30a   :  { %v5348_v48 = vadd.f32 %v5347_v46, %v5346_v39  ;;  %v5349_v49 = vpop.f32.mrb[74].mxu1 }
 0x30b   :  { %v5350_v50 = vpop.f32.mrb[75].mxu1 }
 0x30c   :  { %v2073_v53 = vadd.f32 %v5348_v48, %v2008_v47  ;;  %v5351_v54 = vadd.f32 %v5350_v50, %v5349_v49 }
 0x30e   :  { %v2076_v55 = vadd.f32 %v5351_v54, %v2011_v51 }
 0x310   :  { %v5352_v57 = vpop.f32.mrb[76].mxu1 }
 0x311   :  { %v5353_v44 = vpop.f32.mrb[77].mxu1 }
 0x312   :  { %v5354_v58 = vadd.f32 %v5353_v44, %v5352_v57  ;;  %v5355_v61 = vpop.f32.mrb[78].mxu1 }
 0x313   :  { %v5356_v38 = vpop.f32.mrb[79].mxu1 }
 0x314   :  { %v2081_v63 = vadd.f32 %v5354_v58, %v2016_v10  ;;  %v5357_v17 = vadd.f32 %v5356_v38, %v5355_v61 }
 0x316   :  { %v2084_v0 = vadd.f32 %v5357_v17, %v2019_v16 }
 0x338   :  { %v5374_v6 = vpop.f32.mrb[16].mxu0 }
 0x339   :  { %v5375_v7 = vpop.f32.mrb[17].mxu0 }
 0x33a   :  { %v5376_v31 = vadd.f32 %v5375_v7, %v5374_v6  ;;  %v5377_v8 = vpop.f32.mrb[18].mxu0 }
 0x33b   :  { %v5378_v9 = vpop.f32.mrb[19].mxu0 }
 0x33c   :  { %v2122_v11 = vadd.f32 %v5376_v31, %v6682_v22  ;;  %v5379_v12 = vadd.f32 %v5378_v9, %v5377_v8 }
 0x33e   :  { %v2125_v13 = vadd.f32 %v5379_v12, %v6684_v24 }
 0x340   :  { %v5380_v14 = vpop.f32.mrb[20].mxu0 }
 0x341   :  { %v5381_v59 = vpop.f32.mrb[21].mxu0 }
 0x342   :  { %v5382_v15 = vadd.f32 %v5381_v59, %v5380_v14  ;;  %v5383_v19 = vpop.f32.mrb[22].mxu0 }
 0x343   :  { %v5384_v20 = vpop.f32.mrb[23].mxu0 }
 0x344   :  { %v2130_v23 = vadd.f32 %v5382_v15, %v2065_v18  ;;  %v5385_v25 = vadd.f32 %v5384_v20, %v5383_v19 }
 0x346   :  { %v2133_v26 = vadd.f32 %v5385_v25, %v2068_v41 }
 0x348   :  { %v5386_v28 = vpop.f32.mrb[24].mxu0 }
 0x349   :  { %v5387_v29 = vpop.f32.mrb[25].mxu0 }
 0x34a   :  { %v5388_v30 = vadd.f32 %v5387_v29, %v5386_v28  ;;  %v5389_v32 = vpop.f32.mrb[26].mxu0 }
 0x34b   :  { %v5390_v33 = vpop.f32.mrb[27].mxu0 }
 0x34c   :  { %v2138_v34 = vadd.f32 %v5388_v30, %v2073_v53  ;;  %v5391_v35 = vadd.f32 %v5390_v33, %v5389_v32 }
 0x34e   :  { %v2141_v40 = vadd.f32 %v5391_v35, %v2076_v55  ;;  %v5757_v35 = vld [vmem:[#allocation11 + $0x38] sm:$0xff]  }
 0x350   :  { %v5392_v22 = vpop.f32.mrb[28].mxu0 }
 0x351   :  { %v5393_v45 = vpop.f32.mrb[29].mxu0 }
 0x352   :  { %v5394_v39 = vadd.f32 %v5393_v45, %v5392_v22  ;;  %v5395_v24 = vpop.f32.mrb[30].mxu0  ;;  %v5759_v22 = vld [vmem:[#allocation13 + $0x8] sm:$0xff]   ;;  %v5760_v45 = vld [vmem:[#allocation13 + $0x10] sm:$0xff]  }
 0x353   :  { %v5396_v46 = vpop.f32.mrb[31].mxu0 }
 0x354   :  { %v2146_v47 = vadd.f32 %v5394_v39, %v2081_v63  ;;  %v5397_v48 = vadd.f32 %v5396_v46, %v5395_v24  ;;  %v5761_v39 = vld [vmem:[#allocation13 + $0x18] sm:$0xff]   ;;  %v5762_v24 = vld [vmem:[#allocation13 + $0x20] sm:$0xff]   ;;  %v5763_v46 = vld [vmem:[#allocation13 + $0x28] sm:$0xff]  }
 0x356   :  { %v2149_v49 = vadd.f32 %v5397_v48, %v2084_v0 }
 0x378   :  { %v5414_v50 = vpop.f32.mrb[80].mxu1 }
 0x379   :  { %v5415_v18 = vpop.f32.mrb[81].mxu1 }
 0x37a   :  { %v5416_v51 = vadd.f32 %v5415_v18, %v5414_v50  ;;  %v5417_v41 = vpop.f32.mrb[82].mxu1 }
 0x37b   :  { %v5418_v54 = vpop.f32.mrb[83].mxu1 }
 0x37c   :  { %v2187_v57 = vadd.f32 %v5416_v51, %v2122_v11  ;;  %v5419_v44 = vadd.f32 %v5418_v54, %v5417_v41 }
 0x37e   :  { %v2190_v10 = vadd.f32 %v5419_v44, %v2125_v13  ;;  %v2217_v58 = vmax.f32 %v2187_v57, 0.0 }
 0x380   :  { %v2218_v53 = vmax.f32 %v2190_v10, 0.0  ;;  %v5420_v61 = vpop.f32.mrb[84].mxu1 }
 0x381   :  { %v5421_v55 = vpop.f32.mrb[85].mxu1 }
 0x382   :  { %v5422_v38 = vadd.f32 %v5421_v55, %v5420_v61  ;;  %v5423_v16 = vpop.f32.mrb[86].mxu1  ;;  %v2225_v17 = vpack.c.bf16 %v2218_v53, %v2217_v58 }
 0x383   :  { %v5424_v3 = vpop.f32.mrb[87].mxu1 }
 0x384   :  { %v2195_v4 = vadd.f32 %v5422_v38, %v2130_v23  ;;  %v5425_v63 = vadd.f32 %v5424_v3, %v5423_v16  ;;  %5502 = vmatprep.mubr.bf16.mxu0 %v2225_v17 }
 0x386   :  { %v2198_v0 = vadd.f32 %v5425_v63, %v2133_v26  ;;  %v2219_v62 = vmax.f32 %v2195_v4, 0.0 }
 0x388   :  { %v2220_v21 = vmax.f32 %v2198_v0, 0.0  ;;  %v5426_v27 = vpop.f32.mrb[88].mxu1 }
 0x389   :  { %v5427_v1 = vpop.f32.mrb[89].mxu1 }
 0x38a   :  { %v2226_v6 = vpack.c.bf16 %v2220_v21, %v2219_v62  ;;  %v5428_v7 = vadd.f32 %v5427_v1, %v5426_v27  ;;  %v5429_v31 = vpop.f32.mrb[90].mxu1 }
 0x38b   :  { %v5430_v8 = vpop.f32.mrb[91].mxu1 }
 0x38c   :  { %v2203_v9 = vadd.f32 %v5428_v7, %v2138_v34  ;;  %v5431_v11 = vadd.f32 %v5430_v8, %v5429_v31  ;;  %5503 = vmatmul.mubr.bf16.vlgmr.msra.gmra.mrb[32].mxu0 %v2226_v6  ;;  %v5756_v34 = vld [vmem:[#allocation11 + $0x30] sm:$0xff]  }
 0x38d   :  { %5522 = vmatprep.subr.bf16.mxu1 %v5756_v34  ;;  %v5764_v8 = vld [vmem:[#allocation13 + $0x30] sm:$0xff]  }
 0x38e   :  { %v2206_v12 = vadd.f32 %v5431_v11, %v2141_v40  ;;  %v2221_v13 = vmax.f32 %v2203_v9, 0.0  ;;  %5523 = vmatpush3.bf16.msra.mxu1 %v5756_v34  ;;  %v5758_v40 = vld [vmem:[#allocation13] sm:$0xff]   ;;  %v5765_v9 = vld [vmem:[#allocation13 + $0x38] sm:$0xff]  }
 0x38f   :  { %5524 = vmatprep.subr.bf16.mxu1 %v5757_v35  ;;  %5534 = vmatprep.subr.bf16.mxu0 %v5758_v40  ;;  %v5766_v11 = vld [vmem:[#allocation14] sm:$0xff]  }
 0x390   :  { %v2222_v14 = vmax.f32 %v2206_v12, 0.0  ;;  %v5432_v59 = vpop.f32.mrb[92].mxu1  ;;  %5535 = vmatpush3.bf16.msra.mxu0 %v5758_v40  ;;  %v5767_v12 = vld [vmem:[#allocation14 + $0x8] sm:$0xff]  }
 0x391   :  { %v5433_v15 = vpop.f32.mrb[93].mxu1  ;;  %5536 = vmatprep.subr.bf16.mxu0 %v5759_v22 }
 0x392   :  { %v5434_v19 = vadd.f32 %v5433_v15, %v5432_v59  ;;  %v5435_v20 = vpop.f32.mrb[94].mxu1  ;;  %v2227_v23 = vpack.c.bf16 %v2222_v14, %v2221_v13  ;;  %5525 = vmatpush3.bf16.msra.mxu1 %v5757_v35  ;;  %v5768_v13 = vld [vmem:[#allocation14 + $0x10] sm:$0xff]   ;;  %v5769_v14 = vld [vmem:[#allocation14 + $0x18] sm:$0xff]   ;;  %v5770_v59 = vld [vmem:[#allocation14 + $0x20] sm:$0xff]  }
 0x393   :  { %v5436_v25 = vpop.f32.mrb[95].mxu1  ;;  %5558 = vmatprep.subr.bf16.mxu1 %v5766_v11  ;;  %v5771_v15 = vld [vmem:[#allocation14 + $0x28] sm:$0xff]  }
 0x394   :  { %v2211_v26 = vadd.f32 %v5434_v19, %v2146_v47  ;;  %v5437_v28 = vadd.f32 %v5436_v25, %v5435_v20  ;;  %5506 = vmatprep.mubr.bf16.mxu0 %v2227_v23  ;;  %5537 = vmatpush3.bf16.msra.mxu0 %v5759_v22  ;;  %v5034_v47 = vld [vmem:[%s6972_s6] ss:$0 sm:$0xff] }
 0x395   :  { %5538 = vmatprep.subr.bf16.mxu0 %v5760_v45  ;;  %v5043_v20 = vld [vmem:[%s6974_s8] ss:$0 sm:$0xff] }
 0x396   :  { %v2214_v29 = vadd.f32 %v5437_v28, %v2149_v49  ;;  %v2223_v30 = vmax.f32 %v2211_v26, 0.0 }
 0x398   :  { %v2224_v32 = vmax.f32 %v2214_v29, 0.0  ;;  %5539 = vmatpush3.bf16.msra.mxu0 %v5760_v45 }
 0x399   :  { %5540 = vmatprep.subr.bf16.mxu0 %v5761_v39 }
 0x39a   :  { %v2228_v33 = vpack.c.bf16 %v2224_v32, %v2223_v30 }
 0x39c   :  { %5507 = vmatmul.mubr.bf16.gmra.mrb[36].mxu0 %v2228_v33 }
 0x39d   :  { %5541 = vmatpush3.bf16.msra.mxu0 %v5761_v39 }
 0x39e   :  { %5542 = vmatprep.subr.bf16.mxu0 %v5762_v24 }
 0x3a1   :  { %5543 = vmatpush3.bf16.msra.mxu0 %v5762_v24 }
 0x3a2   :  { %5544 = vmatprep.subr.bf16.mxu0 %v5763_v46 }
 0x3a5   :  { %5545 = vmatpush3.bf16.msra.mxu0 %v5763_v46 }
 0x3a6   :  { %5546 = vmatprep.subr.bf16.mxu0 %v5764_v8 }
 0x3a9   :  { %5547 = vmatpush3.bf16.msra.mxu0 %v5764_v8  ;;  %v2857_v8 = vld [vmem:[#allocation16 + $0x160] sm:$0xff] }
 0x3aa   :  { %5548 = vmatprep.subr.bf16.mxu0 %v5765_v9 }
 0x3ad   :  { %5549 = vmatpush3.bf16.msra.mxu0 %v5765_v9 }
 0x45f   :  { %v5504_v48 = vpop.f32.mrb[32].mxu0 }
 0x460   :  { %v2343_v49 = vadd.f32 %v5504_v48, %v5034_v47  ;;  %v2334_v50 = vpop.f32.mrb[33].mxu0 }
 0x461   :  { %v2335_v18 = vadd.f32 %v5034_v47, %v2334_v50  ;;  %v5505_v51 = vpop.f32.mrb[34].mxu0  ;;  %v5772_v50 = vld [vmem:[#allocation14 + $0x30] sm:$0xff]  }
 0x462   :  { %v2346_v41 = vadd.f32 %v5505_v51, %v5034_v47  ;;  %v2337_v54 = vpop.f32.mrb[35].mxu0  ;;  %v2367_v44 = vmax.f32 %v2343_v49, 0.0  ;;  %v2813_v51 = vld [vmem:[#allocation16] sm:$0xff] }
 0x463   :  { %v2338_v57 = vadd.f32 %v5034_v47, %v2337_v54  ;;  %v2365_v58 = vmax.f32 %v2335_v18, 0.0  ;;  %v5773_v18 = vld [vmem:[#allocation14 + $0x38] sm:$0xff]   ;;  %v2814_v54 = vld [vmem:[#allocation16 + $0x8] sm:$0xff] }
 0x464   :  { %v2368_v10 = vmax.f32 %v2346_v41, 0.0  ;;  %v2817_v41 = vld [vmem:[#allocation16 + $0x20] sm:$0xff] }
 0x465   :  { %v2366_v53 = vmax.f32 %v2338_v57, 0.0  ;;  %v5070_v57 = vcombine.low %v2813_v51, %v2817_v41 }
 0x466   :  { %v2374_v61 = vpack.c.bf16 %v2368_v10, %v2367_v44  ;;  %v5071_v44 = vcombine.high %v2813_v51, %v2817_v41  ;;  %v2818_v10 = vld [vmem:[#allocation16 + $0x28] sm:$0xff] }
 0x467   :  { %v2373_v55 = vpack.c.bf16 %v2366_v53, %v2365_v58  ;;  %v2821_v58 = vld [vmem:[#allocation16 + $0x40] sm:$0xff] }
 0x468   :  { %v2825_v53 = vld [vmem:[#allocation16 + $0x60] sm:$0xff]  ;;  %3239 = vmatprep.subr.bf16.mxu0 %v5071_v44  ;;  %v2846_v44 = vld [vmem:[#allocation16 + $0x108] sm:$0xff] }
 0x469   :  { %5526 = vmatprep.mubr.bf16.mxu1 %v2373_v55  ;;  %v5073_v55 = vcombine.high %v2814_v54, %v2818_v10 }
 0x46a   :  { %5527 = vmatmul.mubr.bf16.vlgmr.msra.gmra.mrb[96].mxu1 %v2374_v61  ;;  %v5072_v61 = vcombine.low %v2814_v54, %v2818_v10  ;;  %v2850_v10 = vld [vmem:[#allocation16 + $0x128] sm:$0xff] }
 0x46b   :  { %5559 = vmatpush3.bf16.msra.mxu1 %v5766_v11 }
 0x46c   :  { %5560 = vmatprep.subr.bf16.mxu1 %v5767_v12 }
 0x46f   :  { %v5508_v38 = vpop.f32.mrb[36].mxu0  ;;  %5561 = vmatpush3.bf16.msra.mxu1 %v5767_v12 }
 0x470   :  { %v2359_v16 = vadd.f32 %v5508_v38, %v5034_v47  ;;  %v2350_v17 = vpop.f32.mrb[37].mxu0  ;;  %5562 = vmatprep.subr.bf16.mxu1 %v5768_v13  ;;  %v5079_v38 = vcombine.high %v2821_v58, %v2825_v53 }
 0x471   :  { %v2351_v3 = vadd.f32 %v5034_v47, %v2350_v17  ;;  %v5509_v4 = vpop.f32.mrb[38].mxu0  ;;  %v2833_v17 = vld [vmem:[#allocation16 + $0xa0] sm:$0xff] }
 0x472   :  { %v2362_v63 = vadd.f32 %v5509_v4, %v5034_v47  ;;  %v2353_v0 = vpop.f32.mrb[39].mxu0  ;;  %v2371_v21 = vmax.f32 %v2359_v16, 0.0  ;;  %v2829_v16 = vld [vmem:[#allocation16 + $0x80] sm:$0xff] }
 0x473   :  { %v2354_v62 = vadd.f32 %v5034_v47, %v2353_v0  ;;  %v2369_v1 = vmax.f32 %v2351_v3, 0.0  ;;  %5563 = vmatpush3.bf16.msra.mxu1 %v5768_v13  ;;  %v5078_v3 = vcombine.low %v2821_v58, %v2825_v53  ;;  %v5087_v4 = vcombine.high %v2829_v16, %v2833_v17  ;;  %v2841_v0 = vld [vmem:[#allocation16 + $0xe0] sm:$0xff]  ;;  %v5052_v13 = vld [vmem:[%s6976_s10] ss:$0 sm:$0xff] }
 0x474   :  { %v2372_v27 = vmax.f32 %v2362_v63, 0.0  ;;  %5564 = vmatprep.subr.bf16.mxu1 %v5769_v14  ;;  %v2837_v63 = vld [vmem:[#allocation16 + $0xc0] sm:$0xff] }
 0x475   :  { %v2370_v6 = vmax.f32 %v2354_v62, 0.0  ;;  %v5086_v62 = vcombine.low %v2829_v16, %v2833_v17  ;;  %v5105_v17 = vcombine.high %v2846_v44, %v2850_v10 }
 0x476   :  { %v2376_v7 = vpack.c.bf16 %v2372_v27, %v2371_v21  ;;  %v5095_v21 = vcombine.high %v2837_v63, %v2841_v0  ;;  %v2845_v27 = vld [vmem:[#allocation16 + $0x100] sm:$0xff] }
 0x477   :  { %v2375_v31 = vpack.c.bf16 %v2370_v6, %v2369_v1  ;;  %5565 = vmatpush3.bf16.msra.mxu1 %v5769_v14  ;;  %v2849_v1 = vld [vmem:[#allocation16 + $0x120] sm:$0xff]  ;;  %v5094_v6 = vcombine.low %v2837_v63, %v2841_v0  ;;  %v2854_v63 = vld [vmem:[#allocation16 + $0x148] sm:$0xff] }
 0x478   :  { %5566 = vmatprep.subr.bf16.mxu1 %v5770_v59  ;;  %v5102_v9 = vcombine.low %v2845_v27, %v2849_v1  ;;  %v2858_v0 = vld [vmem:[#allocation16 + $0x168] sm:$0xff] }
 0x479   :  { %5530 = vmatprep.mubr.bf16.mxu1 %v2375_v31  ;;  %v2853_v31 = vld [vmem:[#allocation16 + $0x140] sm:$0xff] }
 0x47a   :  { %5531 = vmatmul.mubr.bf16.gmra.mrb[100].mxu1 %v2376_v7  ;;  %v5103_v7 = vcombine.high %v2845_v27, %v2849_v1  ;;  %v5111_v11 = vcombine.high %v2853_v31, %v2857_v8  ;;  %v5110_v12 = vcombine.low %v2853_v31, %v2857_v8  ;;  %v5104_v27 = vcombine.low %v2846_v44, %v2850_v10  ;;  %v2865_v31 = vld [vmem:[#allocation16 + $0x1a0] sm:$0xff]  ;;  %v2862_v8 = vld [vmem:[#allocation16 + $0x188] sm:$0xff]  ;;  %v2827_v44 = vld [vmem:[#allocation16 + $0x70] sm:$0xff] }
 0x47b   :  { %5567 = vmatpush3.bf16.msra.mxu1 %v5770_v59  ;;  %v5113_v1 = vcombine.high %v2854_v63, %v2858_v0  ;;  %v2824_v10 = vld [vmem:[#allocation16 + $0x58] sm:$0xff] }
 0x47c   :  { %5568 = vmatprep.subr.bf16.mxu1 %v5771_v15 }
 0x47f   :  { %5569 = vmatpush3.bf16.msra.mxu1 %v5771_v15 }
 0x480   :  { %5570 = vmatprep.subr.bf16.mxu1 %v5772_v50 }
 0x483   :  { %5571 = vmatpush3.bf16.msra.mxu1 %v5772_v50 }
 0x484   :  { %5572 = vmatprep.subr.bf16.mxu1 %v5773_v18 }
 0x487   :  { %5573 = vmatpush3.bf16.msra.mxu1 %v5773_v18 }
 0x488   :  { %3312 = vmatprep.subr.bf16.mxu1 %v5073_v55 }
 0x53d   :  { %v5528_v19 = vpop.f32.mrb[96].mxu1 }
 0x53e   :  { %v2482_v23 = vpop.f32.mrb[97].mxu1  ;;  %v2491_v26 = vadd.f32 %v5528_v19, %v5043_v20 }
 0x53f   :  { %v5529_v25 = vpop.f32.mrb[98].mxu1  ;;  %v2483_v30 = vadd.f32 %v5043_v20, %v2482_v23 }
 0x540   :  { %v2494_v28 = vadd.f32 %v5529_v25, %v5043_v20  ;;  %v2485_v29 = vpop.f32.mrb[99].mxu1 }
 0x541   :  { %v2486_v32 = vadd.f32 %v5043_v20, %v2485_v29 }
 0x542   :  { %v2514_v33 = vpack.c.bf16 %v2494_v28, %v2491_v26 }
 0x543   :  { %v2513_v34 = vpack.c.bf16 %v2486_v32, %v2483_v30 }
 0x545   :  { %5550 = vmatprep.mubr.bf16.mxu0 %v2513_v34  ;;  %v2826_v34 = vld [vmem:[#allocation16 + $0x68] sm:$0xff] }
 0x546   :  { %5551 = vmatmul.mubr.bf16.vlgmr.msra.gmra.mrb[40].mxu0 %v2514_v33  ;;  %v2822_v33 = vld [vmem:[#allocation16 + $0x48] sm:$0xff] }
 0x547   :  { %3240 = vmatpush1.bf16.msra.mxu0 %v5070_v57 }
 0x548   :  { %3241 = vmatprep.subr.bf16.mxu0 %v5079_v38 }
 0x54b   :  { %3242 = vmatpush1.bf16.msra.mxu0 %v5078_v3 }
 0x54c   :  { %3243 = vmatprep.subr.bf16.mxu0 %v5087_v4 }
 0x54d   :  { %v5532_v35 = vpop.f32.mrb[100].mxu1 }
 0x54e   :  { %v2498_v40 = vpop.f32.mrb[101].mxu1  ;;  %v2507_v45 = vadd.f32 %v5532_v35, %v5043_v20 }
 0x54f   :  { %v5533_v22 = vpop.f32.mrb[102].mxu1  ;;  %v2499_v46 = vadd.f32 %v5043_v20, %v2498_v40  ;;  %3244 = vmatpush1.bf16.msra.mxu0 %v5086_v62 }
 0x550   :  { %v2510_v39 = vadd.f32 %v5533_v22, %v5043_v20  ;;  %v2501_v24 = vpop.f32.mrb[103].mxu1  ;;  %3245 = vmatprep.subr.bf16.mxu0 %v5095_v21  ;;  %v5081_v22 = vcombine.high %v2822_v33, %v2826_v34 }
 0x551   :  { %v2502_v47 = vadd.f32 %v5043_v20, %v2501_v24  ;;  %v5080_v24 = vcombine.low %v2822_v33, %v2826_v34  ;;  %v2820_v34 = vld [vmem:[#allocation16 + $0x38] sm:$0xff] }
 0x552   :  { %v2516_v48 = vpack.c.bf16 %v2510_v39, %v2507_v45  ;;  %v2830_v45 = vld [vmem:[#allocation16 + $0x88] sm:$0xff] }
 0x553   :  { %v2515_v49 = vpack.c.bf16 %v2502_v47, %v2499_v46  ;;  %3246 = vmatpush1.bf16.msra.mxu0 %v5094_v6  ;;  %v2834_v39 = vld [vmem:[#allocation16 + $0xa8] sm:$0xff]  ;;  %v5112_v6 = vcombine.low %v2854_v63, %v2858_v0  ;;  %v2832_v63 = vld [vmem:[#allocation16 + $0x98] sm:$0xff] }
 0x554   :  { %3247 = vmatprep.subr.bf16.mxu0 %v5103_v7  ;;  %v5089_v46 = vcombine.high %v2830_v45, %v2834_v39  ;;  %v2838_v47 = vld [vmem:[#allocation16 + $0xc8] sm:$0xff]  ;;  %v5088_v50 = vcombine.low %v2830_v45, %v2834_v39  ;;  %v2861_v7 = vld [vmem:[#allocation16 + $0x180] sm:$0xff]  ;;  %v6702_v39 = vld [vmem:[%s6978_s12] ss:$0 sm:$0xff] }
 0x555   :  { %5554 = vmatprep.mubr.bf16.mxu0 %v2515_v49  ;;  %v2836_v0 = vld [vmem:[#allocation16 + $0xb8] sm:$0xff] }
 0x556   :  { %5555 = vmatmul.mubr.bf16.gmra.mrb[44].mxu0 %v2516_v48  ;;  %v2842_v48 = vld [vmem:[#allocation16 + $0xe8] sm:$0xff] }
 0x557   :  { %3248 = vmatpush1.bf16.msra.mxu0 %v5102_v9  ;;  %v5097_v41 = vcombine.high %v2838_v47, %v2842_v48  ;;  %v5119_v9 = vcombine.high %v2861_v7, %v2865_v31 }
 0x558   :  { %3249 = vmatprep.subr.bf16.mxu0 %v5111_v11  ;;  %v2866_v11 = vld [vmem:[#allocation16 + $0x1a8] sm:$0xff] }
 0x55b   :  { %3250 = vmatpush1.bf16.msra.mxu0 %v5110_v12  ;;  %v5118_v12 = vcombine.low %v2861_v7, %v2865_v31  ;;  %v2843_v7 = vld [vmem:[#allocation16 + $0xf0] sm:$0xff]  ;;  %v2840_v31 = vld [vmem:[#allocation16 + $0xd8] sm:$0xff] }
 0x55c   :  { %3251 = vmatprep.subr.bf16.mxu0 %v5119_v9 }
 0x55f   :  { %3252 = vmatpush1.bf16.msra.mxu0 %v5118_v12 }
 0x619   :  { %v5552_v14 = vpop.f32.mrb[40].mxu0 }
 0x61a   :  { %v2631_v59 = vadd.f32 %v5552_v14, %v5052_v13  ;;  %v2622_v15 = vpop.f32.mrb[41].mxu0  ;;  %v5121_v14 = vcombine.high %v2862_v8, %v2866_v11 }
 0x61b   :  { %v2623_v19 = vadd.f32 %v5052_v13, %v2622_v15  ;;  %v5553_v20 = vpop.f32.mrb[42].mxu0  ;;  %v2873_v15 = vld [vmem:[#allocation16 + $0x1e0] sm:$0xff] }
 0x61c   :  { %v2634_v23 = vadd.f32 %v5553_v20, %v5052_v13  ;;  %v2625_v25 = vpop.f32.mrb[43].mxu0  ;;  %v2655_v28 = vmax.f32 %v2631_v59, 0.0  ;;  %v2869_v59 = vld [vmem:[#allocation16 + $0x1c0] sm:$0xff] }
 0x61d   :  { %v2626_v26 = vadd.f32 %v5052_v13, %v2625_v25  ;;  %v2653_v30 = vmax.f32 %v2623_v19, 0.0  ;;  %v2870_v19 = vld [vmem:[#allocation16 + $0x1c8] sm:$0xff]  ;;  %v5127_v20 = vcombine.high %v2869_v59, %v2873_v15  ;;  %v5126_v25 = vcombine.low %v2869_v59, %v2873_v15  ;;  %v2847_v59 = vld [vmem:[#allocation16 + $0x110] sm:$0xff] }
 0x61e   :  { %v2656_v29 = vmax.f32 %v2634_v23, 0.0  ;;  %v2874_v23 = vld [vmem:[#allocation16 + $0x1e8] sm:$0xff] }
 0x61f   :  { %v2654_v32 = vmax.f32 %v2626_v26, 0.0  ;;  %v5128_v26 = vcombine.low %v2870_v19, %v2874_v23  ;;  %3253 = vmatprep.subr.bf16.mxu0 %v5127_v20  ;;  %v2851_v20 = vld [vmem:[#allocation16 + $0x130] sm:$0xff] }
 0x620   :  { %v2662_v35 = vpack.c.bf16 %v2656_v29, %v2655_v28  ;;  %v5129_v28 = vcombine.high %v2870_v19, %v2874_v23  ;;  %3254 = vmatpush1.bf16.msra.mxu0 %v5126_v25  ;;  %v2815_v29 = vld [vmem:[#allocation16 + $0x10] sm:$0xff]  ;;  %v2848_v23 = vld [vmem:[#allocation16 + $0x118] sm:$0xff] }
 0x621   :  { %v2661_v40 = vpack.c.bf16 %v2654_v32, %v2653_v30  ;;  %v2819_v30 = vld [vmem:[#allocation16 + $0x30] sm:$0xff]  ;;  %v2816_v32 = vld [vmem:[#allocation16 + $0x18] sm:$0xff] }
 0x622   :  { %v5075_v33 = vcombine.high %v2815_v29, %v2819_v30  ;;  %v5077_v45 = vcombine.high %v2816_v32, %v2820_v34  ;;  %v2852_v25 = vld [vmem:[#allocation16 + $0x138] sm:$0xff] }
 0x623   :  { %5574 = vmatprep.mubr.bf16.mxu1 %v2661_v40  ;;  %v5074_v40 = vcombine.low %v2815_v29, %v2819_v30 }
 0x624   :  { %5575 = vmatmul.mubr.bf16.vlgmr.msra.gmra.mrb[104].mxu1 %v2662_v35  ;;  %v6310_v35 = vmov 0   ;;  %3385 = vmatprep.subr.bf16.mxu0 %v5075_v33 }
 0x625   :  { %3313 = vmatpush1.bf16.msra.mxu1 %v5072_v61  ;;  %v5096_v61 = vcombine.low %v2838_v47, %v2842_v48  ;;  %3271 = vmatprep.mubr.bf16.mxu0 %v6310_v35 }
 0x626   :  { %3314 = vmatprep.subr.bf16.mxu1 %v5081_v22  ;;  %v5076_v22 = vcombine.low %v2816_v32, %v2820_v34 }
 0x629   :  { %v5556_v49 = vpop.f32.mrb[44].mxu0  ;;  %3315 = vmatpush1.bf16.msra.mxu1 %v5080_v24 }
 0x62a   :  { %v2647_v18 = vadd.f32 %v5556_v49, %v5052_v13  ;;  %v2638_v51 = vpop.f32.mrb[45].mxu0  ;;  %3316 = vmatprep.subr.bf16.mxu1 %v5089_v46 }
 0x62b   :  { %v2639_v54 = vadd.f32 %v5052_v13, %v2638_v51  ;;  %v5557_v57 = vpop.f32.mrb[46].mxu0 }
 0x62c   :  { %v2650_v58 = vadd.f32 %v5557_v57, %v5052_v13  ;;  %v2641_v53 = vpop.f32.mrb[47].mxu0  ;;  %v2659_v38 = vmax.f32 %v2647_v18, 0.0 }
 0x62d   :  { %v2642_v55 = vadd.f32 %v5052_v13, %v2641_v53  ;;  %3317 = vmatpush1.bf16.msra.mxu1 %v5088_v50  ;;  %v2657_v3 = vmax.f32 %v2639_v54, 0.0  ;;  %v5120_v13 = vcombine.low %v2862_v8, %v2866_v11  ;;  %v2844_v8 = vld [vmem:[#allocation16 + $0xf8] sm:$0xff]  ;;  %v5092_v11 = vcombine.low %v2832_v63, %v2836_v0 }
 0x62e   :  { %v2660_v16 = vmax.f32 %v2650_v58, 0.0  ;;  %3318 = vmatprep.subr.bf16.mxu1 %v5097_v41  ;;  %v2823_v41 = vld [vmem:[#allocation16 + $0x50] sm:$0xff]  ;;  %v2828_v58 = vld [vmem:[#allocation16 + $0x78] sm:$0xff]  ;;  %v5100_v33 = vcombine.low %v2840_v31, %v2844_v8 }
 0x62f   :  { %v2658_v4 = vmax.f32 %v2642_v55, 0.0 }
 0x630   :  { %v2664_v62 = vpack.c.bf16 %v2660_v16, %v2659_v38  ;;  %v5083_v16 = vcombine.high %v2823_v41, %v2827_v44 }
 0x631   :  { %v2663_v21 = vpack.c.bf16 %v2658_v4, %v2657_v3  ;;  %3319 = vmatpush1.bf16.msra.mxu1 %v5096_v61  ;;  %v2831_v3 = vld [vmem:[#allocation16 + $0x90] sm:$0xff] }
 0x632   :  { %3320 = vmatprep.subr.bf16.mxu1 %v5105_v17  ;;  %v5085_v17 = vcombine.high %v2824_v10, %v2828_v58  ;;  %v2835_v4 = vld [vmem:[#allocation16 + $0xb0] sm:$0xff] }
 0x633   :  { %5578 = vmatprep.mubr.bf16.mxu1 %v2663_v21  ;;  %v5084_v21 = vcombine.low %v2824_v10, %v2828_v58  ;;  %v5090_v9 = vcombine.low %v2831_v3, %v2835_v4  ;;  %v2863_v10 = vld [vmem:[#allocation16 + $0x190] sm:$0xff] }
 0x634   :  { %5579 = vmatmul.mubr.bf16.gmra.mrb[108].mxu1 %v2664_v62  ;;  %v5082_v62 = vcombine.low %v2823_v41, %v2827_v44  ;;  %v5108_v41 = vcombine.low %v2848_v23, %v2852_v25  ;;  %v2867_v58 = vld [vmem:[#allocation16 + $0x1b0] sm:$0xff] }
 0x635   :  { %3321 = vmatpush1.bf16.msra.mxu1 %v5104_v27  ;;  %3344 = vmatprep.mubr.bf16.mxu1 %v6310_v35  ;;  %v5091_v27 = vcombine.high %v2831_v3, %v2835_v4  ;;  %v5123_v3 = vcombine.high %v2863_v10, %v2867_v58 }
 0x636   :  { %3322 = vmatprep.subr.bf16.mxu1 %v5113_v1  ;;  %v5093_v1 = vcombine.high %v2832_v63, %v2836_v0  ;;  %v2871_v63 = vld [vmem:[#allocation16 + $0x1d0] sm:$0xff] }
 0x637   :  { %v2875_v0 = vld [vmem:[#allocation16 + $0x1f0] sm:$0xff] }
 0x639   :  { %3323 = vmatpush1.bf16.msra.mxu1 %v5112_v6  ;;  %v2839_v6 = vld [vmem:[#allocation16 + $0xd0] sm:$0xff] }
 0x63a   :  { %3324 = vmatprep.subr.bf16.mxu1 %v5121_v14  ;;  %v5101_v14 = vcombine.high %v2840_v31, %v2844_v8  ;;  %v5098_v32 = vcombine.low %v2839_v6, %v2843_v7  ;;  %v5130_v31 = vcombine.low %v2871_v63, %v2875_v0 }
 0x63d   :  { %3325 = vmatpush1.bf16.msra.mxu1 %v5120_v13  ;;  %v5099_v13 = vcombine.high %v2839_v6, %v2843_v7  ;;  %v5131_v6 = vcombine.high %v2871_v63, %v2875_v0 }
 0x63e   :  { %3326 = vmatprep.subr.bf16.mxu1 %v5129_v28 }
 0x641   :  { %3327 = vmatpush1.bf16.msra.mxu1 %v5128_v26 }
 0x642   :  { %3458 = vmatprep.subr.bf16.mxu1 %v5077_v45  ;;  %v2855_v45 = vld [vmem:[#allocation16 + $0x150] sm:$0xff] }
 0x6f7   :  { %v5576_v24 = vpop.f32.mrb[104].mxu1 }
 0x6f8   :  { %v2779_v46 = vadd.f32 %v5576_v24, %v6702_v39  ;;  %v2770_v47 = vpop.f32.mrb[105].mxu1 }
 0x6f9   :  { %v2771_v48 = vadd.f32 %v6702_v39, %v2770_v47  ;;  %v5577_v49 = vpop.f32.mrb[106].mxu1  ;;  %v2859_v47 = vld [vmem:[#allocation16 + $0x170] sm:$0xff] }
 0x6fa   :  { %v2782_v50 = vadd.f32 %v5577_v49, %v6702_v39  ;;  %v2773_v18 = vpop.f32.mrb[107].mxu1  ;;  %v2803_v54 = vmax.f32 %v2779_v46, 0.0  ;;  %v2860_v49 = vld [vmem:[#allocation16 + $0x178] sm:$0xff] }
 0x6fb   :  { %v2774_v51 = vadd.f32 %v6702_v39, %v2773_v18  ;;  %v2801_v53 = vmax.f32 %v2771_v48, 0.0  ;;  %v2856_v48 = vld [vmem:[#allocation16 + $0x158] sm:$0xff] }
 0x6fc   :  { %v2804_v57 = vmax.f32 %v2782_v50, 0.0  ;;  %v5117_v44 = vcombine.high %v2856_v48, %v2860_v49 }
 0x6fd   :  { %v2802_v55 = vmax.f32 %v2774_v51, 0.0 }
 0x6fe   :  { %v6708_v61 = vpack.c.bf16 %v2804_v57, %v2803_v54  ;;  %v5115_v57 = vcombine.high %v2855_v45, %v2859_v47 }
 0x6ff   :  { %v6710_v38 = vpack.c.bf16 %v2802_v55, %v2801_v53  ;;  %v2864_v53 = vld [vmem:[#allocation16 + $0x198] sm:$0xff] }
 0x700   :  { %v2868_v55 = vld [vmem:[#allocation16 + $0x1b8] sm:$0xff] }
 0x701   :  { %3272 = vmatmul.mubr.bf16.vlgmr.msra.gmra.mrb[48].mxu0 %v6710_v38  ;;  %3345 = vmatmul.mubr.bf16.vlgmr.msra.gmra.mrb[112].mxu1 %v6710_v38  ;;  %v5125_v4 = vcombine.high %v2864_v53, %v2868_v55 }
 0x702   :  { %3386 = vmatpush1.bf16.msra.mxu0 %v5074_v40  ;;  %3459 = vmatpush1.bf16.msra.mxu1 %v5076_v22  ;;  %v5107_v40 = vcombine.high %v2847_v59, %v2851_v20  ;;  %v5109_v22 = vcombine.high %v2848_v23, %v2852_v25  ;;  %v5791_v23 = vld [vmem:[#allocation17 + $0x54] ss:$8 sps:$4 sm:$0xff]   ;;  %v5794_v25 = vld [vmem:[#allocation17 + $0x64] ss:$8 sps:$4 sm:$0xff]  }
 0x703   :  { %3387 = vmatprep.subr.bf16.mxu0 %v5083_v16  ;;  %3460 = vmatprep.subr.bf16.mxu1 %v5085_v17  ;;  %v5114_v16 = vcombine.low %v2855_v45, %v2859_v47  ;;  %v5116_v17 = vcombine.low %v2856_v48, %v2860_v49  ;;  %v5807_v45 = vld [vmem:[#allocation17 + $0xb0] ss:$8 sps:$4 sm:$0xff]   ;;  %v5815_v47 = vld [vmem:[#allocation17 + $0xd4] ss:$8 sps:$4 sm:$0xff]   ;;  %v5818_v49 = vld [vmem:[#allocation17 + $0xe4] ss:$8 sps:$4 sm:$0xff]  }
 0x704   :  { %3281 = vmatprep.mubr.bf16.mxu0 %v6310_v35  ;;  %3354 = vmatprep.mubr.bf16.mxu1 %v6310_v35  ;;  %v5813_v48 = vld [vmem:[#allocation17 + $0xd0] ss:$8 sps:$4 sm:$0xff]  }
 0x706   :  { %3388 = vmatpush1.bf16.msra.mxu0 %v5082_v62  ;;  %3461 = vmatpush1.bf16.msra.mxu1 %v5084_v21  ;;  %v2872_v62 = vld [vmem:[#allocation16 + $0x1d8] sm:$0xff] }
 0x707   :  { %v5580_v12 = vpop.f32.mrb[108].mxu1  ;;  %3389 = vmatprep.subr.bf16.mxu0 %v5091_v27  ;;  %3462 = vmatprep.subr.bf16.mxu1 %v5093_v1  ;;  %v2876_v21 = vld [vmem:[#allocation16 + $0x1f8] sm:$0xff]  ;;  %v5122_v27 = vcombine.low %v2863_v10, %v2867_v58  ;;  %v5124_v1 = vcombine.low %v2864_v53, %v2868_v55 }
 0x708   :  { %v2795_v15 = vadd.f32 %v5580_v12, %v6702_v39  ;;  %v2786_v19 = vpop.f32.mrb[109].mxu1  ;;  %v5133_v7 = vcombine.high %v2872_v62, %v2876_v21  ;;  %v5132_v8 = vcombine.low %v2872_v62, %v2876_v21  ;;  %v5779_v12 = vld [vmem:[#allocation17 + $0x14] ss:$8 sps:$4 sm:$0xff]  }
 0x709   :  { %v2787_v26 = vadd.f32 %v6702_v39, %v2786_v19  ;;  %v5581_v28 = vpop.f32.mrb[110].mxu1  ;;  %3282 = vmatmul.mubr.bf16.gmra.mrb[52].mxu0 %v6708_v61  ;;  %3355 = vmatmul.mubr.bf16.gmra.mrb[116].mxu1 %v6708_v61  ;;  %v5788_v19 = vld [vmem:[#allocation17 + $0x44] ss:$8 sps:$4 sm:$0xff]  }
 0x70a   :  { %v2798_v29 = vadd.f32 %v5581_v28, %v6702_v39  ;;  %v2789_v30 = vpop.f32.mrb[111].mxu1  ;;  %3390 = vmatpush1.bf16.msra.mxu0 %v5090_v9  ;;  %3463 = vmatpush1.bf16.msra.mxu1 %v5092_v11  ;;  %v2807_v24 = vmax.f32 %v2795_v15, 0.0  ;;  %v5776_v9 = vld [vmem:[#allocation17 + $0x4] ss:$8 sps:$4 sm:$0xff]   ;;  %v5774_v11 = vld [vmem:[#allocation17] ss:$8 sps:$4 sm:$0xff]  }
 0x70b   :  { %v2790_v34 = vadd.f32 %v6702_v39, %v2789_v30  ;;  %3391 = vmatprep.subr.bf16.mxu0 %v5099_v13  ;;  %3464 = vmatprep.subr.bf16.mxu1 %v5101_v14  ;;  %v2805_v50 = vmax.f32 %v2787_v26, 0.0  ;;  %v5106_v39 = vcombine.low %v2847_v59, %v2851_v20  ;;  %v5777_v13 = vld [vmem:[#allocation17 + $0x10] ss:$8 sps:$4 sm:$0xff]   ;;  %v5782_v14 = vld [vmem:[#allocation17 + $0x24] ss:$8 sps:$4 sm:$0xff]  }
 0x70c   :  { %v2808_v46 = vmax.f32 %v2798_v29, 0.0  ;;  %3291 = vmatprep.mubr.bf16.mxu0 %v6310_v35  ;;  %3364 = vmatprep.mubr.bf16.mxu1 %v6310_v35  ;;  %v5780_v59 = vld [vmem:[#allocation17 + $0x20] ss:$8 sps:$4 sm:$0xff]   ;;  %v5785_v15 = vld [vmem:[#allocation17 + $0x34] ss:$8 sps:$4 sm:$0xff]  }
 0x70d   :  { %v2806_v18 = vmax.f32 %v2790_v34, 0.0  ;;  %v5786_v20 = vld [vmem:[#allocation17 + $0x40] ss:$8 sps:$4 sm:$0xff]   ;;  %v5797_v28 = vld [vmem:[#allocation17 + $0x74] ss:$8 sps:$4 sm:$0xff]  }
 0x70e   :  { %v6724_v51 = vpack.c.bf16 %v2808_v46, %v2807_v24  ;;  %3392 = vmatpush1.bf16.msra.mxu0 %v5098_v32  ;;  %3465 = vmatpush1.bf16.msra.mxu1 %v5100_v33  ;;  %v5792_v26 = vld [vmem:[#allocation17 + $0x60] ss:$8 sps:$4 sm:$0xff]   ;;  %v5795_v29 = vld [vmem:[#allocation17 + $0x70] ss:$8 sps:$4 sm:$0xff]   ;;  %v5800_v30 = vld [vmem:[#allocation17 + $0x84] ss:$8 sps:$4 sm:$0xff]  }
 0x70f   :  { %v6726_v54 = vpack.c.bf16 %v2806_v18, %v2805_v50  ;;  %3393 = vmatprep.subr.bf16.mxu0 %v5107_v40  ;;  %3466 = vmatprep.subr.bf16.mxu1 %v5109_v22  ;;  %v5798_v32 = vld [vmem:[#allocation17 + $0x80] ss:$8 sps:$4 sm:$0xff]   ;;  %v5801_v33 = vld [vmem:[#allocation17 + $0x90] ss:$8 sps:$4 sm:$0xff]   ;;  %v5806_v34 = vld [vmem:[#allocation17 + $0xa4] ss:$8 sps:$4 sm:$0xff]  }
 0x710   :  { %v5804_v40 = vld [vmem:[#allocation17 + $0xa0] ss:$8 sps:$4 sm:$0xff]   ;;  %v5809_v22 = vld [vmem:[#allocation17 + $0xb4] ss:$8 sps:$4 sm:$0xff]   ;;  %v5812_v24 = vld [vmem:[#allocation17 + $0xc4] ss:$8 sps:$4 sm:$0xff]  }
 0x711   :  { %3292 = vmatmul.mubr.bf16.gmra.mrb[56].mxu0 %v6726_v54  ;;  %3365 = vmatmul.mubr.bf16.gmra.mrb[120].mxu1 %v6726_v54  ;;  %v5810_v46 = vld [vmem:[#allocation17 + $0xc0] ss:$8 sps:$4 sm:$0xff]   ;;  %v5821_v18 = vld [vmem:[#allocation17 + $0xf4] ss:$8 sps:$4 sm:$0xff]  }
 0x712   :  { %3394 = vmatpush1.bf16.msra.mxu0 %v5106_v39  ;;  %3467 = vmatpush1.bf16.msra.mxu1 %v5108_v41  ;;  %v5816_v50 = vld [vmem:[#allocation17 + $0xe0] ss:$8 sps:$4 sm:$0xff]   ;;  %v5824_v39 = vld [vmem:[#allocation17 + $0x104] ss:$8 sps:$4 sm:$0xff]   ;;  %v6753_v41 = vld [vmem:[%s6980_s14] sm:$0xff] }
 0x713   :  { %3395 = vmatprep.subr.bf16.mxu0 %v5115_v57  ;;  %3468 = vmatprep.subr.bf16.mxu1 %v5117_v44  ;;  %v6762_v57 = vrot.slane %v6753_v41, %v340_v60  ;;  %v6766_v44 = vrot.slane %v6753_v41, %v6609_v5  ;;  %v6771_v10 = vrot.slane %v6753_v41, %v344_v37 }
 0x714   :  { %3301 = vmatprep.mubr.bf16.mxu0 %v6310_v35  ;;  %3374 = vmatprep.mubr.bf16.mxu1 %v6310_v35 }
 0x716   :  { %3396 = vmatpush1.bf16.msra.mxu0 %v5114_v16  ;;  %3469 = vmatpush1.bf16.msra.mxu1 %v5116_v17 }
 0x717   :  { %3397 = vmatprep.subr.bf16.mxu0 %v5123_v3  ;;  %3470 = vmatprep.subr.bf16.mxu1 %v5125_v4 }
 0x719   :  { %3302 = vmatmul.mubr.bf16.gmra.mrb[60].mxu0 %v6724_v51  ;;  %3375 = vmatmul.mubr.bf16.gmra.mrb[124].mxu1 %v6724_v51 }
 0x71a   :  { %3398 = vmatpush1.bf16.msra.mxu0 %v5122_v27  ;;  %3471 = vmatpush1.bf16.msra.mxu1 %v5124_v1 }
 0x71b   :  { %3399 = vmatprep.subr.bf16.mxu0 %v5131_v6  ;;  %3472 = vmatprep.subr.bf16.mxu1 %v5133_v7 }
 0x71c   :  { %3417 = vmatprep.mubr.bf16.mxu0 %v6310_v35  ;;  %3490 = vmatprep.mubr.bf16.mxu1 %v6310_v35 }
 0x71e   :  { %3400 = vmatpush1.bf16.msra.mxu0 %v5130_v31  ;;  %3473 = vmatpush1.bf16.msra.mxu1 %v5132_v8 }
 0x71f   :  { %4407 = vmatprep.subr.bf16.mxu0 %v5776_v9 }
 0x721   :  { %3418 = vmatmul.mubr.bf16.vlgmr.msra.gmra.mrb[64].mxu0 %v6710_v38  ;;  %3491 = vmatmul.mubr.bf16.vlgmr.msra.gmra.mrb[128].mxu1 %v6710_v38  ;;  %v5783_v38 = vld [vmem:[#allocation17 + $0x30] ss:$8 sps:$4 sm:$0xff]  }
 0x722   :  { %3427 = vmatprep.mubr.bf16.mxu0 %v6310_v35  ;;  %3500 = vmatprep.mubr.bf16.mxu1 %v6310_v35 }
 0x723   :  { %4408 = vmatpush1.bf16.msra.mxu0 %v5774_v11 }
 0x724   :  { %4409 = vmatprep.subr.bf16.mxu0 %v5779_v12 }
 0x727   :  { %4410 = vmatpush1.bf16.msra.mxu0 %v5777_v13 }
 0x728   :  { %4411 = vmatprep.subr.bf16.mxu0 %v5782_v14 }
 0x729   :  { %3428 = vmatmul.mubr.bf16.gmra.mrb[68].mxu0 %v6708_v61  ;;  %3501 = vmatmul.mubr.bf16.gmra.mrb[132].mxu1 %v6708_v61  ;;  %v5789_v61 = vld [vmem:[#allocation17 + $0x50] ss:$8 sps:$4 sm:$0xff]  }
 0x72a   :  { %3437 = vmatprep.mubr.bf16.mxu0 %v6310_v35  ;;  %3510 = vmatprep.mubr.bf16.mxu1 %v6310_v35 }
 0x72b   :  { %4412 = vmatpush1.bf16.msra.mxu0 %v5780_v59 }
 0x72c   :  { %4413 = vmatprep.subr.bf16.mxu0 %v5785_v15 }
 0x72f   :  { %4414 = vmatpush1.bf16.msra.mxu0 %v5783_v38 }
 0x730   :  { %4415 = vmatprep.subr.bf16.mxu0 %v5788_v19 }
 0x731   :  { %3438 = vmatmul.mubr.bf16.gmra.mrb[72].mxu0 %v6726_v54  ;;  %3511 = vmatmul.mubr.bf16.gmra.mrb[136].mxu1 %v6726_v54  ;;  %v6757_v54 = vrot.slane %v6753_v41, %v6604_v56 }
 0x732   :  { %3447 = vmatprep.mubr.bf16.mxu0 %v6310_v35  ;;  %3520 = vmatprep.mubr.bf16.mxu1 %v6310_v35  ;;  %v5803_v35 = vld [vmem:[#allocation17 + $0x94] ss:$8 sps:$4 sm:$0xff]  }
 0x733   :  { %4416 = vmatpush1.bf16.msra.mxu0 %v5786_v20 }
 0x734   :  { %4417 = vmatprep.subr.bf16.mxu0 %v5791_v23 }
 0x737   :  { %4418 = vmatpush1.bf16.msra.mxu0 %v5789_v61  ;;  %v5822_v61 = vld [vmem:[#allocation17 + $0x100] ss:$8 sps:$4 sm:$0xff]  }
 0x738   :  { %4419 = vmatprep.subr.bf16.mxu0 %v5794_v25 }
 0x739   :  { %3448 = vmatmul.mubr.bf16.gmra.mrb[76].mxu0 %v6724_v51  ;;  %3521 = vmatmul.mubr.bf16.gmra.mrb[140].mxu1 %v6724_v51  ;;  %v5819_v51 = vld [vmem:[#allocation17 + $0xf0] ss:$8 sps:$4 sm:$0xff]  }
 0x73b   :  { %4420 = vmatpush1.bf16.msra.mxu0 %v5792_v26 }
 0x73c   :  { %4421 = vmatprep.subr.bf16.mxu0 %v5797_v28 }
 0x73f   :  { %4422 = vmatpush1.bf16.msra.mxu0 %v5795_v29 }
 0x740   :  { %4423 = vmatprep.subr.bf16.mxu0 %v5800_v30  ;;  %v5827_v30 = vld [vmem:[#allocation17 + $0x114] ss:$8 sps:$4 sm:$0xff]  }
 0x743   :  { %4424 = vmatpush1.bf16.msra.mxu0 %v5798_v32 }
 0x744   :  { %4425 = vmatprep.subr.bf16.mxu0 %v5803_v35 }
 0x747   :  { %4426 = vmatpush1.bf16.msra.mxu0 %v5801_v33 }
 0x748   :  { %4427 = vmatprep.subr.bf16.mxu0 %v5806_v34 }
 0x74b   :  { %4428 = vmatpush1.bf16.msra.mxu0 %v5804_v40 }
 0x74c   :  { %4429 = vmatprep.subr.bf16.mxu0 %v5809_v22 }
 0x74f   :  { %4430 = vmatpush1.bf16.msra.mxu0 %v5807_v45 }
 0x750   :  { %4431 = vmatprep.subr.bf16.mxu0 %v5812_v24 }
 0x753   :  { %4432 = vmatpush1.bf16.msra.mxu0 %v5810_v46 }
 0x754   :  { %4433 = vmatprep.subr.bf16.mxu0 %v5815_v47 }
 0x757   :  { %4434 = vmatpush1.bf16.msra.mxu0 %v5813_v48  ;;  %v5825_v48 = vld [vmem:[#allocation17 + $0x110] ss:$8 sps:$4 sm:$0xff]  }
 0x758   :  { %4435 = vmatprep.subr.bf16.mxu0 %v5818_v49 }
 0x75b   :  { %4436 = vmatpush1.bf16.msra.mxu0 %v5816_v50 }
 0x75c   :  { %4437 = vmatprep.subr.bf16.mxu0 %v5821_v18 }
 0x75f   :  { %4438 = vmatpush1.bf16.msra.mxu0 %v5819_v51 }
 0x760   :  { %4480 = vmatprep.subr.bf16.mxu0 %v5824_v39  ;;  %v5830_v39 = vld [vmem:[#allocation17 + $0x124] ss:$8 sps:$4 sm:$0xff]  }
 0x7d4   :  { %v3273_v58 = vpop.f32.mrb[48].mxu0  ;;  %v3346_v53 = vpop.f32.mrb[112].mxu1 }
 0x7d5   :  { %v3274_v55 = vadd.f32 %v3273_v58, %v6757_v54  ;;  %v3347_v16 = vadd.f32 %v3346_v53, %v6762_v57  ;;  %v3275_v17 = vpop.f32.mrb[49].mxu0  ;;  %v3348_v3 = vpop.f32.mrb[113].mxu1 }
 0x7d6   :  { %v3276_v60 = vadd.f32 %v3275_v17, %v6766_v44  ;;  %v3349_v4 = vadd.f32 %v3348_v3, %v6771_v10  ;;  %v3277_v63 = vpop.f32.mrb[50].mxu0  ;;  %v3350_v0 = vpop.f32.mrb[114].mxu1 }
 0x7d7   :  { %v3278_v62 = vadd.f32 %v3277_v63, %v6757_v54  ;;  %v3351_v21 = vadd.f32 %v3350_v0, %v6762_v57  ;;  %v3279_v37 = vpop.f32.mrb[51].mxu0  ;;  %v3352_v27 = vpop.f32.mrb[115].mxu1  ;;  %v3531_v7 = vmax.f32 %v3274_v55, 0.0  ;;  %v3533_v31 = vmax.f32 %v3347_v16, 0.0 }
 0x7d8   :  { %v3280_v1 = vadd.f32 %v3279_v37, %v6766_v44  ;;  %v3353_v6 = vadd.f32 %v3352_v27, %v6771_v10  ;;  %v3532_v11 = vmax.f32 %v3276_v60, 0.0  ;;  %v3534_v12 = vmax.f32 %v3349_v4, 0.0 }
 0x7d9   :  { %v3539_v8 = vmax.f32 %v3278_v62, 0.0  ;;  %v3541_v9 = vmax.f32 %v3351_v21, 0.0  ;;  %v5828_v62 = vld [vmem:[#allocation17 + $0x120] ss:$8 sps:$4 sm:$0xff]  }
 0x7da   :  { %v3540_v13 = vmax.f32 %v3280_v1, 0.0  ;;  %v3542_v14 = vmax.f32 %v3353_v6, 0.0  ;;  %v5833_v6 = vld [vmem:[#allocation17 + $0x134] ss:$8 sps:$4 sm:$0xff]  }
 0x7db   :  { %v3595_v59 = vpack.c.bf16 %v3539_v8, %v3531_v7  ;;  %v6781_v15 = vpack.c.bf16 %v3541_v9, %v3533_v31 }
 0x7dc   :  { %v3596_v38 = vpack.c.bf16 %v3540_v13, %v3532_v11  ;;  %v6783_v19 = vpack.c.bf16 %v3542_v14, %v3534_v12  ;;  %v3283_v20 = vpop.f32.mrb[52].mxu0  ;;  %v3356_v23 = vpop.f32.mrb[116].mxu1 }
 0x7dd   :  { %v3284_v25 = vadd.f32 %v3283_v20, %v6757_v54  ;;  %v3357_v26 = vadd.f32 %v3356_v23, %v6762_v57  ;;  %v3285_v28 = vpop.f32.mrb[53].mxu0  ;;  %v3358_v29 = vpop.f32.mrb[117].mxu1  ;;  %v5831_v20 = vld [vmem:[#allocation17 + $0x130] ss:$8 sps:$4 sm:$0xff]  }
 0x7de   :  { %v3286_v32 = vadd.f32 %v3285_v28, %v6766_v44  ;;  %v3359_v35 = vadd.f32 %v3358_v29, %v6771_v10  ;;  %v3287_v33 = vpop.f32.mrb[54].mxu0  ;;  %v3360_v34 = vpop.f32.mrb[118].mxu1  ;;  %4439 = vmatprep.mubr.bf16.mxu0 %v3596_v38  ;;  %v5836_v28 = vld [vmem:[#allocation17 + $0x144] ss:$8 sps:$4 sm:$0xff]  }
 0x7df   :  { %v3288_v40 = vadd.f32 %v3287_v33, %v6757_v54  ;;  %v3361_v22 = vadd.f32 %v3360_v34, %v6762_v57  ;;  %v3289_v45 = vpop.f32.mrb[55].mxu0  ;;  %v3362_v24 = vpop.f32.mrb[119].mxu1  ;;  %4440 = vmatmul.mubr.bf16.vlgmr.msra.gmra.mrb[80].mxu0 %v3595_v59  ;;  %v3547_v49 = vmax.f32 %v3284_v25, 0.0  ;;  %v3549_v50 = vmax.f32 %v3357_v26, 0.0 }
 0x7e0   :  { %v3290_v46 = vadd.f32 %v3289_v45, %v6766_v44  ;;  %v3363_v47 = vadd.f32 %v3362_v24, %v6771_v10  ;;  %4481 = vmatpush1.bf16.msra.mxu0 %v5822_v61  ;;  %v3548_v58 = vmax.f32 %v3286_v32, 0.0  ;;  %v3550_v53 = vmax.f32 %v3359_v35, 0.0 }
 0x7e1   :  { %v3555_v18 = vmax.f32 %v3288_v40, 0.0  ;;  %v3557_v51 = vmax.f32 %v3361_v22, 0.0  ;;  %4482 = vmatprep.subr.bf16.mxu0 %v5827_v30 }
 0x7e2   :  { %v3556_v55 = vmax.f32 %v3290_v46, 0.0  ;;  %v3558_v16 = vmax.f32 %v3363_v47, 0.0  ;;  %v5834_v46 = vld [vmem:[#allocation17 + $0x140] ss:$8 sps:$4 sm:$0xff]  }
 0x7e3   :  { %v3603_v17 = vpack.c.bf16 %v3555_v18, %v3547_v49  ;;  %v6793_v3 = vpack.c.bf16 %v3557_v51, %v3549_v50  ;;  %v5839_v18 = vld [vmem:[#allocation17 + $0x154] ss:$8 sps:$4 sm:$0xff]  }
 0x7e4   :  { %v3604_v60 = vpack.c.bf16 %v3556_v55, %v3548_v58  ;;  %v6795_v4 = vpack.c.bf16 %v3558_v16, %v3550_v53  ;;  %4483 = vmatpush1.bf16.msra.mxu0 %v5825_v48  ;;  %v3293_v63 = vpop.f32.mrb[56].mxu0  ;;  %v3366_v0 = vpop.f32.mrb[120].mxu1 }
 0x7e5   :  { %v3294_v21 = vadd.f32 %v3293_v63, %v6757_v54  ;;  %v3367_v37 = vadd.f32 %v3366_v0, %v6762_v57  ;;  %v3295_v27 = vpop.f32.mrb[57].mxu0  ;;  %v3368_v1 = vpop.f32.mrb[121].mxu1  ;;  %4484 = vmatprep.subr.bf16.mxu0 %v5830_v39  ;;  %v6818_v63 = vrot.slane %v6753_v41, %v348_v2  ;;  %v6823_v0 = vrot.slane %v6753_v41, %v356_v42 }
 0x7e6   :  { %v3296_v7 = vadd.f32 %v3295_v27, %v6766_v44  ;;  %v3369_v31 = vadd.f32 %v3368_v1, %v6771_v10  ;;  %v3297_v8 = vpop.f32.mrb[58].mxu0  ;;  %v3370_v9 = vpop.f32.mrb[122].mxu1  ;;  %4449 = vmatprep.mubr.bf16.mxu0 %v3604_v60  ;;  %v6835_v2 = vrot.slane %v6753_v41, %v360_v43 }
 0x7e7   :  { %v3298_v11 = vadd.f32 %v3297_v8, %v6757_v54  ;;  %v3371_v12 = vadd.f32 %v3370_v9, %v6762_v57  ;;  %v3299_v13 = vpop.f32.mrb[59].mxu0  ;;  %v3372_v14 = vpop.f32.mrb[123].mxu1  ;;  %4450 = vmatmul.mubr.bf16.gmra.mrb[84].mxu0 %v3603_v17  ;;  %v3563_v23 = vmax.f32 %v3294_v21, 0.0  ;;  %v3565_v61 = vmax.f32 %v3367_v37, 0.0 }
 0x7e8   :  { %v3300_v59 = vadd.f32 %v3299_v13, %v6766_v44  ;;  %v3373_v38 = vadd.f32 %v3372_v14, %v6771_v10  ;;  %4485 = vmatpush1.bf16.msra.mxu0 %v5828_v62  ;;  %v3564_v29 = vmax.f32 %v3296_v7, 0.0  ;;  %v3566_v30 = vmax.f32 %v3369_v31, 0.0 }
 0x7e9   :  { %v3571_v25 = vmax.f32 %v3298_v11, 0.0  ;;  %v3573_v26 = vmax.f32 %v3371_v12, 0.0  ;;  %4486 = vmatprep.subr.bf16.mxu0 %v5833_v6 }
 0x7ea   :  { %v3572_v32 = vmax.f32 %v3300_v59, 0.0  ;;  %v3574_v35 = vmax.f32 %v3373_v38, 0.0  ;;  %v5845_v38 = vld [vmem:[#allocation17 + $0x174] ss:$8 sps:$4 sm:$0xff]  }
 0x7eb   :  { %v3611_v33 = vpack.c.bf16 %v3571_v25, %v3563_v23  ;;  %v6805_v34 = vpack.c.bf16 %v3573_v26, %v3565_v61 }
 0x7ec   :  { %v3612_v40 = vpack.c.bf16 %v3572_v32, %v3564_v29  ;;  %v6807_v22 = vpack.c.bf16 %v3574_v35, %v3566_v30  ;;  %4487 = vmatpush1.bf16.msra.mxu0 %v5831_v20  ;;  %v3303_v45 = vpop.f32.mrb[60].mxu0  ;;  %v3376_v24 = vpop.f32.mrb[124].mxu1 }
 0x7ed   :  { %v3304_v47 = vadd.f32 %v3303_v45, %v6757_v54  ;;  %v3377_v48 = vadd.f32 %v3376_v24, %v6762_v57  ;;  %v3305_v49 = vpop.f32.mrb[61].mxu0  ;;  %v3378_v50 = vpop.f32.mrb[125].mxu1  ;;  %4488 = vmatprep.subr.bf16.mxu0 %v5836_v28 }
 0x7ee   :  { %v3306_v51 = vadd.f32 %v3305_v49, %v6766_v44  ;;  %v3379_v39 = vadd.f32 %v3378_v50, %v6771_v10  ;;  %v3307_v58 = vpop.f32.mrb[62].mxu0  ;;  %v3380_v53 = vpop.f32.mrb[126].mxu1  ;;  %4459 = vmatprep.mubr.bf16.mxu0 %v3612_v40 }
 0x7ef   :  { %v3308_v55 = vadd.f32 %v3307_v58, %v6757_v54  ;;  %v3381_v16 = vadd.f32 %v3380_v53, %v6762_v57  ;;  %v3309_v17 = vpop.f32.mrb[63].mxu0  ;;  %v3382_v60 = vpop.f32.mrb[127].mxu1  ;;  %4460 = vmatmul.mubr.bf16.gmra.mrb[88].mxu0 %v3611_v33  ;;  %v5837_v54 = vld [vmem:[#allocation17 + $0x150] ss:$8 sps:$4 sm:$0xff]   ;;  %v6830_v57 = vrot.slane %v6753_v41, %v352_v36  ;;  %v3579_v37 = vmax.f32 %v3304_v47, 0.0 }
 0x7f0   :  { %v3310_v62 = vadd.f32 %v3309_v17, %v6766_v44  ;;  %v3383_v21 = vadd.f32 %v3382_v60, %v6771_v10  ;;  %4489 = vmatpush1.bf16.msra.mxu0 %v5834_v46  ;;  %v3581_v27 = vmax.f32 %v3377_v48, 0.0  ;;  %v5842_v44 = vld [vmem:[#allocation17 + $0x164] ss:$8 sps:$4 sm:$0xff]   ;;  %v3580_v6 = vmax.f32 %v3306_v51, 0.0  ;;  %v5840_v41 = vld [vmem:[#allocation17 + $0x160] ss:$8 sps:$4 sm:$0xff]  }
 0x7f1   :  { %v3587_v42 = vmax.f32 %v3308_v55, 0.0  ;;  %v3589_v1 = vmax.f32 %v3381_v16, 0.0  ;;  %4490 = vmatprep.subr.bf16.mxu0 %v5839_v18  ;;  %v3582_v10 = vmax.f32 %v3379_v39, 0.0  ;;  %v5843_v33 = vld [vmem:[#allocation17 + $0x170] ss:$8 sps:$4 sm:$0xff]  }
 0x7f2   :  { %v3588_v7 = vmax.f32 %v3310_v62, 0.0  ;;  %v3590_v31 = vmax.f32 %v3383_v21, 0.0  ;;  %v5848_v47 = vld [vmem:[#allocation17 + $0x184] ss:$8 sps:$4 sm:$0xff]   ;;  %v5846_v16 = vld [vmem:[#allocation17 + $0x180] ss:$8 sps:$4 sm:$0xff]  }
 0x7f3   :  { %v3619_v8 = vpack.c.bf16 %v3587_v42, %v3579_v37  ;;  %v6837_v9 = vpack.c.bf16 %v3589_v1, %v3581_v27 }
 0x7f4   :  { %v3620_v36 = vpack.c.bf16 %v3588_v7, %v3580_v6  ;;  %v6839_v11 = vpack.c.bf16 %v3590_v31, %v3582_v10  ;;  %4491 = vmatpush1.bf16.msra.mxu0 %v5837_v54  ;;  %v3419_v52 = vpop.f32.mrb[64].mxu0  ;;  %v3492_v43 = vpop.f32.mrb[128].mxu1  ;;  %v5851_v54 = vld [vmem:[#allocation17 + $0x194] ss:$8 sps:$4 sm:$0xff]  }
 0x7f5   :  { %v3420_v12 = vadd.f32 %v3419_v52, %v6818_v63  ;;  %v3493_v13 = vadd.f32 %v3492_v43, %v6823_v0  ;;  %v3421_v14 = vpop.f32.mrb[65].mxu0  ;;  %v3494_v59 = vpop.f32.mrb[129].mxu1  ;;  %4492 = vmatprep.subr.bf16.mxu0 %v5842_v44 }
 0x7f6   :  { %v3422_v20 = vadd.f32 %v3421_v14, %v6830_v57  ;;  %v3495_v23 = vadd.f32 %v3494_v59, %v6835_v2  ;;  %v3423_v61 = vpop.f32.mrb[66].mxu0  ;;  %v3496_v25 = vpop.f32.mrb[130].mxu1  ;;  %4469 = vmatprep.mubr.bf16.mxu0 %v3620_v36  ;;  %v5849_v36 = vld [vmem:[#allocation17 + $0x190] ss:$8 sps:$4 sm:$0xff]  }
 0x7f7   :  { %v3424_v26 = vadd.f32 %v3423_v61, %v6818_v63  ;;  %v3497_v28 = vadd.f32 %v3496_v25, %v6823_v0  ;;  %v3425_v29 = vpop.f32.mrb[67].mxu0  ;;  %v3498_v30 = vpop.f32.mrb[131].mxu1  ;;  %4470 = vmatmul.mubr.bf16.gmra.mrb[92].mxu0 %v3619_v8  ;;  %v3535_v40 = vmax.f32 %v3420_v12, 0.0  ;;  %v3537_v45 = vmax.f32 %v3493_v13, 0.0  ;;  %v5854_v13 = vld [vmem:[#allocation17 + $0x1a4] ss:$8 sps:$4 sm:$0xff]  }
 0x7f8   :  { %v3426_v32 = vadd.f32 %v3425_v29, %v6830_v57  ;;  %v3499_v35 = vadd.f32 %v3498_v30, %v6835_v2  ;;  %4493 = vmatpush1.bf16.msra.mxu0 %v5840_v41  ;;  %4512 = vmatprep.mubr.bf16.mxu0 %v6783_v19  ;;  %v3536_v48 = vmax.f32 %v3422_v20, 0.0  ;;  %v3538_v49 = vmax.f32 %v3495_v23, 0.0  ;;  %v5852_v30 = vld [vmem:[#allocation17 + $0x1a0] ss:$8 sps:$4 sm:$0xff]  }
 0x7f9   :  { %v3543_v24 = vmax.f32 %v3424_v26, 0.0  ;;  %v3545_v46 = vmax.f32 %v3497_v28, 0.0  ;;  %4494 = vmatprep.subr.bf16.mxu0 %v5845_v38 }
 0x7fa   :  { %v3544_v50 = vmax.f32 %v3426_v32, 0.0  ;;  %v3546_v18 = vmax.f32 %v3499_v35, 0.0 }
 0x7fb   :  { %v6850_v51 = vpack.c.bf16 %v3543_v24, %v3535_v40  ;;  %v6852_v39 = vpack.c.bf16 %v3545_v46, %v3537_v45  ;;  %v5857_v45 = vld [vmem:[#allocation17 + $0x1b4] ss:$8 sps:$4 sm:$0xff]  }
 0x7fc   :  { %v6854_v58 = vpack.c.bf16 %v3544_v50, %v3536_v48  ;;  %v6856_v53 = vpack.c.bf16 %v3546_v18, %v3538_v49  ;;  %4495 = vmatpush1.bf16.msra.mxu0 %v5843_v33  ;;  %v3429_v19 = vpop.f32.mrb[68].mxu0  ;;  %v3502_v55 = vpop.f32.mrb[132].mxu1 }
 0x7fd   :  { %v3430_v17 = vadd.f32 %v3429_v19, %v6818_v63  ;;  %v3503_v60 = vadd.f32 %v3502_v55, %v6823_v0  ;;  %v3431_v62 = vpop.f32.mrb[69].mxu0  ;;  %v3504_v21 = vpop.f32.mrb[133].mxu1  ;;  %4496 = vmatprep.subr.bf16.mxu0 %v5848_v47 }
 0x7fe   :  { %v3432_v37 = vadd.f32 %v3431_v62, %v6830_v57  ;;  %v3505_v27 = vadd.f32 %v3504_v21, %v6835_v2  ;;  %v3433_v42 = vpop.f32.mrb[70].mxu0  ;;  %v3506_v1 = vpop.f32.mrb[134].mxu1 }
 0x7ff   :  { %v3434_v44 = vadd.f32 %v3433_v42, %v6818_v63  ;;  %v3507_v6 = vadd.f32 %v3506_v1, %v6823_v0  ;;  %v3435_v10 = vpop.f32.mrb[71].mxu0  ;;  %v3508_v7 = vpop.f32.mrb[135].mxu1  ;;  %v3551_v52 = vmax.f32 %v3430_v17, 0.0  ;;  %v3553_v43 = vmax.f32 %v3503_v60, 0.0  ;;  %v5855_v17 = vld [vmem:[#allocation17 + $0x1b0] ss:$8 sps:$4 sm:$0xff]  }
 0x800   :  { %v3436_v31 = vadd.f32 %v3435_v10, %v6830_v57  ;;  %v3509_v8 = vadd.f32 %v3508_v7, %v6835_v2  ;;  %4497 = vmatpush1.bf16.msra.mxu0 %v5846_v16  ;;  %v3552_v14 = vmax.f32 %v3432_v37, 0.0  ;;  %v3554_v59 = vmax.f32 %v3505_v27, 0.0  ;;  %v5860_v37 = vld [vmem:[#allocation17 + $0x1c4] ss:$8 sps:$4 sm:$0xff]  }
 0x801   :  { %v3559_v41 = vmax.f32 %v3434_v44, 0.0  ;;  %v3561_v12 = vmax.f32 %v3507_v6, 0.0  ;;  %4498 = vmatprep.subr.bf16.mxu0 %v5851_v54 }
 0x802   :  { %v3560_v38 = vmax.f32 %v3436_v31, 0.0  ;;  %v3562_v20 = vmax.f32 %v3509_v8, 0.0 }
 0x803   :  { %v6866_v23 = vpack.c.bf16 %v3559_v41, %v3551_v52  ;;  %v6868_v61 = vpack.c.bf16 %v3561_v12, %v3553_v43  ;;  %v5858_v52 = vld [vmem:[#allocation17 + $0x1c0] ss:$8 sps:$4 sm:$0xff]  }
 0x804   :  { %v6870_v25 = vpack.c.bf16 %v3560_v38, %v3552_v14  ;;  %v6872_v26 = vpack.c.bf16 %v3562_v20, %v3554_v59  ;;  %4499 = vmatpush1.bf16.msra.mxu0 %v5849_v36  ;;  %v3439_v28 = vpop.f32.mrb[72].mxu0  ;;  %v3512_v29 = vpop.f32.mrb[136].mxu1  ;;  %v5863_v14 = vld [vmem:[#allocation17 + $0x1d4] ss:$8 sps:$4 sm:$0xff]  }
 0x805   :  { %v3440_v32 = vadd.f32 %v3439_v28, %v6818_v63  ;;  %v3513_v35 = vadd.f32 %v3512_v29, %v6823_v0  ;;  %v3441_v33 = vpop.f32.mrb[73].mxu0  ;;  %v3514_v40 = vpop.f32.mrb[137].mxu1  ;;  %4500 = vmatprep.subr.bf16.mxu0 %v5854_v13 }
 0x806   :  { %v3442_v24 = vadd.f32 %v3441_v33, %v6830_v57  ;;  %v3515_v46 = vadd.f32 %v3514_v40, %v6835_v2  ;;  %v3443_v47 = vpop.f32.mrb[74].mxu0  ;;  %v3516_v48 = vpop.f32.mrb[138].mxu1 }
 0x807   :  { %v3444_v49 = vadd.f32 %v3443_v47, %v6818_v63  ;;  %v3517_v50 = vadd.f32 %v3516_v48, %v6823_v0  ;;  %v3445_v18 = vpop.f32.mrb[75].mxu0  ;;  %v3518_v19 = vpop.f32.mrb[139].mxu1  ;;  %v3567_v60 = vmax.f32 %v3440_v32, 0.0  ;;  %v3569_v62 = vmax.f32 %v3513_v35, 0.0 }
 0x808   :  { %v3446_v55 = vadd.f32 %v3445_v18, %v6830_v57  ;;  %v3519_v16 = vadd.f32 %v3518_v19, %v6835_v2  ;;  %4501 = vmatpush1.bf16.msra.mxu0 %v5852_v30  ;;  %v3568_v27 = vmax.f32 %v3442_v24, 0.0  ;;  %v3570_v42 = vmax.f32 %v3515_v46, 0.0 }
 0x809   :  { %v3575_v21 = vmax.f32 %v3444_v49, 0.0  ;;  %v3577_v54 = vmax.f32 %v3517_v50, 0.0  ;;  %4502 = vmatprep.subr.bf16.mxu0 %v5857_v45  ;;  %v5861_v45 = vld [vmem:[#allocation17 + $0x1d0] ss:$8 sps:$4 sm:$0xff]   ;;  %v5866_v49 = vld [vmem:[#allocation17 + $0x1e4] ss:$8 sps:$4 sm:$0xff]  }
 0x80a   :  { %v3576_v1 = vmax.f32 %v3446_v55, 0.0  ;;  %v3578_v44 = vmax.f32 %v3519_v16, 0.0 }
 0x80b   :  { %v6882_v6 = vpack.c.bf16 %v3575_v21, %v3567_v60  ;;  %v6884_v10 = vpack.c.bf16 %v3577_v54, %v3569_v62  ;;  %v5867_v60 = vld [vmem:[#allocation17 + $0x1f0] ss:$8 sps:$4 sm:$0xff]   ;;  %v5872_v62 = vld [vmem:[#allocation17 + $0x204] ss:$8 sps:$4 sm:$0xff]   ;;  %v5870_v21 = vld [vmem:[#allocation17 + $0x200] ss:$8 sps:$4 sm:$0xff]  }
 0x80c   :  { %v6886_v7 = vpack.c.bf16 %v3576_v1, %v3568_v27  ;;  %v6888_v31 = vpack.c.bf16 %v3578_v44, %v3570_v42  ;;  %4503 = vmatpush1.bf16.msra.mxu0 %v5855_v17  ;;  %v3449_v8 = vpop.f32.mrb[76].mxu0  ;;  %v3522_v36 = vpop.f32.mrb[140].mxu1  ;;  %v5869_v17 = vld [vmem:[#allocation17 + $0x1f4] ss:$8 sps:$4 sm:$0xff]   ;;  %v5878_v27 = vld [vmem:[#allocation17 + $0x224] ss:$8 sps:$4 sm:$0xff]  }
 0x80d   :  { %v3450_v43 = vadd.f32 %v3449_v8, %v6818_v63  ;;  %v3523_v41 = vadd.f32 %v3522_v36, %v6823_v0  ;;  %v3451_v12 = vpop.f32.mrb[77].mxu0  ;;  %v3524_v13 = vpop.f32.mrb[141].mxu1  ;;  %4504 = vmatprep.subr.bf16.mxu0 %v5860_v37  ;;  %v5875_v54 = vld [vmem:[#allocation17 + $0x214] ss:$8 sps:$4 sm:$0xff]   ;;  %v5873_v37 = vld [vmem:[#allocation17 + $0x210] ss:$8 sps:$4 sm:$0xff]  }
 0x80e   :  { %v3452_v59 = vadd.f32 %v3451_v12, %v6830_v57  ;;  %v3525_v38 = vadd.f32 %v3524_v13, %v6835_v2  ;;  %v3453_v20 = vpop.f32.mrb[78].mxu0  ;;  %v3526_v28 = vpop.f32.mrb[142].mxu1  ;;  %v5876_v42 = vld [vmem:[#allocation17 + $0x220] ss:$8 sps:$4 sm:$0xff]   ;;  %v5881_v1 = vld [vmem:[#allocation17 + $0x234] ss:$8 sps:$4 sm:$0xff]  }
 0x80f   :  { %v3454_v29 = vadd.f32 %v3453_v20, %v6818_v63  ;;  %v3527_v30 = vadd.f32 %v3526_v28, %v6823_v0  ;;  %v3455_v32 = vpop.f32.mrb[79].mxu0  ;;  %v3528_v35 = vpop.f32.mrb[143].mxu1  ;;  %v3583_v24 = vmax.f32 %v3450_v43, 0.0  ;;  %v3585_v46 = vmax.f32 %v3523_v41, 0.0  ;;  %v5879_v44 = vld [vmem:[#allocation17 + $0x230] ss:$8 sps:$4 sm:$0xff]  }
 0x810   :  { %v3456_v33 = vadd.f32 %v3455_v32, %v6830_v57  ;;  %v3529_v40 = vadd.f32 %v3528_v35, %v6835_v2  ;;  %4505 = vmatpush1.bf16.msra.mxu0 %v5858_v52  ;;  %v3584_v50 = vmax.f32 %v3452_v59, 0.0  ;;  %v3586_v18 = vmax.f32 %v3525_v38, 0.0  ;;  %v5864_v2 = vld [vmem:[#allocation17 + $0x1e0] ss:$8 sps:$4 sm:$0xff]   ;;  %v5884_v8 = vld [vmem:[#allocation17 + $0x244] ss:$8 sps:$4 sm:$0xff]  }
 0x811   :  { %v3591_v47 = vmax.f32 %v3454_v29, 0.0  ;;  %v3593_v48 = vmax.f32 %v3527_v30, 0.0  ;;  %4506 = vmatprep.subr.bf16.mxu0 %v5863_v14  ;;  %v5885_v36 = vld [vmem:[#allocation17 + $0x250] ss:$8 sps:$4 sm:$0xff]   ;;  %v5890_v52 = vld [vmem:[#allocation17 + $0x264] ss:$8 sps:$4 sm:$0xff]  }
 0x812   :  { %v3592_v19 = vmax.f32 %v3456_v33, 0.0  ;;  %v3594_v63 = vmax.f32 %v3529_v40, 0.0  ;;  %v5891_v43 = vld [vmem:[#allocation17 + $0x270] ss:$8 sps:$4 sm:$0xff]   ;;  %v5896_v41 = vld [vmem:[#allocation17 + $0x284] ss:$8 sps:$4 sm:$0xff]  }
 0x813   :  { %v6898_v55 = vpack.c.bf16 %v3591_v47, %v3583_v24  ;;  %v6900_v0 = vpack.c.bf16 %v3593_v48, %v3585_v46  ;;  %v5897_v12 = vld [vmem:[#allocation17 + $0x290] ss:$8 sps:$4 sm:$0xff]   ;;  %v5902_v13 = vld [vmem:[#allocation17 + $0x2a4] ss:$8 sps:$4 sm:$0xff]   ;;  %v5900_v14 = vld [vmem:[#allocation17 + $0x2a0] ss:$8 sps:$4 sm:$0xff]  }
 0x814   :  { %v6902_v16 = vpack.c.bf16 %v3592_v19, %v3584_v50  ;;  %v6904_v57 = vpack.c.bf16 %v3594_v63, %v3586_v18  ;;  %4507 = vmatpush1.bf16.msra.mxu0 %v5861_v45  ;;  %v5905_v59 = vld [vmem:[#allocation17 + $0x2b4] ss:$8 sps:$4 sm:$0xff]   ;;  %v5908_v38 = vld [vmem:[#allocation17 + $0x2c4] ss:$8 sps:$4 sm:$0xff]   ;;  %v5909_v28 = vld [vmem:[#allocation17 + $0x2d0] ss:$8 sps:$4 sm:$0xff]  }
 0x815   :  { %4508 = vmatprep.subr.bf16.mxu0 %v5866_v49  ;;  %v5911_v20 = vld [vmem:[#allocation17 + $0x2d4] ss:$8 sps:$4 sm:$0xff]   ;;  %v5914_v29 = vld [vmem:[#allocation17 + $0x2e4] ss:$8 sps:$4 sm:$0xff]   ;;  %v5912_v30 = vld [vmem:[#allocation17 + $0x2e0] ss:$8 sps:$4 sm:$0xff]  }
 0x816   :  { %v5917_v32 = vld [vmem:[#allocation17 + $0x2f4] ss:$8 sps:$4 sm:$0xff]   ;;  %v5915_v35 = vld [vmem:[#allocation17 + $0x2f0] ss:$8 sps:$4 sm:$0xff]   ;;  %v5920_v33 = vld [vmem:[#allocation17 + $0x304] ss:$8 sps:$4 sm:$0xff]  }
 0x817   :  { %v5918_v40 = vld [vmem:[#allocation17 + $0x300] ss:$8 sps:$4 sm:$0xff]   ;;  %v5923_v45 = vld [vmem:[#allocation17 + $0x314] ss:$8 sps:$4 sm:$0xff]   ;;  %v5921_v24 = vld [vmem:[#allocation17 + $0x310] ss:$8 sps:$4 sm:$0xff]  }
 0x818   :  { %4509 = vmatpush1.bf16.msra.mxu0 %v5864_v2  ;;  %v5926_v46 = vld [vmem:[#allocation17 + $0x324] ss:$8 sps:$4 sm:$0xff]   ;;  %v5924_v47 = vld [vmem:[#allocation17 + $0x320] ss:$8 sps:$4 sm:$0xff]   ;;  %v5929_v48 = vld [vmem:[#allocation17 + $0x334] ss:$8 sps:$4 sm:$0xff]  }
 0x819   :  { %4510 = vmatprep.subr.bf16.mxu0 %v5869_v17  ;;  %v5927_v49 = vld [vmem:[#allocation17 + $0x330] ss:$8 sps:$4 sm:$0xff]   ;;  %v5932_v50 = vld [vmem:[#allocation17 + $0x344] ss:$8 sps:$4 sm:$0xff]  }
 0x81a   :  { %v5933_v18 = vld [vmem:[#allocation17 + $0x350] ss:$8 sps:$4 sm:$0xff]   ;;  %v5938_v19 = vld [vmem:[#allocation17 + $0x364] ss:$8 sps:$4 sm:$0xff]  }
 0x81b   :  { %v5939_v63 = vld [vmem:[#allocation17 + $0x370] ss:$8 sps:$4 sm:$0xff]   ;;  %v5944_v2 = vld [vmem:[#allocation17 + $0x384] ss:$8 sps:$4 sm:$0xff]  }
 0x81c   :  { %4511 = vmatpush1.bf16.msra.mxu0 %v5867_v60  ;;  %v5945_v17 = vld [vmem:[#allocation17 + $0x390] ss:$8 sps:$4 sm:$0xff]   ;;  %v5950_v60 = vld [vmem:[#allocation17 + $0x3a4] ss:$8 sps:$4 sm:$0xff]  }
 0x81d   :  { %4553 = vmatprep.subr.bf16.mxu0 %v5872_v62  ;;  %v5948_v62 = vld [vmem:[#allocation17 + $0x3a0] ss:$8 sps:$4 sm:$0xff]  }
 0x81f   :  { %4513 = vmatmul.mubr.bf16.vlgmr.msra.gmra.mrb[80].mxu0 %v6781_v15  ;;  %v5882_v15 = vld [vmem:[#allocation17 + $0x240] ss:$8 sps:$4 sm:$0xff]  }
 0x820   :  { %4522 = vmatprep.mubr.bf16.mxu0 %v6795_v4  ;;  %4554 = vmatpush1.bf16.msra.mxu0 %v5870_v21  ;;  %v5887_v4 = vld [vmem:[#allocation17 + $0x254] ss:$8 sps:$4 sm:$0xff]  }
 0x821   :  { %4555 = vmatprep.subr.bf16.mxu0 %v5875_v54  ;;  %v5953_v21 = vld [vmem:[#allocation17 + $0x3b4] ss:$8 sps:$4 sm:$0xff]   ;;  %v5956_v54 = vld [vmem:[#allocation17 + $0x3c4] ss:$8 sps:$4 sm:$0xff]  }
 0x824   :  { %4556 = vmatpush1.bf16.msra.mxu0 %v5873_v37  ;;  %v5959_v37 = vld [vmem:[#allocation17 + $0x3d4] ss:$8 sps:$4 sm:$0xff]  }
 0x825   :  { %4557 = vmatprep.subr.bf16.mxu0 %v5878_v27  ;;  %v5957_v27 = vld [vmem:[#allocation17 + $0x3d0] ss:$8 sps:$4 sm:$0xff]  }
 0x827   :  { %4523 = vmatmul.mubr.bf16.gmra.mrb[84].mxu0 %v6793_v3  ;;  %v5888_v3 = vld [vmem:[#allocation17 + $0x260] ss:$8 sps:$4 sm:$0xff]  }
 0x828   :  { %4532 = vmatprep.mubr.bf16.mxu0 %v6807_v22  ;;  %4558 = vmatpush1.bf16.msra.mxu0 %v5876_v42  ;;  %v5893_v22 = vld [vmem:[#allocation17 + $0x274] ss:$8 sps:$4 sm:$0xff]   ;;  %v5962_v42 = vld [vmem:[#allocation17 + $0x3e4] ss:$8 sps:$4 sm:$0xff]  }
 0x829   :  { %4559 = vmatprep.subr.bf16.mxu0 %v5881_v1  ;;  %v5960_v1 = vld [vmem:[#allocation17 + $0x3e0] ss:$8 sps:$4 sm:$0xff]  }
 0x82c   :  { %4560 = vmatpush1.bf16.msra.mxu0 %v5879_v44  ;;  %v5965_v44 = vld [vmem:[#allocation17 + $0x3f4] ss:$8 sps:$4 sm:$0xff]  }
 0x82d   :  { %4561 = vmatprep.subr.bf16.mxu0 %v5884_v8  ;;  %v5963_v8 = vld [vmem:[#allocation17 + $0x3f0] ss:$8 sps:$4 sm:$0xff]  }
 0x82f   :  { %4533 = vmatmul.mubr.bf16.gmra.mrb[88].mxu0 %v6805_v34  ;;  %v5894_v34 = vld [vmem:[#allocation17 + $0x280] ss:$8 sps:$4 sm:$0xff]  }
 0x830   :  { %4542 = vmatprep.mubr.bf16.mxu0 %v6839_v11  ;;  %4562 = vmatpush1.bf16.msra.mxu0 %v5882_v15  ;;  %v5899_v11 = vld [vmem:[#allocation17 + $0x294] ss:$8 sps:$4 sm:$0xff]   ;;  %v3755_v15 = vld [vmem:[%s6982_s16] sm:$0x3]  ;;  %s6311_s16 = smov [#allocation19]  }
 0x831   :  { %4563 = vmatprep.subr.bf16.mxu0 %v5887_v4  ;;  %v6933_v4 = vrot.slane %v3755_v15, %v6604_v56  ;;  %s4816_s9 = sshll.u32 %s6311_s16, 4  ;;  %s4817_s9 = int_to_ptr.vmem [resolvable:$true] %s4816_s9 }
 0x832   :  { %s6258_s25 = scalar_lea.vmem %s4817_s9, 2048  ;;  %p6263_p11 = scmp.lt.s32.totalorder %s4817_s9, %s4817_s9 }
 0x833   :  { %p6259_p10 = scmp.ne.s32.totalorder %s4817_s9, %s6258_s25  ;;  %p6264_p12 = scmp.lt.s32.totalorder %s6258_s25, %s6258_s25 }
 0x834   :  { %4564 = vmatpush1.bf16.msra.mxu0 %v5885_v36 }
 0x835   :  { %4565 = vmatprep.subr.bf16.mxu0 %v5890_v52  ;;  %p6265_p13 = por %p6264_p12, %p6263_p11 }
 0x837   :  { %4543 = vmatmul.mubr.bf16.gmra.mrb[92].mxu0 %v6837_v9  ;;  %v5903_v9 = vld [vmem:[#allocation17 + $0x2b0] ss:$8 sps:$4 sm:$0xff]   ;;  %p6266_p0 = pnand %p6265_p13, %p6259_p10 }
 0x838   :  { %4566 = vmatpush1.bf16.msra.mxu0 %v5888_v3  ;;  %4585 = vmatprep.mubr.bf16.mxu0 %v6854_v58  ;;  %v5906_v58 = vld [vmem:[#allocation17 + $0x2c0] ss:$8 sps:$4 sm:$0xff]  }
 0x839   :  { %4567 = vmatprep.subr.bf16.mxu0 %v5893_v22 }
 0x83c   :  { %4568 = vmatpush1.bf16.msra.mxu0 %v5891_v43 }
 0x83d   :  { %4569 = vmatprep.subr.bf16.mxu0 %v5896_v41 }
 0x840   :  { %4570 = vmatpush1.bf16.msra.mxu0 %v5894_v34 }
 0x841   :  { %4571 = vmatprep.subr.bf16.mxu0 %v5899_v11 }
 0x844   :  { %4572 = vmatpush1.bf16.msra.mxu0 %v5897_v12 }
 0x845   :  { %4573 = vmatprep.subr.bf16.mxu0 %v5902_v13 }
 0x848   :  { %4574 = vmatpush1.bf16.msra.mxu0 %v5900_v14 }
 0x849   :  { %4575 = vmatprep.subr.bf16.mxu0 %v5905_v59 }
 0x84c   :  { %4576 = vmatpush1.bf16.msra.mxu0 %v5903_v9 }
 0x84d   :  { %4577 = vmatprep.subr.bf16.mxu0 %v5908_v38 }
 0x850   :  { %4578 = vmatpush1.bf16.msra.mxu0 %v5906_v58 }
 0x851   :  { %4579 = vmatprep.subr.bf16.mxu0 %v5911_v20 }
 0x854   :  { %4580 = vmatpush1.bf16.msra.mxu0 %v5909_v28 }
 0x855   :  { %4581 = vmatprep.subr.bf16.mxu0 %v5914_v29 }
 0x858   :  { %4582 = vmatpush1.bf16.msra.mxu0 %v5912_v30 }
 0x859   :  { %4583 = vmatprep.subr.bf16.mxu0 %v5917_v32 }
 0x85c   :  { %4584 = vmatpush1.bf16.msra.mxu0 %v5915_v35 }
 0x85d   :  { %4626 = vmatprep.subr.bf16.mxu0 %v5920_v33 }
 0x85f   :  { %4586 = vmatmul.mubr.bf16.vlgmr.msra.gmra.mrb[80].mxu0 %v6850_v51  ;;  %v5930_v51 = vld [vmem:[#allocation17 + $0x340] ss:$8 sps:$4 sm:$0xff]  }
 0x860   :  { %4595 = vmatprep.mubr.bf16.mxu0 %v6870_v25  ;;  %4627 = vmatpush1.bf16.msra.mxu0 %v5918_v40  ;;  %v5935_v25 = vld [vmem:[#allocation17 + $0x354] ss:$8 sps:$4 sm:$0xff]  }
 0x861   :  { %4628 = vmatprep.subr.bf16.mxu0 %v5923_v45 }
 0x864   :  { %4629 = vmatpush1.bf16.msra.mxu0 %v5921_v24 }
 0x865   :  { %4630 = vmatprep.subr.bf16.mxu0 %v5926_v46 }
 0x867   :  { %4596 = vmatmul.mubr.bf16.gmra.mrb[84].mxu0 %v6866_v23  ;;  %v5936_v23 = vld [vmem:[#allocation17 + $0x360] ss:$8 sps:$4 sm:$0xff]  }
 0x868   :  { %4605 = vmatprep.mubr.bf16.mxu0 %v6886_v7  ;;  %4631 = vmatpush1.bf16.msra.mxu0 %v5924_v47  ;;  %v5941_v7 = vld [vmem:[#allocation17 + $0x374] ss:$8 sps:$4 sm:$0xff]  }
 0x869   :  { %4632 = vmatprep.subr.bf16.mxu0 %v5929_v48 }
 0x86c   :  { %4633 = vmatpush1.bf16.msra.mxu0 %v5927_v49 }
 0x86d   :  { %4634 = vmatprep.subr.bf16.mxu0 %v5932_v50 }
 0x86f   :  { %4606 = vmatmul.mubr.bf16.gmra.mrb[88].mxu0 %v6882_v6  ;;  %v5942_v6 = vld [vmem:[#allocation17 + $0x380] ss:$8 sps:$4 sm:$0xff]  }
 0x870   :  { %4615 = vmatprep.mubr.bf16.mxu0 %v6902_v16  ;;  %4635 = vmatpush1.bf16.msra.mxu0 %v5930_v51  ;;  %v5947_v16 = vld [vmem:[#allocation17 + $0x394] ss:$8 sps:$4 sm:$0xff]  }
 0x871   :  { %4636 = vmatprep.subr.bf16.mxu0 %v5935_v25 }
 0x874   :  { %4637 = vmatpush1.bf16.msra.mxu0 %v5933_v18 }
 0x875   :  { %4638 = vmatprep.subr.bf16.mxu0 %v5938_v19 }
 0x877   :  { %4616 = vmatmul.mubr.bf16.gmra.mrb[92].mxu0 %v6898_v55  ;;  %v5951_v55 = vld [vmem:[#allocation17 + $0x3b0] ss:$8 sps:$4 sm:$0xff]  }
 0x878   :  { %4639 = vmatpush1.bf16.msra.mxu0 %v5936_v23  ;;  %4658 = vmatprep.mubr.bf16.mxu0 %v6856_v53  ;;  %v5954_v53 = vld [vmem:[#allocation17 + $0x3c0] ss:$8 sps:$4 sm:$0xff]  }
 0x879   :  { %4640 = vmatprep.subr.bf16.mxu0 %v5941_v7 }
 0x87c   :  { %4641 = vmatpush1.bf16.msra.mxu0 %v5939_v63 }
 0x87d   :  { %4642 = vmatprep.subr.bf16.mxu0 %v5944_v2 }
 0x880   :  { %4643 = vmatpush1.bf16.msra.mxu0 %v5942_v6 }
 0x881   :  { %4644 = vmatprep.subr.bf16.mxu0 %v5947_v16 }
 0x884   :  { %4645 = vmatpush1.bf16.msra.mxu0 %v5945_v17 }
 0x885   :  { %4646 = vmatprep.subr.bf16.mxu0 %v5950_v60 }
 0x888   :  { %4647 = vmatpush1.bf16.msra.mxu0 %v5948_v62 }
 0x889   :  { %4648 = vmatprep.subr.bf16.mxu0 %v5953_v21 }
 0x88c   :  { %4649 = vmatpush1.bf16.msra.mxu0 %v5951_v55 }
 0x88d   :  { %4650 = vmatprep.subr.bf16.mxu0 %v5956_v54 }
 0x890   :  { %4651 = vmatpush1.bf16.msra.mxu0 %v5954_v53 }
 0x891   :  { %4652 = vmatprep.subr.bf16.mxu0 %v5959_v37 }
 0x894   :  { %4653 = vmatpush1.bf16.msra.mxu0 %v5957_v27 }
 0x895   :  { %4654 = vmatprep.subr.bf16.mxu0 %v5962_v42 }
 0x898   :  { %4655 = vmatpush1.bf16.msra.mxu0 %v5960_v1 }
 0x899   :  { %4656 = vmatprep.subr.bf16.mxu0 %v5965_v44 }
 0x89c   :  { %4657 = vmatpush1.bf16.msra.mxu0 %v5963_v8 }
 0x89f   :  { %4659 = vmatmul.mubr.bf16.vlgmr.msra.gmra.mrb[80].mxu0 %v6852_v39  ;;  %v6936_v39 = vrot.slane %v3755_v15, %v6609_v5 }
 0x8a0   :  { %4668 = vmatprep.mubr.bf16.mxu0 %v6872_v26 }
 0x8a7   :  { %4669 = vmatmul.mubr.bf16.gmra.mrb[84].mxu0 %v6868_v61 }
 0x8a8   :  { %4678 = vmatprep.mubr.bf16.mxu0 %v6888_v31 }
 0x8af   :  { %4679 = vmatmul.mubr.bf16.gmra.mrb[88].mxu0 %v6884_v10 }
 0x8b0   :  { %4688 = vmatprep.mubr.bf16.mxu0 %v6904_v57 }
 0x8b7   :  { %4689 = vmatmul.mubr.bf16.gmra.mrb[92].mxu0 %v6900_v0 }
 0x972   :  { %v4660_v26 = vpop.f32.mrb[80].mxu0 }
 0x973   :  { %v5582_v61 = vadd.f32 %v4660_v26, %v6933_v4  ;;  %v4662_v31 = vpop.f32.mrb[81].mxu0 }
 0x974   :  { %v5583_v10 = vadd.f32 %v4662_v31, %v6936_v39  ;;  %v4664_v36 = vpop.f32.mrb[82].mxu0 }
 0x975   :  { %v5262_v57 = vmul.f32 -1.442695, %v5582_v61  ;;  %v5584_v0 = vadd.f32 %v4664_v36, %v6933_v4  ;;  %v4666_v52 = vpop.f32.mrb[83].mxu0 }
 0x976   :  { %v5263_v3 = vmul.f32 -1.442695, %v5583_v10  ;;  %v5585_v22 = vadd.f32 %v4666_v52, %v6936_v39 }
 0x977   :  { %5966 = vpow2.f32 %v5262_v57  ;;  %v5264_v56 = vmul.f32 -1.442695, %v5584_v0 }
 0x978   :  { %5968 = vpow2.f32 %v5263_v3  ;;  %v5265_v43 = vmul.f32 -1.442695, %v5585_v22 }
 0x979   :  { %5970 = vpow2.f32 %v5264_v56 }
 0x97a   :  { %5972 = vpow2.f32 %v5265_v43  ;;  %v4670_v5 = vpop.f32.mrb[84].mxu0 }
 0x97b   :  { %v5586_v41 = vadd.f32 %v4670_v5, %v6933_v4  ;;  %v4672_v34 = vpop.f32.mrb[85].mxu0 }
 0x97c   :  { %v5587_v11 = vadd.f32 %v4672_v34, %v6936_v39  ;;  %v4674_v12 = vpop.f32.mrb[86].mxu0 }
 0x97d   :  { %v5266_v13 = vmul.f32 -1.442695, %v5586_v41  ;;  %v5588_v14 = vadd.f32 %v4674_v12, %v6933_v4  ;;  %v4676_v59 = vpop.f32.mrb[87].mxu0 }
 0x97e   :  { %v5267_v9 = vmul.f32 -1.442695, %v5587_v11  ;;  %v5589_v38 = vadd.f32 %v4676_v59, %v6936_v39 }
 0x97f   :  { %5974 = vpow2.f32 %v5266_v13  ;;  %v5268_v58 = vmul.f32 -1.442695, %v5588_v14 }
 0x980   :  { %5976 = vpow2.f32 %v5267_v9  ;;  %v5269_v20 = vmul.f32 -1.442695, %v5589_v38 }
 0x981   :  { %v5967_v28 = vpop.eup %5966  ;;  %5978 = vpow2.f32 %v5268_v58 }
 0x982   :  { %v5969_v29 = vpop.eup %5968  ;;  %v4747_v30 = vadd.f32 1.0, %v5967_v28  ;;  %5980 = vpow2.f32 %v5269_v20  ;;  %v4680_v32 = vpop.f32.mrb[88].mxu0 }
 0x983   :  { %v5971_v35 = vpop.eup %5970  ;;  %v4748_v33 = vadd.f32 1.0, %v5969_v29  ;;  %v5590_v40 = vadd.f32 %v4680_v32, %v6933_v4  ;;  %v4682_v45 = vpop.f32.mrb[89].mxu0 }
 0x984   :  { %v5973_v24 = vpop.eup %5972  ;;  %5982 = vrcp.f32 %v4747_v30  ;;  %v4749_v46 = vadd.f32 1.0, %v5971_v35  ;;  %v5591_v47 = vadd.f32 %v4682_v45, %v6936_v39  ;;  %v4684_v48 = vpop.f32.mrb[90].mxu0 }
 0x985   :  { %5984 = vrcp.f32 %v4748_v33  ;;  %v4750_v49 = vadd.f32 1.0, %v5973_v24  ;;  %v5270_v50 = vmul.f32 -1.442695, %v5590_v40  ;;  %v5592_v51 = vadd.f32 %v4684_v48, %v6933_v4  ;;  %v4686_v25 = vpop.f32.mrb[91].mxu0 }
 0x986   :  { %5986 = vrcp.f32 %v4749_v46  ;;  %v5271_v18 = vmul.f32 -1.442695, %v5591_v47  ;;  %v5593_v19 = vadd.f32 %v4686_v25, %v6936_v39 }
 0x987   :  { %5988 = vrcp.f32 %v4750_v49  ;;  %v5272_v23 = vmul.f32 -1.442695, %v5592_v51 }
 0x988   :  { %5990 = vpow2.f32 %v5270_v50  ;;  %v5273_v7 = vmul.f32 -1.442695, %v5593_v19 }
 0x989   :  { %v5975_v63 = vpop.eup %5974  ;;  %5992 = vpow2.f32 %v5271_v18 }
 0x98a   :  { %v5977_v2 = vpop.eup %5976  ;;  %v4751_v6 = vadd.f32 1.0, %v5975_v63  ;;  %5994 = vpow2.f32 %v5272_v23  ;;  %v4690_v16 = vpop.f32.mrb[92].mxu0 }
 0x98b   :  { %v5979_v17 = vpop.eup %5978  ;;  %v4752_v60 = vadd.f32 1.0, %v5977_v2  ;;  %5996 = vpow2.f32 %v5273_v7  ;;  %v5594_v62 = vadd.f32 %v4690_v16, %v6933_v4  ;;  %v4692_v21 = vpop.f32.mrb[93].mxu0 }
 0x98c   :  { %v5981_v55 = vpop.eup %5980  ;;  %5998 = vrcp.f32 %v4751_v6  ;;  %v4753_v54 = vadd.f32 1.0, %v5979_v17  ;;  %v5595_v53 = vadd.f32 %v4692_v21, %v6936_v39  ;;  %v4694_v37 = vpop.f32.mrb[94].mxu0 }
 0x98d   :  { %6000 = vrcp.f32 %v4752_v60  ;;  %v4754_v27 = vadd.f32 1.0, %v5981_v55  ;;  %v5274_v42 = vmul.f32 -1.442695, %v5594_v62  ;;  %v5596_v1 = vadd.f32 %v4694_v37, %v6933_v4  ;;  %v4696_v44 = vpop.f32.mrb[95].mxu0 }
 0x98e   :  { %v5983_v8 = vpop.eup %5982  ;;  %6002 = vrcp.f32 %v4753_v54  ;;  %v5275_v15 = vmul.f32 -1.442695, %v5595_v53  ;;  %v5597_v26 = vadd.f32 %v4696_v44, %v6936_v39 }
 0x98f   :  { %v5985_v61 = vpop.eup %5984  ;;  %4795 = vst [vmem:[#allocation19] sm:$0xff] %v5983_v8  ;;  %6004 = vrcp.f32 %v4754_v27  ;;  %v5276_v31 = vmul.f32 -1.442695, %v5596_v1 }
 0x990   :  { %v5987_v10 = vpop.eup %5986  ;;  %4796 = vst [vmem:[#allocation19 + $0x8] sm:$0xff] %v5985_v61  ;;  %6006 = vpow2.f32 %v5274_v42  ;;  %v5277_v36 = vmul.f32 -1.442695, %v5597_v26 }
 0x991   :  { %v5989_v57 = vpop.eup %5988  ;;  %4797 = vst [vmem:[#allocation19 + $0x10] sm:$0xff] %v5987_v10  ;;  %6008 = vpow2.f32 %v5275_v15 }
 0x992   :  { %v5991_v0 = vpop.eup %5990  ;;  %4798 = vst [vmem:[#allocation19 + $0x18] sm:$0xff] %v5989_v57  ;;  %6010 = vpow2.f32 %v5276_v31 }
 0x993   :  { %v5993_v4 = vpop.eup %5992  ;;  %v4755_v52 = vadd.f32 1.0, %v5991_v0  ;;  %6012 = vpow2.f32 %v5277_v36 }
 0x994   :  { %v5995_v3 = vpop.eup %5994  ;;  %v4756_v22 = vadd.f32 1.0, %v5993_v4 }
 0x995   :  { %v5997_v39 = vpop.eup %5996  ;;  %6014 = vrcp.f32 %v4755_v52  ;;  %v4757_v56 = vadd.f32 1.0, %v5995_v3 }
 0x996   :  { %v5999_v43 = vpop.eup %5998  ;;  %6016 = vrcp.f32 %v4756_v22  ;;  %v4758_v5 = vadd.f32 1.0, %v5997_v39 }
 0x997   :  { %v6001_v41 = vpop.eup %6000  ;;  %4799 = vst [vmem:[#allocation19 + $0x20] sm:$0xff] %v5999_v43  ;;  %6018 = vrcp.f32 %v4757_v56 }
 0x998   :  { %v6003_v34 = vpop.eup %6002  ;;  %4800 = vst [vmem:[#allocation19 + $0x28] sm:$0xff] %v6001_v41  ;;  %6020 = vrcp.f32 %v4758_v5 }
 0x999   :  { %v6005_v11 = vpop.eup %6004  ;;  %4801 = vst [vmem:[#allocation19 + $0x30] sm:$0xff] %v6003_v34 }
 0x99a   :  { %v6007_v12 = vpop.eup %6006  ;;  %4802 = vst [vmem:[#allocation19 + $0x38] sm:$0xff] %v6005_v11 }
 0x99b   :  { %v6009_v13 = vpop.eup %6008  ;;  %v4759_v14 = vadd.f32 1.0, %v6007_v12 }
 0x99c   :  { %v6011_v59 = vpop.eup %6010  ;;  %v4760_v9 = vadd.f32 1.0, %v6009_v13 }
 0x99d   :  { %v6013_v38 = vpop.eup %6012  ;;  %6022 = vrcp.f32 %v4759_v14  ;;  %v4761_v58 = vadd.f32 1.0, %v6011_v59 }
 0x99e   :  { %6024 = vrcp.f32 %v4760_v9  ;;  %v4762_v20 = vadd.f32 1.0, %v6013_v38 }
 0x99f   :  { %v6015_v28 = vpop.eup %6014  ;;  %6026 = vrcp.f32 %v4761_v58 }
 0x9a0   :  { %v6017_v29 = vpop.eup %6016  ;;  %4803 = vst [vmem:[#allocation19 + $0x40] sm:$0xff] %v6015_v28  ;;  %6028 = vrcp.f32 %v4762_v20 }
 0x9a1   :  { %v6019_v30 = vpop.eup %6018  ;;  %4804 = vst [vmem:[#allocation19 + $0x48] sm:$0xff] %v6017_v29 }
 0x9a2   :  { %v6021_v32 = vpop.eup %6020  ;;  %4805 = vst [vmem:[#allocation19 + $0x50] sm:$0xff] %v6019_v30 }
 0x9a3   :  { %4806 = vst [vmem:[#allocation19 + $0x58] sm:$0xff] %v6021_v32 }
 0x9a7   :  { %v6023_v35 = vpop.eup %6022 }
 0x9a8   :  { %v6025_v33 = vpop.eup %6024  ;;  %4807 = vst [vmem:[#allocation19 + $0x60] sm:$0xff] %v6023_v35 }
 0x9a9   :  { %v6027_v40 = vpop.eup %6026  ;;  %4808 = vst [vmem:[#allocation19 + $0x68] sm:$0xff] %v6025_v33 }
 0x9aa   :  { %v6029_v45 = vpop.eup %6028  ;;  %4809 = vst [vmem:[#allocation19 + $0x70] sm:$0xff] %v6027_v40 }
 0x9ab   :  { %4810 = vst [vmem:[#allocation19 + $0x78] sm:$0xff] %v6029_v45 }
 0x9ac   :  { %6269 = shalt.err (!%p6266_p0)
}
 0x9ad   :  { %s6996_s19 = sld [smem:[#allocation29_spill]] }
 0x9b3   :  { %s6270_s26 = scalar_lea.hbm %s6996_s19, 2048 }
 0x9b4   :  { %p6271_p1 = scmp.ne.s32.totalorder %s6996_s19, %s6270_s26  ;;  %p6274_p2 = scmp.lt.u32.totalorder %s6270_s26, %s6996_s19 }
 0x9b6   :  { %p6276_p3 = pnand %p6274_p2, %p6271_p1 }
 0x9b8   :  { %6279 = shalt.err (!%p6276_p3)
}
 0x9b9   :  { %s6312_s20 = smov 256   ;;  %s6313_s21 = smov 16  }
 0x9ba   :  { %4822 = dma.vmem_to_hbm [thread:$0]  %s4817_s9, 2048, %s6996_s19, [#allocation4], %s6312_s20, %s6312_s20, %s6313_s21  }
 0x9bb   :  { %6292 = dma.done.wait [#allocation4], 2048  }
 0x9bc   :  { %6293 = vsyncadd [#allocation4], 4294965248 }
 0x9bd   :  { %4826 = vsyncpa [#allocation3], 1 }
 0x9be   :  { %4827 = vsyncpa [#allocation6], 1 }
 0x9bf   :  { %4828 = vsyncpa [#allocation9], 1 }
 0x9c0   :  { %4829 = vsyncpa [#allocation12], 1 }
 0x9c1   :  { %4830 = vsyncpa [#allocation15], 1 }
 0x9c2   :  { %4831 = vsyncpa [#allocation18], 1 }
 0x9c3   :  { %4832 = vsyncpa [#allocation4], 1 }

// kernel: tpu_custom_call.1
= control target key start
LH: loop header
LB: loop body
LE: loop exit
PB: predicated region body
PF: predicated region fallthrough
CT: control target
= control target key end

     0   :  { %s6966_s0 = inlined_call_operand.hbm [shape: bf16[64,256], index: 0, kind: input, shape index: {}]   ;;  %s6967_s1 = inlined_call_operand.hbm [shape: bf16[256,1024], index: 1, kind: input, shape index: {}]   ;;  %s6968_s2 = inlined_call_operand.hbm [shape: f32[1,1024], index: 2, kind: input, shape index: {}]   ;;  %s6969_s3 = inlined_call_operand.hbm [shape: bf16[1024,128], index: 3, kind: input, shape index: {}]   ;;  %s6970_s4 = inlined_call_operand.vmem [shape: f32[1,128], index: 4, kind: input, shape index: {}]   ;;  %s6971_s5 = inlined_call_operand.hbm [shape: bf16[128,128], index: 5, kind: input, shape index: {}]   ;;  %s6972_s6 = inlined_call_operand.vmem [shape: f32[1,128], index: 6, kind: input, shape index: {}]   ;;  %s6973_s7 = inlined_call_operand.hbm [shape: bf16[128,128], index: 7, kind: input, shape index: {}]   ;;  %s6974_s8 = inlined_call_operand.vmem [shape: f32[1,128], index: 8, kind: input, shape index: {}]   ;;  %s6975_s9 = inlined_call_operand.hbm [shape: bf16[128,128], index: 9, kind: input, shape index: {}]   ;;  %s6976_s10 = inlined_call_operand.vmem [shape: f32[1,128], index: 10, kind: input, shape index: {}]   ;;  %s6977_s11 = inlined_call_operand.hbm [shape: bf16[128,128], index: 11, kind: input, shape index: {}]   ;;  %s6978_s12 = inlined_call_operand.vmem [shape: f32[1,128], index: 12, kind: input, shape index: {}]   ;;  %s6979_s13 = inlined_call_operand.hbm [shape: bf16[128,1024], index: 13, kind: input, shape index: {}]   ;;  %s6980_s14 = inlined_call_operand.vmem [shape: f32[1,1024], index: 14, kind: input, shape index: {}]   ;;  %s6981_s15 = inlined_call_operand.hbm [shape: bf16[1024,256], index: 15, kind: input, shape index: {}]   ;;  %s6982_s16 = inlined_call_operand.vmem [shape: f32[1,256], index: 16, kind: input, shape index: {}]   ;;  %s6983_s17 = inlined_call_operand.hbm [shape: f32[64,256], index: 17, kind: output, shape index: {}]  }
   0x1   :  { %6989 = sst [smem:[#allocation27_spill]] %s6966_s0 }
   0x2   :  { %6990 = sst [smem:[#allocation28_spill]] %s6967_s1 }
   0x3   :  { %6991 = sst [smem:[#allocation29_spill]] %s6983_s17 }
   0x4   :  { %22 = vsyncpa [#allocation3], 0 }
   0x5   :  { %23 = vsyncpa [#allocation6], 0 }
   0x6   :  { %24 = vsyncpa [#allocation9], 0 }
   0x7   :  { %25 = vsyncpa [#allocation12], 0 }
   0x8   :  { %26 = vsyncpa [#allocation15], 0 }
   0x9   :  { %27 = vsyncpa [#allocation18], 0 }
   0xa   :  { %28 = vsyncpa [#allocation4], 0  ;;  %s6294_s24 = smov [#allocation5]   ;;  %s6992_s28 = sld [smem:[#allocation28_spill]] }
   0xb   :  { %s46_s25 = sshll.u32 %s6294_s24, 4  ;;  %s47_s25 = int_to_ptr.vmem [resolvable:$true] %s46_s25 }
  0x10   :  { %s6038_s29 = scalar_lea.hbm %s6992_s28, 16384 }
  0x11   :  { %p6039_p0 = scmp.ne.s32.totalorder %s6992_s28, %s6038_s29  ;;  %p6042_p1 = scmp.lt.u32.totalorder %s6038_s29, %s6992_s28 }
  0x13   :  { %p6044_p2 = pnand %p6042_p1, %p6039_p0 }
  0x15   :  { %6047 = shalt.err (!%p6044_p2)
}
  0x16   :  { %s6048_s1 = scalar_lea.vmem %s47_s25, 16384  ;;  %p6053_p4 = scmp.lt.s32.totalorder %s47_s25, %s47_s25 }
  0x17   :  { %p6049_p3 = scmp.ne.s32.totalorder %s47_s25, %s6048_s1  ;;  %p6054_p5 = scmp.lt.s32.totalorder %s6048_s1, %s6048_s1 }
  0x19   :  { %p6055_p6 = por %p6054_p5, %p6053_p4 }
  0x1b   :  { %p6056_p7 = pnand %p6055_p6, %p6049_p3 }
  0x1d   :  { %6059 = shalt.err (!%p6056_p7)
}
  0x1e   :  { %s6987_s20 = smov 512   ;;  %s6988_s21 = smov 32  }
  0x1f   :  { %52 = dma.hbm_to_vmem [thread:$0]  %s6992_s28, 16384, %s47_s25, [#allocation6], %s6987_s20, %s6987_s20, %s6988_s21  }
  0x20   :  { %s6297_s24 = smov [#allocation8]   ;;  %s6060_s0 = scalar_lea.hbm %s6969_s3, 8192 }
  0x21   :  { %s68_s26 = sshll.u32 %s6297_s24, 4  ;;  %p6061_p8 = scmp.ne.s32.totalorder %s6969_s3, %s6060_s0  ;;  %s69_s26 = int_to_ptr.vmem [resolvable:$true] %s68_s26 }
  0x22   :  { %p6064_p9 = scmp.lt.u32.totalorder %s6060_s0, %s6969_s3 }
  0x24   :  { %p6066_p10 = pnand %p6064_p9, %p6061_p8 }
  0x26   :  { %6069 = shalt.err (!%p6066_p10)
}
  0x27   :  { %s6070_s17 = scalar_lea.vmem %s69_s26, 8192  ;;  %p6075_p12 = scmp.lt.s32.totalorder %s69_s26, %s69_s26 }
  0x28   :  { %p6071_p11 = scmp.ne.s32.totalorder %s69_s26, %s6070_s17  ;;  %p6076_p13 = scmp.lt.s32.totalorder %s6070_s17, %s6070_s17 }
  0x2a   :  { %p6077_p0 = por %p6076_p13, %p6075_p12 }
  0x2c   :  { %p6078_p1 = pnand %p6077_p0, %p6071_p11 }
  0x2e   :  { %6081 = shalt.err (!%p6078_p1)
}
  0x2f   :  { %s6298_s25 = smov 64   ;;  %s6299_s28 = smov 4  }
  0x30   :  { %74 = dma.hbm_to_vmem [thread:$0]  %s6969_s3, 8192, %s69_s26, [#allocation9], %s6298_s25, %s6298_s25, %s6299_s28  }
  0x31   :  { %s6300_s24 = smov [#allocation11]   ;;  %s6301_s29 = smov [#allocation14]  }
  0x32   :  { %s96_s27 = sshll.u32 %s6300_s24, 4  ;;  %s124_s0 = sshll.u32 %s6301_s29, 4  ;;  %s97_s27 = int_to_ptr.vmem [resolvable:$true] %s96_s27  ;;  %s6434_s0 = int_to_ptr.vmem [resolvable:$true] %s124_s0 }
  0x33   :  { %s6082_s18 = scalar_lea.hbm %s6973_s7, 1024 }
  0x34   :  { %p6083_p2 = scmp.ne.s32.totalorder %s6973_s7, %s6082_s18  ;;  %p6086_p3 = scmp.lt.u32.totalorder %s6082_s18, %s6973_s7 }
  0x36   :  { %p6088_p4 = pnand %p6086_p3, %p6083_p2 }
  0x38   :  { %6091 = shalt.err (!%p6088_p4)
}
  0x39   :  { %s6092_s3 = scalar_lea.vmem %s97_s27, 1024  ;;  %p6097_p6 = scmp.lt.s32.totalorder %s97_s27, %s97_s27 }
  0x3a   :  { %p6093_p5 = scmp.ne.s32.totalorder %s97_s27, %s6092_s3  ;;  %p6098_p7 = scmp.lt.s32.totalorder %s6092_s3, %s6092_s3 }
  0x3c   :  { %p6099_p8 = por %p6098_p7, %p6097_p6 }
  0x3e   :  { %p6100_p9 = pnand %p6099_p8, %p6093_p5 }
  0x40   :  { %6103 = shalt.err (!%p6100_p9)
}
  0x41   :  { %102 = dma.hbm_to_vmem [thread:$0]  %s6973_s7, 1024, %s97_s27, [#allocation12], %s6298_s25, %s6298_s25, %s6299_s28  }
  0x42   :  { %s6104_s20 = scalar_lea.hbm %s6977_s11, 1024 }
  0x43   :  { %p6105_p10 = scmp.ne.s32.totalorder %s6977_s11, %s6104_s20  ;;  %p6108_p11 = scmp.lt.u32.totalorder %s6104_s20, %s6977_s11 }
  0x45   :  { %p6110_p12 = pnand %p6108_p11, %p6105_p10 }
  0x47   :  { %6113 = shalt.err (!%p6110_p12)
}
  0x48   :  { %s6114_s18 = scalar_lea.vmem %s6434_s0, 1024  ;;  %p6119_p0 = scmp.lt.s32.totalorder %s6434_s0, %s6434_s0 }
  0x49   :  { %p6115_p13 = scmp.ne.s32.totalorder %s6434_s0, %s6114_s18  ;;  %p6120_p1 = scmp.lt.s32.totalorder %s6114_s18, %s6114_s18 }
  0x4b   :  { %p6121_p2 = por %p6120_p1, %p6119_p0 }
  0x4d   :  { %p6122_p3 = pnand %p6121_p2, %p6115_p13 }
  0x4f   :  { %6125 = shalt.err (!%p6122_p3)
}
  0x50   :  { %130 = dma.hbm_to_vmem [thread:$0]  %s6977_s11, 1024, %s6434_s0, [#allocation15], %s6298_s25, %s6298_s25, %s6299_s28  }
  0x51   :  { %s6302_s19 = smov [#allocation2]   ;;  %s6993_s22 = sld [smem:[#allocation27_spill]] }
  0x52   :  { %s34_s1 = sshll.u32 %s6302_s19, 4  ;;  %s35_s1 = int_to_ptr.vmem [resolvable:$true] %s34_s1 }
  0x57   :  { %s6126_s23 = scalar_lea.hbm %s6993_s22, 1024 }
  0x58   :  { %p6127_p4 = scmp.ne.s32.totalorder %s6993_s22, %s6126_s23  ;;  %p6130_p5 = scmp.lt.u32.totalorder %s6126_s23, %s6993_s22 }
  0x5a   :  { %p6132_p6 = pnand %p6130_p5, %p6127_p4 }
  0x5c   :  { %6135 = shalt.err (!%p6132_p6)
}
  0x5d   :  { %s6136_s17 = scalar_lea.vmem %s35_s1, 1024  ;;  %p6141_p8 = scmp.lt.s32.totalorder %s35_s1, %s35_s1 }
  0x5e   :  { %p6137_p7 = scmp.ne.s32.totalorder %s35_s1, %s6136_s17  ;;  %p6142_p9 = scmp.lt.s32.totalorder %s6136_s17, %s6136_s17 }
  0x60   :  { %p6143_p10 = por %p6142_p9, %p6141_p8 }
  0x62   :  { %p6144_p11 = pnand %p6143_p10, %p6137_p7 }
  0x64   :  { %6147 = shalt.err (!%p6144_p11)
}
  0x65   :  { %s6303_s11 = smov 128   ;;  %s6304_s0 = smov 8  }
  0x66   :  { %40 = dma.hbm_to_vmem [thread:$0]  %s6993_s22, 1024, %s35_s1, [#allocation3], %s6303_s11, %s6303_s11, %s6304_s0  }
  0x67   :  { %s6305_s7 = smov [#allocation7]   ;;  %s6306_s19 = smov [#allocation10]  }
  0x68   :  { %s59_s27 = sshll.u32 %s6305_s7, 4  ;;  %s82_s3 = sshll.u32 %s6306_s19, 4  ;;  %s60_s27 = int_to_ptr.vmem [resolvable:$true] %s59_s27  ;;  %s83_s3 = int_to_ptr.vmem [resolvable:$true] %s82_s3 }
  0x69   :  { %s6148_s24 = scalar_lea.hbm %s6968_s2, 128 }
  0x6a   :  { %p6149_p12 = scmp.ne.s32.totalorder %s6968_s2, %s6148_s24  ;;  %p6152_p13 = scmp.lt.u32.totalorder %s6148_s24, %s6968_s2 }
  0x6c   :  { %p6154_p0 = pnand %p6152_p13, %p6149_p12 }
  0x6e   :  { %6157 = shalt.err (!%p6154_p0)
}
  0x6f   :  { %s6158_s1 = scalar_lea.vmem %s60_s27, 128  ;;  %p6163_p2 = scmp.lt.s32.totalorder %s60_s27, %s60_s27 }
  0x70   :  { %p6159_p1 = scmp.ne.s32.totalorder %s60_s27, %s6158_s1  ;;  %p6164_p3 = scmp.lt.s32.totalorder %s6158_s1, %s6158_s1 }
  0x72   :  { %p6165_p4 = por %p6164_p3, %p6163_p2 }
  0x74   :  { %p6166_p5 = pnand %p6165_p4, %p6159_p1 }
  0x76   :  { %6169 = shalt.err (!%p6166_p5)
}
  0x77   :  { %62 = dma.hbm_to_vmem [thread:$0]  %s6968_s2, 128, %s60_s27, [#allocation6]  }
  0x78   :  { %s6170_s19 = scalar_lea.hbm %s6971_s5, 1024 }
  0x79   :  { %p6171_p6 = scmp.ne.s32.totalorder %s6971_s5, %s6170_s19  ;;  %p6174_p7 = scmp.lt.u32.totalorder %s6170_s19, %s6971_s5 }
  0x7b   :  { %p6176_p8 = pnand %p6174_p7, %p6171_p6 }
  0x7d   :  { %6179 = shalt.err (!%p6176_p8)
}
  0x7e   :  { %s6180_s21 = scalar_lea.vmem %s83_s3, 1024  ;;  %p6185_p10 = scmp.lt.s32.totalorder %s83_s3, %s83_s3 }
  0x7f   :  { %p6181_p9 = scmp.ne.s32.totalorder %s83_s3, %s6180_s21  ;;  %p6186_p11 = scmp.lt.s32.totalorder %s6180_s21, %s6180_s21 }
  0x81   :  { %p6187_p12 = por %p6186_p11, %p6185_p10 }
  0x83   :  { %p6188_p13 = pnand %p6187_p12, %p6181_p9 }
  0x85   :  { %6191 = shalt.err (!%p6188_p13)
}
  0x86   :  { %88 = dma.hbm_to_vmem [thread:$0]  %s6971_s5, 1024, %s83_s3, [#allocation9], %s6298_s25, %s6298_s25, %s6299_s28  }
  0x87   :  { %s6307_s29 = smov [#allocation13]   ;;  %s6308_s1 = smov [#allocation16]  }
  0x88   :  { %s110_s17 = sshll.u32 %s6307_s29, 4  ;;  %s138_s22 = sshll.u32 %s6308_s1, 4  ;;  %s111_s17 = int_to_ptr.vmem [resolvable:$true] %s110_s17  ;;  %s139_s22 = int_to_ptr.vmem [resolvable:$true] %s138_s22 }
  0x89   :  { %s6192_s7 = scalar_lea.hbm %s6975_s9, 1024 }
  0x8a   :  { %p6193_p0 = scmp.ne.s32.totalorder %s6975_s9, %s6192_s7  ;;  %p6196_p1 = scmp.lt.u32.totalorder %s6192_s7, %s6975_s9 }
  0x8c   :  { %p6198_p2 = pnand %p6196_p1, %p6193_p0 }
  0x8e   :  { %6201 = shalt.err (!%p6198_p2)
}
  0x8f   :  { %s6202_s5 = scalar_lea.vmem %s111_s17, 1024  ;;  %p6207_p4 = scmp.lt.s32.totalorder %s111_s17, %s111_s17 }
  0x90   :  { %p6203_p3 = scmp.ne.s32.totalorder %s111_s17, %s6202_s5  ;;  %p6208_p5 = scmp.lt.s32.totalorder %s6202_s5, %s6202_s5 }
  0x92   :  { %p6209_p6 = por %p6208_p5, %p6207_p4 }
  0x94   :  { %p6210_p7 = pnand %p6209_p6, %p6203_p3 }
  0x96   :  { %6213 = shalt.err (!%p6210_p7)
}
  0x97   :  { %116 = dma.hbm_to_vmem [thread:$0]  %s6975_s9, 1024, %s111_s17, [#allocation12], %s6298_s25, %s6298_s25, %s6299_s28  }
  0x98   :  { %s6214_s27 = scalar_lea.hbm %s6979_s13, 8192 }
  0x99   :  { %p6215_p8 = scmp.ne.s32.totalorder %s6979_s13, %s6214_s27  ;;  %p6218_p9 = scmp.lt.u32.totalorder %s6214_s27, %s6979_s13 }
  0x9b   :  { %p6220_p10 = pnand %p6218_p9, %p6215_p8 }
  0x9d   :  { %6223 = shalt.err (!%p6220_p10)
}
  0x9e   :  { %s6224_s7 = scalar_lea.vmem %s139_s22, 8192  ;;  %p6229_p12 = scmp.lt.s32.totalorder %s139_s22, %s139_s22 }
  0x9f   :  { %p6225_p11 = scmp.ne.s32.totalorder %s139_s22, %s6224_s7  ;;  %p6230_p13 = scmp.lt.s32.totalorder %s6224_s7, %s6224_s7 }
  0xa1   :  { %p6231_p0 = por %p6230_p13, %p6229_p12 }
  0xa3   :  { %p6232_p1 = pnand %p6231_p0, %p6225_p11 }
  0xa5   :  { %6235 = shalt.err (!%p6232_p1)
}
  0xa6   :  { %s6994_s9 = smov 32   ;;  %s6995_s25 = smov 512  }
  0xa7   :  { %144 = dma.hbm_to_vmem [thread:$0]  %s6979_s13, 8192, %s139_s22, [#allocation15], %s6995_s25, %s6995_s25, %s6994_s9  }
  0xa8   :  { %s6309_s19 = smov [#allocation17]   ;;  %s6236_s5 = scalar_lea.hbm %s6981_s15, 16384 }
  0xa9   :  { %s152_s26 = sshll.u32 %s6309_s19, 4  ;;  %p6237_p2 = scmp.ne.s32.totalorder %s6981_s15, %s6236_s5  ;;  %s153_s26 = int_to_ptr.vmem [resolvable:$true] %s152_s26 }
  0xaa   :  { %p6240_p3 = scmp.lt.u32.totalorder %s6236_s5, %s6981_s15 }
  0xac   :  { %p6242_p4 = pnand %p6240_p3, %p6237_p2 }
  0xae   :  { %6245 = shalt.err (!%p6242_p4)
}
  0xaf   :  { %s6246_s27 = scalar_lea.vmem %s153_s26, 16384  ;;  %p6251_p6 = scmp.lt.s32.totalorder %s153_s26, %s153_s26 }
  0xb0   :  { %p6247_p5 = scmp.ne.s32.totalorder %s153_s26, %s6246_s27  ;;  %p6252_p7 = scmp.lt.s32.totalorder %s6246_s27, %s6246_s27 }
  0xb2   :  { %p6253_p8 = por %p6252_p7, %p6251_p6 }
  0xb4   :  { %p6254_p9 = pnand %p6253_p8, %p6247_p5 }
  0xb6   :  { %6257 = shalt.err (!%p6254_p9)
}
  0xb7   :  { %158 = dma.hbm_to_vmem [thread:$0]  %s6981_s15, 16384, %s153_s26, [#allocation18], %s6303_s11, %s6303_s11, %s6304_s0  }
  0xb8   :  { %6280 = dma.done.wait [#allocation3], 1024  }
  0xb9   :  { %6281 = vsyncadd [#allocation3], 4294966272 }
  0xba   :  { %6282 = dma.done.wait [#allocation6], 16512  }
  0xbb   :  { %6283 = vsyncadd [#allocation6], 4294950784 }
  0xbc   :  { %6284 = dma.done.wait [#allocation9], 9216  }
  0xbd   :  { %6285 = vsyncadd [#allocation9], 4294958080 }
  0xbe   :  { %6286 = dma.done.wait [#allocation12], 2048  }
  0xbf   :  { %6287 = vsyncadd [#allocation12], 4294965248 }
  0xc0   :  { %6288 = dma.done.wait [#allocation15], 9216  }
  0xc1   :  { %6289 = vsyncadd [#allocation15], 4294958080 }
  0xc2   :  { %6290 = dma.done.wait [#allocation18], 16384  }
  0xc3   :  { %6291 = vsyncadd [#allocation18], 4294950912  ;;  %v200_v0 = vld [vmem:[#allocation5] sm:$0xff]  ;;  %v201_v63 = vld [vmem:[#allocation5 + $0x8] sm:$0xff] }
  0xc4   :  { %v204_v1 = vld [vmem:[#allocation5 + $0x20] sm:$0xff] }
  0xc5   :  { %v208_v2 = vld [vmem:[#allocation5 + $0x40] sm:$0xff]  ;;  %v4842_v3 = vcombine.high %v200_v0, %v204_v1  ;;  %v4841_v4 = vcombine.low %v200_v0, %v204_v1  ;;  %v205_v0 = vld [vmem:[#allocation5 + $0x28] sm:$0xff] }
  0xc6   :  { %v212_v5 = vld [vmem:[#allocation5 + $0x60] sm:$0xff] }
  0xc7   :  { %v4850_v6 = vcombine.high %v208_v2, %v212_v5  ;;  %v216_v7 = vld [vmem:[#allocation5 + $0x80] sm:$0xff]  ;;  %1050 = vmatprep.subr.bf16.mxu1 %v4842_v3  ;;  %v4849_v9 = vcombine.low %v208_v2, %v212_v5  ;;  %v209_v3 = vld [vmem:[#allocation5 + $0x48] sm:$0xff] }
  0xc8   :  { %v220_v8 = vld [vmem:[#allocation5 + $0xa0] sm:$0xff]  ;;  %1051 = vmatpush1.bf16.msra.mxu1 %v4841_v4  ;;  %v213_v4 = vld [vmem:[#allocation5 + $0x68] sm:$0xff] }
  0xc9   :  { %1052 = vmatprep.subr.bf16.mxu1 %v4850_v6  ;;  %v4858_v10 = vcombine.high %v216_v7, %v220_v8  ;;  %v224_v11 = vld [vmem:[#allocation5 + $0xc0] sm:$0xff]  ;;  %v4857_v13 = vcombine.low %v216_v7, %v220_v8  ;;  %v4844_v6 = vcombine.high %v201_v63, %v205_v0  ;;  %v4843_v7 = vcombine.low %v201_v63, %v205_v0  ;;  %v217_v8 = vld [vmem:[#allocation5 + $0x88] sm:$0xff] }
  0xca   :  { %v228_v12 = vld [vmem:[#allocation5 + $0xe0] sm:$0xff]  ;;  %v317_v63 = vld [vmem:[#allocation5 + $0x3a8] sm:$0xff] }
  0xcb   :  { %v4866_v14 = vcombine.high %v224_v11, %v228_v12  ;;  %v232_v15 = vld [vmem:[#allocation5 + $0x100] sm:$0xff]  ;;  %v4865_v18 = vcombine.low %v224_v11, %v228_v12  ;;  %v4852_v11 = vcombine.high %v209_v3, %v213_v4  ;;  %v4851_v12 = vcombine.low %v209_v3, %v213_v4  ;;  %v325_v3 = vld [vmem:[#allocation5 + $0x3e8] sm:$0xff] }
  0xcc   :  { %1053 = vmatpush1.bf16.msra.mxu1 %v4849_v9  ;;  %v236_v16 = vld [vmem:[#allocation5 + $0x120] sm:$0xff]  ;;  %v221_v9 = vld [vmem:[#allocation5 + $0xa8] sm:$0xff] }
  0xcd   :  { %1054 = vmatprep.subr.bf16.mxu1 %v4858_v10  ;;  %v6558_v17 = vld [vmem:[#allocation2 + $0x4] ss:$8 sps:$4 sm:$0xff]   ;;  %v4874_v19 = vcombine.high %v232_v15, %v236_v16  ;;  %v4873_v22 = vcombine.low %v232_v15, %v236_v16  ;;  %v6561_v5 = vld [vmem:[#allocation2] ss:$8 sps:$4 sm:$0xff]   ;;  %v6563_v10 = vld [vmem:[#allocation2 + $0x14] ss:$8 sps:$4 sm:$0xff]   ;;  %v4860_v15 = vcombine.high %v217_v8, %v221_v9 }
  0xce   :  { %1082 = vmatprep.mubr.bf16.mxu1 %v6558_v17  ;;  %v240_v20 = vld [vmem:[#allocation5 + $0x140] sm:$0xff]  ;;  %v6567_v16 = vld [vmem:[#allocation2 + $0x10] ss:$8 sps:$4 sm:$0xff]  }
  0xcf   :  { %v244_v21 = vld [vmem:[#allocation5 + $0x160] sm:$0xff] }
  0xd0   :  { %1055 = vmatpush1.bf16.msra.mxu1 %v4857_v13  ;;  %v4882_v23 = vcombine.high %v240_v20, %v244_v21  ;;  %v248_v24 = vld [vmem:[#allocation5 + $0x180] sm:$0xff]  ;;  %v4881_v26 = vcombine.low %v240_v20, %v244_v21  ;;  %v225_v13 = vld [vmem:[#allocation5 + $0xc8] sm:$0xff] }
  0xd1   :  { %1056 = vmatprep.subr.bf16.mxu1 %v4866_v14  ;;  %v252_v25 = vld [vmem:[#allocation5 + $0x1a0] sm:$0xff]  ;;  %v229_v14 = vld [vmem:[#allocation5 + $0xe8] sm:$0xff] }
  0xd2   :  { %v4890_v27 = vcombine.high %v248_v24, %v252_v25  ;;  %v256_v28 = vld [vmem:[#allocation5 + $0x1c0] sm:$0xff]  ;;  %v4889_v30 = vcombine.low %v248_v24, %v252_v25  ;;  %v237_v20 = vld [vmem:[#allocation5 + $0x128] sm:$0xff] }
  0xd3   :  { %v260_v29 = vld [vmem:[#allocation5 + $0x1e0] sm:$0xff]  ;;  %v241_v24 = vld [vmem:[#allocation5 + $0x148] sm:$0xff] }
  0xd4   :  { %1057 = vmatpush1.bf16.msra.mxu1 %v4865_v18  ;;  %v4898_v31 = vcombine.high %v256_v28, %v260_v29  ;;  %v264_v32 = vld [vmem:[#allocation5 + $0x200] sm:$0xff]  ;;  %v4897_v34 = vcombine.low %v256_v28, %v260_v29  ;;  %v4859_v18 = vcombine.low %v217_v8, %v221_v9  ;;  %v245_v25 = vld [vmem:[#allocation5 + $0x168] sm:$0xff]  ;;  %v206_v8 = vld [vmem:[#allocation5 + $0x30] sm:$0xff] }
  0xd5   :  { %1058 = vmatprep.subr.bf16.mxu1 %v4874_v19  ;;  %v268_v33 = vld [vmem:[#allocation5 + $0x220] sm:$0xff]  ;;  %v233_v19 = vld [vmem:[#allocation5 + $0x108] sm:$0xff] }
  0xd6   :  { %v4906_v35 = vcombine.high %v264_v32, %v268_v33  ;;  %v272_v36 = vld [vmem:[#allocation5 + $0x240] sm:$0xff]  ;;  %v4905_v38 = vcombine.low %v264_v32, %v268_v33  ;;  %v4875_v28 = vcombine.low %v233_v19, %v237_v20  ;;  %v249_v29 = vld [vmem:[#allocation5 + $0x188] sm:$0xff]  ;;  %v4884_v32 = vcombine.high %v241_v24, %v245_v25 }
  0xd7   :  { %v276_v37 = vld [vmem:[#allocation5 + $0x260] sm:$0xff]  ;;  %v4883_v33 = vcombine.low %v241_v24, %v245_v25  ;;  %v5680_v24 = vld [vmem:[#allocation8 + $0x48] sm:$0xff]  }
  0xd8   :  { %1059 = vmatpush1.bf16.msra.mxu1 %v4873_v22  ;;  %v280_v39 = vld [vmem:[#allocation5 + $0x280] sm:$0xff]  ;;  %v4914_v41 = vcombine.high %v272_v36, %v276_v37  ;;  %v4913_v42 = vcombine.low %v272_v36, %v276_v37  ;;  %v4868_v22 = vcombine.high %v225_v13, %v229_v14  ;;  %v6579_v37 = vld [vmem:[#allocation2 + $0x30] ss:$8 sps:$4 sm:$0xff]  }
  0xd9   :  { %1060 = vmatprep.subr.bf16.mxu1 %v4882_v23  ;;  %v284_v40 = vld [vmem:[#allocation5 + $0x2a0] sm:$0xff]  ;;  %v4867_v23 = vcombine.low %v225_v13, %v229_v14  ;;  %v214_v13 = vld [vmem:[#allocation5 + $0x70] sm:$0xff] }
  0xda   :  { %v288_v43 = vld [vmem:[#allocation5 + $0x2c0] sm:$0xff]  ;;  %v4922_v45 = vcombine.high %v280_v39, %v284_v40  ;;  %v4921_v46 = vcombine.low %v280_v39, %v284_v40  ;;  %v265_v39 = vld [vmem:[#allocation5 + $0x208] sm:$0xff]  ;;  %v5681_v25 = vld [vmem:[#allocation8 + $0x8] sm:$0xff]  }
  0xdb   :  { %v292_v44 = vld [vmem:[#allocation5 + $0x2e0] sm:$0xff]  ;;  %v269_v40 = vld [vmem:[#allocation5 + $0x228] sm:$0xff] }
  0xdc   :  { %1061 = vmatpush1.bf16.msra.mxu1 %v4881_v26  ;;  %v296_v47 = vld [vmem:[#allocation5 + $0x300] sm:$0xff]  ;;  %v4930_v49 = vcombine.high %v288_v43, %v292_v44  ;;  %v4929_v50 = vcombine.low %v288_v43, %v292_v44  ;;  %v4876_v26 = vcombine.high %v233_v19, %v237_v20  ;;  %v273_v43 = vld [vmem:[#allocation5 + $0x248] sm:$0xff]  ;;  %v218_v19 = vld [vmem:[#allocation5 + $0x90] sm:$0xff] }
  0xdd   :  { %1062 = vmatprep.subr.bf16.mxu1 %v4890_v27  ;;  %v300_v48 = vld [vmem:[#allocation5 + $0x320] sm:$0xff]  ;;  %v277_v44 = vld [vmem:[#allocation5 + $0x268] sm:$0xff]  ;;  %v222_v20 = vld [vmem:[#allocation5 + $0xb0] sm:$0xff] }
  0xde   :  { %v304_v51 = vld [vmem:[#allocation5 + $0x340] sm:$0xff]  ;;  %v4938_v53 = vcombine.high %v296_v47, %v300_v48  ;;  %v4937_v54 = vcombine.low %v296_v47, %v300_v48  ;;  %v281_v47 = vld [vmem:[#allocation5 + $0x288] sm:$0xff] }
  0xdf   :  { %v308_v52 = vld [vmem:[#allocation5 + $0x360] sm:$0xff]  ;;  %v285_v48 = vld [vmem:[#allocation5 + $0x2a8] sm:$0xff] }
  0xe0   :  { %1063 = vmatpush1.bf16.msra.mxu1 %v4889_v30  ;;  %v312_v55 = vld [vmem:[#allocation5 + $0x380] sm:$0xff]  ;;  %v4946_v57 = vcombine.high %v304_v51, %v308_v52  ;;  %v4945_v58 = vcombine.low %v304_v51, %v308_v52  ;;  %v253_v30 = vld [vmem:[#allocation5 + $0x1a8] sm:$0xff] }
  0xe1   :  { %1064 = vmatprep.subr.bf16.mxu1 %v4898_v31  ;;  %v316_v56 = vld [vmem:[#allocation5 + $0x3a0] sm:$0xff]  ;;  %v6575_v31 = vld [vmem:[#allocation2 + $0x34] ss:$8 sps:$4 sm:$0xff]   ;;  %v4892_v36 = vcombine.high %v249_v29, %v253_v30  ;;  %v289_v51 = vld [vmem:[#allocation5 + $0x2c8] sm:$0xff] }
  0xe2   :  { %v320_v59 = vld [vmem:[#allocation5 + $0x3c0] sm:$0xff]  ;;  %v4954_v61 = vcombine.high %v312_v55, %v316_v56  ;;  %v4953_v62 = vcombine.low %v312_v55, %v316_v56  ;;  %v293_v52 = vld [vmem:[#allocation5 + $0x2e8] sm:$0xff] }
  0xe3   :  { %v324_v60 = vld [vmem:[#allocation5 + $0x3e0] sm:$0xff]  ;;  %v297_v55 = vld [vmem:[#allocation5 + $0x308] sm:$0xff] }
  0xe4   :  { %1065 = vmatpush1.bf16.msra.mxu1 %v4897_v34  ;;  %v4962_v1 = vcombine.high %v320_v59, %v324_v60  ;;  %v4961_v2 = vcombine.low %v320_v59, %v324_v60  ;;  %v6569_v21 = vld [vmem:[#allocation2 + $0x24] ss:$8 sps:$4 sm:$0xff]   ;;  %v6573_v27 = vld [vmem:[#allocation2 + $0x20] ss:$8 sps:$4 sm:$0xff]  }
  0xe5   :  { %1066 = vmatprep.subr.bf16.mxu1 %v4906_v35  ;;  %v257_v34 = vld [vmem:[#allocation5 + $0x1c8] sm:$0xff] }
  0xe6   :  { %v261_v35 = vld [vmem:[#allocation5 + $0x1e8] sm:$0xff] }
  0xe7   :  { %v301_v56 = vld [vmem:[#allocation5 + $0x328] sm:$0xff] }
  0xe8   :  { %1067 = vmatpush1.bf16.msra.mxu1 %v4905_v38  ;;  %v4891_v38 = vcombine.low %v249_v29, %v253_v30  ;;  %v309_v59 = vld [vmem:[#allocation5 + $0x368] sm:$0xff]  ;;  %v4940_v60 = vcombine.high %v297_v55, %v301_v56  ;;  %v226_v29 = vld [vmem:[#allocation5 + $0xd0] sm:$0xff] }
  0xe9   :  { %1068 = vmatprep.subr.bf16.mxu1 %v4914_v41  ;;  %v4900_v41 = vcombine.high %v257_v34, %v261_v35  ;;  %v230_v30 = vld [vmem:[#allocation5 + $0xf0] sm:$0xff] }
  0xec   :  { %1069 = vmatpush1.bf16.msra.mxu1 %v4913_v42  ;;  %v4899_v42 = vcombine.low %v257_v34, %v261_v35  ;;  %v4861_v34 = vcombine.low %v218_v19, %v222_v20  ;;  %v234_v35 = vld [vmem:[#allocation5 + $0x110] sm:$0xff] }
  0xed   :  { %1070 = vmatprep.subr.bf16.mxu1 %v4922_v45  ;;  %v4908_v45 = vcombine.high %v265_v39, %v269_v40 }
  0xf0   :  { %1071 = vmatpush1.bf16.msra.mxu1 %v4921_v46  ;;  %v4907_v46 = vcombine.low %v265_v39, %v269_v40  ;;  %v5684_v39 = vld [vmem:[#allocation8 + $0x58] sm:$0xff]  }
  0xf1   :  { %1072 = vmatprep.subr.bf16.mxu1 %v4930_v49  ;;  %v4916_v49 = vcombine.high %v273_v43, %v277_v44  ;;  %v5685_v40 = vld [vmem:[#allocation8 + $0x18] sm:$0xff]  }
  0xf4   :  { %1073 = vmatpush1.bf16.msra.mxu1 %v4929_v50  ;;  %v4915_v50 = vcombine.low %v273_v43, %v277_v44  ;;  %v242_v43 = vld [vmem:[#allocation5 + $0x150] sm:$0xff] }
  0xf5   :  { %1074 = vmatprep.subr.bf16.mxu1 %v4938_v53  ;;  %v4924_v53 = vcombine.high %v281_v47, %v285_v48  ;;  %v246_v44 = vld [vmem:[#allocation5 + $0x170] sm:$0xff] }
  0xf8   :  { %1075 = vmatpush1.bf16.msra.mxu1 %v4937_v54  ;;  %v4923_v54 = vcombine.low %v281_v47, %v285_v48  ;;  %v250_v48 = vld [vmem:[#allocation5 + $0x190] sm:$0xff] }
  0xf9   :  { %1076 = vmatprep.subr.bf16.mxu1 %v4946_v57  ;;  %v4931_v57 = vcombine.low %v289_v51, %v293_v52 }
  0xfc   :  { %1077 = vmatpush1.bf16.msra.mxu1 %v4945_v58  ;;  %v305_v58 = vld [vmem:[#allocation5 + $0x348] sm:$0xff] }
  0xfd   :  { %1078 = vmatprep.subr.bf16.mxu1 %v4954_v61  ;;  %v4939_v61 = vcombine.low %v297_v55, %v301_v56  ;;  %v4948_v0 = vcombine.high %v305_v58, %v309_v59  ;;  %v5689_v55 = vld [vmem:[#allocation8 + $0x28] sm:$0xff]  }
 0x100   :  { %1079 = vmatpush1.bf16.msra.mxu1 %v4953_v62  ;;  %v313_v62 = vld [vmem:[#allocation5 + $0x388] sm:$0xff] }
 0x101   :  { %1080 = vmatprep.subr.bf16.mxu1 %v4962_v1  ;;  %v4947_v1 = vcombine.low %v305_v58, %v309_v59  ;;  %v4956_v4 = vcombine.high %v313_v62, %v317_v63  ;;  %v266_v58 = vld [vmem:[#allocation5 + $0x210] sm:$0xff] }
 0x102   :  { %v270_v59 = vld [vmem:[#allocation5 + $0x230] sm:$0xff] }
 0x104   :  { %1081 = vmatpush1.bf16.msra.mxu1 %v4961_v2  ;;  %v321_v2 = vld [vmem:[#allocation5 + $0x3c8] sm:$0xff] }
 0x105   :  { %1123 = vmatprep.subr.bf16.mxu1 %v4844_v6  ;;  %v4955_v6 = vcombine.low %v313_v62, %v317_v63  ;;  %v4964_v9 = vcombine.high %v321_v2, %v325_v3  ;;  %v5692_v62 = vld [vmem:[#allocation8 + $0x78] sm:$0xff]  }
 0x107   :  { %1083 = vmatmul.mubr.bf16.vlgmr.msra.gmra.mrb[0].mxu1 %v6561_v5 }
 0x108   :  { %1124 = vmatpush1.bf16.msra.mxu1 %v4843_v7  ;;  %1092 = vmatprep.mubr.bf16.mxu1 %v6563_v10  ;;  %v202_v7 = vld [vmem:[#allocation5 + $0x10] sm:$0xff] }
 0x109   :  { %1125 = vmatprep.subr.bf16.mxu1 %v4852_v11  ;;  %v4963_v11 = vcombine.low %v321_v2, %v325_v3  ;;  %v4846_v14 = vcombine.high %v202_v7, %v206_v8  ;;  %v6590_v2 = vld [vmem:[#allocation2 + $0x4] ss:$8 sps:$4 sm:$0xff]  }
 0x10a   :  { %v5693_v3 = vld [vmem:[#allocation8 + $0x38] sm:$0xff]  }
 0x10c   :  { %1126 = vmatpush1.bf16.msra.mxu1 %v4851_v12  ;;  %v210_v12 = vld [vmem:[#allocation5 + $0x50] sm:$0xff] }
 0x10d   :  { %1127 = vmatprep.subr.bf16.mxu1 %v4860_v15  ;;  %v5678_v15 = vld [vmem:[#allocation8 + $0x40] sm:$0xff]  }
 0x10e   :  { %5278 = vmatprep.subr.bf16.mxu0 %v5678_v15 }
 0x10f   :  { %1093 = vmatmul.mubr.bf16.gmra.mrb[4].mxu1 %v6567_v16 }
 0x110   :  { %1128 = vmatpush1.bf16.msra.mxu1 %v4859_v18  ;;  %1102 = vmatprep.mubr.bf16.mxu1 %v6569_v21  ;;  %v4845_v18 = vcombine.low %v202_v7, %v206_v8  ;;  %v282_v8 = vld [vmem:[#allocation5 + $0x290] sm:$0xff] }
 0x111   :  { %1129 = vmatprep.subr.bf16.mxu1 %v4868_v22  ;;  %v5679_v22 = vld [vmem:[#allocation8] sm:$0xff]  }
 0x112   :  { %5279 = vmatpush3.bf16.msra.mxu0 %v5679_v22 }
 0x113   :  { %5280 = vmatprep.subr.bf16.mxu0 %v5680_v24  ;;  %v306_v24 = vld [vmem:[#allocation5 + $0x350] sm:$0xff] }
 0x114   :  { %1130 = vmatpush1.bf16.msra.mxu1 %v4867_v23  ;;  %v4854_v23 = vcombine.high %v210_v12, %v214_v13 }
 0x115   :  { %1131 = vmatprep.subr.bf16.mxu1 %v4876_v26  ;;  %v5682_v26 = vld [vmem:[#allocation8 + $0x50] sm:$0xff]  }
 0x116   :  { %5281 = vmatpush3.bf16.msra.mxu0 %v5681_v25  ;;  %v310_v25 = vld [vmem:[#allocation5 + $0x370] sm:$0xff] }
 0x117   :  { %1103 = vmatmul.mubr.bf16.gmra.mrb[8].mxu1 %v6573_v27  ;;  %5282 = vmatprep.subr.bf16.mxu0 %v5682_v26 }
 0x118   :  { %1132 = vmatpush1.bf16.msra.mxu1 %v4875_v28  ;;  %1112 = vmatprep.mubr.bf16.mxu1 %v6575_v31  ;;  %v4853_v28 = vcombine.low %v210_v12, %v214_v13  ;;  %v290_v13 = vld [vmem:[#allocation5 + $0x2d0] sm:$0xff] }
 0x119   :  { %1133 = vmatprep.subr.bf16.mxu1 %v4884_v32  ;;  %v5683_v32 = vld [vmem:[#allocation8 + $0x10] sm:$0xff]  }
 0x11a   :  { %5283 = vmatpush3.bf16.msra.mxu0 %v5683_v32  ;;  %v4949_v32 = vcombine.low %v306_v24, %v310_v25 }
 0x11b   :  { %5284 = vmatprep.subr.bf16.mxu0 %v5684_v39  ;;  %v203_v39 = vld [vmem:[#allocation5 + $0x18] sm:$0xff] }
 0x11c   :  { %1134 = vmatpush1.bf16.msra.mxu1 %v4883_v33  ;;  %v4862_v33 = vcombine.high %v218_v19, %v222_v20  ;;  %v298_v19 = vld [vmem:[#allocation5 + $0x310] sm:$0xff] }
 0x11d   :  { %1135 = vmatprep.subr.bf16.mxu1 %v4892_v36  ;;  %v238_v36 = vld [vmem:[#allocation5 + $0x130] sm:$0xff] }
 0x11e   :  { %5285 = vmatpush3.bf16.msra.mxu0 %v5685_v40  ;;  %v4877_v47 = vcombine.low %v234_v35, %v238_v36  ;;  %v302_v20 = vld [vmem:[#allocation5 + $0x330] sm:$0xff]  ;;  %v207_v40 = vld [vmem:[#allocation5 + $0x38] sm:$0xff] }
 0x11f   :  { %1113 = vmatmul.mubr.bf16.gmra.mrb[12].mxu1 %v6579_v37  ;;  %v4941_v26 = vcombine.low %v298_v19, %v302_v20 }
 0x120   :  { %1136 = vmatpush1.bf16.msra.mxu1 %v4891_v38  ;;  %1155 = vmatprep.mubr.bf16.mxu1 %v6558_v17  ;;  %v4932_v17 = vcombine.high %v289_v51, %v293_v52  ;;  %v4870_v38 = vcombine.high %v226_v29, %v230_v30  ;;  %v5688_v51 = vld [vmem:[#allocation8 + $0x68] sm:$0xff]   ;;  %v4885_v52 = vcombine.low %v242_v43, %v246_v44 }
 0x121   :  { %1137 = vmatprep.subr.bf16.mxu1 %v4900_v41  ;;  %v5686_v41 = vld [vmem:[#allocation8 + $0x60] sm:$0xff]  }
 0x122   :  { %5286 = vmatprep.subr.bf16.mxu0 %v5686_v41 }
 0x124   :  { %1138 = vmatpush1.bf16.msra.mxu1 %v4899_v42  ;;  %v4869_v42 = vcombine.low %v226_v29, %v230_v30  ;;  %v314_v29 = vld [vmem:[#allocation5 + $0x390] sm:$0xff] }
 0x125   :  { %1139 = vmatprep.subr.bf16.mxu1 %v4908_v45  ;;  %v5687_v45 = vld [vmem:[#allocation8 + $0x20] sm:$0xff]   ;;  %v318_v30 = vld [vmem:[#allocation5 + $0x3b0] sm:$0xff] }
 0x126   :  { %5287 = vmatpush3.bf16.msra.mxu0 %v5687_v45  ;;  %v4847_v45 = vcombine.low %v203_v39, %v207_v40 }
 0x127   :  { %5288 = vmatprep.subr.bf16.mxu0 %v5688_v51  ;;  %v227_v51 = vld [vmem:[#allocation5 + $0xd8] sm:$0xff] }
 0x128   :  { %1140 = vmatpush1.bf16.msra.mxu1 %v4907_v46  ;;  %v4878_v46 = vcombine.high %v234_v35, %v238_v36  ;;  %v326_v35 = vld [vmem:[#allocation5 + $0x3f0] sm:$0xff]  ;;  %v4957_v36 = vcombine.low %v314_v29, %v318_v30 }
 0x129   :  { %1141 = vmatprep.subr.bf16.mxu1 %v4916_v49  ;;  %v254_v49 = vld [vmem:[#allocation5 + $0x1b0] sm:$0xff] }
 0x12a   :  { %v4894_v56 = vcombine.high %v250_v48, %v254_v49  ;;  %5289 = vmatpush3.bf16.msra.mxu0 %v5689_v55  ;;  %v235_v55 = vld [vmem:[#allocation5 + $0x118] sm:$0xff] }
 0x12c   :  { %1142 = vmatpush1.bf16.msra.mxu1 %v4915_v50  ;;  %v4886_v50 = vcombine.high %v242_v43, %v246_v44  ;;  %v211_v43 = vld [vmem:[#allocation5 + $0x58] sm:$0xff] }
 0x12d   :  { %1143 = vmatprep.subr.bf16.mxu1 %v4924_v53  ;;  %v258_v53 = vld [vmem:[#allocation5 + $0x1d0] sm:$0xff]  ;;  %v215_v44 = vld [vmem:[#allocation5 + $0x78] sm:$0xff] }
 0x130   :  { %1144 = vmatpush1.bf16.msra.mxu1 %v4923_v54  ;;  %v262_v54 = vld [vmem:[#allocation5 + $0x1f0] sm:$0xff] }
 0x131   :  { %1145 = vmatprep.subr.bf16.mxu1 %v4932_v17  ;;  %v5690_v17 = vld [vmem:[#allocation8 + $0x70] sm:$0xff]   ;;  %v4901_v63 = vcombine.low %v258_v53, %v262_v54 }
 0x132   :  { %5290 = vmatprep.subr.bf16.mxu0 %v5690_v17 }
 0x134   :  { %1146 = vmatpush1.bf16.msra.mxu1 %v4931_v57  ;;  %v4893_v57 = vcombine.low %v250_v48, %v254_v49  ;;  %v223_v48 = vld [vmem:[#allocation5 + $0xb8] sm:$0xff]  ;;  %v4855_v49 = vcombine.low %v211_v43, %v215_v44 }
 0x135   :  { %1147 = vmatprep.subr.bf16.mxu1 %v4940_v60  ;;  %v5691_v60 = vld [vmem:[#allocation8 + $0x30] sm:$0xff]  }
 0x136   :  { %5291 = vmatpush3.bf16.msra.mxu0 %v5691_v60  ;;  %v251_v60 = vld [vmem:[#allocation5 + $0x198] sm:$0xff] }
 0x137   :  { %5292 = vmatprep.subr.bf16.mxu0 %v5692_v62 }
 0x138   :  { %1148 = vmatpush1.bf16.msra.mxu1 %v4939_v61  ;;  %v4902_v61 = vcombine.high %v258_v53, %v262_v54 }
 0x139   :  { %1149 = vmatprep.subr.bf16.mxu1 %v4948_v0  ;;  %v274_v0 = vld [vmem:[#allocation5 + $0x250] sm:$0xff] }
 0x13a   :  { %5293 = vmatpush3.bf16.msra.mxu0 %v5693_v3  ;;  %v267_v3 = vld [vmem:[#allocation5 + $0x218] sm:$0xff] }
 0x13c   :  { %1150 = vmatpush1.bf16.msra.mxu1 %v4947_v1  ;;  %v278_v1 = vld [vmem:[#allocation5 + $0x270] sm:$0xff] }
 0x13d   :  { %1151 = vmatprep.subr.bf16.mxu1 %v4956_v4  ;;  %v4910_v4 = vcombine.high %v266_v58, %v270_v59  ;;  %v4918_v7 = vcombine.high %v274_v0, %v278_v1 }
 0x140   :  { %1152 = vmatpush1.bf16.msra.mxu1 %v4955_v6  ;;  %v4909_v6 = vcombine.low %v266_v58, %v270_v59 }
 0x141   :  { %1153 = vmatprep.subr.bf16.mxu1 %v4964_v9  ;;  %v286_v9 = vld [vmem:[#allocation5 + $0x2b0] sm:$0xff] }
 0x142   :  { %v4926_v12 = vcombine.high %v282_v8, %v286_v9  ;;  %v4925_v15 = vcombine.low %v282_v8, %v286_v9 }
 0x144   :  { %1154 = vmatpush1.bf16.msra.mxu1 %v4963_v11  ;;  %v4917_v11 = vcombine.low %v274_v0, %v278_v1 }
 0x145   :  { %1196 = vmatprep.subr.bf16.mxu1 %v4846_v14  ;;  %v294_v14 = vld [vmem:[#allocation5 + $0x2f0] sm:$0xff] }
 0x146   :  { %v4933_v22 = vcombine.low %v290_v13, %v294_v14 }
 0x147   :  { %1156 = vmatmul.mubr.bf16.vlgmr.msra.gmra.mrb[16].mxu1 %v6561_v5 }
 0x148   :  { %1197 = vmatpush1.bf16.msra.mxu1 %v4845_v18  ;;  %1165 = vmatprep.mubr.bf16.mxu1 %v6563_v10  ;;  %v4934_v18 = vcombine.high %v290_v13, %v294_v14 }
 0x149   :  { %1198 = vmatprep.subr.bf16.mxu1 %v4854_v23  ;;  %v4942_v23 = vcombine.high %v298_v19, %v302_v20  ;;  %v299_v19 = vld [vmem:[#allocation5 + $0x318] sm:$0xff] }
 0x14a   :  { %v303_v20 = vld [vmem:[#allocation5 + $0x338] sm:$0xff] }
 0x14c   :  { %1199 = vmatpush1.bf16.msra.mxu1 %v4853_v28  ;;  %v4950_v28 = vcombine.high %v306_v24, %v310_v25  ;;  %v307_v24 = vld [vmem:[#allocation5 + $0x358] sm:$0xff] }
 0x14d   :  { %1200 = vmatprep.subr.bf16.mxu1 %v4862_v33  ;;  %v4958_v33 = vcombine.high %v314_v29, %v318_v30  ;;  %v311_v25 = vld [vmem:[#allocation5 + $0x378] sm:$0xff] }
 0x14e   :  { %v315_v29 = vld [vmem:[#allocation5 + $0x398] sm:$0xff] }
 0x14f   :  { %1166 = vmatmul.mubr.bf16.gmra.mrb[20].mxu1 %v6567_v16  ;;  %v319_v30 = vld [vmem:[#allocation5 + $0x3b8] sm:$0xff] }
 0x150   :  { %1201 = vmatpush1.bf16.msra.mxu1 %v4861_v34  ;;  %1175 = vmatprep.mubr.bf16.mxu1 %v6569_v21  ;;  %v322_v34 = vld [vmem:[#allocation5 + $0x3d0] sm:$0xff] }
 0x151   :  { %1202 = vmatprep.subr.bf16.mxu1 %v4870_v38  ;;  %v4966_v38 = vcombine.high %v322_v34, %v326_v35  ;;  %v4965_v41 = vcombine.low %v322_v34, %v326_v35  ;;  %v323_v34 = vld [vmem:[#allocation5 + $0x3d8] sm:$0xff] }
 0x152   :  { %v327_v35 = vld [vmem:[#allocation5 + $0x3f8] sm:$0xff] }
 0x154   :  { %1203 = vmatpush1.bf16.msra.mxu1 %v4869_v42  ;;  %v4848_v42 = vcombine.high %v203_v39, %v207_v40  ;;  %v5710_v39 = vld [vmem:[#allocation8 + $0x140] sm:$0xff]   ;;  %v4967_v40 = vcombine.low %v323_v34, %v327_v35 }
 0x155   :  { %1204 = vmatprep.subr.bf16.mxu1 %v4878_v46  ;;  %v4856_v46 = vcombine.high %v211_v43, %v215_v44  ;;  %5358 = vmatprep.subr.bf16.mxu0 %v5710_v39  ;;  %v5696_v43 = vld [vmem:[#allocation8 + $0xc8] sm:$0xff]   ;;  %v6031_v44 = vld [vmem:[#allocation2] ss:$8 sps:$4 sm:$0xff]  }
 0x157   :  { %1176 = vmatmul.mubr.bf16.gmra.mrb[24].mxu1 %v6573_v27 }
 0x158   :  { %1205 = vmatpush1.bf16.msra.mxu1 %v4877_v47  ;;  %1185 = vmatprep.mubr.bf16.mxu1 %v6575_v31  ;;  %v219_v47 = vld [vmem:[#allocation5 + $0x98] sm:$0xff] }
 0x159   :  { %1206 = vmatprep.subr.bf16.mxu1 %v4886_v50  ;;  %v4864_v50 = vcombine.high %v219_v47, %v223_v48  ;;  %v4863_v53 = vcombine.low %v219_v47, %v223_v48  ;;  %v5698_v47 = vld [vmem:[#allocation8 + $0xd0] sm:$0xff]   ;;  %v330_v48 = vlaneseq }
 0x15c   :  { %1207 = vmatpush1.bf16.msra.mxu1 %v4885_v52  ;;  %v231_v52 = vld [vmem:[#allocation5 + $0xf8] sm:$0xff] }
 0x15d   :  { %1208 = vmatprep.subr.bf16.mxu1 %v4894_v56  ;;  %v4872_v54 = vcombine.high %v227_v51, %v231_v52  ;;  %v239_v56 = vld [vmem:[#allocation5 + $0x138] sm:$0xff]  ;;  %v4871_v17 = vcombine.low %v227_v51, %v231_v52  ;;  %v6601_v52 = vshrl.u32 %v330_v48, 7 }
 0x15e   :  { %v4879_v58 = vcombine.low %v235_v55, %v239_v56  ;;  %v6033_v51 = vld [vmem:[#allocation2 + $0x10] ss:$8 sps:$4 sm:$0xff]  }
 0x15f   :  { %1186 = vmatmul.mubr.bf16.gmra.mrb[28].mxu1 %v6579_v37 }
 0x160   :  { %1209 = vmatpush1.bf16.msra.mxu1 %v4893_v57  ;;  %1228 = vmatprep.mubr.bf16.mxu1 %v6590_v2  ;;  %v243_v57 = vld [vmem:[#allocation5 + $0x158] sm:$0xff] }
 0x161   :  { %1210 = vmatprep.subr.bf16.mxu1 %v4902_v61  ;;  %v255_v61 = vld [vmem:[#allocation5 + $0x1b8] sm:$0xff] }
 0x162   :  { %v4895_v0 = vcombine.low %v251_v60, %v255_v61 }
 0x164   :  { %1211 = vmatpush1.bf16.msra.mxu1 %v4901_v63  ;;  %v259_v63 = vld [vmem:[#allocation5 + $0x1d8] sm:$0xff] }
 0x165   :  { %1212 = vmatprep.subr.bf16.mxu1 %v4910_v4  ;;  %v271_v4 = vld [vmem:[#allocation5 + $0x238] sm:$0xff] }
 0x166   :  { %v4911_v8 = vcombine.low %v267_v3, %v271_v4 }
 0x168   :  { %1213 = vmatpush1.bf16.msra.mxu1 %v4909_v6 }
 0x169   :  { %1214 = vmatprep.subr.bf16.mxu1 %v4918_v7  ;;  %v275_v7 = vld [vmem:[#allocation5 + $0x258] sm:$0xff] }
 0x16c   :  { %1215 = vmatpush1.bf16.msra.mxu1 %v4917_v11  ;;  %v283_v11 = vld [vmem:[#allocation5 + $0x298] sm:$0xff] }
 0x16d   :  { %1216 = vmatprep.subr.bf16.mxu1 %v4926_v12  ;;  %v287_v12 = vld [vmem:[#allocation5 + $0x2b8] sm:$0xff] }
 0x16e   :  { %v4928_v14 = vcombine.high %v283_v11, %v287_v12 }
 0x170   :  { %1217 = vmatpush1.bf16.msra.mxu1 %v4925_v15  ;;  %v291_v15 = vld [vmem:[#allocation5 + $0x2d8] sm:$0xff] }
 0x171   :  { %1218 = vmatprep.subr.bf16.mxu1 %v4934_v18  ;;  %v4927_v18 = vcombine.low %v283_v11, %v287_v12  ;;  %v6037_v11 = vld [vmem:[#allocation2 + $0x30] ss:$8 sps:$4 sm:$0xff]  }
 0x174   :  { %1219 = vmatpush1.bf16.msra.mxu1 %v4933_v22 }
 0x175   :  { %1220 = vmatprep.subr.bf16.mxu1 %v4942_v23  ;;  %v4944_v23 = vcombine.high %v299_v19, %v303_v20 }
 0x178   :  { %1221 = vmatpush1.bf16.msra.mxu1 %v4941_v26  ;;  %v4943_v26 = vcombine.low %v299_v19, %v303_v20 }
 0x179   :  { %1222 = vmatprep.subr.bf16.mxu1 %v4950_v28  ;;  %v4952_v28 = vcombine.high %v307_v24, %v311_v25 }
 0x17c   :  { %1223 = vmatpush1.bf16.msra.mxu1 %v4949_v32  ;;  %v4951_v32 = vcombine.low %v307_v24, %v311_v25 }
 0x17d   :  { %1224 = vmatprep.subr.bf16.mxu1 %v4958_v33  ;;  %v4960_v33 = vcombine.high %v315_v29, %v319_v30 }
 0x180   :  { %1225 = vmatpush1.bf16.msra.mxu1 %v4957_v36  ;;  %v4959_v36 = vcombine.low %v315_v29, %v319_v30 }
 0x181   :  { %1226 = vmatprep.subr.bf16.mxu1 %v4966_v38  ;;  %v4968_v38 = vcombine.high %v323_v34, %v327_v35  ;;  %v5714_v34 = vld [vmem:[#allocation8 + $0x150] sm:$0xff]  }
 0x184   :  { %1227 = vmatpush1.bf16.msra.mxu1 %v4965_v41  ;;  %v5694_v41 = vld [vmem:[#allocation8 + $0xc0] sm:$0xff]  }
 0x185   :  { %1269 = vmatprep.subr.bf16.mxu1 %v4848_v42  ;;  %v5695_v42 = vld [vmem:[#allocation8 + $0x80] sm:$0xff]  }
 0x187   :  { %1229 = vmatmul.mubr.bf16.vlgmr.msra.gmra.mrb[32].mxu1 %v6561_v5  ;;  %v4880_v5 = vcombine.high %v235_v55, %v239_v56  ;;  %v5702_v55 = vld [vmem:[#allocation8 + $0xe0] sm:$0xff]   ;;  %v6604_v56 = vsub.s32 0, %v6601_v52 }
 0x188   :  { %1270 = vmatpush1.bf16.msra.mxu1 %v4847_v45  ;;  %1238 = vmatprep.mubr.bf16.mxu1 %v6563_v10  ;;  %v247_v10 = vld [vmem:[#allocation5 + $0x178] sm:$0xff] }
 0x189   :  { %1271 = vmatprep.subr.bf16.mxu1 %v4856_v46  ;;  %v4888_v59 = vcombine.high %v243_v57, %v247_v10  ;;  %v4887_v62 = vcombine.low %v243_v57, %v247_v10  ;;  %v6032_v45 = vld [vmem:[#allocation2 + $0x14] ss:$8 sps:$4 sm:$0xff]   ;;  %v5703_v57 = vld [vmem:[#allocation8 + $0xa0] sm:$0xff]  }
 0x18a   :  { %v5697_v46 = vld [vmem:[#allocation8 + $0x88] sm:$0xff]  }
 0x18b   :  { %v5704_v10 = vld [vmem:[#allocation8 + $0xe8] sm:$0xff]  }
 0x18c   :  { %1272 = vmatpush1.bf16.msra.mxu1 %v4855_v49  ;;  %v5699_v49 = vld [vmem:[#allocation8 + $0x90] sm:$0xff]  }
 0x18d   :  { %1273 = vmatprep.subr.bf16.mxu1 %v4864_v50  ;;  %v5700_v50 = vld [vmem:[#allocation8 + $0xd8] sm:$0xff]  }
 0x18f   :  { %1239 = vmatmul.mubr.bf16.gmra.mrb[36].mxu1 %v6567_v16  ;;  %v4896_v16 = vcombine.high %v251_v60, %v255_v61  ;;  %v6036_v61 = vld [vmem:[#allocation2 + $0x34] ss:$8 sps:$4 sm:$0xff]  }
 0x190   :  { %1274 = vmatpush1.bf16.msra.mxu1 %v4863_v53  ;;  %1248 = vmatprep.mubr.bf16.mxu1 %v6569_v21  ;;  %v263_v21 = vld [vmem:[#allocation5 + $0x1f8] sm:$0xff]  ;;  %v6034_v53 = vld [vmem:[#allocation2 + $0x24] ss:$8 sps:$4 sm:$0xff]  }
 0x191   :  { %1275 = vmatprep.subr.bf16.mxu1 %v4872_v54  ;;  %v4904_v1 = vcombine.high %v259_v63, %v263_v21  ;;  %v4903_v6 = vcombine.low %v259_v63, %v263_v21  ;;  %v5701_v54 = vld [vmem:[#allocation8 + $0x98] sm:$0xff]  }
 0x194   :  { %1276 = vmatpush1.bf16.msra.mxu1 %v4871_v17  ;;  %v6606_v17 = vld [vmem:[#allocation7] sm:$0xff] }
 0x195   :  { %1277 = vmatprep.subr.bf16.mxu1 %v4880_v5  ;;  %v6609_v5 = vsub.s32 1, %v6601_v52 }
 0x197   :  { %1249 = vmatmul.mubr.bf16.gmra.mrb[40].mxu1 %v6573_v27  ;;  %v4912_v27 = vcombine.high %v267_v3, %v271_v4  ;;  %v6617_v60 = vrot.slane %v6606_v17, %v6609_v5  ;;  %v5707_v4 = vld [vmem:[#allocation8 + $0xb0] sm:$0xff]  }
 0x198   :  { %1278 = vmatpush1.bf16.msra.mxu1 %v4879_v58  ;;  %1258 = vmatprep.mubr.bf16.mxu1 %v6575_v31  ;;  %v279_v31 = vld [vmem:[#allocation5 + $0x278] sm:$0xff]  ;;  %v6035_v58 = vld [vmem:[#allocation2 + $0x20] ss:$8 sps:$4 sm:$0xff]  }
 0x199   :  { %1279 = vmatprep.subr.bf16.mxu1 %v4888_v59  ;;  %v4920_v9 = vcombine.high %v275_v7, %v279_v31  ;;  %v4919_v13 = vcombine.low %v275_v7, %v279_v31  ;;  %v6613_v59 = vrot.slane %v6606_v17, %v6604_v56  ;;  %v5708_v31 = vld [vmem:[#allocation8 + $0xf8] sm:$0xff]  }
 0x19c   :  { %1280 = vmatpush1.bf16.msra.mxu1 %v4887_v62  ;;  %v5705_v62 = vld [vmem:[#allocation8 + $0xa8] sm:$0xff]  }
 0x19d   :  { %1281 = vmatprep.subr.bf16.mxu1 %v4896_v16  ;;  %v5706_v16 = vld [vmem:[#allocation8 + $0xf0] sm:$0xff]  }
 0x19f   :  { %1259 = vmatmul.mubr.bf16.gmra.mrb[44].mxu1 %v6579_v37  ;;  %v295_v37 = vld [vmem:[#allocation5 + $0x2f8] sm:$0xff] }
 0x1a0   :  { %1282 = vmatpush1.bf16.msra.mxu1 %v4895_v0  ;;  %1301 = vmatprep.mubr.bf16.mxu1 %v6590_v2  ;;  %v4936_v2 = vcombine.high %v291_v15, %v295_v37  ;;  %v4935_v22 = vcombine.low %v291_v15, %v295_v37 }
 0x1a1   :  { %1283 = vmatprep.subr.bf16.mxu1 %v4904_v1 }
 0x1a4   :  { %1284 = vmatpush1.bf16.msra.mxu1 %v4903_v6 }
 0x1a5   :  { %1285 = vmatprep.subr.bf16.mxu1 %v4912_v27 }
 0x1a8   :  { %1286 = vmatpush1.bf16.msra.mxu1 %v4911_v8 }
 0x1a9   :  { %1287 = vmatprep.subr.bf16.mxu1 %v4920_v9 }
 0x1ac   :  { %1288 = vmatpush1.bf16.msra.mxu1 %v4919_v13 }
 0x1ad   :  { %1289 = vmatprep.subr.bf16.mxu1 %v4928_v14  ;;  %v5709_v14 = vld [vmem:[#allocation8 + $0xb8] sm:$0xff]  }
 0x1b0   :  { %1290 = vmatpush1.bf16.msra.mxu1 %v4927_v18 }
 0x1b1   :  { %1291 = vmatprep.subr.bf16.mxu1 %v4936_v2  ;;  %v5711_v2 = vld [vmem:[#allocation8 + $0x100] sm:$0xff]  }
 0x1b4   :  { %1292 = vmatpush1.bf16.msra.mxu1 %v4935_v22  ;;  %v5712_v22 = vld [vmem:[#allocation8 + $0x148] sm:$0xff]  }
 0x1b5   :  { %1293 = vmatprep.subr.bf16.mxu1 %v4944_v23 }
 0x1b8   :  { %1294 = vmatpush1.bf16.msra.mxu1 %v4943_v26 }
 0x1b9   :  { %1295 = vmatprep.subr.bf16.mxu1 %v4952_v28 }
 0x1bc   :  { %1296 = vmatpush1.bf16.msra.mxu1 %v4951_v32  ;;  %v5713_v32 = vld [vmem:[#allocation8 + $0x108] sm:$0xff]  }
 0x1bd   :  { %1297 = vmatprep.subr.bf16.mxu1 %v4960_v33 }
 0x1c0   :  { %1298 = vmatpush1.bf16.msra.mxu1 %v4959_v36 }
 0x1c1   :  { %1299 = vmatprep.subr.bf16.mxu1 %v4968_v38 }
 0x1c4   :  { %1300 = vmatpush1.bf16.msra.mxu1 %v4967_v40  ;;  %v5715_v40 = vld [vmem:[#allocation8 + $0x110] sm:$0xff]  }
 0x1c5   :  { %5318 = vmatprep.subr.bf16.mxu1 %v5694_v41 }
 0x1c7   :  { %1302 = vmatmul.mubr.bf16.vlgmr.msra.gmra.mrb[48].mxu1 %v6031_v44 }
 0x1c8   :  { %1311 = vmatprep.mubr.bf16.mxu1 %v6032_v45  ;;  %5319 = vmatpush3.bf16.msra.mxu1 %v5695_v42 }
 0x1c9   :  { %5320 = vmatprep.subr.bf16.mxu1 %v5696_v43  ;;  %v5716_v43 = vld [vmem:[#allocation8 + $0x158] sm:$0xff]  }
 0x1cc   :  { %5321 = vmatpush3.bf16.msra.mxu1 %v5697_v46 }
 0x1cd   :  { %5322 = vmatprep.subr.bf16.mxu1 %v5698_v47 }
 0x1cf   :  { %1312 = vmatmul.mubr.bf16.gmra.mrb[52].mxu1 %v6033_v51  ;;  %v5717_v51 = vld [vmem:[#allocation8 + $0x118] sm:$0xff]  }
 0x1d0   :  { %1321 = vmatprep.mubr.bf16.mxu1 %v6034_v53  ;;  %5323 = vmatpush3.bf16.msra.mxu1 %v5699_v49 }
 0x1d1   :  { %5324 = vmatprep.subr.bf16.mxu1 %v5700_v50 }
 0x1d4   :  { %5325 = vmatpush3.bf16.msra.mxu1 %v5701_v54  ;;  %v5718_v54 = vld [vmem:[#allocation8 + $0x160] sm:$0xff]  }
 0x1d5   :  { %5326 = vmatprep.subr.bf16.mxu1 %v5702_v55 }
 0x1d7   :  { %1322 = vmatmul.mubr.bf16.gmra.mrb[56].mxu1 %v6035_v58 }
 0x1d8   :  { %1331 = vmatprep.mubr.bf16.mxu1 %v6036_v61  ;;  %5327 = vmatpush3.bf16.msra.mxu1 %v5703_v57  ;;  %v5719_v61 = vld [vmem:[#allocation8 + $0x120] sm:$0xff]  }
 0x1d9   :  { %5328 = vmatprep.subr.bf16.mxu1 %v5704_v10 }
 0x1da   :  { %v1084_v63 = vpop.f32.mrb[0].mxu1 }
 0x1db   :  { %v1085_v21 = vadd.f32 %v1084_v63, %v6613_v59  ;;  %v1086_v0 = vpop.f32.mrb[1].mxu1  ;;  %v5720_v63 = vld [vmem:[#allocation8 + $0x168] sm:$0xff]  }
 0x1dc   :  { %v1087_v1 = vadd.f32 %v1086_v0, %v6617_v60  ;;  %v1088_v3 = vpop.f32.mrb[2].mxu1  ;;  %5329 = vmatpush3.bf16.msra.mxu1 %v5705_v62 }
 0x1dd   :  { %v1342_v6 = vmax.f32 %v1085_v21, 0.0  ;;  %v1089_v27 = vadd.f32 %v1088_v3, %v6613_v59  ;;  %v1090_v7 = vpop.f32.mrb[3].mxu1  ;;  %5330 = vmatprep.subr.bf16.mxu1 %v5706_v16 }
 0x1de   :  { %v1091_v8 = vadd.f32 %v1090_v7, %v6617_v60  ;;  %v1343_v12 = vmax.f32 %v1087_v1, 0.0  ;;  %v5721_v7 = vld [vmem:[#allocation8 + $0x128] sm:$0xff]  }
 0x1df   :  { %v1350_v9 = vmax.f32 %v1089_v27, 0.0  ;;  %1332 = vmatmul.mubr.bf16.gmra.mrb[60].mxu1 %v6037_v11 }
 0x1e0   :  { %v1351_v13 = vmax.f32 %v1091_v8, 0.0  ;;  %5331 = vmatpush3.bf16.msra.mxu1 %v5707_v4  ;;  %v5722_v8 = vld [vmem:[#allocation8 + $0x170] sm:$0xff]  }
 0x1e1   :  { %v1406_v15 = vpack.c.bf16 %v1350_v9, %v1342_v6  ;;  %5332 = vmatprep.subr.bf16.mxu1 %v5708_v31 }
 0x1e2   :  { %v1407_v37 = vpack.c.bf16 %v1351_v13, %v1343_v12  ;;  %v1094_v18 = vpop.f32.mrb[4].mxu1  ;;  %v5723_v13 = vld [vmem:[#allocation8 + $0x130] sm:$0xff]  }
 0x1e3   :  { %v1095_v19 = vadd.f32 %v1094_v18, %v6613_v59  ;;  %v1096_v20 = vpop.f32.mrb[5].mxu1 }
 0x1e4   :  { %1989 = vmatprep.mubr.bf16.mxu0 %v1407_v37  ;;  %v1097_v23 = vadd.f32 %v1096_v20, %v6617_v60  ;;  %v1098_v24 = vpop.f32.mrb[6].mxu1  ;;  %5333 = vmatpush3.bf16.msra.mxu1 %v5709_v14  ;;  %v5724_v14 = vld [vmem:[#allocation8 + $0x178] sm:$0xff]   ;;  %v344_v37 = vsub.s32 3, %v6601_v52 }
 0x1e5   :  { %1990 = vmatmul.mubr.bf16.vlgmr.msra.gmra.mrb[0].mxu0 %v1406_v15  ;;  %v1358_v25 = vmax.f32 %v1095_v19, 0.0  ;;  %v1099_v26 = vadd.f32 %v1098_v24, %v6613_v59  ;;  %v1100_v28 = vpop.f32.mrb[7].mxu1  ;;  %v5725_v15 = vld [vmem:[#allocation8 + $0x138] sm:$0xff]  }
 0x1e6   :  { %v1359_v29 = vmax.f32 %v1097_v23, 0.0  ;;  %v1101_v30 = vadd.f32 %v1100_v28, %v6617_v60  ;;  %5359 = vmatpush3.bf16.msra.mxu0 %v5711_v2  ;;  %v6645_v2 = vrot.slane %v6606_v17, %v344_v37 }
 0x1e7   :  { %v1366_v33 = vmax.f32 %v1099_v26, 0.0  ;;  %5360 = vmatprep.subr.bf16.mxu0 %v5712_v22 }
 0x1e8   :  { %v1367_v35 = vmax.f32 %v1101_v30, 0.0 }
 0x1e9   :  { %v1414_v36 = vpack.c.bf16 %v1366_v33, %v1358_v25 }
 0x1ea   :  { %v1415_v38 = vpack.c.bf16 %v1367_v35, %v1359_v29  ;;  %v1104_v39 = vpop.f32.mrb[8].mxu1  ;;  %5361 = vmatpush3.bf16.msra.mxu0 %v5713_v32 }
 0x1eb   :  { %v1105_v41 = vadd.f32 %v1104_v39, %v6613_v59  ;;  %v1106_v42 = vpop.f32.mrb[9].mxu1  ;;  %5362 = vmatprep.subr.bf16.mxu0 %v5714_v34 }
 0x1ec   :  { %v1107_v44 = vadd.f32 %v1106_v42, %v6617_v60  ;;  %v1108_v45 = vpop.f32.mrb[10].mxu1  ;;  %1997 = vmatprep.mubr.bf16.mxu0 %v1415_v38  ;;  %v5727_v38 = vld [vmem:[#allocation8 + $0x180] sm:$0xff]  }
 0x1ed   :  { %v1374_v46 = vmax.f32 %v1105_v41, 0.0  ;;  %v1109_v47 = vadd.f32 %v1108_v45, %v6613_v59  ;;  %v1110_v48 = vpop.f32.mrb[11].mxu1  ;;  %1998 = vmatmul.mubr.bf16.gmra.mrb[4].mxu0 %v1414_v36  ;;  %v5728_v41 = vld [vmem:[#allocation8 + $0x1c8] sm:$0xff]  }
 0x1ee   :  { %v1375_v49 = vmax.f32 %v1107_v44, 0.0  ;;  %v1111_v50 = vadd.f32 %v1110_v48, %v6617_v60  ;;  %5363 = vmatpush3.bf16.msra.mxu0 %v5715_v40 }
 0x1ef   :  { %v1382_v53 = vmax.f32 %v1109_v47, 0.0  ;;  %5364 = vmatprep.subr.bf16.mxu0 %v5716_v43 }
 0x1f0   :  { %v1383_v55 = vmax.f32 %v1111_v50, 0.0 }
 0x1f1   :  { %v1422_v57 = vpack.c.bf16 %v1382_v53, %v1374_v46 }
 0x1f2   :  { %v1423_v10 = vpack.c.bf16 %v1383_v55, %v1375_v49  ;;  %v1114_v58 = vpop.f32.mrb[12].mxu1  ;;  %5365 = vmatpush3.bf16.msra.mxu0 %v5717_v51  ;;  %v5729_v49 = vld [vmem:[#allocation8 + $0x188] sm:$0xff]   ;;  %v5730_v51 = vld [vmem:[#allocation8 + $0x1d0] sm:$0xff]  }
 0x1f3   :  { %v1115_v62 = vadd.f32 %v1114_v58, %v6613_v59  ;;  %v1116_v16 = vpop.f32.mrb[13].mxu1  ;;  %5366 = vmatprep.subr.bf16.mxu0 %v5718_v54 }
 0x1f4   :  { %v1117_v21 = vadd.f32 %v1116_v16, %v6617_v60  ;;  %v1118_v0 = vpop.f32.mrb[14].mxu1  ;;  %2005 = vmatprep.mubr.bf16.mxu0 %v1423_v10  ;;  %v5731_v10 = vld [vmem:[#allocation8 + $0x190] sm:$0xff]  }
 0x1f5   :  { %v1390_v1 = vmax.f32 %v1115_v62, 0.0  ;;  %v1119_v3 = vadd.f32 %v1118_v0, %v6613_v59  ;;  %v1120_v4 = vpop.f32.mrb[15].mxu1  ;;  %2006 = vmatmul.mubr.bf16.gmra.mrb[8].mxu0 %v1422_v57  ;;  %v5726_v59 = vld [vmem:[#allocation8 + $0x1c0] sm:$0xff]   ;;  %v5732_v62 = vld [vmem:[#allocation8 + $0x1d8] sm:$0xff]  }
 0x1f6   :  { %v1391_v6 = vmax.f32 %v1117_v21, 0.0  ;;  %v1121_v27 = vadd.f32 %v1120_v4, %v6617_v60  ;;  %5367 = vmatpush3.bf16.msra.mxu0 %v5719_v61  ;;  %5398 = vmatprep.subr.bf16.mxu1 %v5726_v59  ;;  %v340_v60 = vsub.s32 2, %v6601_v52  ;;  %v5736_v59 = vld [vmem:[#allocation8 + $0x1e8] sm:$0xff]  }
 0x1f7   :  { %v1398_v31 = vmax.f32 %v1119_v3, 0.0  ;;  %5368 = vmatprep.subr.bf16.mxu0 %v5720_v63 }
 0x1f8   :  { %v1399_v9 = vmax.f32 %v1121_v27, 0.0  ;;  %v6640_v18 = vrot.slane %v6606_v17, %v340_v60 }
 0x1f9   :  { %v1430_v11 = vpack.c.bf16 %v1398_v31, %v1390_v1 }
 0x1fa   :  { %v1431_v12 = vpack.c.bf16 %v1399_v9, %v1391_v6  ;;  %5369 = vmatpush3.bf16.msra.mxu0 %v5721_v7  ;;  %v5733_v6 = vld [vmem:[#allocation8 + $0x198] sm:$0xff]   ;;  %v5734_v7 = vld [vmem:[#allocation8 + $0x1e0] sm:$0xff]  }
 0x1fb   :  { %5370 = vmatprep.subr.bf16.mxu0 %v5722_v8 }
 0x1fc   :  { %2013 = vmatprep.mubr.bf16.mxu0 %v1431_v12  ;;  %v5735_v12 = vld [vmem:[#allocation8 + $0x1a0] sm:$0xff]  }
 0x1fd   :  { %2014 = vmatmul.mubr.bf16.gmra.mrb[12].mxu0 %v1430_v11 }
 0x1fe   :  { %5371 = vmatpush3.bf16.msra.mxu0 %v5723_v13 }
 0x1ff   :  { %5372 = vmatprep.subr.bf16.mxu0 %v5724_v14 }
 0x202   :  { %5373 = vmatpush3.bf16.msra.mxu0 %v5725_v15 }
 0x21a   :  { %v1157_v19 = vpop.f32.mrb[16].mxu1 }
 0x21b   :  { %v1158_v20 = vadd.f32 %v1157_v19, %v6640_v18  ;;  %v1159_v22 = vpop.f32.mrb[17].mxu1 }
 0x21c   :  { %v1160_v23 = vadd.f32 %v1159_v22, %v6645_v2  ;;  %v1161_v24 = vpop.f32.mrb[18].mxu1 }
 0x21d   :  { %v1344_v25 = vmax.f32 %v1158_v20, 0.0  ;;  %v1162_v26 = vadd.f32 %v1161_v24, %v6640_v18  ;;  %v1163_v28 = vpop.f32.mrb[19].mxu1 }
 0x21e   :  { %v1164_v29 = vadd.f32 %v1163_v28, %v6645_v2  ;;  %v1345_v32 = vmax.f32 %v1160_v23, 0.0 }
 0x21f   :  { %v1352_v30 = vmax.f32 %v1162_v26, 0.0  ;;  %v5737_v26 = vld [vmem:[#allocation8 + $0x1a8] sm:$0xff]  }
 0x220   :  { %v1353_v33 = vmax.f32 %v1164_v29, 0.0  ;;  %v5738_v29 = vld [vmem:[#allocation8 + $0x1f0] sm:$0xff]  }
 0x221   :  { %v1408_v34 = vpack.c.bf16 %v1352_v30, %v1344_v25 }
 0x222   :  { %v1409_v35 = vpack.c.bf16 %v1353_v33, %v1345_v32  ;;  %v1167_v36 = vpop.f32.mrb[20].mxu1 }
 0x223   :  { %v1168_v39 = vadd.f32 %v1167_v36, %v6640_v18  ;;  %v1169_v40 = vpop.f32.mrb[21].mxu1  ;;  %v352_v36 = vsub.s32 5, %v6601_v52 }
 0x224   :  { %v1170_v42 = vadd.f32 %v1169_v40, %v6645_v2  ;;  %v1171_v43 = vpop.f32.mrb[22].mxu1  ;;  %2054 = vmatprep.mubr.bf16.mxu1 %v1409_v35  ;;  %v5740_v35 = vld [vmem:[#allocation8 + $0x1f8] sm:$0xff]  }
 0x225   :  { %v1360_v44 = vmax.f32 %v1168_v39, 0.0  ;;  %v1172_v45 = vadd.f32 %v1171_v43, %v6640_v18  ;;  %v1173_v46 = vpop.f32.mrb[23].mxu1  ;;  %2055 = vmatmul.mubr.bf16.vlgmr.msra.gmra.mrb[64].mxu1 %v1408_v34  ;;  %v5739_v34 = vld [vmem:[#allocation8 + $0x1b0] sm:$0xff]   ;;  %v353_v39 = vrot.slane %v6606_v17, %v352_v36 }
 0x226   :  { %v1361_v47 = vmax.f32 %v1170_v42, 0.0  ;;  %v1174_v48 = vadd.f32 %v1173_v46, %v6645_v2  ;;  %5399 = vmatpush3.bf16.msra.mxu1 %v5727_v38 }
 0x227   :  { %v1368_v50 = vmax.f32 %v1172_v45, 0.0  ;;  %5400 = vmatprep.subr.bf16.mxu1 %v5728_v41 }
 0x228   :  { %v1369_v53 = vmax.f32 %v1174_v48, 0.0 }
 0x229   :  { %v1416_v54 = vpack.c.bf16 %v1368_v50, %v1360_v44 }
 0x22a   :  { %v1417_v55 = vpack.c.bf16 %v1369_v53, %v1361_v47  ;;  %v1177_v57 = vpop.f32.mrb[24].mxu1  ;;  %5401 = vmatpush3.bf16.msra.mxu1 %v5729_v49 }
 0x22b   :  { %v1178_v58 = vadd.f32 %v1177_v57, %v6640_v18  ;;  %v1179_v61 = vpop.f32.mrb[25].mxu1  ;;  %5402 = vmatprep.subr.bf16.mxu1 %v5730_v51 }
 0x22c   :  { %v1180_v16 = vadd.f32 %v1179_v61, %v6645_v2  ;;  %v1181_v63 = vpop.f32.mrb[26].mxu1  ;;  %2062 = vmatprep.mubr.bf16.mxu1 %v1417_v55 }
 0x22d   :  { %v1376_v21 = vmax.f32 %v1178_v58, 0.0  ;;  %v1182_v0 = vadd.f32 %v1181_v63, %v6640_v18  ;;  %v1183_v1 = vpop.f32.mrb[27].mxu1  ;;  %2063 = vmatmul.mubr.bf16.gmra.mrb[68].mxu1 %v1416_v54 }
 0x22e   :  { %v1377_v3 = vmax.f32 %v1180_v16, 0.0  ;;  %v1184_v4 = vadd.f32 %v1183_v1, %v6645_v2  ;;  %5403 = vmatpush3.bf16.msra.mxu1 %v5731_v10 }
 0x22f   :  { %v1384_v27 = vmax.f32 %v1182_v0, 0.0  ;;  %5404 = vmatprep.subr.bf16.mxu1 %v5732_v62 }
 0x230   :  { %v1385_v31 = vmax.f32 %v1184_v4, 0.0 }
 0x231   :  { %v1424_v8 = vpack.c.bf16 %v1384_v27, %v1376_v21 }
 0x232   :  { %v1425_v9 = vpack.c.bf16 %v1385_v31, %v1377_v3  ;;  %v1187_v11 = vpop.f32.mrb[28].mxu1  ;;  %5405 = vmatpush3.bf16.msra.mxu1 %v5733_v6 }
 0x233   :  { %v1188_v13 = vadd.f32 %v1187_v11, %v6640_v18  ;;  %v1189_v14 = vpop.f32.mrb[29].mxu1  ;;  %5406 = vmatprep.subr.bf16.mxu1 %v5734_v7 }
 0x234   :  { %v1190_v15 = vadd.f32 %v1189_v14, %v6645_v2  ;;  %v1191_v19 = vpop.f32.mrb[30].mxu1  ;;  %2070 = vmatprep.mubr.bf16.mxu1 %v1425_v9 }
 0x235   :  { %v1392_v20 = vmax.f32 %v1188_v13, 0.0  ;;  %v1192_v22 = vadd.f32 %v1191_v19, %v6640_v18  ;;  %v1193_v23 = vpop.f32.mrb[31].mxu1  ;;  %2071 = vmatmul.mubr.bf16.gmra.mrb[72].mxu1 %v1424_v8  ;;  %v5741_v18 = vld [vmem:[#allocation8 + $0x1b8] sm:$0xff]  }
 0x236   :  { %v1393_v24 = vmax.f32 %v1190_v15, 0.0  ;;  %v1194_v25 = vadd.f32 %v1193_v23, %v6645_v2  ;;  %5407 = vmatpush3.bf16.msra.mxu1 %v5735_v12  ;;  %v348_v2 = vsub.s32 4, %v6601_v52 }
 0x237   :  { %v1400_v28 = vmax.f32 %v1192_v22, 0.0  ;;  %5408 = vmatprep.subr.bf16.mxu1 %v5736_v59 }
 0x238   :  { %v1401_v30 = vmax.f32 %v1194_v25, 0.0  ;;  %v349_v38 = vrot.slane %v6606_v17, %v348_v2 }
 0x239   :  { %v1432_v32 = vpack.c.bf16 %v1400_v28, %v1392_v20 }
 0x23a   :  { %v1433_v33 = vpack.c.bf16 %v1401_v30, %v1393_v24  ;;  %5409 = vmatpush3.bf16.msra.mxu1 %v5737_v26 }
 0x23b   :  { %5410 = vmatprep.subr.bf16.mxu1 %v5738_v29 }
 0x23c   :  { %2078 = vmatprep.mubr.bf16.mxu1 %v1433_v33 }
 0x23d   :  { %2079 = vmatmul.mubr.bf16.gmra.mrb[76].mxu1 %v1432_v32 }
 0x23e   :  { %5411 = vmatpush3.bf16.msra.mxu1 %v5739_v34 }
 0x23f   :  { %5412 = vmatprep.subr.bf16.mxu1 %v5740_v35 }
 0x242   :  { %5413 = vmatpush3.bf16.msra.mxu1 %v5741_v18 }
 0x25a   :  { %v1230_v40 = vpop.f32.mrb[32].mxu1 }
 0x25b   :  { %v1231_v41 = vadd.f32 %v1230_v40, %v349_v38  ;;  %v1232_v42 = vpop.f32.mrb[33].mxu1 }
 0x25c   :  { %v1233_v43 = vadd.f32 %v1232_v42, %v353_v39  ;;  %v1234_v44 = vpop.f32.mrb[34].mxu1  ;;  %v356_v42 = vsub.s32 6, %v6601_v52 }
 0x25d   :  { %v1346_v45 = vmax.f32 %v1231_v41, 0.0  ;;  %v1235_v46 = vadd.f32 %v1234_v44, %v349_v38  ;;  %v1236_v47 = vpop.f32.mrb[35].mxu1 }
 0x25e   :  { %v1237_v48 = vadd.f32 %v1236_v47, %v353_v39  ;;  %v1347_v50 = vmax.f32 %v1233_v43, 0.0  ;;  %v360_v43 = vsub.s32 7, %v6601_v52  ;;  %v357_v44 = vrot.slane %v6606_v17, %v356_v42 }
 0x25f   :  { %v1354_v49 = vmax.f32 %v1235_v46, 0.0 }
 0x260   :  { %v1355_v51 = vmax.f32 %v1237_v48, 0.0 }
 0x261   :  { %v1410_v53 = vpack.c.bf16 %v1354_v49, %v1346_v45 }
 0x262   :  { %v1411_v54 = vpack.c.bf16 %v1355_v51, %v1347_v50  ;;  %v1240_v55 = vpop.f32.mrb[36].mxu1 }
 0x263   :  { %v1241_v57 = vadd.f32 %v1240_v55, %v349_v38  ;;  %v1242_v10 = vpop.f32.mrb[37].mxu1 }
 0x264   :  { %v1243_v58 = vadd.f32 %v1242_v10, %v353_v39  ;;  %v1244_v61 = vpop.f32.mrb[38].mxu1  ;;  %2119 = vmatprep.mubr.bf16.mxu0 %v1411_v54 }
 0x265   :  { %v1362_v62 = vmax.f32 %v1241_v57, 0.0  ;;  %v1245_v16 = vadd.f32 %v1244_v61, %v349_v38  ;;  %v1246_v63 = vpop.f32.mrb[39].mxu1  ;;  %2120 = vmatmul.mubr.bf16.vlgmr.msra.gmra.mrb[16].mxu0 %v1410_v53 }
 0x266   :  { %v1363_v21 = vmax.f32 %v1243_v58, 0.0  ;;  %v1247_v0 = vadd.f32 %v1246_v63, %v353_v39 }
 0x267   :  { %v1370_v1 = vmax.f32 %v1245_v16, 0.0 }
 0x268   :  { %v1371_v3 = vmax.f32 %v1247_v0, 0.0 }
 0x269   :  { %v1418_v4 = vpack.c.bf16 %v1370_v1, %v1362_v62 }
 0x26a   :  { %v1419_v6 = vpack.c.bf16 %v1371_v3, %v1363_v21  ;;  %v1250_v27 = vpop.f32.mrb[40].mxu1 }
 0x26b   :  { %v1251_v7 = vadd.f32 %v1250_v27, %v349_v38  ;;  %v1252_v31 = vpop.f32.mrb[41].mxu1 }
 0x26c   :  { %v1253_v8 = vadd.f32 %v1252_v31, %v353_v39  ;;  %v1254_v9 = vpop.f32.mrb[42].mxu1  ;;  %2127 = vmatprep.mubr.bf16.mxu0 %v1419_v6 }
 0x26d   :  { %v1378_v11 = vmax.f32 %v1251_v7, 0.0  ;;  %v1255_v12 = vadd.f32 %v1254_v9, %v349_v38  ;;  %v1256_v13 = vpop.f32.mrb[43].mxu1  ;;  %2128 = vmatmul.mubr.bf16.gmra.mrb[20].mxu0 %v1418_v4 }
 0x26e   :  { %v1379_v14 = vmax.f32 %v1253_v8, 0.0  ;;  %v1257_v59 = vadd.f32 %v1256_v13, %v353_v39 }
 0x26f   :  { %v1386_v15 = vmax.f32 %v1255_v12, 0.0 }
 0x270   :  { %v1387_v19 = vmax.f32 %v1257_v59, 0.0 }
 0x271   :  { %v1426_v20 = vpack.c.bf16 %v1386_v15, %v1378_v11 }
 0x272   :  { %v1427_v22 = vpack.c.bf16 %v1387_v19, %v1379_v14  ;;  %v1260_v23 = vpop.f32.mrb[44].mxu1 }
 0x273   :  { %v1261_v24 = vadd.f32 %v1260_v23, %v349_v38  ;;  %v1262_v25 = vpop.f32.mrb[45].mxu1 }
 0x274   :  { %v1263_v26 = vadd.f32 %v1262_v25, %v353_v39  ;;  %v1264_v28 = vpop.f32.mrb[46].mxu1  ;;  %2135 = vmatprep.mubr.bf16.mxu0 %v1427_v22 }
 0x275   :  { %v1394_v29 = vmax.f32 %v1261_v24, 0.0  ;;  %v1265_v30 = vadd.f32 %v1264_v28, %v349_v38  ;;  %v1266_v32 = vpop.f32.mrb[47].mxu1  ;;  %2136 = vmatmul.mubr.bf16.gmra.mrb[24].mxu0 %v1426_v20  ;;  %v361_v38 = vrot.slane %v6606_v17, %v360_v43 }
 0x276   :  { %v1395_v33 = vmax.f32 %v1263_v26, 0.0  ;;  %v1267_v34 = vadd.f32 %v1266_v32, %v353_v39 }
 0x277   :  { %v1402_v35 = vmax.f32 %v1265_v30, 0.0 }
 0x278   :  { %v1403_v18 = vmax.f32 %v1267_v34, 0.0 }
 0x279   :  { %v1434_v40 = vpack.c.bf16 %v1402_v35, %v1394_v29 }
 0x27a   :  { %v1435_v41 = vpack.c.bf16 %v1403_v18, %v1395_v33 }
 0x27c   :  { %2143 = vmatprep.mubr.bf16.mxu0 %v1435_v41 }
 0x27d   :  { %2144 = vmatmul.mubr.bf16.gmra.mrb[28].mxu0 %v1434_v40 }
 0x29a   :  { %v1303_v45 = vpop.f32.mrb[48].mxu1 }
 0x29b   :  { %v1304_v39 = vadd.f32 %v1303_v45, %v357_v44  ;;  %v1305_v46 = vpop.f32.mrb[49].mxu1 }
 0x29c   :  { %v1306_v47 = vadd.f32 %v1305_v46, %v361_v38  ;;  %v1307_v48 = vpop.f32.mrb[50].mxu1 }
 0x29d   :  { %v1308_v49 = vadd.f32 %v1307_v48, %v357_v44  ;;  %v1309_v50 = vpop.f32.mrb[51].mxu1  ;;  %v1348_v53 = vmax.f32 %v1304_v39, 0.0 }
 0x29e   :  { %v1310_v51 = vadd.f32 %v1309_v50, %v361_v38  ;;  %v1349_v55 = vmax.f32 %v1306_v47, 0.0 }
 0x29f   :  { %v1356_v54 = vmax.f32 %v1308_v49, 0.0 }
 0x2a0   :  { %v1357_v57 = vmax.f32 %v1310_v51, 0.0 }
 0x2a1   :  { %v1412_v10 = vpack.c.bf16 %v1356_v54, %v1348_v53 }
 0x2a2   :  { %v1413_v58 = vpack.c.bf16 %v1357_v57, %v1349_v55  ;;  %v1313_v61 = vpop.f32.mrb[52].mxu1 }
 0x2a3   :  { %v1314_v62 = vadd.f32 %v1313_v61, %v357_v44  ;;  %v1315_v16 = vpop.f32.mrb[53].mxu1 }
 0x2a4   :  { %v1316_v63 = vadd.f32 %v1315_v16, %v361_v38  ;;  %v1317_v21 = vpop.f32.mrb[54].mxu1  ;;  %2184 = vmatprep.mubr.bf16.mxu1 %v1413_v58 }
 0x2a5   :  { %v1318_v17 = vadd.f32 %v1317_v21, %v357_v44  ;;  %v1319_v0 = vpop.f32.mrb[55].mxu1  ;;  %2185 = vmatmul.mubr.bf16.vlgmr.msra.gmra.mrb[80].mxu1 %v1412_v10  ;;  %v1364_v3 = vmax.f32 %v1314_v62, 0.0 }
 0x2a6   :  { %v1320_v1 = vadd.f32 %v1319_v0, %v361_v38  ;;  %v1365_v6 = vmax.f32 %v1316_v63, 0.0 }
 0x2a7   :  { %v1372_v4 = vmax.f32 %v1318_v17, 0.0 }
 0x2a8   :  { %v1373_v27 = vmax.f32 %v1320_v1, 0.0 }
 0x2a9   :  { %v1420_v7 = vpack.c.bf16 %v1372_v4, %v1364_v3 }
 0x2aa   :  { %v1421_v31 = vpack.c.bf16 %v1373_v27, %v1365_v6  ;;  %v1323_v8 = vpop.f32.mrb[56].mxu1  ;;  %v5742_v27 = vld [vmem:[#allocation10] sm:$0xff]  }
 0x2ab   :  { %v1324_v9 = vadd.f32 %v1323_v8, %v357_v44  ;;  %v1325_v11 = vpop.f32.mrb[57].mxu1  ;;  %5486 = vmatprep.subr.bf16.mxu0 %v5742_v27  ;;  %v5745_v8 = vld [vmem:[#allocation10 + $0x18] sm:$0xff]  }
 0x2ac   :  { %v1326_v12 = vadd.f32 %v1325_v11, %v361_v38  ;;  %v1327_v13 = vpop.f32.mrb[58].mxu1  ;;  %2192 = vmatprep.mubr.bf16.mxu1 %v1421_v31  ;;  %5487 = vmatpush3.bf16.msra.mxu0 %v5742_v27  ;;  %v5744_v31 = vld [vmem:[#allocation10 + $0x10] sm:$0xff]   ;;  %v5754_v27 = vld [vmem:[#allocation11 + $0x20] sm:$0xff]  }
 0x2ad   :  { %v1380_v14 = vmax.f32 %v1324_v9, 0.0  ;;  %v1328_v59 = vadd.f32 %v1327_v13, %v357_v44  ;;  %v1329_v15 = vpop.f32.mrb[59].mxu1  ;;  %2193 = vmatmul.mubr.bf16.gmra.mrb[84].mxu1 %v1420_v7  ;;  %v5743_v7 = vld [vmem:[#allocation10 + $0x8] sm:$0xff]   ;;  %v4969_v9 = vld [vmem:[%s6970_s4] ss:$0 sm:$0xff] }
 0x2ae   :  { %v1381_v19 = vmax.f32 %v1326_v12, 0.0  ;;  %v1330_v20 = vadd.f32 %v1329_v15, %v361_v38  ;;  %5488 = vmatprep.subr.bf16.mxu0 %v5743_v7  ;;  %v5746_v15 = vld [vmem:[#allocation10 + $0x20] sm:$0xff]  }
 0x2af   :  { %v1388_v22 = vmax.f32 %v1328_v59, 0.0 }
 0x2b0   :  { %v1389_v23 = vmax.f32 %v1330_v20, 0.0  ;;  %5489 = vmatpush3.bf16.msra.mxu0 %v5743_v7 }
 0x2b1   :  { %v1428_v24 = vpack.c.bf16 %v1388_v22, %v1380_v14  ;;  %5490 = vmatprep.subr.bf16.mxu0 %v5744_v31 }
 0x2b2   :  { %v1429_v25 = vpack.c.bf16 %v1389_v23, %v1381_v19  ;;  %v1333_v26 = vpop.f32.mrb[60].mxu1 }
 0x2b3   :  { %v1334_v28 = vadd.f32 %v1333_v26, %v357_v44  ;;  %v1335_v29 = vpop.f32.mrb[61].mxu1 }
 0x2b4   :  { %v1336_v30 = vadd.f32 %v1335_v29, %v361_v38  ;;  %v1337_v32 = vpop.f32.mrb[62].mxu1  ;;  %2200 = vmatprep.mubr.bf16.mxu1 %v1429_v25  ;;  %5491 = vmatpush3.bf16.msra.mxu0 %v5744_v31  ;;  %v5747_v25 = vld [vmem:[#allocation10 + $0x28] sm:$0xff]  }
 0x2b5   :  { %v1396_v33 = vmax.f32 %v1334_v28, 0.0  ;;  %v1338_v34 = vadd.f32 %v1337_v32, %v357_v44  ;;  %v1339_v35 = vpop.f32.mrb[63].mxu1  ;;  %2201 = vmatmul.mubr.bf16.gmra.mrb[88].mxu1 %v1428_v24  ;;  %5492 = vmatprep.subr.bf16.mxu0 %v5745_v8 }
 0x2b6   :  { %v1397_v18 = vmax.f32 %v1336_v30, 0.0  ;;  %v1340_v40 = vadd.f32 %v1339_v35, %v361_v38 }
 0x2b7   :  { %v1404_v41 = vmax.f32 %v1338_v34, 0.0 }
 0x2b8   :  { %v1405_v45 = vmax.f32 %v1340_v40, 0.0  ;;  %v5294_v39 = vpop.f32.mrb[0].mxu0  ;;  %5493 = vmatpush3.bf16.msra.mxu0 %v5745_v8 }
 0x2b9   :  { %v1436_v46 = vpack.c.bf16 %v1404_v41, %v1396_v33  ;;  %v5295_v47 = vpop.f32.mrb[1].mxu0  ;;  %5494 = vmatprep.subr.bf16.mxu0 %v5746_v15  ;;  %v5748_v33 = vld [vmem:[#allocation10 + $0x30] sm:$0xff]  }
 0x2ba   :  { %v1437_v48 = vpack.c.bf16 %v1405_v45, %v1397_v18  ;;  %v5296_v49 = vadd.f32 %v5295_v47, %v5294_v39  ;;  %v5297_v50 = vpop.f32.mrb[2].mxu0  ;;  %v5749_v45 = vld [vmem:[#allocation10 + $0x38] sm:$0xff]  }
 0x2bb   :  { %v5298_v51 = vpop.f32.mrb[3].mxu0 }
 0x2bc   :  { %v5299_v53 = vadd.f32 %v5298_v51, %v5297_v50  ;;  %2208 = vmatprep.mubr.bf16.mxu1 %v1437_v48  ;;  %v1992_v13 = vadd.f32 %v5296_v49, %v4969_v9  ;;  %5495 = vmatpush3.bf16.msra.mxu0 %v5746_v15 }
 0x2bd   :  { %2209 = vmatmul.mubr.bf16.gmra.mrb[92].mxu1 %v1436_v46  ;;  %5496 = vmatprep.subr.bf16.mxu0 %v5747_v25 }
 0x2be   :  { %v1995_v20 = vadd.f32 %v5299_v53, %v4969_v9 }
 0x2c0   :  { %v5300_v54 = vpop.f32.mrb[4].mxu0  ;;  %5497 = vmatpush3.bf16.msra.mxu0 %v5747_v25 }
 0x2c1   :  { %v5301_v55 = vpop.f32.mrb[5].mxu0  ;;  %5498 = vmatprep.subr.bf16.mxu0 %v5748_v33 }
 0x2c2   :  { %v5302_v57 = vadd.f32 %v5301_v55, %v5300_v54  ;;  %v5303_v44 = vpop.f32.mrb[6].mxu0 }
 0x2c3   :  { %v5304_v10 = vpop.f32.mrb[7].mxu0 }
 0x2c4   :  { %v5305_v58 = vadd.f32 %v5304_v10, %v5303_v44  ;;  %v2000_v29 = vadd.f32 %v5302_v57, %v4969_v9  ;;  %5499 = vmatpush3.bf16.msra.mxu0 %v5748_v33 }
 0x2c5   :  { %5500 = vmatprep.subr.bf16.mxu0 %v5749_v45 }
 0x2c6   :  { %v2003_v35 = vadd.f32 %v5305_v58, %v4969_v9 }
 0x2c8   :  { %v5306_v61 = vpop.f32.mrb[8].mxu0  ;;  %5501 = vmatpush3.bf16.msra.mxu0 %v5749_v45 }
 0x2c9   :  { %v5307_v38 = vpop.f32.mrb[9].mxu0 }
 0x2ca   :  { %v5308_v62 = vadd.f32 %v5307_v38, %v5306_v61  ;;  %v5309_v16 = vpop.f32.mrb[10].mxu0 }
 0x2cb   :  { %v5310_v63 = vpop.f32.mrb[11].mxu0 }
 0x2cc   :  { %v5311_v21 = vadd.f32 %v5310_v63, %v5309_v16  ;;  %v2008_v47 = vadd.f32 %v5308_v62, %v4969_v9  ;;  %v5752_v62 = vld [vmem:[#allocation11 + $0x10] sm:$0xff]  }
 0x2ce   :  { %v2011_v51 = vadd.f32 %v5311_v21, %v4969_v9  ;;  %v5753_v21 = vld [vmem:[#allocation11 + $0x18] sm:$0xff]  }
 0x2d0   :  { %v5312_v17 = vpop.f32.mrb[12].mxu0 }
 0x2d1   :  { %v5313_v0 = vpop.f32.mrb[13].mxu0 }
 0x2d2   :  { %v5314_v1 = vadd.f32 %v5313_v0, %v5312_v17  ;;  %v5315_v3 = vpop.f32.mrb[14].mxu0 }
 0x2d3   :  { %v5316_v4 = vpop.f32.mrb[15].mxu0 }
 0x2d4   :  { %v5317_v6 = vadd.f32 %v5316_v4, %v5315_v3  ;;  %v2016_v10 = vadd.f32 %v5314_v1, %v4969_v9  ;;  %v5750_v3 = vld [vmem:[#allocation11] sm:$0xff]   ;;  %v5751_v4 = vld [vmem:[#allocation11 + $0x8] sm:$0xff]  }
 0x2d5   :  { %5510 = vmatprep.subr.bf16.mxu1 %v5750_v3  ;;  %v5755_v1 = vld [vmem:[#allocation11 + $0x28] sm:$0xff]  }
 0x2d6   :  { %v2019_v16 = vadd.f32 %v5317_v6, %v4969_v9  ;;  %5511 = vmatpush3.bf16.msra.mxu1 %v5750_v3 }
 0x2d7   :  { %5512 = vmatprep.subr.bf16.mxu1 %v5751_v4 }
 0x2da   :  { %5513 = vmatpush3.bf16.msra.mxu1 %v5751_v4 }
 0x2db   :  { %5514 = vmatprep.subr.bf16.mxu1 %v5752_v62 }
 0x2de   :  { %5515 = vmatpush3.bf16.msra.mxu1 %v5752_v62 }
 0x2df   :  { %5516 = vmatprep.subr.bf16.mxu1 %v5753_v21 }
 0x2e2   :  { %5517 = vmatpush3.bf16.msra.mxu1 %v5753_v21 }
 0x2e3   :  { %5518 = vmatprep.subr.bf16.mxu1 %v5754_v27 }
 0x2e6   :  { %5519 = vmatpush3.bf16.msra.mxu1 %v5754_v27 }
 0x2e7   :  { %5520 = vmatprep.subr.bf16.mxu1 %v5755_v1 }
 0x2ea   :  { %5521 = vmatpush3.bf16.msra.mxu1 %v5755_v1 }
 0x2f8   :  { %v5334_v11 = vpop.f32.mrb[64].mxu1 }
 0x2f9   :  { %v5335_v12 = vpop.f32.mrb[65].mxu1 }
 0x2fa   :  { %v5336_v14 = vadd.f32 %v5335_v12, %v5334_v11  ;;  %v5337_v59 = vpop.f32.mrb[66].mxu1 }
 0x2fb   :  { %v5338_v19 = vpop.f32.mrb[67].mxu1 }
 0x2fc   :  { %v6682_v22 = vadd.f32 %v5336_v14, %v1992_v13  ;;  %v5339_v23 = vadd.f32 %v5338_v19, %v5337_v59 }
 0x2fe   :  { %v6684_v24 = vadd.f32 %v5339_v23, %v1995_v20 }
 0x300   :  { %v5340_v26 = vpop.f32.mrb[68].mxu1 }
 0x301   :  { %v5341_v28 = vpop.f32.mrb[69].mxu1 }
 0x302   :  { %v5342_v30 = vadd.f32 %v5341_v28, %v5340_v26  ;;  %v5343_v32 = vpop.f32.mrb[70].mxu1 }
 0x303   :  { %v5344_v34 = vpop.f32.mrb[71].mxu1 }
 0x304   :  { %v2065_v18 = vadd.f32 %v5342_v30, %v2000_v29  ;;  %v5345_v40 = vadd.f32 %v5344_v34, %v5343_v32 }
 0x306   :  { %v2068_v41 = vadd.f32 %v5345_v40, %v2003_v35 }
 0x308   :  { %v5346_v39 = vpop.f32.mrb[72].mxu1 }
 0x309   :  { %v5347_v46 = vpop.f32.mrb[73].mxu1 }
 0x30a   :  { %v5348_v48 = vadd.f32 %v5347_v46, %v5346_v39  ;;  %v5349_v49 = vpop.f32.mrb[74].mxu1 }
 0x30b   :  { %v5350_v50 = vpop.f32.mrb[75].mxu1 }
 0x30c   :  { %v2073_v53 = vadd.f32 %v5348_v48, %v2008_v47  ;;  %v5351_v54 = vadd.f32 %v5350_v50, %v5349_v49 }
 0x30e   :  { %v2076_v55 = vadd.f32 %v5351_v54, %v2011_v51 }
 0x310   :  { %v5352_v57 = vpop.f32.mrb[76].mxu1 }
 0x311   :  { %v5353_v44 = vpop.f32.mrb[77].mxu1 }
 0x312   :  { %v5354_v58 = vadd.f32 %v5353_v44, %v5352_v57  ;;  %v5355_v61 = vpop.f32.mrb[78].mxu1 }
 0x313   :  { %v5356_v38 = vpop.f32.mrb[79].mxu1 }
 0x314   :  { %v2081_v63 = vadd.f32 %v5354_v58, %v2016_v10  ;;  %v5357_v17 = vadd.f32 %v5356_v38, %v5355_v61 }
 0x316   :  { %v2084_v0 = vadd.f32 %v5357_v17, %v2019_v16 }
 0x338   :  { %v5374_v6 = vpop.f32.mrb[16].mxu0 }
 0x339   :  { %v5375_v7 = vpop.f32.mrb[17].mxu0 }
 0x33a   :  { %v5376_v31 = vadd.f32 %v5375_v7, %v5374_v6  ;;  %v5377_v8 = vpop.f32.mrb[18].mxu0 }
 0x33b   :  { %v5378_v9 = vpop.f32.mrb[19].mxu0 }
 0x33c   :  { %v2122_v11 = vadd.f32 %v5376_v31, %v6682_v22  ;;  %v5379_v12 = vadd.f32 %v5378_v9, %v5377_v8 }
 0x33e   :  { %v2125_v13 = vadd.f32 %v5379_v12, %v6684_v24 }
 0x340   :  { %v5380_v14 = vpop.f32.mrb[20].mxu0 }
 0x341   :  { %v5381_v59 = vpop.f32.mrb[21].mxu0 }
 0x342   :  { %v5382_v15 = vadd.f32 %v5381_v59, %v5380_v14  ;;  %v5383_v19 = vpop.f32.mrb[22].mxu0 }
 0x343   :  { %v5384_v20 = vpop.f32.mrb[23].mxu0 }
 0x344   :  { %v2130_v23 = vadd.f32 %v5382_v15, %v2065_v18  ;;  %v5385_v25 = vadd.f32 %v5384_v20, %v5383_v19 }
 0x346   :  { %v2133_v26 = vadd.f32 %v5385_v25, %v2068_v41 }
 0x348   :  { %v5386_v28 = vpop.f32.mrb[24].mxu0 }
 0x349   :  { %v5387_v29 = vpop.f32.mrb[25].mxu0 }
 0x34a   :  { %v5388_v30 = vadd.f32 %v5387_v29, %v5386_v28  ;;  %v5389_v32 = vpop.f32.mrb[26].mxu0 }
 0x34b   :  { %v5390_v33 = vpop.f32.mrb[27].mxu0 }
 0x34c   :  { %v2138_v34 = vadd.f32 %v5388_v30, %v2073_v53  ;;  %v5391_v35 = vadd.f32 %v5390_v33, %v5389_v32 }
 0x34e   :  { %v2141_v40 = vadd.f32 %v5391_v35, %v2076_v55  ;;  %v5757_v35 = vld [vmem:[#allocation11 + $0x38] sm:$0xff]  }
 0x350   :  { %v5392_v22 = vpop.f32.mrb[28].mxu0 }
 0x351   :  { %v5393_v45 = vpop.f32.mrb[29].mxu0 }
 0x352   :  { %v5394_v39 = vadd.f32 %v5393_v45, %v5392_v22  ;;  %v5395_v24 = vpop.f32.mrb[30].mxu0  ;;  %v5759_v22 = vld [vmem:[#allocation13 + $0x8] sm:$0xff]   ;;  %v5760_v45 = vld [vmem:[#allocation13 + $0x10] sm:$0xff]  }
 0x353   :  { %v5396_v46 = vpop.f32.mrb[31].mxu0 }
 0x354   :  { %v2146_v47 = vadd.f32 %v5394_v39, %v2081_v63  ;;  %v5397_v48 = vadd.f32 %v5396_v46, %v5395_v24  ;;  %v5761_v39 = vld [vmem:[#allocation13 + $0x18] sm:$0xff]   ;;  %v5762_v24 = vld [vmem:[#allocation13 + $0x20] sm:$0xff]   ;;  %v5763_v46 = vld [vmem:[#allocation13 + $0x28] sm:$0xff]  }
 0x356   :  { %v2149_v49 = vadd.f32 %v5397_v48, %v2084_v0 }
 0x378   :  { %v5414_v50 = vpop.f32.mrb[80].mxu1 }
 0x379   :  { %v5415_v18 = vpop.f32.mrb[81].mxu1 }
 0x37a   :  { %v5416_v51 = vadd.f32 %v5415_v18, %v5414_v50  ;;  %v5417_v41 = vpop.f32.mrb[82].mxu1 }
 0x37b   :  { %v5418_v54 = vpop.f32.mrb[83].mxu1 }
 0x37c   :  { %v2187_v57 = vadd.f32 %v5416_v51, %v2122_v11  ;;  %v5419_v44 = vadd.f32 %v5418_v54, %v5417_v41 }
 0x37e   :  { %v2190_v10 = vadd.f32 %v5419_v44, %v2125_v13  ;;  %v2217_v58 = vmax.f32 %v2187_v57, 0.0 }
 0x380   :  { %v2218_v53 = vmax.f32 %v2190_v10, 0.0  ;;  %v5420_v61 = vpop.f32.mrb[84].mxu1 }
 0x381   :  { %v5421_v55 = vpop.f32.mrb[85].mxu1 }
 0x382   :  { %v5422_v38 = vadd.f32 %v5421_v55, %v5420_v61  ;;  %v5423_v16 = vpop.f32.mrb[86].mxu1  ;;  %v2225_v17 = vpack.c.bf16 %v2218_v53, %v2217_v58 }
 0x383   :  { %v5424_v3 = vpop.f32.mrb[87].mxu1 }
 0x384   :  { %v2195_v4 = vadd.f32 %v5422_v38, %v2130_v23  ;;  %v5425_v63 = vadd.f32 %v5424_v3, %v5423_v16  ;;  %5502 = vmatprep.mubr.bf16.mxu0 %v2225_v17 }
 0x386   :  { %v2198_v0 = vadd.f32 %v5425_v63, %v2133_v26  ;;  %v2219_v62 = vmax.f32 %v2195_v4, 0.0 }
 0x388   :  { %v2220_v21 = vmax.f32 %v2198_v0, 0.0  ;;  %v5426_v27 = vpop.f32.mrb[88].mxu1 }
 0x389   :  { %v5427_v1 = vpop.f32.mrb[89].mxu1 }
 0x38a   :  { %v2226_v6 = vpack.c.bf16 %v2220_v21, %v2219_v62  ;;  %v5428_v7 = vadd.f32 %v5427_v1, %v5426_v27  ;;  %v5429_v31 = vpop.f32.mrb[90].mxu1 }
 0x38b   :  { %v5430_v8 = vpop.f32.mrb[91].mxu1 }
 0x38c   :  { %v2203_v9 = vadd.f32 %v5428_v7, %v2138_v34  ;;  %v5431_v11 = vadd.f32 %v5430_v8, %v5429_v31  ;;  %5503 = vmatmul.mubr.bf16.vlgmr.msra.gmra.mrb[32].mxu0 %v2226_v6  ;;  %v5756_v34 = vld [vmem:[#allocation11 + $0x30] sm:$0xff]  }
 0x38d   :  { %5522 = vmatprep.subr.bf16.mxu1 %v5756_v34  ;;  %v5764_v8 = vld [vmem:[#allocation13 + $0x30] sm:$0xff]  }
 0x38e   :  { %v2206_v12 = vadd.f32 %v5431_v11, %v2141_v40  ;;  %v2221_v13 = vmax.f32 %v2203_v9, 0.0  ;;  %5523 = vmatpush3.bf16.msra.mxu1 %v5756_v34  ;;  %v5758_v40 = vld [vmem:[#allocation13] sm:$0xff]   ;;  %v5765_v9 = vld [vmem:[#allocation13 + $0x38] sm:$0xff]  }
 0x38f   :  { %5524 = vmatprep.subr.bf16.mxu1 %v5757_v35  ;;  %5534 = vmatprep.subr.bf16.mxu0 %v5758_v40  ;;  %v5766_v11 = vld [vmem:[#allocation14] sm:$0xff]  }
 0x390   :  { %v2222_v14 = vmax.f32 %v2206_v12, 0.0  ;;  %v5432_v59 = vpop.f32.mrb[92].mxu1  ;;  %5535 = vmatpush3.bf16.msra.mxu0 %v5758_v40  ;;  %v5767_v12 = vld [vmem:[#allocation14 + $0x8] sm:$0xff]  }
 0x391   :  { %v5433_v15 = vpop.f32.mrb[93].mxu1  ;;  %5536 = vmatprep.subr.bf16.mxu0 %v5759_v22 }
 0x392   :  { %v5434_v19 = vadd.f32 %v5433_v15, %v5432_v59  ;;  %v5435_v20 = vpop.f32.mrb[94].mxu1  ;;  %v2227_v23 = vpack.c.bf16 %v2222_v14, %v2221_v13  ;;  %5525 = vmatpush3.bf16.msra.mxu1 %v5757_v35  ;;  %v5768_v13 = vld [vmem:[#allocation14 + $0x10] sm:$0xff]   ;;  %v5769_v14 = vld [vmem:[#allocation14 + $0x18] sm:$0xff]   ;;  %v5770_v59 = vld [vmem:[#allocation14 + $0x20] sm:$0xff]  }
 0x393   :  { %v5436_v25 = vpop.f32.mrb[95].mxu1  ;;  %5558 = vmatprep.subr.bf16.mxu1 %v5766_v11  ;;  %v5771_v15 = vld [vmem:[#allocation14 + $0x28] sm:$0xff]  }
 0x394   :  { %v2211_v26 = vadd.f32 %v5434_v19, %v2146_v47  ;;  %v5437_v28 = vadd.f32 %v5436_v25, %v5435_v20  ;;  %5506 = vmatprep.mubr.bf16.mxu0 %v2227_v23  ;;  %5537 = vmatpush3.bf16.msra.mxu0 %v5759_v22  ;;  %v5034_v47 = vld [vmem:[%s6972_s6] ss:$0 sm:$0xff] }
 0x395   :  { %5538 = vmatprep.subr.bf16.mxu0 %v5760_v45  ;;  %v5043_v20 = vld [vmem:[%s6974_s8] ss:$0 sm:$0xff] }
 0x396   :  { %v2214_v29 = vadd.f32 %v5437_v28, %v2149_v49  ;;  %v2223_v30 = vmax.f32 %v2211_v26, 0.0 }
 0x398   :  { %v2224_v32 = vmax.f32 %v2214_v29, 0.0  ;;  %5539 = vmatpush3.bf16.msra.mxu0 %v5760_v45 }
 0x399   :  { %5540 = vmatprep.subr.bf16.mxu0 %v5761_v39 }
 0x39a   :  { %v2228_v33 = vpack.c.bf16 %v2224_v32, %v2223_v30 }
 0x39c   :  { %5507 = vmatmul.mubr.bf16.gmra.mrb[36].mxu0 %v2228_v33 }
 0x39d   :  { %5541 = vmatpush3.bf16.msra.mxu0 %v5761_v39 }
 0x39e   :  { %5542 = vmatprep.subr.bf16.mxu0 %v5762_v24 }
 0x3a1   :  { %5543 = vmatpush3.bf16.msra.mxu0 %v5762_v24 }
 0x3a2   :  { %5544 = vmatprep.subr.bf16.mxu0 %v5763_v46 }
 0x3a5   :  { %5545 = vmatpush3.bf16.msra.mxu0 %v5763_v46 }
 0x3a6   :  { %5546 = vmatprep.subr.bf16.mxu0 %v5764_v8 }
 0x3a9   :  { %5547 = vmatpush3.bf16.msra.mxu0 %v5764_v8  ;;  %v2857_v8 = vld [vmem:[#allocation16 + $0x160] sm:$0xff] }
 0x3aa   :  { %5548 = vmatprep.subr.bf16.mxu0 %v5765_v9 }
 0x3ad   :  { %5549 = vmatpush3.bf16.msra.mxu0 %v5765_v9 }
 0x45f   :  { %v5504_v48 = vpop.f32.mrb[32].mxu0 }
 0x460   :  { %v2343_v49 = vadd.f32 %v5504_v48, %v5034_v47  ;;  %v2334_v50 = vpop.f32.mrb[33].mxu0 }
 0x461   :  { %v2335_v18 = vadd.f32 %v5034_v47, %v2334_v50  ;;  %v5505_v51 = vpop.f32.mrb[34].mxu0  ;;  %v5772_v50 = vld [vmem:[#allocation14 + $0x30] sm:$0xff]  }
 0x462   :  { %v2346_v41 = vadd.f32 %v5505_v51, %v5034_v47  ;;  %v2337_v54 = vpop.f32.mrb[35].mxu0  ;;  %v2367_v44 = vmax.f32 %v2343_v49, 0.0  ;;  %v2813_v51 = vld [vmem:[#allocation16] sm:$0xff] }
 0x463   :  { %v2338_v57 = vadd.f32 %v5034_v47, %v2337_v54  ;;  %v2365_v58 = vmax.f32 %v2335_v18, 0.0  ;;  %v5773_v18 = vld [vmem:[#allocation14 + $0x38] sm:$0xff]   ;;  %v2814_v54 = vld [vmem:[#allocation16 + $0x8] sm:$0xff] }
 0x464   :  { %v2368_v10 = vmax.f32 %v2346_v41, 0.0  ;;  %v2817_v41 = vld [vmem:[#allocation16 + $0x20] sm:$0xff] }
 0x465   :  { %v2366_v53 = vmax.f32 %v2338_v57, 0.0  ;;  %v5070_v57 = vcombine.low %v2813_v51, %v2817_v41 }
 0x466   :  { %v2374_v61 = vpack.c.bf16 %v2368_v10, %v2367_v44  ;;  %v5071_v44 = vcombine.high %v2813_v51, %v2817_v41  ;;  %v2818_v10 = vld [vmem:[#allocation16 + $0x28] sm:$0xff] }
 0x467   :  { %v2373_v55 = vpack.c.bf16 %v2366_v53, %v2365_v58  ;;  %v2821_v58 = vld [vmem:[#allocation16 + $0x40] sm:$0xff] }
 0x468   :  { %v2825_v53 = vld [vmem:[#allocation16 + $0x60] sm:$0xff]  ;;  %3239 = vmatprep.subr.bf16.mxu0 %v5071_v44  ;;  %v2846_v44 = vld [vmem:[#allocation16 + $0x108] sm:$0xff] }
 0x469   :  { %5526 = vmatprep.mubr.bf16.mxu1 %v2373_v55  ;;  %v5073_v55 = vcombine.high %v2814_v54, %v2818_v10 }
 0x46a   :  { %5527 = vmatmul.mubr.bf16.vlgmr.msra.gmra.mrb[96].mxu1 %v2374_v61  ;;  %v5072_v61 = vcombine.low %v2814_v54, %v2818_v10  ;;  %v2850_v10 = vld [vmem:[#allocation16 + $0x128] sm:$0xff] }
 0x46b   :  { %5559 = vmatpush3.bf16.msra.mxu1 %v5766_v11 }
 0x46c   :  { %5560 = vmatprep.subr.bf16.mxu1 %v5767_v12 }
 0x46f   :  { %v5508_v38 = vpop.f32.mrb[36].mxu0  ;;  %5561 = vmatpush3.bf16.msra.mxu1 %v5767_v12 }
 0x470   :  { %v2359_v16 = vadd.f32 %v5508_v38, %v5034_v47  ;;  %v2350_v17 = vpop.f32.mrb[37].mxu0  ;;  %5562 = vmatprep.subr.bf16.mxu1 %v5768_v13  ;;  %v5079_v38 = vcombine.high %v2821_v58, %v2825_v53 }
 0x471   :  { %v2351_v3 = vadd.f32 %v5034_v47, %v2350_v17  ;;  %v5509_v4 = vpop.f32.mrb[38].mxu0  ;;  %v2833_v17 = vld [vmem:[#allocation16 + $0xa0] sm:$0xff] }
 0x472   :  { %v2362_v63 = vadd.f32 %v5509_v4, %v5034_v47  ;;  %v2353_v0 = vpop.f32.mrb[39].mxu0  ;;  %v2371_v21 = vmax.f32 %v2359_v16, 0.0  ;;  %v2829_v16 = vld [vmem:[#allocation16 + $0x80] sm:$0xff] }
 0x473   :  { %v2354_v62 = vadd.f32 %v5034_v47, %v2353_v0  ;;  %v2369_v1 = vmax.f32 %v2351_v3, 0.0  ;;  %5563 = vmatpush3.bf16.msra.mxu1 %v5768_v13  ;;  %v5078_v3 = vcombine.low %v2821_v58, %v2825_v53  ;;  %v5087_v4 = vcombine.high %v2829_v16, %v2833_v17  ;;  %v2841_v0 = vld [vmem:[#allocation16 + $0xe0] sm:$0xff]  ;;  %v5052_v13 = vld [vmem:[%s6976_s10] ss:$0 sm:$0xff] }
 0x474   :  { %v2372_v27 = vmax.f32 %v2362_v63, 0.0  ;;  %5564 = vmatprep.subr.bf16.mxu1 %v5769_v14  ;;  %v2837_v63 = vld [vmem:[#allocation16 + $0xc0] sm:$0xff] }
 0x475   :  { %v2370_v6 = vmax.f32 %v2354_v62, 0.0  ;;  %v5086_v62 = vcombine.low %v2829_v16, %v2833_v17  ;;  %v5105_v17 = vcombine.high %v2846_v44, %v2850_v10 }
 0x476   :  { %v2376_v7 = vpack.c.bf16 %v2372_v27, %v2371_v21  ;;  %v5095_v21 = vcombine.high %v2837_v63, %v2841_v0  ;;  %v2845_v27 = vld [vmem:[#allocation16 + $0x100] sm:$0xff] }
 0x477   :  { %v2375_v31 = vpack.c.bf16 %v2370_v6, %v2369_v1  ;;  %5565 = vmatpush3.bf16.msra.mxu1 %v5769_v14  ;;  %v2849_v1 = vld [vmem:[#allocation16 + $0x120] sm:$0xff]  ;;  %v5094_v6 = vcombine.low %v2837_v63, %v2841_v0  ;;  %v2854_v63 = vld [vmem:[#allocation16 + $0x148] sm:$0xff] }
 0x478   :  { %5566 = vmatprep.subr.bf16.mxu1 %v5770_v59  ;;  %v5102_v9 = vcombine.low %v2845_v27, %v2849_v1  ;;  %v2858_v0 = vld [vmem:[#allocation16 + $0x168] sm:$0xff] }
 0x479   :  { %5530 = vmatprep.mubr.bf16.mxu1 %v2375_v31  ;;  %v2853_v31 = vld [vmem:[#allocation16 + $0x140] sm:$0xff] }
 0x47a   :  { %5531 = vmatmul.mubr.bf16.gmra.mrb[100].mxu1 %v2376_v7  ;;  %v5103_v7 = vcombine.high %v2845_v27, %v2849_v1  ;;  %v5111_v11 = vcombine.high %v2853_v31, %v2857_v8  ;;  %v5110_v12 = vcombine.low %v2853_v31, %v2857_v8  ;;  %v5104_v27 = vcombine.low %v2846_v44, %v2850_v10  ;;  %v2865_v31 = vld [vmem:[#allocation16 + $0x1a0] sm:$0xff]  ;;  %v2862_v8 = vld [vmem:[#allocation16 + $0x188] sm:$0xff]  ;;  %v2827_v44 = vld [vmem:[#allocation16 + $0x70] sm:$0xff] }
 0x47b   :  { %5567 = vmatpush3.bf16.msra.mxu1 %v5770_v59  ;;  %v5113_v1 = vcombine.high %v2854_v63, %v2858_v0  ;;  %v2824_v10 = vld [vmem:[#allocation16 + $0x58] sm:$0xff] }
 0x47c   :  { %5568 = vmatprep.subr.bf16.mxu1 %v5771_v15 }
 0x47f   :  { %5569 = vmatpush3.bf16.msra.mxu1 %v5771_v15 }
 0x480   :  { %5570 = vmatprep.subr.bf16.mxu1 %v5772_v50 }
 0x483   :  { %5571 = vmatpush3.bf16.msra.mxu1 %v5772_v50 }
 0x484   :  { %5572 = vmatprep.subr.bf16.mxu1 %v5773_v18 }
 0x487   :  { %5573 = vmatpush3.bf16.msra.mxu1 %v5773_v18 }
 0x488   :  { %3312 = vmatprep.subr.bf16.mxu1 %v5073_v55 }
 0x53d   :  { %v5528_v19 = vpop.f32.mrb[96].mxu1 }
 0x53e   :  { %v2482_v23 = vpop.f32.mrb[97].mxu1  ;;  %v2491_v26 = vadd.f32 %v5528_v19, %v5043_v20 }
 0x53f   :  { %v5529_v25 = vpop.f32.mrb[98].mxu1  ;;  %v2483_v30 = vadd.f32 %v5043_v20, %v2482_v23 }
 0x540   :  { %v2494_v28 = vadd.f32 %v5529_v25, %v5043_v20  ;;  %v2485_v29 = vpop.f32.mrb[99].mxu1 }
 0x541   :  { %v2486_v32 = vadd.f32 %v5043_v20, %v2485_v29 }
 0x542   :  { %v2514_v33 = vpack.c.bf16 %v2494_v28, %v2491_v26 }
 0x543   :  { %v2513_v34 = vpack.c.bf16 %v2486_v32, %v2483_v30 }
 0x545   :  { %5550 = vmatprep.mubr.bf16.mxu0 %v2513_v34  ;;  %v2826_v34 = vld [vmem:[#allocation16 + $0x68] sm:$0xff] }
 0x546   :  { %5551 = vmatmul.mubr.bf16.vlgmr.msra.gmra.mrb[40].mxu0 %v2514_v33  ;;  %v2822_v33 = vld [vmem:[#allocation16 + $0x48] sm:$0xff] }
 0x547   :  { %3240 = vmatpush1.bf16.msra.mxu0 %v5070_v57 }
 0x548   :  { %3241 = vmatprep.subr.bf16.mxu0 %v5079_v38 }
 0x54b   :  { %3242 = vmatpush1.bf16.msra.mxu0 %v5078_v3 }
 0x54c   :  { %3243 = vmatprep.subr.bf16.mxu0 %v5087_v4 }
 0x54d   :  { %v5532_v35 = vpop.f32.mrb[100].mxu1 }
 0x54e   :  { %v2498_v40 = vpop.f32.mrb[101].mxu1  ;;  %v2507_v45 = vadd.f32 %v5532_v35, %v5043_v20 }
 0x54f   :  { %v5533_v22 = vpop.f32.mrb[102].mxu1  ;;  %v2499_v46 = vadd.f32 %v5043_v20, %v2498_v40  ;;  %3244 = vmatpush1.bf16.msra.mxu0 %v5086_v62 }
 0x550   :  { %v2510_v39 = vadd.f32 %v5533_v22, %v5043_v20  ;;  %v2501_v24 = vpop.f32.mrb[103].mxu1  ;;  %3245 = vmatprep.subr.bf16.mxu0 %v5095_v21  ;;  %v5081_v22 = vcombine.high %v2822_v33, %v2826_v34 }
 0x551   :  { %v2502_v47 = vadd.f32 %v5043_v20, %v2501_v24  ;;  %v5080_v24 = vcombine.low %v2822_v33, %v2826_v34  ;;  %v2820_v34 = vld [vmem:[#allocation16 + $0x38] sm:$0xff] }
 0x552   :  { %v2516_v48 = vpack.c.bf16 %v2510_v39, %v2507_v45  ;;  %v2830_v45 = vld [vmem:[#allocation16 + $0x88] sm:$0xff] }
 0x553   :  { %v2515_v49 = vpack.c.bf16 %v2502_v47, %v2499_v46  ;;  %3246 = vmatpush1.bf16.msra.mxu0 %v5094_v6  ;;  %v2834_v39 = vld [vmem:[#allocation16 + $0xa8] sm:$0xff]  ;;  %v5112_v6 = vcombine.low %v2854_v63, %v2858_v0  ;;  %v2832_v63 = vld [vmem:[#allocation16 + $0x98] sm:$0xff] }
 0x554   :  { %3247 = vmatprep.subr.bf16.mxu0 %v5103_v7  ;;  %v5089_v46 = vcombine.high %v2830_v45, %v2834_v39  ;;  %v2838_v47 = vld [vmem:[#allocation16 + $0xc8] sm:$0xff]  ;;  %v5088_v50 = vcombine.low %v2830_v45, %v2834_v39  ;;  %v2861_v7 = vld [vmem:[#allocation16 + $0x180] sm:$0xff]  ;;  %v6702_v39 = vld [vmem:[%s6978_s12] ss:$0 sm:$0xff] }
 0x555   :  { %5554 = vmatprep.mubr.bf16.mxu0 %v2515_v49  ;;  %v2836_v0 = vld [vmem:[#allocation16 + $0xb8] sm:$0xff] }
 0x556   :  { %5555 = vmatmul.mubr.bf16.gmra.mrb[44].mxu0 %v2516_v48  ;;  %v2842_v48 = vld [vmem:[#allocation16 + $0xe8] sm:$0xff] }
 0x557   :  { %3248 = vmatpush1.bf16.msra.mxu0 %v5102_v9  ;;  %v5097_v41 = vcombine.high %v2838_v47, %v2842_v48  ;;  %v5119_v9 = vcombine.high %v2861_v7, %v2865_v31 }
 0x558   :  { %3249 = vmatprep.subr.bf16.mxu0 %v5111_v11  ;;  %v2866_v11 = vld [vmem:[#allocation16 + $0x1a8] sm:$0xff] }
 0x55b   :  { %3250 = vmatpush1.bf16.msra.mxu0 %v5110_v12  ;;  %v5118_v12 = vcombine.low %v2861_v7, %v2865_v31  ;;  %v2843_v7 = vld [vmem:[#allocation16 + $0xf0] sm:$0xff]  ;;  %v2840_v31 = vld [vmem:[#allocation16 + $0xd8] sm:$0xff] }
 0x55c   :  { %3251 = vmatprep.subr.bf16.mxu0 %v5119_v9 }
 0x55f   :  { %3252 = vmatpush1.bf16.msra.mxu0 %v5118_v12 }
 0x619   :  { %v5552_v14 = vpop.f32.mrb[40].mxu0 }
 0x61a   :  { %v2631_v59 = vadd.f32 %v5552_v14, %v5052_v13  ;;  %v2622_v15 = vpop.f32.mrb[41].mxu0  ;;  %v5121_v14 = vcombine.high %v2862_v8, %v2866_v11 }
 0x61b   :  { %v2623_v19 = vadd.f32 %v5052_v13, %v2622_v15  ;;  %v5553_v20 = vpop.f32.mrb[42].mxu0  ;;  %v2873_v15 = vld [vmem:[#allocation16 + $0x1e0] sm:$0xff] }
 0x61c   :  { %v2634_v23 = vadd.f32 %v5553_v20, %v5052_v13  ;;  %v2625_v25 = vpop.f32.mrb[43].mxu0  ;;  %v2655_v28 = vmax.f32 %v2631_v59, 0.0  ;;  %v2869_v59 = vld [vmem:[#allocation16 + $0x1c0] sm:$0xff] }
 0x61d   :  { %v2626_v26 = vadd.f32 %v5052_v13, %v2625_v25  ;;  %v2653_v30 = vmax.f32 %v2623_v19, 0.0  ;;  %v2870_v19 = vld [vmem:[#allocation16 + $0x1c8] sm:$0xff]  ;;  %v5127_v20 = vcombine.high %v2869_v59, %v2873_v15  ;;  %v5126_v25 = vcombine.low %v2869_v59, %v2873_v15  ;;  %v2847_v59 = vld [vmem:[#allocation16 + $0x110] sm:$0xff] }
 0x61e   :  { %v2656_v29 = vmax.f32 %v2634_v23, 0.0  ;;  %v2874_v23 = vld [vmem:[#allocation16 + $0x1e8] sm:$0xff] }
 0x61f   :  { %v2654_v32 = vmax.f32 %v2626_v26, 0.0  ;;  %v5128_v26 = vcombine.low %v2870_v19, %v2874_v23  ;;  %3253 = vmatprep.subr.bf16.mxu0 %v5127_v20  ;;  %v2851_v20 = vld [vmem:[#allocation16 + $0x130] sm:$0xff] }
 0x620   :  { %v2662_v35 = vpack.c.bf16 %v2656_v29, %v2655_v28  ;;  %v5129_v28 = vcombine.high %v2870_v19, %v2874_v23  ;;  %3254 = vmatpush1.bf16.msra.mxu0 %v5126_v25  ;;  %v2815_v29 = vld [vmem:[#allocation16 + $0x10] sm:$0xff]  ;;  %v2848_v23 = vld [vmem:[#allocation16 + $0x118] sm:$0xff] }
 0x621   :  { %v2661_v40 = vpack.c.bf16 %v2654_v32, %v2653_v30  ;;  %v2819_v30 = vld [vmem:[#allocation16 + $0x30] sm:$0xff]  ;;  %v2816_v32 = vld [vmem:[#allocation16 + $0x18] sm:$0xff] }
 0x622   :  { %v5075_v33 = vcombine.high %v2815_v29, %v2819_v30  ;;  %v5077_v45 = vcombine.high %v2816_v32, %v2820_v34  ;;  %v2852_v25 = vld [vmem:[#allocation16 + $0x138] sm:$0xff] }
 0x623   :  { %5574 = vmatprep.mubr.bf16.mxu1 %v2661_v40  ;;  %v5074_v40 = vcombine.low %v2815_v29, %v2819_v30 }
 0x624   :  { %5575 = vmatmul.mubr.bf16.vlgmr.msra.gmra.mrb[104].mxu1 %v2662_v35  ;;  %v6310_v35 = vmov 0   ;;  %3385 = vmatprep.subr.bf16.mxu0 %v5075_v33 }
 0x625   :  { %3313 = vmatpush1.bf16.msra.mxu1 %v5072_v61  ;;  %v5096_v61 = vcombine.low %v2838_v47, %v2842_v48  ;;  %3271 = vmatprep.mubr.bf16.mxu0 %v6310_v35 }
 0x626   :  { %3314 = vmatprep.subr.bf16.mxu1 %v5081_v22  ;;  %v5076_v22 = vcombine.low %v2816_v32, %v2820_v34 }
 0x629   :  { %v5556_v49 = vpop.f32.mrb[44].mxu0  ;;  %3315 = vmatpush1.bf16.msra.mxu1 %v5080_v24 }
 0x62a   :  { %v2647_v18 = vadd.f32 %v5556_v49, %v5052_v13  ;;  %v2638_v51 = vpop.f32.mrb[45].mxu0  ;;  %3316 = vmatprep.subr.bf16.mxu1 %v5089_v46 }
 0x62b   :  { %v2639_v54 = vadd.f32 %v5052_v13, %v2638_v51  ;;  %v5557_v57 = vpop.f32.mrb[46].mxu0 }
 0x62c   :  { %v2650_v58 = vadd.f32 %v5557_v57, %v5052_v13  ;;  %v2641_v53 = vpop.f32.mrb[47].mxu0  ;;  %v2659_v38 = vmax.f32 %v2647_v18, 0.0 }
 0x62d   :  { %v2642_v55 = vadd.f32 %v5052_v13, %v2641_v53  ;;  %3317 = vmatpush1.bf16.msra.mxu1 %v5088_v50  ;;  %v2657_v3 = vmax.f32 %v2639_v54, 0.0  ;;  %v5120_v13 = vcombine.low %v2862_v8, %v2866_v11  ;;  %v2844_v8 = vld [vmem:[#allocation16 + $0xf8] sm:$0xff]  ;;  %v5092_v11 = vcombine.low %v2832_v63, %v2836_v0 }
 0x62e   :  { %v2660_v16 = vmax.f32 %v2650_v58, 0.0  ;;  %3318 = vmatprep.subr.bf16.mxu1 %v5097_v41  ;;  %v2823_v41 = vld [vmem:[#allocation16 + $0x50] sm:$0xff]  ;;  %v2828_v58 = vld [vmem:[#allocation16 + $0x78] sm:$0xff]  ;;  %v5100_v33 = vcombine.low %v2840_v31, %v2844_v8 }
 0x62f   :  { %v2658_v4 = vmax.f32 %v2642_v55, 0.0 }
 0x630   :  { %v2664_v62 = vpack.c.bf16 %v2660_v16, %v2659_v38  ;;  %v5083_v16 = vcombine.high %v2823_v41, %v2827_v44 }
 0x631   :  { %v2663_v21 = vpack.c.bf16 %v2658_v4, %v2657_v3  ;;  %3319 = vmatpush1.bf16.msra.mxu1 %v5096_v61  ;;  %v2831_v3 = vld [vmem:[#allocation16 + $0x90] sm:$0xff] }
 0x632   :  { %3320 = vmatprep.subr.bf16.mxu1 %v5105_v17  ;;  %v5085_v17 = vcombine.high %v2824_v10, %v2828_v58  ;;  %v2835_v4 = vld [vmem:[#allocation16 + $0xb0] sm:$0xff] }
 0x633   :  { %5578 = vmatprep.mubr.bf16.mxu1 %v2663_v21  ;;  %v5084_v21 = vcombine.low %v2824_v10, %v2828_v58  ;;  %v5090_v9 = vcombine.low %v2831_v3, %v2835_v4  ;;  %v2863_v10 = vld [vmem:[#allocation16 + $0x190] sm:$0xff] }
 0x634   :  { %5579 = vmatmul.mubr.bf16.gmra.mrb[108].mxu1 %v2664_v62  ;;  %v5082_v62 = vcombine.low %v2823_v41, %v2827_v44  ;;  %v5108_v41 = vcombine.low %v2848_v23, %v2852_v25  ;;  %v2867_v58 = vld [vmem:[#allocation16 + $0x1b0] sm:$0xff] }
 0x635   :  { %3321 = vmatpush1.bf16.msra.mxu1 %v5104_v27  ;;  %3344 = vmatprep.mubr.bf16.mxu1 %v6310_v35  ;;  %v5091_v27 = vcombine.high %v2831_v3, %v2835_v4  ;;  %v5123_v3 = vcombine.high %v2863_v10, %v2867_v58 }
 0x636   :  { %3322 = vmatprep.subr.bf16.mxu1 %v5113_v1  ;;  %v5093_v1 = vcombine.high %v2832_v63, %v2836_v0  ;;  %v2871_v63 = vld [vmem:[#allocation16 + $0x1d0] sm:$0xff] }
 0x637   :  { %v2875_v0 = vld [vmem:[#allocation16 + $0x1f0] sm:$0xff] }
 0x639   :  { %3323 = vmatpush1.bf16.msra.mxu1 %v5112_v6  ;;  %v2839_v6 = vld [vmem:[#allocation16 + $0xd0] sm:$0xff] }
 0x63a   :  { %3324 = vmatprep.subr.bf16.mxu1 %v5121_v14  ;;  %v5101_v14 = vcombine.high %v2840_v31, %v2844_v8  ;;  %v5098_v32 = vcombine.low %v2839_v6, %v2843_v7  ;;  %v5130_v31 = vcombine.low %v2871_v63, %v2875_v0 }
 0x63d   :  { %3325 = vmatpush1.bf16.msra.mxu1 %v5120_v13  ;;  %v5099_v13 = vcombine.high %v2839_v6, %v2843_v7  ;;  %v5131_v6 = vcombine.high %v2871_v63, %v2875_v0 }
 0x63e   :  { %3326 = vmatprep.subr.bf16.mxu1 %v5129_v28 }
 0x641   :  { %3327 = vmatpush1.bf16.msra.mxu1 %v5128_v26 }
 0x642   :  { %3458 = vmatprep.subr.bf16.mxu1 %v5077_v45  ;;  %v2855_v45 = vld [vmem:[#allocation16 + $0x150] sm:$0xff] }
 0x6f7   :  { %v5576_v24 = vpop.f32.mrb[104].mxu1 }
 0x6f8   :  { %v2779_v46 = vadd.f32 %v5576_v24, %v6702_v39  ;;  %v2770_v47 = vpop.f32.mrb[105].mxu1 }
 0x6f9   :  { %v2771_v48 = vadd.f32 %v6702_v39, %v2770_v47  ;;  %v5577_v49 = vpop.f32.mrb[106].mxu1  ;;  %v2859_v47 = vld [vmem:[#allocation16 + $0x170] sm:$0xff] }
 0x6fa   :  { %v2782_v50 = vadd.f32 %v5577_v49, %v6702_v39  ;;  %v2773_v18 = vpop.f32.mrb[107].mxu1  ;;  %v2803_v54 = vmax.f32 %v2779_v46, 0.0  ;;  %v2860_v49 = vld [vmem:[#allocation16 + $0x178] sm:$0xff] }
 0x6fb   :  { %v2774_v51 = vadd.f32 %v6702_v39, %v2773_v18  ;;  %v2801_v53 = vmax.f32 %v2771_v48, 0.0  ;;  %v2856_v48 = vld [vmem:[#allocation16 + $0x158] sm:$0xff] }
 0x6fc   :  { %v2804_v57 = vmax.f32 %v2782_v50, 0.0  ;;  %v5117_v44 = vcombine.high %v2856_v48, %v2860_v49 }
 0x6fd   :  { %v2802_v55 = vmax.f32 %v2774_v51, 0.0 }
 0x6fe   :  { %v6708_v61 = vpack.c.bf16 %v2804_v57, %v2803_v54  ;;  %v5115_v57 = vcombine.high %v2855_v45, %v2859_v47 }
 0x6ff   :  { %v6710_v38 = vpack.c.bf16 %v2802_v55, %v2801_v53  ;;  %v2864_v53 = vld [vmem:[#allocation16 + $0x198] sm:$0xff] }
 0x700   :  { %v2868_v55 = vld [vmem:[#allocation16 + $0x1b8] sm:$0xff] }
 0x701   :  { %3272 = vmatmul.mubr.bf16.vlgmr.msra.gmra.mrb[48].mxu0 %v6710_v38  ;;  %3345 = vmatmul.mubr.bf16.vlgmr.msra.gmra.mrb[112].mxu1 %v6710_v38  ;;  %v5125_v4 = vcombine.high %v2864_v53, %v2868_v55 }
 0x702   :  { %3386 = vmatpush1.bf16.msra.mxu0 %v5074_v40  ;;  %3459 = vmatpush1.bf16.msra.mxu1 %v5076_v22  ;;  %v5107_v40 = vcombine.high %v2847_v59, %v2851_v20  ;;  %v5109_v22 = vcombine.high %v2848_v23, %v2852_v25  ;;  %v5791_v23 = vld [vmem:[#allocation17 + $0x54] ss:$8 sps:$4 sm:$0xff]   ;;  %v5794_v25 = vld [vmem:[#allocation17 + $0x64] ss:$8 sps:$4 sm:$0xff]  }
 0x703   :  { %3387 = vmatprep.subr.bf16.mxu0 %v5083_v16  ;;  %3460 = vmatprep.subr.bf16.mxu1 %v5085_v17  ;;  %v5114_v16 = vcombine.low %v2855_v45, %v2859_v47  ;;  %v5116_v17 = vcombine.low %v2856_v48, %v2860_v49  ;;  %v5807_v45 = vld [vmem:[#allocation17 + $0xb0] ss:$8 sps:$4 sm:$0xff]   ;;  %v5815_v47 = vld [vmem:[#allocation17 + $0xd4] ss:$8 sps:$4 sm:$0xff]   ;;  %v5818_v49 = vld [vmem:[#allocation17 + $0xe4] ss:$8 sps:$4 sm:$0xff]  }
 0x704   :  { %3281 = vmatprep.mubr.bf16.mxu0 %v6310_v35  ;;  %3354 = vmatprep.mubr.bf16.mxu1 %v6310_v35  ;;  %v5813_v48 = vld [vmem:[#allocation17 + $0xd0] ss:$8 sps:$4 sm:$0xff]  }
 0x706   :  { %3388 = vmatpush1.bf16.msra.mxu0 %v5082_v62  ;;  %3461 = vmatpush1.bf16.msra.mxu1 %v5084_v21  ;;  %v2872_v62 = vld [vmem:[#allocation16 + $0x1d8] sm:$0xff] }
 0x707   :  { %v5580_v12 = vpop.f32.mrb[108].mxu1  ;;  %3389 = vmatprep.subr.bf16.mxu0 %v5091_v27  ;;  %3462 = vmatprep.subr.bf16.mxu1 %v5093_v1  ;;  %v2876_v21 = vld [vmem:[#allocation16 + $0x1f8] sm:$0xff]  ;;  %v5122_v27 = vcombine.low %v2863_v10, %v2867_v58  ;;  %v5124_v1 = vcombine.low %v2864_v53, %v2868_v55 }
 0x708   :  { %v2795_v15 = vadd.f32 %v5580_v12, %v6702_v39  ;;  %v2786_v19 = vpop.f32.mrb[109].mxu1  ;;  %v5133_v7 = vcombine.high %v2872_v62, %v2876_v21  ;;  %v5132_v8 = vcombine.low %v2872_v62, %v2876_v21  ;;  %v5779_v12 = vld [vmem:[#allocation17 + $0x14] ss:$8 sps:$4 sm:$0xff]  }
 0x709   :  { %v2787_v26 = vadd.f32 %v6702_v39, %v2786_v19  ;;  %v5581_v28 = vpop.f32.mrb[110].mxu1  ;;  %3282 = vmatmul.mubr.bf16.gmra.mrb[52].mxu0 %v6708_v61  ;;  %3355 = vmatmul.mubr.bf16.gmra.mrb[116].mxu1 %v6708_v61  ;;  %v5788_v19 = vld [vmem:[#allocation17 + $0x44] ss:$8 sps:$4 sm:$0xff]  }
 0x70a   :  { %v2798_v29 = vadd.f32 %v5581_v28, %v6702_v39  ;;  %v2789_v30 = vpop.f32.mrb[111].mxu1  ;;  %3390 = vmatpush1.bf16.msra.mxu0 %v5090_v9  ;;  %3463 = vmatpush1.bf16.msra.mxu1 %v5092_v11  ;;  %v2807_v24 = vmax.f32 %v2795_v15, 0.0  ;;  %v5776_v9 = vld [vmem:[#allocation17 + $0x4] ss:$8 sps:$4 sm:$0xff]   ;;  %v5774_v11 = vld [vmem:[#allocation17] ss:$8 sps:$4 sm:$0xff]  }
 0x70b   :  { %v2790_v34 = vadd.f32 %v6702_v39, %v2789_v30  ;;  %3391 = vmatprep.subr.bf16.mxu0 %v5099_v13  ;;  %3464 = vmatprep.subr.bf16.mxu1 %v5101_v14  ;;  %v2805_v50 = vmax.f32 %v2787_v26, 0.0  ;;  %v5106_v39 = vcombine.low %v2847_v59, %v2851_v20  ;;  %v5777_v13 = vld [vmem:[#allocation17 + $0x10] ss:$8 sps:$4 sm:$0xff]   ;;  %v5782_v14 = vld [vmem:[#allocation17 + $0x24] ss:$8 sps:$4 sm:$0xff]  }
 0x70c   :  { %v2808_v46 = vmax.f32 %v2798_v29, 0.0  ;;  %3291 = vmatprep.mubr.bf16.mxu0 %v6310_v35  ;;  %3364 = vmatprep.mubr.bf16.mxu1 %v6310_v35  ;;  %v5780_v59 = vld [vmem:[#allocation17 + $0x20] ss:$8 sps:$4 sm:$0xff]   ;;  %v5785_v15 = vld [vmem:[#allocation17 + $0x34] ss:$8 sps:$4 sm:$0xff]  }
 0x70d   :  { %v2806_v18 = vmax.f32 %v2790_v34, 0.0  ;;  %v5786_v20 = vld [vmem:[#allocation17 + $0x40] ss:$8 sps:$4 sm:$0xff]   ;;  %v5797_v28 = vld [vmem:[#allocation17 + $0x74] ss:$8 sps:$4 sm:$0xff]  }
 0x70e   :  { %v6724_v51 = vpack.c.bf16 %v2808_v46, %v2807_v24  ;;  %3392 = vmatpush1.bf16.msra.mxu0 %v5098_v32  ;;  %3465 = vmatpush1.bf16.msra.mxu1 %v5100_v33  ;;  %v5792_v26 = vld [vmem:[#allocation17 + $0x60] ss:$8 sps:$4 sm:$0xff]   ;;  %v5795_v29 = vld [vmem:[#allocation17 + $0x70] ss:$8 sps:$4 sm:$0xff]   ;;  %v5800_v30 = vld [vmem:[#allocation17 + $0x84] ss:$8 sps:$4 sm:$0xff]  }
 0x70f   :  { %v6726_v54 = vpack.c.bf16 %v2806_v18, %v2805_v50  ;;  %3393 = vmatprep.subr.bf16.mxu0 %v5107_v40  ;;  %3466 = vmatprep.subr.bf16.mxu1 %v5109_v22  ;;  %v5798_v32 = vld [vmem:[#allocation17 + $0x80] ss:$8 sps:$4 sm:$0xff]   ;;  %v5801_v33 = vld [vmem:[#allocation17 + $0x90] ss:$8 sps:$4 sm:$0xff]   ;;  %v5806_v34 = vld [vmem:[#allocation17 + $0xa4] ss:$8 sps:$4 sm:$0xff]  }
 0x710   :  { %v5804_v40 = vld [vmem:[#allocation17 + $0xa0] ss:$8 sps:$4 sm:$0xff]   ;;  %v5809_v22 = vld [vmem:[#allocation17 + $0xb4] ss:$8 sps:$4 sm:$0xff]   ;;  %v5812_v24 = vld [vmem:[#allocation17 + $0xc4] ss:$8 sps:$4 sm:$0xff]  }
 0x711   :  { %3292 = vmatmul.mubr.bf16.gmra.mrb[56].mxu0 %v6726_v54  ;;  %3365 = vmatmul.mubr.bf16.gmra.mrb[120].mxu1 %v6726_v54  ;;  %v5810_v46 = vld [vmem:[#allocation17 + $0xc0] ss:$8 sps:$4 sm:$0xff]   ;;  %v5821_v18 = vld [vmem:[#allocation17 + $0xf4] ss:$8 sps:$4 sm:$0xff]  }
 0x712   :  { %3394 = vmatpush1.bf16.msra.mxu0 %v5106_v39  ;;  %3467 = vmatpush1.bf16.msra.mxu1 %v5108_v41  ;;  %v5816_v50 = vld [vmem:[#allocation17 + $0xe0] ss:$8 sps:$4 sm:$0xff]   ;;  %v5824_v39 = vld [vmem:[#allocation17 + $0x104] ss:$8 sps:$4 sm:$0xff]   ;;  %v6753_v41 = vld [vmem:[%s6980_s14] sm:$0xff] }
 0x713   :  { %3395 = vmatprep.subr.bf16.mxu0 %v5115_v57  ;;  %3468 = vmatprep.subr.bf16.mxu1 %v5117_v44  ;;  %v6762_v57 = vrot.slane %v6753_v41, %v340_v60  ;;  %v6766_v44 = vrot.slane %v6753_v41, %v6609_v5  ;;  %v6771_v10 = vrot.slane %v6753_v41, %v344_v37 }
 0x714   :  { %3301 = vmatprep.mubr.bf16.mxu0 %v6310_v35  ;;  %3374 = vmatprep.mubr.bf16.mxu1 %v6310_v35 }
 0x716   :  { %3396 = vmatpush1.bf16.msra.mxu0 %v5114_v16  ;;  %3469 = vmatpush1.bf16.msra.mxu1 %v5116_v17 }
 0x717   :  { %3397 = vmatprep.subr.bf16.mxu0 %v5123_v3  ;;  %3470 = vmatprep.subr.bf16.mxu1 %v5125_v4 }
 0x719   :  { %3302 = vmatmul.mubr.bf16.gmra.mrb[60].mxu0 %v6724_v51  ;;  %3375 = vmatmul.mubr.bf16.gmra.mrb[124].mxu1 %v6724_v51 }
 0x71a   :  { %3398 = vmatpush1.bf16.msra.mxu0 %v5122_v27  ;;  %3471 = vmatpush1.bf16.msra.mxu1 %v5124_v1 }
 0x71b   :  { %3399 = vmatprep.subr.bf16.mxu0 %v5131_v6  ;;  %3472 = vmatprep.subr.bf16.mxu1 %v5133_v7 }
 0x71c   :  { %3417 = vmatprep.mubr.bf16.mxu0 %v6310_v35  ;;  %3490 = vmatprep.mubr.bf16.mxu1 %v6310_v35 }
 0x71e   :  { %3400 = vmatpush1.bf16.msra.mxu0 %v5130_v31  ;;  %3473 = vmatpush1.bf16.msra.mxu1 %v5132_v8 }
 0x71f   :  { %4407 = vmatprep.subr.bf16.mxu0 %v5776_v9 }
 0x721   :  { %3418 = vmatmul.mubr.bf16.vlgmr.msra.gmra.mrb[64].mxu0 %v6710_v38  ;;  %3491 = vmatmul.mubr.bf16.vlgmr.msra.gmra.mrb[128].mxu1 %v6710_v38  ;;  %v5783_v38 = vld [vmem:[#allocation17 + $0x30] ss:$8 sps:$4 sm:$0xff]  }
 0x722   :  { %3427 = vmatprep.mubr.bf16.mxu0 %v6310_v35  ;;  %3500 = vmatprep.mubr.bf16.mxu1 %v6310_v35 }
 0x723   :  { %4408 = vmatpush1.bf16.msra.mxu0 %v5774_v11 }
 0x724   :  { %4409 = vmatprep.subr.bf16.mxu0 %v5779_v12 }
 0x727   :  { %4410 = vmatpush1.bf16.msra.mxu0 %v5777_v13 }
 0x728   :  { %4411 = vmatprep.subr.bf16.mxu0 %v5782_v14 }
 0x729   :  { %3428 = vmatmul.mubr.bf16.gmra.mrb[68].mxu0 %v6708_v61  ;;  %3501 = vmatmul.mubr.bf16.gmra.mrb[132].mxu1 %v6708_v61  ;;  %v5789_v61 = vld [vmem:[#allocation17 + $0x50] ss:$8 sps:$4 sm:$0xff]  }
 0x72a   :  { %3437 = vmatprep.mubr.bf16.mxu0 %v6310_v35  ;;  %3510 = vmatprep.mubr.bf16.mxu1 %v6310_v35 }
 0x72b   :  { %4412 = vmatpush1.bf16.msra.mxu0 %v5780_v59 }
 0x72c   :  { %4413 = vmatprep.subr.bf16.mxu0 %v5785_v15 }
 0x72f   :  { %4414 = vmatpush1.bf16.msra.mxu0 %v5783_v38 }
 0x730   :  { %4415 = vmatprep.subr.bf16.mxu0 %v5788_v19 }
 0x731   :  { %3438 = vmatmul.mubr.bf16.gmra.mrb[72].mxu0 %v6726_v54  ;;  %3511 = vmatmul.mubr.bf16.gmra.mrb[136].mxu1 %v6726_v54  ;;  %v6757_v54 = vrot.slane %v6753_v41, %v6604_v56 }
 0x732   :  { %3447 = vmatprep.mubr.bf16.mxu0 %v6310_v35  ;;  %3520 = vmatprep.mubr.bf16.mxu1 %v6310_v35  ;;  %v5803_v35 = vld [vmem:[#allocation17 + $0x94] ss:$8 sps:$4 sm:$0xff]  }
 0x733   :  { %4416 = vmatpush1.bf16.msra.mxu0 %v5786_v20 }
 0x734   :  { %4417 = vmatprep.subr.bf16.mxu0 %v5791_v23 }
 0x737   :  { %4418 = vmatpush1.bf16.msra.mxu0 %v5789_v61  ;;  %v5822_v61 = vld [vmem:[#allocation17 + $0x100] ss:$8 sps:$4 sm:$0xff]  }
 0x738   :  { %4419 = vmatprep.subr.bf16.mxu0 %v5794_v25 }
 0x739   :  { %3448 = vmatmul.mubr.bf16.gmra.mrb[76].mxu0 %v6724_v51  ;;  %3521 = vmatmul.mubr.bf16.gmra.mrb[140].mxu1 %v6724_v51  ;;  %v5819_v51 = vld [vmem:[#allocation17 + $0xf0] ss:$8 sps:$4 sm:$0xff]  }
 0x73b   :  { %4420 = vmatpush1.bf16.msra.mxu0 %v5792_v26 }
 0x73c   :  { %4421 = vmatprep.subr.bf16.mxu0 %v5797_v28 }
 0x73f   :  { %4422 = vmatpush1.bf16.msra.mxu0 %v5795_v29 }
 0x740   :  { %4423 = vmatprep.subr.bf16.mxu0 %v5800_v30  ;;  %v5827_v30 = vld [vmem:[#allocation17 + $0x114] ss:$8 sps:$4 sm:$0xff]  }
 0x743   :  { %4424 = vmatpush1.bf16.msra.mxu0 %v5798_v32 }
 0x744   :  { %4425 = vmatprep.subr.bf16.mxu0 %v5803_v35 }
 0x747   :  { %4426 = vmatpush1.bf16.msra.mxu0 %v5801_v33 }
 0x748   :  { %4427 = vmatprep.subr.bf16.mxu0 %v5806_v34 }
 0x74b   :  { %4428 = vmatpush1.bf16.msra.mxu0 %v5804_v40 }
 0x74c   :  { %4429 = vmatprep.subr.bf16.mxu0 %v5809_v22 }
 0x74f   :  { %4430 = vmatpush1.bf16.msra.mxu0 %v5807_v45 }
 0x750   :  { %4431 = vmatprep.subr.bf16.mxu0 %v5812_v24 }
 0x753   :  { %4432 = vmatpush1.bf16.msra.mxu0 %v5810_v46 }
 0x754   :  { %4433 = vmatprep.subr.bf16.mxu0 %v5815_v47 }
 0x757   :  { %4434 = vmatpush1.bf16.msra.mxu0 %v5813_v48  ;;  %v5825_v48 = vld [vmem:[#allocation17 + $0x110] ss:$8 sps:$4 sm:$0xff]  }
 0x758   :  { %4435 = vmatprep.subr.bf16.mxu0 %v5818_v49 }
 0x75b   :  { %4436 = vmatpush1.bf16.msra.mxu0 %v5816_v50 }
 0x75c   :  { %4437 = vmatprep.subr.bf16.mxu0 %v5821_v18 }
 0x75f   :  { %4438 = vmatpush1.bf16.msra.mxu0 %v5819_v51 }
 0x760   :  { %4480 = vmatprep.subr.bf16.mxu0 %v5824_v39  ;;  %v5830_v39 = vld [vmem:[#allocation17 + $0x124] ss:$8 sps:$4 sm:$0xff]  }
 0x7d4   :  { %v3273_v58 = vpop.f32.mrb[48].mxu0  ;;  %v3346_v53 = vpop.f32.mrb[112].mxu1 }
 0x7d5   :  { %v3274_v55 = vadd.f32 %v3273_v58, %v6757_v54  ;;  %v3347_v16 = vadd.f32 %v3346_v53, %v6762_v57  ;;  %v3275_v17 = vpop.f32.mrb[49].mxu0  ;;  %v3348_v3 = vpop.f32.mrb[113].mxu1 }
 0x7d6   :  { %v3276_v60 = vadd.f32 %v3275_v17, %v6766_v44  ;;  %v3349_v4 = vadd.f32 %v3348_v3, %v6771_v10  ;;  %v3277_v63 = vpop.f32.mrb[50].mxu0  ;;  %v3350_v0 = vpop.f32.mrb[114].mxu1 }
 0x7d7   :  { %v3278_v62 = vadd.f32 %v3277_v63, %v6757_v54  ;;  %v3351_v21 = vadd.f32 %v3350_v0, %v6762_v57  ;;  %v3279_v37 = vpop.f32.mrb[51].mxu0  ;;  %v3352_v27 = vpop.f32.mrb[115].mxu1  ;;  %v3531_v7 = vmax.f32 %v3274_v55, 0.0  ;;  %v3533_v31 = vmax.f32 %v3347_v16, 0.0 }
 0x7d8   :  { %v3280_v1 = vadd.f32 %v3279_v37, %v6766_v44  ;;  %v3353_v6 = vadd.f32 %v3352_v27, %v6771_v10  ;;  %v3532_v11 = vmax.f32 %v3276_v60, 0.0  ;;  %v3534_v12 = vmax.f32 %v3349_v4, 0.0 }
 0x7d9   :  { %v3539_v8 = vmax.f32 %v3278_v62, 0.0  ;;  %v3541_v9 = vmax.f32 %v3351_v21, 0.0  ;;  %v5828_v62 = vld [vmem:[#allocation17 + $0x120] ss:$8 sps:$4 sm:$0xff]  }
 0x7da   :  { %v3540_v13 = vmax.f32 %v3280_v1, 0.0  ;;  %v3542_v14 = vmax.f32 %v3353_v6, 0.0  ;;  %v5833_v6 = vld [vmem:[#allocation17 + $0x134] ss:$8 sps:$4 sm:$0xff]  }
 0x7db   :  { %v3595_v59 = vpack.c.bf16 %v3539_v8, %v3531_v7  ;;  %v6781_v15 = vpack.c.bf16 %v3541_v9, %v3533_v31 }
 0x7dc   :  { %v3596_v38 = vpack.c.bf16 %v3540_v13, %v3532_v11  ;;  %v6783_v19 = vpack.c.bf16 %v3542_v14, %v3534_v12  ;;  %v3283_v20 = vpop.f32.mrb[52].mxu0  ;;  %v3356_v23 = vpop.f32.mrb[116].mxu1 }
 0x7dd   :  { %v3284_v25 = vadd.f32 %v3283_v20, %v6757_v54  ;;  %v3357_v26 = vadd.f32 %v3356_v23, %v6762_v57  ;;  %v3285_v28 = vpop.f32.mrb[53].mxu0  ;;  %v3358_v29 = vpop.f32.mrb[117].mxu1  ;;  %v5831_v20 = vld [vmem:[#allocation17 + $0x130] ss:$8 sps:$4 sm:$0xff]  }
 0x7de   :  { %v3286_v32 = vadd.f32 %v3285_v28, %v6766_v44  ;;  %v3359_v35 = vadd.f32 %v3358_v29, %v6771_v10  ;;  %v3287_v33 = vpop.f32.mrb[54].mxu0  ;;  %v3360_v34 = vpop.f32.mrb[118].mxu1  ;;  %4439 = vmatprep.mubr.bf16.mxu0 %v3596_v38  ;;  %v5836_v28 = vld [vmem:[#allocation17 + $0x144] ss:$8 sps:$4 sm:$0xff]  }
 0x7df   :  { %v3288_v40 = vadd.f32 %v3287_v33, %v6757_v54  ;;  %v3361_v22 = vadd.f32 %v3360_v34, %v6762_v57  ;;  %v3289_v45 = vpop.f32.mrb[55].mxu0  ;;  %v3362_v24 = vpop.f32.mrb[119].mxu1  ;;  %4440 = vmatmul.mubr.bf16.vlgmr.msra.gmra.mrb[80].mxu0 %v3595_v59  ;;  %v3547_v49 = vmax.f32 %v3284_v25, 0.0  ;;  %v3549_v50 = vmax.f32 %v3357_v26, 0.0 }
 0x7e0   :  { %v3290_v46 = vadd.f32 %v3289_v45, %v6766_v44  ;;  %v3363_v47 = vadd.f32 %v3362_v24, %v6771_v10  ;;  %4481 = vmatpush1.bf16.msra.mxu0 %v5822_v61  ;;  %v3548_v58 = vmax.f32 %v3286_v32, 0.0  ;;  %v3550_v53 = vmax.f32 %v3359_v35, 0.0 }
 0x7e1   :  { %v3555_v18 = vmax.f32 %v3288_v40, 0.0  ;;  %v3557_v51 = vmax.f32 %v3361_v22, 0.0  ;;  %4482 = vmatprep.subr.bf16.mxu0 %v5827_v30 }
 0x7e2   :  { %v3556_v55 = vmax.f32 %v3290_v46, 0.0  ;;  %v3558_v16 = vmax.f32 %v3363_v47, 0.0  ;;  %v5834_v46 = vld [vmem:[#allocation17 + $0x140] ss:$8 sps:$4 sm:$0xff]  }
 0x7e3   :  { %v3603_v17 = vpack.c.bf16 %v3555_v18, %v3547_v49  ;;  %v6793_v3 = vpack.c.bf16 %v3557_v51, %v3549_v50  ;;  %v5839_v18 = vld [vmem:[#allocation17 + $0x154] ss:$8 sps:$4 sm:$0xff]  }
 0x7e4   :  { %v3604_v60 = vpack.c.bf16 %v3556_v55, %v3548_v58  ;;  %v6795_v4 = vpack.c.bf16 %v3558_v16, %v3550_v53  ;;  %4483 = vmatpush1.bf16.msra.mxu0 %v5825_v48  ;;  %v3293_v63 = vpop.f32.mrb[56].mxu0  ;;  %v3366_v0 = vpop.f32.mrb[120].mxu1 }
 0x7e5   :  { %v3294_v21 = vadd.f32 %v3293_v63, %v6757_v54  ;;  %v3367_v37 = vadd.f32 %v3366_v0, %v6762_v57  ;;  %v3295_v27 = vpop.f32.mrb[57].mxu0  ;;  %v3368_v1 = vpop.f32.mrb[121].mxu1  ;;  %4484 = vmatprep.subr.bf16.mxu0 %v5830_v39  ;;  %v6818_v63 = vrot.slane %v6753_v41, %v348_v2  ;;  %v6823_v0 = vrot.slane %v6753_v41, %v356_v42 }
 0x7e6   :  { %v3296_v7 = vadd.f32 %v3295_v27, %v6766_v44  ;;  %v3369_v31 = vadd.f32 %v3368_v1, %v6771_v10  ;;  %v3297_v8 = vpop.f32.mrb[58].mxu0  ;;  %v3370_v9 = vpop.f32.mrb[122].mxu1  ;;  %4449 = vmatprep.mubr.bf16.mxu0 %v3604_v60  ;;  %v6835_v2 = vrot.slane %v6753_v41, %v360_v43 }
 0x7e7   :  { %v3298_v11 = vadd.f32 %v3297_v8, %v6757_v54  ;;  %v3371_v12 = vadd.f32 %v3370_v9, %v6762_v57  ;;  %v3299_v13 = vpop.f32.mrb[59].mxu0  ;;  %v3372_v14 = vpop.f32.mrb[123].mxu1  ;;  %4450 = vmatmul.mubr.bf16.gmra.mrb[84].mxu0 %v3603_v17  ;;  %v3563_v23 = vmax.f32 %v3294_v21, 0.0  ;;  %v3565_v61 = vmax.f32 %v3367_v37, 0.0 }
 0x7e8   :  { %v3300_v59 = vadd.f32 %v3299_v13, %v6766_v44  ;;  %v3373_v38 = vadd.f32 %v3372_v14, %v6771_v10  ;;  %4485 = vmatpush1.bf16.msra.mxu0 %v5828_v62  ;;  %v3564_v29 = vmax.f32 %v3296_v7, 0.0  ;;  %v3566_v30 = vmax.f32 %v3369_v31, 0.0 }
 0x7e9   :  { %v3571_v25 = vmax.f32 %v3298_v11, 0.0  ;;  %v3573_v26 = vmax.f32 %v3371_v12, 0.0  ;;  %4486 = vmatprep.subr.bf16.mxu0 %v5833_v6 }
 0x7ea   :  { %v3572_v32 = vmax.f32 %v3300_v59, 0.0  ;;  %v3574_v35 = vmax.f32 %v3373_v38, 0.0  ;;  %v5845_v38 = vld [vmem:[#allocation17 + $0x174] ss:$8 sps:$4 sm:$0xff]  }
 0x7eb   :  { %v3611_v33 = vpack.c.bf16 %v3571_v25, %v3563_v23  ;;  %v6805_v34 = vpack.c.bf16 %v3573_v26, %v3565_v61 }
 0x7ec   :  { %v3612_v40 = vpack.c.bf16 %v3572_v32, %v3564_v29  ;;  %v6807_v22 = vpack.c.bf16 %v3574_v35, %v3566_v30  ;;  %4487 = vmatpush1.bf16.msra.mxu0 %v5831_v20  ;;  %v3303_v45 = vpop.f32.mrb[60].mxu0  ;;  %v3376_v24 = vpop.f32.mrb[124].mxu1 }
 0x7ed   :  { %v3304_v47 = vadd.f32 %v3303_v45, %v6757_v54  ;;  %v3377_v48 = vadd.f32 %v3376_v24, %v6762_v57  ;;  %v3305_v49 = vpop.f32.mrb[61].mxu0  ;;  %v3378_v50 = vpop.f32.mrb[125].mxu1  ;;  %4488 = vmatprep.subr.bf16.mxu0 %v5836_v28 }
 0x7ee   :  { %v3306_v51 = vadd.f32 %v3305_v49, %v6766_v44  ;;  %v3379_v39 = vadd.f32 %v3378_v50, %v6771_v10  ;;  %v3307_v58 = vpop.f32.mrb[62].mxu0  ;;  %v3380_v53 = vpop.f32.mrb[126].mxu1  ;;  %4459 = vmatprep.mubr.bf16.mxu0 %v3612_v40 }
 0x7ef   :  { %v3308_v55 = vadd.f32 %v3307_v58, %v6757_v54  ;;  %v3381_v16 = vadd.f32 %v3380_v53, %v6762_v57  ;;  %v3309_v17 = vpop.f32.mrb[63].mxu0  ;;  %v3382_v60 = vpop.f32.mrb[127].mxu1  ;;  %4460 = vmatmul.mubr.bf16.gmra.mrb[88].mxu0 %v3611_v33  ;;  %v5837_v54 = vld [vmem:[#allocation17 + $0x150] ss:$8 sps:$4 sm:$0xff]   ;;  %v6830_v57 = vrot.slane %v6753_v41, %v352_v36  ;;  %v3579_v37 = vmax.f32 %v3304_v47, 0.0 }
 0x7f0   :  { %v3310_v62 = vadd.f32 %v3309_v17, %v6766_v44  ;;  %v3383_v21 = vadd.f32 %v3382_v60, %v6771_v10  ;;  %4489 = vmatpush1.bf16.msra.mxu0 %v5834_v46  ;;  %v3581_v27 = vmax.f32 %v3377_v48, 0.0  ;;  %v5842_v44 = vld [vmem:[#allocation17 + $0x164] ss:$8 sps:$4 sm:$0xff]   ;;  %v3580_v6 = vmax.f32 %v3306_v51, 0.0  ;;  %v5840_v41 = vld [vmem:[#allocation17 + $0x160] ss:$8 sps:$4 sm:$0xff]  }
 0x7f1   :  { %v3587_v42 = vmax.f32 %v3308_v55, 0.0  ;;  %v3589_v1 = vmax.f32 %v3381_v16, 0.0  ;;  %4490 = vmatprep.subr.bf16.mxu0 %v5839_v18  ;;  %v3582_v10 = vmax.f32 %v3379_v39, 0.0  ;;  %v5843_v33 = vld [vmem:[#allocation17 + $0x170] ss:$8 sps:$4 sm:$0xff]  }
 0x7f2   :  { %v3588_v7 = vmax.f32 %v3310_v62, 0.0  ;;  %v3590_v31 = vmax.f32 %v3383_v21, 0.0  ;;  %v5848_v47 = vld [vmem:[#allocation17 + $0x184] ss:$8 sps:$4 sm:$0xff]   ;;  %v5846_v16 = vld [vmem:[#allocation17 + $0x180] ss:$8 sps:$4 sm:$0xff]  }
 0x7f3   :  { %v3619_v8 = vpack.c.bf16 %v3587_v42, %v3579_v37  ;;  %v6837_v9 = vpack.c.bf16 %v3589_v1, %v3581_v27 }
 0x7f4   :  { %v3620_v36 = vpack.c.bf16 %v3588_v7, %v3580_v6  ;;  %v6839_v11 = vpack.c.bf16 %v3590_v31, %v3582_v10  ;;  %4491 = vmatpush1.bf16.msra.mxu0 %v5837_v54  ;;  %v3419_v52 = vpop.f32.mrb[64].mxu0  ;;  %v3492_v43 = vpop.f32.mrb[128].mxu1  ;;  %v5851_v54 = vld [vmem:[#allocation17 + $0x194] ss:$8 sps:$4 sm:$0xff]  }
 0x7f5   :  { %v3420_v12 = vadd.f32 %v3419_v52, %v6818_v63  ;;  %v3493_v13 = vadd.f32 %v3492_v43, %v6823_v0  ;;  %v3421_v14 = vpop.f32.mrb[65].mxu0  ;;  %v3494_v59 = vpop.f32.mrb[129].mxu1  ;;  %4492 = vmatprep.subr.bf16.mxu0 %v5842_v44 }
 0x7f6   :  { %v3422_v20 = vadd.f32 %v3421_v14, %v6830_v57  ;;  %v3495_v23 = vadd.f32 %v3494_v59, %v6835_v2  ;;  %v3423_v61 = vpop.f32.mrb[66].mxu0  ;;  %v3496_v25 = vpop.f32.mrb[130].mxu1  ;;  %4469 = vmatprep.mubr.bf16.mxu0 %v3620_v36  ;;  %v5849_v36 = vld [vmem:[#allocation17 + $0x190] ss:$8 sps:$4 sm:$0xff]  }
 0x7f7   :  { %v3424_v26 = vadd.f32 %v3423_v61, %v6818_v63  ;;  %v3497_v28 = vadd.f32 %v3496_v25, %v6823_v0  ;;  %v3425_v29 = vpop.f32.mrb[67].mxu0  ;;  %v3498_v30 = vpop.f32.mrb[131].mxu1  ;;  %4470 = vmatmul.mubr.bf16.gmra.mrb[92].mxu0 %v3619_v8  ;;  %v3535_v40 = vmax.f32 %v3420_v12, 0.0  ;;  %v3537_v45 = vmax.f32 %v3493_v13, 0.0  ;;  %v5854_v13 = vld [vmem:[#allocation17 + $0x1a4] ss:$8 sps:$4 sm:$0xff]  }
 0x7f8   :  { %v3426_v32 = vadd.f32 %v3425_v29, %v6830_v57  ;;  %v3499_v35 = vadd.f32 %v3498_v30, %v6835_v2  ;;  %4493 = vmatpush1.bf16.msra.mxu0 %v5840_v41  ;;  %4512 = vmatprep.mubr.bf16.mxu0 %v6783_v19  ;;  %v3536_v48 = vmax.f32 %v3422_v20, 0.0  ;;  %v3538_v49 = vmax.f32 %v3495_v23, 0.0  ;;  %v5852_v30 = vld [vmem:[#allocation17 + $0x1a0] ss:$8 sps:$4 sm:$0xff]  }
 0x7f9   :  { %v3543_v24 = vmax.f32 %v3424_v26, 0.0  ;;  %v3545_v46 = vmax.f32 %v3497_v28, 0.0  ;;  %4494 = vmatprep.subr.bf16.mxu0 %v5845_v38 }
 0x7fa   :  { %v3544_v50 = vmax.f32 %v3426_v32, 0.0  ;;  %v3546_v18 = vmax.f32 %v3499_v35, 0.0 }
 0x7fb   :  { %v6850_v51 = vpack.c.bf16 %v3543_v24, %v3535_v40  ;;  %v6852_v39 = vpack.c.bf16 %v3545_v46, %v3537_v45  ;;  %v5857_v45 = vld [vmem:[#allocation17 + $0x1b4] ss:$8 sps:$4 sm:$0xff]  }
 0x7fc   :  { %v6854_v58 = vpack.c.bf16 %v3544_v50, %v3536_v48  ;;  %v6856_v53 = vpack.c.bf16 %v3546_v18, %v3538_v49  ;;  %4495 = vmatpush1.bf16.msra.mxu0 %v5843_v33  ;;  %v3429_v19 = vpop.f32.mrb[68].mxu0  ;;  %v3502_v55 = vpop.f32.mrb[132].mxu1 }
 0x7fd   :  { %v3430_v17 = vadd.f32 %v3429_v19, %v6818_v63  ;;  %v3503_v60 = vadd.f32 %v3502_v55, %v6823_v0  ;;  %v3431_v62 = vpop.f32.mrb[69].mxu0  ;;  %v3504_v21 = vpop.f32.mrb[133].mxu1  ;;  %4496 = vmatprep.subr.bf16.mxu0 %v5848_v47 }
 0x7fe   :  { %v3432_v37 = vadd.f32 %v3431_v62, %v6830_v57  ;;  %v3505_v27 = vadd.f32 %v3504_v21, %v6835_v2  ;;  %v3433_v42 = vpop.f32.mrb[70].mxu0  ;;  %v3506_v1 = vpop.f32.mrb[134].mxu1 }
 0x7ff   :  { %v3434_v44 = vadd.f32 %v3433_v42, %v6818_v63  ;;  %v3507_v6 = vadd.f32 %v3506_v1, %v6823_v0  ;;  %v3435_v10 = vpop.f32.mrb[71].mxu0  ;;  %v3508_v7 = vpop.f32.mrb[135].mxu1  ;;  %v3551_v52 = vmax.f32 %v3430_v17, 0.0  ;;  %v3553_v43 = vmax.f32 %v3503_v60, 0.0  ;;  %v5855_v17 = vld [vmem:[#allocation17 + $0x1b0] ss:$8 sps:$4 sm:$0xff]  }
 0x800   :  { %v3436_v31 = vadd.f32 %v3435_v10, %v6830_v57  ;;  %v3509_v8 = vadd.f32 %v3508_v7, %v6835_v2  ;;  %4497 = vmatpush1.bf16.msra.mxu0 %v5846_v16  ;;  %v3552_v14 = vmax.f32 %v3432_v37, 0.0  ;;  %v3554_v59 = vmax.f32 %v3505_v27, 0.0  ;;  %v5860_v37 = vld [vmem:[#allocation17 + $0x1c4] ss:$8 sps:$4 sm:$0xff]  }
 0x801   :  { %v3559_v41 = vmax.f32 %v3434_v44, 0.0  ;;  %v3561_v12 = vmax.f32 %v3507_v6, 0.0  ;;  %4498 = vmatprep.subr.bf16.mxu0 %v5851_v54 }
 0x802   :  { %v3560_v38 = vmax.f32 %v3436_v31, 0.0  ;;  %v3562_v20 = vmax.f32 %v3509_v8, 0.0 }
 0x803   :  { %v6866_v23 = vpack.c.bf16 %v3559_v41, %v3551_v52  ;;  %v6868_v61 = vpack.c.bf16 %v3561_v12, %v3553_v43  ;;  %v5858_v52 = vld [vmem:[#allocation17 + $0x1c0] ss:$8 sps:$4 sm:$0xff]  }
 0x804   :  { %v6870_v25 = vpack.c.bf16 %v3560_v38, %v3552_v14  ;;  %v6872_v26 = vpack.c.bf16 %v3562_v20, %v3554_v59  ;;  %4499 = vmatpush1.bf16.msra.mxu0 %v5849_v36  ;;  %v3439_v28 = vpop.f32.mrb[72].mxu0  ;;  %v3512_v29 = vpop.f32.mrb[136].mxu1  ;;  %v5863_v14 = vld [vmem:[#allocation17 + $0x1d4] ss:$8 sps:$4 sm:$0xff]  }
 0x805   :  { %v3440_v32 = vadd.f32 %v3439_v28, %v6818_v63  ;;  %v3513_v35 = vadd.f32 %v3512_v29, %v6823_v0  ;;  %v3441_v33 = vpop.f32.mrb[73].mxu0  ;;  %v3514_v40 = vpop.f32.mrb[137].mxu1  ;;  %4500 = vmatprep.subr.bf16.mxu0 %v5854_v13 }
 0x806   :  { %v3442_v24 = vadd.f32 %v3441_v33, %v6830_v57  ;;  %v3515_v46 = vadd.f32 %v3514_v40, %v6835_v2  ;;  %v3443_v47 = vpop.f32.mrb[74].mxu0  ;;  %v3516_v48 = vpop.f32.mrb[138].mxu1 }
 0x807   :  { %v3444_v49 = vadd.f32 %v3443_v47, %v6818_v63  ;;  %v3517_v50 = vadd.f32 %v3516_v48, %v6823_v0  ;;  %v3445_v18 = vpop.f32.mrb[75].mxu0  ;;  %v3518_v19 = vpop.f32.mrb[139].mxu1  ;;  %v3567_v60 = vmax.f32 %v3440_v32, 0.0  ;;  %v3569_v62 = vmax.f32 %v3513_v35, 0.0 }
 0x808   :  { %v3446_v55 = vadd.f32 %v3445_v18, %v6830_v57  ;;  %v3519_v16 = vadd.f32 %v3518_v19, %v6835_v2  ;;  %4501 = vmatpush1.bf16.msra.mxu0 %v5852_v30  ;;  %v3568_v27 = vmax.f32 %v3442_v24, 0.0  ;;  %v3570_v42 = vmax.f32 %v3515_v46, 0.0 }
 0x809   :  { %v3575_v21 = vmax.f32 %v3444_v49, 0.0  ;;  %v3577_v54 = vmax.f32 %v3517_v50, 0.0  ;;  %4502 = vmatprep.subr.bf16.mxu0 %v5857_v45  ;;  %v5861_v45 = vld [vmem:[#allocation17 + $0x1d0] ss:$8 sps:$4 sm:$0xff]   ;;  %v5866_v49 = vld [vmem:[#allocation17 + $0x1e4] ss:$8 sps:$4 sm:$0xff]  }
 0x80a   :  { %v3576_v1 = vmax.f32 %v3446_v55, 0.0  ;;  %v3578_v44 = vmax.f32 %v3519_v16, 0.0 }
 0x80b   :  { %v6882_v6 = vpack.c.bf16 %v3575_v21, %v3567_v60  ;;  %v6884_v10 = vpack.c.bf16 %v3577_v54, %v3569_v62  ;;  %v5867_v60 = vld [vmem:[#allocation17 + $0x1f0] ss:$8 sps:$4 sm:$0xff]   ;;  %v5872_v62 = vld [vmem:[#allocation17 + $0x204] ss:$8 sps:$4 sm:$0xff]   ;;  %v5870_v21 = vld [vmem:[#allocation17 + $0x200] ss:$8 sps:$4 sm:$0xff]  }
 0x80c   :  { %v6886_v7 = vpack.c.bf16 %v3576_v1, %v3568_v27  ;;  %v6888_v31 = vpack.c.bf16 %v3578_v44, %v3570_v42  ;;  %4503 = vmatpush1.bf16.msra.mxu0 %v5855_v17  ;;  %v3449_v8 = vpop.f32.mrb[76].mxu0  ;;  %v3522_v36 = vpop.f32.mrb[140].mxu1  ;;  %v5869_v17 = vld [vmem:[#allocation17 + $0x1f4] ss:$8 sps:$4 sm:$0xff]   ;;  %v5878_v27 = vld [vmem:[#allocation17 + $0x224] ss:$8 sps:$4 sm:$0xff]  }
 0x80d   :  { %v3450_v43 = vadd.f32 %v3449_v8, %v6818_v63  ;;  %v3523_v41 = vadd.f32 %v3522_v36, %v6823_v0  ;;  %v3451_v12 = vpop.f32.mrb[77].mxu0  ;;  %v3524_v13 = vpop.f32.mrb[141].mxu1  ;;  %4504 = vmatprep.subr.bf16.mxu0 %v5860_v37  ;;  %v5875_v54 = vld [vmem:[#allocation17 + $0x214] ss:$8 sps:$4 sm:$0xff]   ;;  %v5873_v37 = vld [vmem:[#allocation17 + $0x210] ss:$8 sps:$4 sm:$0xff]  }
 0x80e   :  { %v3452_v59 = vadd.f32 %v3451_v12, %v6830_v57  ;;  %v3525_v38 = vadd.f32 %v3524_v13, %v6835_v2  ;;  %v3453_v20 = vpop.f32.mrb[78].mxu0  ;;  %v3526_v28 = vpop.f32.mrb[142].mxu1  ;;  %v5876_v42 = vld [vmem:[#allocation17 + $0x220] ss:$8 sps:$4 sm:$0xff]   ;;  %v5881_v1 = vld [vmem:[#allocation17 + $0x234] ss:$8 sps:$4 sm:$0xff]  }
 0x80f   :  { %v3454_v29 = vadd.f32 %v3453_v20, %v6818_v63  ;;  %v3527_v30 = vadd.f32 %v3526_v28, %v6823_v0  ;;  %v3455_v32 = vpop.f32.mrb[79].mxu0  ;;  %v3528_v35 = vpop.f32.mrb[143].mxu1  ;;  %v3583_v24 = vmax.f32 %v3450_v43, 0.0  ;;  %v3585_v46 = vmax.f32 %v3523_v41, 0.0  ;;  %v5879_v44 = vld [vmem:[#allocation17 + $0x230] ss:$8 sps:$4 sm:$0xff]  }
 0x810   :  { %v3456_v33 = vadd.f32 %v3455_v32, %v6830_v57  ;;  %v3529_v40 = vadd.f32 %v3528_v35, %v6835_v2  ;;  %4505 = vmatpush1.bf16.msra.mxu0 %v5858_v52  ;;  %v3584_v50 = vmax.f32 %v3452_v59, 0.0  ;;  %v3586_v18 = vmax.f32 %v3525_v38, 0.0  ;;  %v5864_v2 = vld [vmem:[#allocation17 + $0x1e0] ss:$8 sps:$4 sm:$0xff]   ;;  %v5884_v8 = vld [vmem:[#allocation17 + $0x244] ss:$8 sps:$4 sm:$0xff]  }
 0x811   :  { %v3591_v47 = vmax.f32 %v3454_v29, 0.0  ;;  %v3593_v48 = vmax.f32 %v3527_v30, 0.0  ;;  %4506 = vmatprep.subr.bf16.mxu0 %v5863_v14  ;;  %v5885_v36 = vld [vmem:[#allocation17 + $0x250] ss:$8 sps:$4 sm:$0xff]   ;;  %v5890_v52 = vld [vmem:[#allocation17 + $0x264] ss:$8 sps:$4 sm:$0xff]  }
 0x812   :  { %v3592_v19 = vmax.f32 %v3456_v33, 0.0  ;;  %v3594_v63 = vmax.f32 %v3529_v40, 0.0  ;;  %v5891_v43 = vld [vmem:[#allocation17 + $0x270] ss:$8 sps:$4 sm:$0xff]   ;;  %v5896_v41 = vld [vmem:[#allocation17 + $0x284] ss:$8 sps:$4 sm:$0xff]  }
 0x813   :  { %v6898_v55 = vpack.c.bf16 %v3591_v47, %v3583_v24  ;;  %v6900_v0 = vpack.c.bf16 %v3593_v48, %v3585_v46  ;;  %v5897_v12 = vld [vmem:[#allocation17 + $0x290] ss:$8 sps:$4 sm:$0xff]   ;;  %v5902_v13 = vld [vmem:[#allocation17 + $0x2a4] ss:$8 sps:$4 sm:$0xff]   ;;  %v5900_v14 = vld [vmem:[#allocation17 + $0x2a0] ss:$8 sps:$4 sm:$0xff]  }
 0x814   :  { %v6902_v16 = vpack.c.bf16 %v3592_v19, %v3584_v50  ;;  %v6904_v57 = vpack.c.bf16 %v3594_v63, %v3586_v18  ;;  %4507 = vmatpush1.bf16.msra.mxu0 %v5861_v45  ;;  %v5905_v59 = vld [vmem:[#allocation17 + $0x2b4] ss:$8 sps:$4 sm:$0xff]   ;;  %v5908_v38 = vld [vmem:[#allocation17 + $0x2c4] ss:$8 sps:$4 sm:$0xff]   ;;  %v5909_v28 = vld [vmem:[#allocation17 + $0x2d0] ss:$8 sps:$4 sm:$0xff]  }
 0x815   :  { %4508 = vmatprep.subr.bf16.mxu0 %v5866_v49  ;;  %v5911_v20 = vld [vmem:[#allocation17 + $0x2d4] ss:$8 sps:$4 sm:$0xff]   ;;  %v5914_v29 = vld [vmem:[#allocation17 + $0x2e4] ss:$8 sps:$4 sm:$0xff]   ;;  %v5912_v30 = vld [vmem:[#allocation17 + $0x2e0] ss:$8 sps:$4 sm:$0xff]  }
 0x816   :  { %v5917_v32 = vld [vmem:[#allocation17 + $0x2f4] ss:$8 sps:$4 sm:$0xff]   ;;  %v5915_v35 = vld [vmem:[#allocation17 + $0x2f0] ss:$8 sps:$4 sm:$0xff]   ;;  %v5920_v33 = vld [vmem:[#allocation17 + $0x304] ss:$8 sps:$4 sm:$0xff]  }
 0x817   :  { %v5918_v40 = vld [vmem:[#allocation17 + $0x300] ss:$8 sps:$4 sm:$0xff]   ;;  %v5923_v45 = vld [vmem:[#allocation17 + $0x314] ss:$8 sps:$4 sm:$0xff]   ;;  %v5921_v24 = vld [vmem:[#allocation17 + $0x310] ss:$8 sps:$4 sm:$0xff]  }
 0x818   :  { %4509 = vmatpush1.bf16.msra.mxu0 %v5864_v2  ;;  %v5926_v46 = vld [vmem:[#allocation17 + $0x324] ss:$8 sps:$4 sm:$0xff]   ;;  %v5924_v47 = vld [vmem:[#allocation17 + $0x320] ss:$8 sps:$4 sm:$0xff]   ;;  %v5929_v48 = vld [vmem:[#allocation17 + $0x334] ss:$8 sps:$4 sm:$0xff]  }
 0x819   :  { %4510 = vmatprep.subr.bf16.mxu0 %v5869_v17  ;;  %v5927_v49 = vld [vmem:[#allocation17 + $0x330] ss:$8 sps:$4 sm:$0xff]   ;;  %v5932_v50 = vld [vmem:[#allocation17 + $0x344] ss:$8 sps:$4 sm:$0xff]  }
 0x81a   :  { %v5933_v18 = vld [vmem:[#allocation17 + $0x350] ss:$8 sps:$4 sm:$0xff]   ;;  %v5938_v19 = vld [vmem:[#allocation17 + $0x364] ss:$8 sps:$4 sm:$0xff]  }
 0x81b   :  { %v5939_v63 = vld [vmem:[#allocation17 + $0x370] ss:$8 sps:$4 sm:$0xff]   ;;  %v5944_v2 = vld [vmem:[#allocation17 + $0x384] ss:$8 sps:$4 sm:$0xff]  }
 0x81c   :  { %4511 = vmatpush1.bf16.msra.mxu0 %v5867_v60  ;;  %v5945_v17 = vld [vmem:[#allocation17 + $0x390] ss:$8 sps:$4 sm:$0xff]   ;;  %v5950_v60 = vld [vmem:[#allocation17 + $0x3a4] ss:$8 sps:$4 sm:$0xff]  }
 0x81d   :  { %4553 = vmatprep.subr.bf16.mxu0 %v5872_v62  ;;  %v5948_v62 = vld [vmem:[#allocation17 + $0x3a0] ss:$8 sps:$4 sm:$0xff]  }
 0x81f   :  { %4513 = vmatmul.mubr.bf16.vlgmr.msra.gmra.mrb[80].mxu0 %v6781_v15  ;;  %v5882_v15 = vld [vmem:[#allocation17 + $0x240] ss:$8 sps:$4 sm:$0xff]  }
 0x820   :  { %4522 = vmatprep.mubr.bf16.mxu0 %v6795_v4  ;;  %4554 = vmatpush1.bf16.msra.mxu0 %v5870_v21  ;;  %v5887_v4 = vld [vmem:[#allocation17 + $0x254] ss:$8 sps:$4 sm:$0xff]  }
 0x821   :  { %4555 = vmatprep.subr.bf16.mxu0 %v5875_v54  ;;  %v5953_v21 = vld [vmem:[#allocation17 + $0x3b4] ss:$8 sps:$4 sm:$0xff]   ;;  %v5956_v54 = vld [vmem:[#allocation17 + $0x3c4] ss:$8 sps:$4 sm:$0xff]  }
 0x824   :  { %4556 = vmatpush1.bf16.msra.mxu0 %v5873_v37  ;;  %v5959_v37 = vld [vmem:[#allocation17 + $0x3d4] ss:$8 sps:$4 sm:$0xff]  }
 0x825   :  { %4557 = vmatprep.subr.bf16.mxu0 %v5878_v27  ;;  %v5957_v27 = vld [vmem:[#allocation17 + $0x3d0] ss:$8 sps:$4 sm:$0xff]  }
 0x827   :  { %4523 = vmatmul.mubr.bf16.gmra.mrb[84].mxu0 %v6793_v3  ;;  %v5888_v3 = vld [vmem:[#allocation17 + $0x260] ss:$8 sps:$4 sm:$0xff]  }
 0x828   :  { %4532 = vmatprep.mubr.bf16.mxu0 %v6807_v22  ;;  %4558 = vmatpush1.bf16.msra.mxu0 %v5876_v42  ;;  %v5893_v22 = vld [vmem:[#allocation17 + $0x274] ss:$8 sps:$4 sm:$0xff]   ;;  %v5962_v42 = vld [vmem:[#allocation17 + $0x3e4] ss:$8 sps:$4 sm:$0xff]  }
 0x829   :  { %4559 = vmatprep.subr.bf16.mxu0 %v5881_v1  ;;  %v5960_v1 = vld [vmem:[#allocation17 + $0x3e0] ss:$8 sps:$4 sm:$0xff]  }
 0x82c   :  { %4560 = vmatpush1.bf16.msra.mxu0 %v5879_v44  ;;  %v5965_v44 = vld [vmem:[#allocation17 + $0x3f4] ss:$8 sps:$4 sm:$0xff]  }
 0x82d   :  { %4561 = vmatprep.subr.bf16.mxu0 %v5884_v8  ;;  %v5963_v8 = vld [vmem:[#allocation17 + $0x3f0] ss:$8 sps:$4 sm:$0xff]  }
 0x82f   :  { %4533 = vmatmul.mubr.bf16.gmra.mrb[88].mxu0 %v6805_v34  ;;  %v5894_v34 = vld [vmem:[#allocation17 + $0x280] ss:$8 sps:$4 sm:$0xff]  }
 0x830   :  { %4542 = vmatprep.mubr.bf16.mxu0 %v6839_v11  ;;  %4562 = vmatpush1.bf16.msra.mxu0 %v5882_v15  ;;  %v5899_v11 = vld [vmem:[#allocation17 + $0x294] ss:$8 sps:$4 sm:$0xff]   ;;  %v3755_v15 = vld [vmem:[%s6982_s16] sm:$0x3]  ;;  %s6311_s16 = smov [#allocation19]  }
 0x831   :  { %4563 = vmatprep.subr.bf16.mxu0 %v5887_v4  ;;  %v6933_v4 = vrot.slane %v3755_v15, %v6604_v56  ;;  %s4816_s9 = sshll.u32 %s6311_s16, 4  ;;  %s4817_s9 = int_to_ptr.vmem [resolvable:$true] %s4816_s9 }
 0x832   :  { %s6258_s25 = scalar_lea.vmem %s4817_s9, 2048  ;;  %p6263_p11 = scmp.lt.s32.totalorder %s4817_s9, %s4817_s9 }
 0x833   :  { %p6259_p10 = scmp.ne.s32.totalorder %s4817_s9, %s6258_s25  ;;  %p6264_p12 = scmp.lt.s32.totalorder %s6258_s25, %s6258_s25 }
 0x834   :  { %4564 = vmatpush1.bf16.msra.mxu0 %v5885_v36 }
 0x835   :  { %4565 = vmatprep.subr.bf16.mxu0 %v5890_v52  ;;  %p6265_p13 = por %p6264_p12, %p6263_p11 }
 0x837   :  { %4543 = vmatmul.mubr.bf16.gmra.mrb[92].mxu0 %v6837_v9  ;;  %v5903_v9 = vld [vmem:[#allocation17 + $0x2b0] ss:$8 sps:$4 sm:$0xff]   ;;  %p6266_p0 = pnand %p6265_p13, %p6259_p10 }
 0x838   :  { %4566 = vmatpush1.bf16.msra.mxu0 %v5888_v3  ;;  %4585 = vmatprep.mubr.bf16.mxu0 %v6854_v58  ;;  %v5906_v58 = vld [vmem:[#allocation17 + $0x2c0] ss:$8 sps:$4 sm:$0xff]  }
 0x839   :  { %4567 = vmatprep.subr.bf16.mxu0 %v5893_v22 }
 0x83c   :  { %4568 = vmatpush1.bf16.msra.mxu0 %v5891_v43 }
 0x83d   :  { %4569 = vmatprep.subr.bf16.mxu0 %v5896_v41 }
 0x840   :  { %4570 = vmatpush1.bf16.msra.mxu0 %v5894_v34 }
 0x841   :  { %4571 = vmatprep.subr.bf16.mxu0 %v5899_v11 }
 0x844   :  { %4572 = vmatpush1.bf16.msra.mxu0 %v5897_v12 }
 0x845   :  { %4573 = vmatprep.subr.bf16.mxu0 %v5902_v13 }
 0x848   :  { %4574 = vmatpush1.bf16.msra.mxu0 %v5900_v14 }
 0x849   :  { %4575 = vmatprep.subr.bf16.mxu0 %v5905_v59 }
 0x84c   :  { %4576 = vmatpush1.bf16.msra.mxu0 %v5903_v9 }
 0x84d   :  { %4577 = vmatprep.subr.bf16.mxu0 %v5908_v38 }
 0x850   :  { %4578 = vmatpush1.bf16.msra.mxu0 %v5906_v58 }
 0x851   :  { %4579 = vmatprep.subr.bf16.mxu0 %v5911_v20 }
 0x854   :  { %4580 = vmatpush1.bf16.msra.mxu0 %v5909_v28 }
 0x855   :  { %4581 = vmatprep.subr.bf16.mxu0 %v5914_v29 }
 0x858   :  { %4582 = vmatpush1.bf16.msra.mxu0 %v5912_v30 }
 0x859   :  { %4583 = vmatprep.subr.bf16.mxu0 %v5917_v32 }
 0x85c   :  { %4584 = vmatpush1.bf16.msra.mxu0 %v5915_v35 }
 0x85d   :  { %4626 = vmatprep.subr.bf16.mxu0 %v5920_v33 }
 0x85f   :  { %4586 = vmatmul.mubr.bf16.vlgmr.msra.gmra.mrb[80].mxu0 %v6850_v51  ;;  %v5930_v51 = vld [vmem:[#allocation17 + $0x340] ss:$8 sps:$4 sm:$0xff]  }
 0x860   :  { %4595 = vmatprep.mubr.bf16.mxu0 %v6870_v25  ;;  %4627 = vmatpush1.bf16.msra.mxu0 %v5918_v40  ;;  %v5935_v25 = vld [vmem:[#allocation17 + $0x354] ss:$8 sps:$4 sm:$0xff]  }
 0x861   :  { %4628 = vmatprep.subr.bf16.mxu0 %v5923_v45 }
 0x864   :  { %4629 = vmatpush1.bf16.msra.mxu0 %v5921_v24 }
 0x865   :  { %4630 = vmatprep.subr.bf16.mxu0 %v5926_v46 }
 0x867   :  { %4596 = vmatmul.mubr.bf16.gmra.mrb[84].mxu0 %v6866_v23  ;;  %v5936_v23 = vld [vmem:[#allocation17 + $0x360] ss:$8 sps:$4 sm:$0xff]  }
 0x868   :  { %4605 = vmatprep.mubr.bf16.mxu0 %v6886_v7  ;;  %4631 = vmatpush1.bf16.msra.mxu0 %v5924_v47  ;;  %v5941_v7 = vld [vmem:[#allocation17 + $0x374] ss:$8 sps:$4 sm:$0xff]  }
 0x869   :  { %4632 = vmatprep.subr.bf16.mxu0 %v5929_v48 }
 0x86c   :  { %4633 = vmatpush1.bf16.msra.mxu0 %v5927_v49 }
 0x86d   :  { %4634 = vmatprep.subr.bf16.mxu0 %v5932_v50 }
 0x86f   :  { %4606 = vmatmul.mubr.bf16.gmra.mrb[88].mxu0 %v6882_v6  ;;  %v5942_v6 = vld [vmem:[#allocation17 + $0x380] ss:$8 sps:$4 sm:$0xff]  }
 0x870   :  { %4615 = vmatprep.mubr.bf16.mxu0 %v6902_v16  ;;  %4635 = vmatpush1.bf16.msra.mxu0 %v5930_v51  ;;  %v5947_v16 = vld [vmem:[#allocation17 + $0x394] ss:$8 sps:$4 sm:$0xff]  }
 0x871   :  { %4636 = vmatprep.subr.bf16.mxu0 %v5935_v25 }
 0x874   :  { %4637 = vmatpush1.bf16.msra.mxu0 %v5933_v18 }
 0x875   :  { %4638 = vmatprep.subr.bf16.mxu0 %v5938_v19 }
 0x877   :  { %4616 = vmatmul.mubr.bf16.gmra.mrb[92].mxu0 %v6898_v55  ;;  %v5951_v55 = vld [vmem:[#allocation17 + $0x3b0] ss:$8 sps:$4 sm:$0xff]  }
 0x878   :  { %4639 = vmatpush1.bf16.msra.mxu0 %v5936_v23  ;;  %4658 = vmatprep.mubr.bf16.mxu0 %v6856_v53  ;;  %v5954_v53 = vld [vmem:[#allocation17 + $0x3c0] ss:$8 sps:$4 sm:$0xff]  }
 0x879   :  { %4640 = vmatprep.subr.bf16.mxu0 %v5941_v7 }
 0x87c   :  { %4641 = vmatpush1.bf16.msra.mxu0 %v5939_v63 }
 0x87d   :  { %4642 = vmatprep.subr.bf16.mxu0 %v5944_v2 }
 0x880   :  { %4643 = vmatpush1.bf16.msra.mxu0 %v5942_v6 }
 0x881   :  { %4644 = vmatprep.subr.bf16.mxu0 %v5947_v16 }
 0x884   :  { %4645 = vmatpush1.bf16.msra.mxu0 %v5945_v17 }
 0x885   :  { %4646 = vmatprep.subr.bf16.mxu0 %v5950_v60 }
 0x888   :  { %4647 = vmatpush1.bf16.msra.mxu0 %v5948_v62 }
 0x889   :  { %4648 = vmatprep.subr.bf16.mxu0 %v5953_v21 }
 0x88c   :  { %4649 = vmatpush1.bf16.msra.mxu0 %v5951_v55 }
 0x88d   :  { %4650 = vmatprep.subr.bf16.mxu0 %v5956_v54 }
 0x890   :  { %4651 = vmatpush1.bf16.msra.mxu0 %v5954_v53 }
 0x891   :  { %4652 = vmatprep.subr.bf16.mxu0 %v5959_v37 }
 0x894   :  { %4653 = vmatpush1.bf16.msra.mxu0 %v5957_v27 }
 0x895   :  { %4654 = vmatprep.subr.bf16.mxu0 %v5962_v42 }
 0x898   :  { %4655 = vmatpush1.bf16.msra.mxu0 %v5960_v1 }
 0x899   :  { %4656 = vmatprep.subr.bf16.mxu0 %v5965_v44 }
 0x89c   :  { %4657 = vmatpush1.bf16.msra.mxu0 %v5963_v8 }
 0x89f   :  { %4659 = vmatmul.mubr.bf16.vlgmr.msra.gmra.mrb[80].mxu0 %v6852_v39  ;;  %v6936_v39 = vrot.slane %v3755_v15, %v6609_v5 }
 0x8a0   :  { %4668 = vmatprep.mubr.bf16.mxu0 %v6872_v26 }
 0x8a7   :  { %4669 = vmatmul.mubr.bf16.gmra.mrb[84].mxu0 %v6868_v61 }
 0x8a8   :  { %4678 = vmatprep.mubr.bf16.mxu0 %v6888_v31 }
 0x8af   :  { %4679 = vmatmul.mubr.bf16.gmra.mrb[88].mxu0 %v6884_v10 }
 0x8b0   :  { %4688 = vmatprep.mubr.bf16.mxu0 %v6904_v57 }
 0x8b7   :  { %4689 = vmatmul.mubr.bf16.gmra.mrb[92].mxu0 %v6900_v0 }
 0x972   :  { %v4660_v26 = vpop.f32.mrb[80].mxu0 }
 0x973   :  { %v5582_v61 = vadd.f32 %v4660_v26, %v6933_v4  ;;  %v4662_v31 = vpop.f32.mrb[81].mxu0 }
 0x974   :  { %v5583_v10 = vadd.f32 %v4662_v31, %v6936_v39  ;;  %v4664_v36 = vpop.f32.mrb[82].mxu0 }
 0x975   :  { %v5262_v57 = vmul.f32 -1.442695, %v5582_v61  ;;  %v5584_v0 = vadd.f32 %v4664_v36, %v6933_v4  ;;  %v4666_v52 = vpop.f32.mrb[83].mxu0 }
 0x976   :  { %v5263_v3 = vmul.f32 -1.442695, %v5583_v10  ;;  %v5585_v22 = vadd.f32 %v4666_v52, %v6936_v39 }
 0x977   :  { %5966 = vpow2.f32 %v5262_v57  ;;  %v5264_v56 = vmul.f32 -1.442695, %v5584_v0 }
 0x978   :  { %5968 = vpow2.f32 %v5263_v3  ;;  %v5265_v43 = vmul.f32 -1.442695, %v5585_v22 }
 0x979   :  { %5970 = vpow2.f32 %v5264_v56 }
 0x97a   :  { %5972 = vpow2.f32 %v5265_v43  ;;  %v4670_v5 = vpop.f32.mrb[84].mxu0 }
 0x97b   :  { %v5586_v41 = vadd.f32 %v4670_v5, %v6933_v4  ;;  %v4672_v34 = vpop.f32.mrb[85].mxu0 }
 0x97c   :  { %v5587_v11 = vadd.f32 %v4672_v34, %v6936_v39  ;;  %v4674_v12 = vpop.f32.mrb[86].mxu0 }
 0x97d   :  { %v5266_v13 = vmul.f32 -1.442695, %v5586_v41  ;;  %v5588_v14 = vadd.f32 %v4674_v12, %v6933_v4  ;;  %v4676_v59 = vpop.f32.mrb[87].mxu0 }
 0x97e   :  { %v5267_v9 = vmul.f32 -1.442695, %v5587_v11  ;;  %v5589_v38 = vadd.f32 %v4676_v59, %v6936_v39 }
 0x97f   :  { %5974 = vpow2.f32 %v5266_v13  ;;  %v5268_v58 = vmul.f32 -1.442695, %v5588_v14 }
 0x980   :  { %5976 = vpow2.f32 %v5267_v9  ;;  %v5269_v20 = vmul.f32 -1.442695, %v5589_v38 }
 0x981   :  { %v5967_v28 = vpop.eup %5966  ;;  %5978 = vpow2.f32 %v5268_v58 }
 0x982   :  { %v5969_v29 = vpop.eup %5968  ;;  %v4747_v30 = vadd.f32 1.0, %v5967_v28  ;;  %5980 = vpow2.f32 %v5269_v20  ;;  %v4680_v32 = vpop.f32.mrb[88].mxu0 }
 0x983   :  { %v5971_v35 = vpop.eup %5970  ;;  %v4748_v33 = vadd.f32 1.0, %v5969_v29  ;;  %v5590_v40 = vadd.f32 %v4680_v32, %v6933_v4  ;;  %v4682_v45 = vpop.f32.mrb[89].mxu0 }
 0x984   :  { %v5973_v24 = vpop.eup %5972  ;;  %5982 = vrcp.f32 %v4747_v30  ;;  %v4749_v46 = vadd.f32 1.0, %v5971_v35  ;;  %v5591_v47 = vadd.f32 %v4682_v45, %v6936_v39  ;;  %v4684_v48 = vpop.f32.mrb[90].mxu0 }
 0x985   :  { %5984 = vrcp.f32 %v4748_v33  ;;  %v4750_v49 = vadd.f32 1.0, %v5973_v24  ;;  %v5270_v50 = vmul.f32 -1.442695, %v5590_v40  ;;  %v5592_v51 = vadd.f32 %v4684_v48, %v6933_v4  ;;  %v4686_v25 = vpop.f32.mrb[91].mxu0 }
 0x986   :  { %5986 = vrcp.f32 %v4749_v46  ;;  %v5271_v18 = vmul.f32 -1.442695, %v5591_v47  ;;  %v5593_v19 = vadd.f32 %v4686_v25, %v6936_v39 }
 0x987   :  { %5988 = vrcp.f32 %v4750_v49  ;;  %v5272_v23 = vmul.f32 -1.442695, %v5592_v51 }
 0x988   :  { %5990 = vpow2.f32 %v5270_v50  ;;  %v5273_v7 = vmul.f32 -1.442695, %v5593_v19 }
 0x989   :  { %v5975_v63 = vpop.eup %5974  ;;  %5992 = vpow2.f32 %v5271_v18 }
 0x98a   :  { %v5977_v2 = vpop.eup %5976  ;;  %v4751_v6 = vadd.f32 1.0, %v5975_v63  ;;  %5994 = vpow2.f32 %v5272_v23  ;;  %v4690_v16 = vpop.f32.mrb[92].mxu0 }
 0x98b   :  { %v5979_v17 = vpop.eup %5978  ;;  %v4752_v60 = vadd.f32 1.0, %v5977_v2  ;;  %5996 = vpow2.f32 %v5273_v7  ;;  %v5594_v62 = vadd.f32 %v4690_v16, %v6933_v4  ;;  %v4692_v21 = vpop.f32.mrb[93].mxu0 }
 0x98c   :  { %v5981_v55 = vpop.eup %5980  ;;  %5998 = vrcp.f32 %v4751_v6  ;;  %v4753_v54 = vadd.f32 1.0, %v5979_v17  ;;  %v5595_v53 = vadd.f32 %v4692_v21, %v6936_v39  ;;  %v4694_v37 = vpop.f32.mrb[94].mxu0 }
 0x98d   :  { %6000 = vrcp.f32 %v4752_v60  ;;  %v4754_v27 = vadd.f32 1.0, %v5981_v55  ;;  %v5274_v42 = vmul.f32 -1.442695, %v5594_v62  ;;  %v5596_v1 = vadd.f32 %v4694_v37, %v6933_v4  ;;  %v4696_v44 = vpop.f32.mrb[95].mxu0 }
 0x98e   :  { %v5983_v8 = vpop.eup %5982  ;;  %6002 = vrcp.f32 %v4753_v54  ;;  %v5275_v15 = vmul.f32 -1.442695, %v5595_v53  ;;  %v5597_v26 = vadd.f32 %v4696_v44, %v6936_v39 }
 0x98f   :  { %v5985_v61 = vpop.eup %5984  ;;  %4795 = vst [vmem:[#allocation19] sm:$0xff] %v5983_v8  ;;  %6004 = vrcp.f32 %v4754_v27  ;;  %v5276_v31 = vmul.f32 -1.442695, %v5596_v1 }
 0x990   :  { %v5987_v10 = vpop.eup %5986  ;;  %4796 = vst [vmem:[#allocation19 + $0x8] sm:$0xff] %v5985_v61  ;;  %6006 = vpow2.f32 %v5274_v42  ;;  %v5277_v36 = vmul.f32 -1.442695, %v5597_v26 }
 0x991   :  { %v5989_v57 = vpop.eup %5988  ;;  %4797 = vst [vmem:[#allocation19 + $0x10] sm:$0xff] %v5987_v10  ;;  %6008 = vpow2.f32 %v5275_v15 }
 0x992   :  { %v5991_v0 = vpop.eup %5990  ;;  %4798 = vst [vmem:[#allocation19 + $0x18] sm:$0xff] %v5989_v57  ;;  %6010 = vpow2.f32 %v5276_v31 }
 0x993   :  { %v5993_v4 = vpop.eup %5992  ;;  %v4755_v52 = vadd.f32 1.0, %v5991_v0  ;;  %6012 = vpow2.f32 %v5277_v36 }
 0x994   :  { %v5995_v3 = vpop.eup %5994  ;;  %v4756_v22 = vadd.f32 1.0, %v5993_v4 }
 0x995   :  { %v5997_v39 = vpop.eup %5996  ;;  %6014 = vrcp.f32 %v4755_v52  ;;  %v4757_v56 = vadd.f32 1.0, %v5995_v3 }
 0x996   :  { %v5999_v43 = vpop.eup %5998  ;;  %6016 = vrcp.f32 %v4756_v22  ;;  %v4758_v5 = vadd.f32 1.0, %v5997_v39 }
 0x997   :  { %v6001_v41 = vpop.eup %6000  ;;  %4799 = vst [vmem:[#allocation19 + $0x20] sm:$0xff] %v5999_v43  ;;  %6018 = vrcp.f32 %v4757_v56 }
 0x998   :  { %v6003_v34 = vpop.eup %6002  ;;  %4800 = vst [vmem:[#allocation19 + $0x28] sm:$0xff] %v6001_v41  ;;  %6020 = vrcp.f32 %v4758_v5 }
 0x999   :  { %v6005_v11 = vpop.eup %6004  ;;  %4801 = vst [vmem:[#allocation19 + $0x30] sm:$0xff] %v6003_v34 }
 0x99a   :  { %v6007_v12 = vpop.eup %6006  ;;  %4802 = vst [vmem:[#allocation19 + $0x38] sm:$0xff] %v6005_v11 }
 0x99b   :  { %v6009_v13 = vpop.eup %6008  ;;  %v4759_v14 = vadd.f32 1.0, %v6007_v12 }
 0x99c   :  { %v6011_v59 = vpop.eup %6010  ;;  %v4760_v9 = vadd.f32 1.0, %v6009_v13 }
 0x99d   :  { %v6013_v38 = vpop.eup %6012  ;;  %6022 = vrcp.f32 %v4759_v14  ;;  %v4761_v58 = vadd.f32 1.0, %v6011_v59 }
 0x99e   :  { %6024 = vrcp.f32 %v4760_v9  ;;  %v4762_v20 = vadd.f32 1.0, %v6013_v38 }
 0x99f   :  { %v6015_v28 = vpop.eup %6014  ;;  %6026 = vrcp.f32 %v4761_v58 }
 0x9a0   :  { %v6017_v29 = vpop.eup %6016  ;;  %4803 = vst [vmem:[#allocation19 + $0x40] sm:$0xff] %v6015_v28  ;;  %6028 = vrcp.f32 %v4762_v20 }
 0x9a1   :  { %v6019_v30 = vpop.eup %6018  ;;  %4804 = vst [vmem:[#allocation19 + $0x48] sm:$0xff] %v6017_v29 }
 0x9a2   :  { %v6021_v32 = vpop.eup %6020  ;;  %4805 = vst [vmem:[#allocation19 + $0x50] sm:$0xff] %v6019_v30 }
 0x9a3   :  { %4806 = vst [vmem:[#allocation19 + $0x58] sm:$0xff] %v6021_v32 }
 0x9a7   :  { %v6023_v35 = vpop.eup %6022 }
 0x9a8   :  { %v6025_v33 = vpop.eup %6024  ;;  %4807 = vst [vmem:[#allocation19 + $0x60] sm:$0xff] %v6023_v35 }
 0x9a9   :  { %v6027_v40 = vpop.eup %6026  ;;  %4808 = vst [vmem:[#allocation19 + $0x68] sm:$0xff] %v6025_v33 }
 0x9aa   :  { %v6029_v45 = vpop.eup %6028  ;;  %4809 = vst [vmem:[#allocation19 + $0x70] sm:$0xff] %v6027_v40 }
 0x9ab   :  { %4810 = vst [vmem:[#allocation19 + $0x78] sm:$0xff] %v6029_v45 }
 0x9ac   :  { %6269 = shalt.err (!%p6266_p0)
}
 0x9ad   :  { %s6996_s19 = sld [smem:[#allocation29_spill]] }
 0x9b3   :  { %s6270_s26 = scalar_lea.hbm %s6996_s19, 2048 }
 0x9b4   :  { %p6271_p1 = scmp.ne.s32.totalorder %s6996_s19, %s6270_s26  ;;  %p6274_p2 = scmp.lt.u32.totalorder %s6270_s26, %s6996_s19 }
 0x9b6   :  { %p6276_p3 = pnand %p6274_p2, %p6271_p1 }
 0x9b8   :  { %6279 = shalt.err (!%p6276_p3)
}
 0x9b9   :  { %s6312_s20 = smov 256   ;;  %s6313_s21 = smov 16  }
 0x9ba   :  { %4822 = dma.vmem_to_hbm [thread:$0]  %s4817_s9, 2048, %s6996_s19, [#allocation4], %s6312_s20, %s6312_s20, %s6313_s21  }
 0x9bb   :  { %6292 = dma.done.wait [#allocation4], 2048  }
 0x9bc   :  { %6293 = vsyncadd [#allocation4], 4294965248 }
 0x9bd   :  { %4826 = vsyncpa [#allocation3], 1 }
 0x9be   :  { %4827 = vsyncpa [#allocation6], 1 }
 0x9bf   :  { %4828 = vsyncpa [#allocation9], 1 }
 0x9c0   :  { %4829 = vsyncpa [#allocation12], 1 }
 0x9c1   :  { %4830 = vsyncpa [#allocation15], 1 }
 0x9c2   :  { %4831 = vsyncpa [#allocation18], 1 }
 0x9c3   :  { %4832 = vsyncpa [#allocation4], 1 }

</bundles_post_ra>
